<compile_context>
chip_gen: v6e
topology: v6e:2x2x1
jax: 0.10.0
libtpu: 0.0.40
codegen_flags: <defaults>
</compile_context>

<pallas_src>
import functools

import jax
import jax.numpy as jnp
from jax import lax
from jax.experimental import pallas as pl
from jax.experimental.pallas import tpu as pltpu


# --------------------------------------------------------------------------------------
# In-kernel building blocks (operate on flattened (C, H*W) tiles held in VMEM / vregs)
# --------------------------------------------------------------------------------------

def _log2(n):
    assert n > 0 and (n & (n - 1)) == 0, f"{n} must be a power of two"
    return n.bit_length() - 1


def _conv3x3_same(x, w_ref, b_ref, H, W):
    """3x3, stride-1, zero-padded ('same') convolution on a flattened (Cin, H*W) tile.

    w_ref: (9, Cout, Cin) VMEM ref with tap index k = dh*3 + dw; b_ref: (Cout, 1) VMEM ref.
    Returns a (Cout, H*W) float32 tile.
    """
    P = H * W
    Cout = w_ref.shape[1]
    q_idx = lax.broadcasted_iota(jnp.int32, (P, 1), 0)   # source (contracting) position
    p_idx = lax.broadcasted_iota(jnp.int32, (1, P), 1)   # destination position
    p_col = p_idx & (W - 1)                              # W is a power of two
    acc = jnp.zeros((Cout, P), jnp.float32)
    for dh in range(3):
        for dw in range(3):
            a, b = dh - 1, dw - 1
            off = a * W + b
            # sel[q, p] = 1 iff q == p + off and the tap stays inside the zero-padded
            # image. Row over/underflow falls outside [0, P) automatically; only column
            # wrap-around needs an explicit mask.
            sel = q_idx == (p_idx + off)
            if b == -1:
                sel = jnp.logical_and(sel, p_col >= 1)
            elif b == 1:
                sel = jnp.logical_and(sel, p_col < (W - 1))
            sel_f = jnp.where(sel, 1.0, 0.0)                                   # (P, P)
            tap = jnp.dot(w_ref[dh * 3 + dw], x,
                          preferred_element_type=jnp.float32)                  # (Cout, P)
            acc = acc + jnp.dot(tap, sel_f, preferred_element_type=jnp.float32)
    return acc + b_ref[...]                              # bias folded into the epilogue


def _maxpool2x2(x, H, W):
    """nn.MaxPool2d(kernel_size=2) on a flattened (C, H*W) tile -> (C, (H//2)*(W//2))."""
    P = H * W
    Ho, Wo = H // 2, W // 2
    Q = Ho * Wo
    p_idx = lax.broadcasted_iota(jnp.int32, (P, 1), 0)
    q_idx = lax.broadcasted_iota(jnp.int32, (1, Q), 1)
    q_row = q_idx >> _log2(Wo)
    q_col = q_idx & (Wo - 1)
    anchor = q_row * (2 * W) + 2 * q_col                 # flat index of the (2r, 2c) corner
    out = None
    for d in (0, 1, W, W + 1):                           # the four taps of the 2x2 window
        sel = jnp.where(p_idx == anchor + d, 1.0, 0.0)                         # (P, Q)
        tap = jnp.dot(x, sel, preferred_element_type=jnp.float32)              # (C, Q)
        out = tap if out is None else jnp.maximum(out, tap)
    return out


def _upsample2x_nearest(x, H, W):
    """nn.Upsample(scale_factor=2) (default mode='nearest') on a flattened (C, H*W) tile."""
    # TODO(synk): the FPN docstring example uses mode='bilinear'; only nn.Upsample's
    # default 'nearest' is implemented here.
    P = H * W
    Wo = 2 * W
    Q = 4 * P
    p_idx = lax.broadcasted_iota(jnp.int32, (P, 1), 0)
    q_idx = lax.broadcasted_iota(jnp.int32, (1, Q), 1)
    q_row = q_idx >> _log2(Wo)
    q_col = q_idx & (Wo - 1)
    src = (q_row >> 1) * W + (q_col >> 1)
    sel = jnp.where(p_idx == src, 1.0, 0.0)                                    # (P, Q)
    return jnp.dot(x, sel, preferred_element_type=jnp.float32)


# --------------------------------------------------------------------------------------
# The fused FPN kernel: whole forward pass per batch element, fully VMEM-resident
# --------------------------------------------------------------------------------------

def _fpn_kernel(*refs, H, W, path_lens, num_levels):
    x_ref, *wb_refs, o_ref = refs
    it = iter(wb_refs)
    paths = [[(next(it), next(it)) for _ in range(n)] for n in path_lens]
    down_paths = paths[:num_levels]
    bridge_path = paths[num_levels]
    up_paths_topdown = paths[num_levels + 1:]            # deepest level first

    x = x_ref[0].astype(jnp.float32)                     # (C0, H*W), lane dim = H*W
    h, w = H, W
    skips = []

    # down path: conv block -> keep skip (middle path == identity) -> max-pool
    for lvl in range(num_levels):
        for (w_ref, b_ref) in down_paths[lvl]:
            x = _conv3x3_same(x, w_ref, b_ref, h, w)
        skips.append(x)
        x = _maxpool2x2(x, h, w)
        h, w = h // 2, w // 2

    # bridge
    for (w_ref, b_ref) in bridge_path:
        x = _conv3x3_same(x, w_ref, b_ref, h, w)

    # up path: upsample -> merge (== torch.add) -> conv block
    for i, lvl in enumerate(reversed(range(num_levels))):
        x = _upsample2x_nearest(x, h, w)
        h, w = 2 * h, 2 * w
        x = skips[lvl] + x
        for (w_ref, b_ref) in up_paths_topdown[i]:
            x = _conv3x3_same(x, w_ref, b_ref, h, w)

    o_ref[0] = x.astype(o_ref.dtype)                     # (Cout, H*W): lane-dense store


# --------------------------------------------------------------------------------------
# Wrapper: weight prep, BlockSpecs, pallas_call
# --------------------------------------------------------------------------------------

def _prep_conv(w, b):
    # (3, 3, Cin, Cout) HWIO -> (9, Cout, Cin): each tap k = dh*3 + dw is a ready-to-use
    # (Cout, Cin) matmul LHS; bias -> (Cout, 1) so it broadcasts over the lane (H*W) dim.
    kh, kw, cin, cout = w.shape
    wt = jnp.transpose(w, (0, 1, 3, 2)).reshape(kh * kw, cout, cin)
    return wt, b.reshape(cout, 1)


def _const_index_map(ndim):
    return lambda n: (0,) * ndim


@jax.jit
def fpn_forward(x_nchw, params):
    """FPN forward (last_level=True): NCHW in, NCHW out. One fused Pallas kernel."""
    N, C0, H, W = x_nchw.shape
    num_levels = len(params["down"])
    assert W & (W - 1) == 0, "W must be a power of two"
    assert H % (1 << num_levels) == 0 and W % (1 << num_levels) == 0, \
        "spatial dims must be divisible by 2**num_levels"
    P = H * W

    # Flatten spatial dims: (N, C, H*W) -> minor (lane) dim is H*W (lane-dense I/O).
    x = x_nchw.reshape(N, C0, P)

    ordered_paths = list(params["down"]) + [params["bridge"]] + list(reversed(params["up"]))
    path_lens = tuple(len(p) for p in ordered_paths)
    flat_wb = []
    for path in ordered_paths:
        for (w, b) in path:
            flat_wb.extend(_prep_conv(w, b))
    cout_final = params["up"][0][-1][0].shape[-1]

    in_specs = [pl.BlockSpec((1, C0, P), lambda n: (n, 0, 0))]
    in_specs += [pl.BlockSpec(a.shape, _const_index_map(a.ndim)) for a in flat_wb]

    out = pl.pallas_call(
        functools.partial(_fpn_kernel, H=H, W=W, path_lens=path_lens,
                          num_levels=num_levels),
        out_shape=jax.ShapeDtypeStruct((N, cout_final, P), x_nchw.dtype),
        grid=(N,),
        in_specs=in_specs,
        out_specs=pl.BlockSpec((1, cout_final, P), lambda n: (n, 0, 0)),
        compiler_params=pltpu.CompilerParams(dimension_semantics=("parallel",)),
    )(x, *flat_wb)
    return out.reshape(N, cout_final, H, W)


# --------------------------------------------------------------------------------------
# FPN structure / parameter init (mirrors FPN.__init__ with the structure below)
# --------------------------------------------------------------------------------------

STRUCTURE = [
    [[4, 8],  [8, 8]],    # level 1: left path, right path
    [[8, 16], [16, 8]],   # level 2: left path, right path
    [16, 16],             # bridge
]


def init_conv_params(key, cin, cout):
    kw, kb = jax.random.split(key)
    fan_in = 9 * cin
    w = jax.random.normal(kw, (3, 3, cin, cout), jnp.float32) / jnp.sqrt(jnp.float32(fan_in))
    b = 0.01 * jax.random.normal(kb, (cout,), jnp.float32)
    return w, b


def init_path(key, channels):
    n = len(channels) - 1
    keys = jax.random.split(key, max(n, 1))
    return [init_conv_params(keys[i], channels[i], channels[i + 1]) for i in range(n)]


def init_fpn_params(key, structure):
    *levels, bridge = structure
    keys = jax.random.split(key, 2 * len(levels) + 1)
    down, up = [], []
    for i, (left, right) in enumerate(levels):
        down.append(init_path(keys[2 * i], left))      # down_path level i
        up.append(init_path(keys[2 * i + 1], right))   # up_path   level i
    bridge_p = init_path(keys[-1], bridge)
    return {"down": down, "up": up, "bridge": bridge_p}


# --------------------------------------------------------------------------------------
# Pure-JAX/XLA reference of the same forward pass (for a correctness check)
# --------------------------------------------------------------------------------------

@jax.jit
def _reference_forward(x_nchw, params):
    def conv(x, w, b):
        y = lax.conv_general_dilated(
            x, w, window_strides=(1, 1), padding="SAME",
            dimension_numbers=("NCHW", "HWIO", "NCHW"),
            precision=lax.Precision.HIGHEST)
        return y + b[None, :, None, None]

    def pool(x):
        return lax.reduce_window(x, -jnp.inf, lax.max, (1, 1, 2, 2), (1, 1, 2, 2), "VALID")

    def up(x):
        return jnp.repeat(jnp.repeat(x, 2, axis=2), 2, axis=3)

    def apply_path(x, p):
        for (w, b) in p:
            x = conv(x, w, b)
        return x

    skips = []
    x = x_nchw
    for p in params["down"]:
        x = apply_path(x, p)
        skips.append(x)
        x = pool(x)
    x = apply_path(x, params["bridge"])
    for p, skip in zip(reversed(params["up"]), reversed(skips)):
        x = apply_path(skip + up(x), p)
    return x


# --------------------------------------------------------------------------------------
if __name__ == "__main__":
    key = jax.random.PRNGKey(0)
    kx, kp = jax.random.split(key)

    # PyTorch-style NCHW input: batch=2, channels=4, spatial=16x16
    x_nchw = jax.random.normal(kx, (2, 4, 16, 16), jnp.float32)
    params = init_fpn_params(kp, STRUCTURE)

    out = fpn_forward(x_nchw, params)
    jax.block_until_ready(out)
    assert out.shape == (2, 8, 16, 16), out.shape
    assert out.dtype == jnp.float32

    # Correctness check against the pure-JAX reference of the same FPN forward.
    ref = _reference_forward(x_nchw, params)
    max_err = float(jnp.max(jnp.abs(out - ref)))
    assert max_err < 2e-2, f"max abs error vs reference: {max_err}"

    print("KERNEL_OK")
</pallas_src>

<mosaic_0001>
module attributes {stable_mosaic.version = 11 : i64} {
  func.func @_fpn_kernel(%arg0: i32, %arg1: memref<1x4x256xf32, #tpu.memory_space<vmem>>, %arg2: memref<9x8x4xf32, #tpu.memory_space<vmem>>, %arg3: memref<8x1xf32, #tpu.memory_space<vmem>>, %arg4: memref<9x16x8xf32, #tpu.memory_space<vmem>>, %arg5: memref<16x1xf32, #tpu.memory_space<vmem>>, %arg6: memref<9x16x16xf32, #tpu.memory_space<vmem>>, %arg7: memref<16x1xf32, #tpu.memory_space<vmem>>, %arg8: memref<9x8x16xf32, #tpu.memory_space<vmem>>, %arg9: memref<8x1xf32, #tpu.memory_space<vmem>>, %arg10: memref<9x8x8xf32, #tpu.memory_space<vmem>>, %arg11: memref<8x1xf32, #tpu.memory_space<vmem>>, %arg12: memref<1x8x256xf32, #tpu.memory_space<vmem>>) attributes {dimension_semantics = [#tpu.dimension_semantics<parallel>], iteration_bounds = array<i64: 2>, scalar_prefetch = 0 : i64, scratch_operands = 0 : i64, tpu.core_type = #tpu.core_type<tc>, window_params = [{transform_indices = @transform_0, window_bounds = array<i64: 1, 4, 256>}, {pipeline_mode = #tpu.pipeline_mode<synchronous>, transform_indices = @transform_1, window_bounds = array<i64: 9, 8, 4>}, {pipeline_mode = #tpu.pipeline_mode<synchronous>, transform_indices = @transform_2, window_bounds = array<i64: 8, 1>}, {pipeline_mode = #tpu.pipeline_mode<synchronous>, transform_indices = @transform_3, window_bounds = array<i64: 9, 16, 8>}, {pipeline_mode = #tpu.pipeline_mode<synchronous>, transform_indices = @transform_4, window_bounds = array<i64: 16, 1>}, {pipeline_mode = #tpu.pipeline_mode<synchronous>, transform_indices = @transform_5, window_bounds = array<i64: 9, 16, 16>}, {pipeline_mode = #tpu.pipeline_mode<synchronous>, transform_indices = @transform_6, window_bounds = array<i64: 16, 1>}, {pipeline_mode = #tpu.pipeline_mode<synchronous>, transform_indices = @transform_7, window_bounds = array<i64: 9, 8, 16>}, {pipeline_mode = #tpu.pipeline_mode<synchronous>, transform_indices = @transform_8, window_bounds = array<i64: 8, 1>}, {pipeline_mode = #tpu.pipeline_mode<synchronous>, transform_indices = @transform_9, window_bounds = array<i64: 9, 8, 8>}, {pipeline_mode = #tpu.pipeline_mode<synchronous>, transform_indices = @transform_10, window_bounds = array<i64: 8, 1>}, {transform_indices = @transform_11, window_bounds = array<i64: 1, 8, 256>}]} {
    %c0 = arith.constant 0 : index
    %c0_0 = arith.constant 0 : index
    %c0_1 = arith.constant 0 : index
    %0 = vector.load %arg1[%c0, %c0_0, %c0_1] : memref<1x4x256xf32, #tpu.memory_space<vmem>>, vector<1x4x256xf32>
    %1 = vector.shape_cast %0 : vector<1x4x256xf32> to vector<4x256xf32>
    %2 = tpu.iota {dimensions = array<i32: 0>} : vector<256x1xi32>
    %3 = tpu.iota {dimensions = array<i32: 1>} : vector<1x256xi32>
    %c15_i32 = arith.constant 15 : i32
    %4 = vector.broadcast %c15_i32 : i32 to vector<1x256xi32>
    %5 = arith.andi %3, %4 : vector<1x256xi32>
    %cst = arith.constant 0.000000e+00 : f32
    %6 = vector.broadcast %cst : f32 to vector<8x256xf32>
    %c-17_i32 = arith.constant -17 : i32
    %7 = vector.broadcast %c-17_i32 : i32 to vector<1x256xi32>
    %8 = arith.addi %3, %7 : vector<1x256xi32>
    %9 = vector.broadcast %2 : vector<256x1xi32> to vector<256x256xi32>
    %10 = vector.broadcast %8 : vector<1x256xi32> to vector<256x256xi32>
    %11 = arith.cmpi eq, %9, %10 : vector<256x256xi32>
    %c1_i32 = arith.constant 1 : i32
    %12 = vector.broadcast %c1_i32 : i32 to vector<1x256xi32>
    %13 = arith.cmpi sge, %5, %12 : vector<1x256xi32>
    %14 = vector.broadcast %13 : vector<1x256xi1> to vector<256x256xi1>
    %15 = arith.andi %11, %14 : vector<256x256xi1>
    %cst_2 = arith.constant 1.000000e+00 : f32
    %cst_3 = arith.constant 0.000000e+00 : f32
    %16 = vector.broadcast %cst_2 : f32 to vector<256x256xf32>
    %17 = vector.broadcast %cst_3 : f32 to vector<256x256xf32>
    %18 = arith.select %15, %16, %17 : vector<256x256xi1>, vector<256x256xf32>
    %c0_4 = arith.constant 0 : index
    %c0_5 = arith.constant 0 : index
    %c0_6 = arith.constant 0 : index
    %19 = vector.load %arg2[%c0_4, %c0_5, %c0_6] : memref<9x8x4xf32, #tpu.memory_space<vmem>>, vector<1x8x4xf32>
    %20 = vector.shape_cast %19 : vector<1x8x4xf32> to vector<8x4xf32>
    %cst_7 = arith.constant dense<0.000000e+00> : vector<8x256xf32>
    %21 = tpu.matmul %20, %1, %cst_7 {dimension_numbers = #tpu.dot_dimension_numbers<[1], [0], [0], [1], [0, 0, 1, 1], [], []>} : vector<8x4xf32>, vector<4x256xf32>, vector<8x256xf32> -> vector<8x256xf32>
    %cst_8 = arith.constant dense<0.000000e+00> : vector<8x256xf32>
    %22 = tpu.matmul %21, %18, %cst_8 {dimension_numbers = #tpu.dot_dimension_numbers<[1], [0], [0], [1], [0, 0, 1, 1], [], []>} : vector<8x256xf32>, vector<256x256xf32>, vector<8x256xf32> -> vector<8x256xf32>
    %23 = arith.addf %6, %22 : vector<8x256xf32>
    %c-16_i32 = arith.constant -16 : i32
    %24 = vector.broadcast %c-16_i32 : i32 to vector<1x256xi32>
    %25 = arith.addi %3, %24 : vector<1x256xi32>
    %26 = vector.broadcast %2 : vector<256x1xi32> to vector<256x256xi32>
    %27 = vector.broadcast %25 : vector<1x256xi32> to vector<256x256xi32>
    %28 = arith.cmpi eq, %26, %27 : vector<256x256xi32>
    %cst_9 = arith.constant 1.000000e+00 : f32
    %cst_10 = arith.constant 0.000000e+00 : f32
    %29 = vector.broadcast %cst_9 : f32 to vector<256x256xf32>
    %30 = vector.broadcast %cst_10 : f32 to vector<256x256xf32>
    %31 = arith.select %28, %29, %30 : vector<256x256xi1>, vector<256x256xf32>
    %c1 = arith.constant 1 : index
    %c0_11 = arith.constant 0 : index
    %c0_12 = arith.constant 0 : index
    %32 = vector.load %arg2[%c1, %c0_11, %c0_12] : memref<9x8x4xf32, #tpu.memory_space<vmem>>, vector<1x8x4xf32>
    %33 = vector.shape_cast %32 : vector<1x8x4xf32> to vector<8x4xf32>
    %cst_13 = arith.constant dense<0.000000e+00> : vector<8x256xf32>
    %34 = tpu.matmul %33, %1, %cst_13 {dimension_numbers = #tpu.dot_dimension_numbers<[1], [0], [0], [1], [0, 0, 1, 1], [], []>} : vector<8x4xf32>, vector<4x256xf32>, vector<8x256xf32> -> vector<8x256xf32>
    %cst_14 = arith.constant dense<0.000000e+00> : vector<8x256xf32>
    %35 = tpu.matmul %34, %31, %cst_14 {dimension_numbers = #tpu.dot_dimension_numbers<[1], [0], [0], [1], [0, 0, 1, 1], [], []>} : vector<8x256xf32>, vector<256x256xf32>, vector<8x256xf32> -> vector<8x256xf32>
    %36 = arith.addf %23, %35 : vector<8x256xf32>
    %c-15_i32 = arith.constant -15 : i32
    %37 = vector.broadcast %c-15_i32 : i32 to vector<1x256xi32>
    %38 = arith.addi %3, %37 : vector<1x256xi32>
    %39 = vector.broadcast %2 : vector<256x1xi32> to vector<256x256xi32>
    %40 = vector.broadcast %38 : vector<1x256xi32> to vector<256x256xi32>
    %41 = arith.cmpi eq, %39, %40 : vector<256x256xi32>
    %c15_i32_15 = arith.constant 15 : i32
    %42 = vector.broadcast %c15_i32_15 : i32 to vector<1x256xi32>
    %43 = arith.cmpi slt, %5, %42 : vector<1x256xi32>
    %44 = vector.broadcast %43 : vector<1x256xi1> to vector<256x256xi1>
    %45 = arith.andi %41, %44 : vector<256x256xi1>
    %cst_16 = arith.constant 1.000000e+00 : f32
    %cst_17 = arith.constant 0.000000e+00 : f32
    %46 = vector.broadcast %cst_16 : f32 to vector<256x256xf32>
    %47 = vector.broadcast %cst_17 : f32 to vector<256x256xf32>
    %48 = arith.select %45, %46, %47 : vector<256x256xi1>, vector<256x256xf32>
    %c2 = arith.constant 2 : index
    %c0_18 = arith.constant 0 : index
    %c0_19 = arith.constant 0 : index
    %49 = vector.load %arg2[%c2, %c0_18, %c0_19] : memref<9x8x4xf32, #tpu.memory_space<vmem>>, vector<1x8x4xf32>
    %50 = vector.shape_cast %49 : vector<1x8x4xf32> to vector<8x4xf32>
    %cst_20 = arith.constant dense<0.000000e+00> : vector<8x256xf32>
    %51 = tpu.matmul %50, %1, %cst_20 {dimension_numbers = #tpu.dot_dimension_numbers<[1], [0], [0], [1], [0, 0, 1, 1], [], []>} : vector<8x4xf32>, vector<4x256xf32>, vector<8x256xf32> -> vector<8x256xf32>
    %cst_21 = arith.constant dense<0.000000e+00> : vector<8x256xf32>
    %52 = tpu.matmul %51, %48, %cst_21 {dimension_numbers = #tpu.dot_dimension_numbers<[1], [0], [0], [1], [0, 0, 1, 1], [], []>} : vector<8x256xf32>, vector<256x256xf32>, vector<8x256xf32> -> vector<8x256xf32>
    %53 = arith.addf %36, %52 : vector<8x256xf32>
    %c-1_i32 = arith.constant -1 : i32
    %54 = vector.broadcast %c-1_i32 : i32 to vector<1x256xi32>
    %55 = arith.addi %3, %54 : vector<1x256xi32>
    %56 = vector.broadcast %2 : vector<256x1xi32> to vector<256x256xi32>
    %57 = vector.broadcast %55 : vector<1x256xi32> to vector<256x256xi32>
    %58 = arith.cmpi eq, %56, %57 : vector<256x256xi32>
    %c1_i32_22 = arith.constant 1 : i32
    %59 = vector.broadcast %c1_i32_22 : i32 to vector<1x256xi32>
    %60 = arith.cmpi sge, %5, %59 : vector<1x256xi32>
    %61 = vector.broadcast %60 : vector<1x256xi1> to vector<256x256xi1>
    %62 = arith.andi %58, %61 : vector<256x256xi1>
    %cst_23 = arith.constant 1.000000e+00 : f32
    %cst_24 = arith.constant 0.000000e+00 : f32
    %63 = vector.broadcast %cst_23 : f32 to vector<256x256xf32>
    %64 = vector.broadcast %cst_24 : f32 to vector<256x256xf32>
    %65 = arith.select %62, %63, %64 : vector<256x256xi1>, vector<256x256xf32>
    %c3 = arith.constant 3 : index
    %c0_25 = arith.constant 0 : index
    %c0_26 = arith.constant 0 : index
    %66 = vector.load %arg2[%c3, %c0_25, %c0_26] : memref<9x8x4xf32, #tpu.memory_space<vmem>>, vector<1x8x4xf32>
    %67 = vector.shape_cast %66 : vector<1x8x4xf32> to vector<8x4xf32>
    %cst_27 = arith.constant dense<0.000000e+00> : vector<8x256xf32>
    %68 = tpu.matmul %67, %1, %cst_27 {dimension_numbers = #tpu.dot_dimension_numbers<[1], [0], [0], [1], [0, 0, 1, 1], [], []>} : vector<8x4xf32>, vector<4x256xf32>, vector<8x256xf32> -> vector<8x256xf32>
    %cst_28 = arith.constant dense<0.000000e+00> : vector<8x256xf32>
    %69 = tpu.matmul %68, %65, %cst_28 {dimension_numbers = #tpu.dot_dimension_numbers<[1], [0], [0], [1], [0, 0, 1, 1], [], []>} : vector<8x256xf32>, vector<256x256xf32>, vector<8x256xf32> -> vector<8x256xf32>
    %70 = arith.addf %53, %69 : vector<8x256xf32>
    %c0_i32 = arith.constant 0 : i32
    %71 = vector.broadcast %c0_i32 : i32 to vector<1x256xi32>
    %72 = arith.addi %3, %71 : vector<1x256xi32>
    %73 = vector.broadcast %2 : vector<256x1xi32> to vector<256x256xi32>
    %74 = vector.broadcast %72 : vector<1x256xi32> to vector<256x256xi32>
    %75 = arith.cmpi eq, %73, %74 : vector<256x256xi32>
    %cst_29 = arith.constant 1.000000e+00 : f32
    %cst_30 = arith.constant 0.000000e+00 : f32
    %76 = vector.broadcast %cst_29 : f32 to vector<256x256xf32>
    %77 = vector.broadcast %cst_30 : f32 to vector<256x256xf32>
    %78 = arith.select %75, %76, %77 : vector<256x256xi1>, vector<256x256xf32>
    %c4 = arith.constant 4 : index
    %c0_31 = arith.constant 0 : index
    %c0_32 = arith.constant 0 : index
    %79 = vector.load %arg2[%c4, %c0_31, %c0_32] : memref<9x8x4xf32, #tpu.memory_space<vmem>>, vector<1x8x4xf32>
    %80 = vector.shape_cast %79 : vector<1x8x4xf32> to vector<8x4xf32>
    %cst_33 = arith.constant dense<0.000000e+00> : vector<8x256xf32>
    %81 = tpu.matmul %80, %1, %cst_33 {dimension_numbers = #tpu.dot_dimension_numbers<[1], [0], [0], [1], [0, 0, 1, 1], [], []>} : vector<8x4xf32>, vector<4x256xf32>, vector<8x256xf32> -> vector<8x256xf32>
    %cst_34 = arith.constant dense<0.000000e+00> : vector<8x256xf32>
    %82 = tpu.matmul %81, %78, %cst_34 {dimension_numbers = #tpu.dot_dimension_numbers<[1], [0], [0], [1], [0, 0, 1, 1], [], []>} : vector<8x256xf32>, vector<256x256xf32>, vector<8x256xf32> -> vector<8x256xf32>
    %83 = arith.addf %70, %82 : vector<8x256xf32>
    %c1_i32_35 = arith.constant 1 : i32
    %84 = vector.broadcast %c1_i32_35 : i32 to vector<1x256xi32>
    %85 = arith.addi %3, %84 : vector<1x256xi32>
    %86 = vector.broadcast %2 : vector<256x1xi32> to vector<256x256xi32>
    %87 = vector.broadcast %85 : vector<1x256xi32> to vector<256x256xi32>
    %88 = arith.cmpi eq, %86, %87 : vector<256x256xi32>
    %c15_i32_36 = arith.constant 15 : i32
    %89 = vector.broadcast %c15_i32_36 : i32 to vector<1x256xi32>
    %90 = arith.cmpi slt, %5, %89 : vector<1x256xi32>
    %91 = vector.broadcast %90 : vector<1x256xi1> to vector<256x256xi1>
    %92 = arith.andi %88, %91 : vector<256x256xi1>
    %cst_37 = arith.constant 1.000000e+00 : f32
    %cst_38 = arith.constant 0.000000e+00 : f32
    %93 = vector.broadcast %cst_37 : f32 to vector<256x256xf32>
    %94 = vector.broadcast %cst_38 : f32 to vector<256x256xf32>
    %95 = arith.select %92, %93, %94 : vector<256x256xi1>, vector<256x256xf32>
    %c5 = arith.constant 5 : index
    %c0_39 = arith.constant 0 : index
    %c0_40 = arith.constant 0 : index
    %96 = vector.load %arg2[%c5, %c0_39, %c0_40] : memref<9x8x4xf32, #tpu.memory_space<vmem>>, vector<1x8x4xf32>
    %97 = vector.shape_cast %96 : vector<1x8x4xf32> to vector<8x4xf32>
    %cst_41 = arith.constant dense<0.000000e+00> : vector<8x256xf32>
    %98 = tpu.matmul %97, %1, %cst_41 {dimension_numbers = #tpu.dot_dimension_numbers<[1], [0], [0], [1], [0, 0, 1, 1], [], []>} : vector<8x4xf32>, vector<4x256xf32>, vector<8x256xf32> -> vector<8x256xf32>
    %cst_42 = arith.constant dense<0.000000e+00> : vector<8x256xf32>
    %99 = tpu.matmul %98, %95, %cst_42 {dimension_numbers = #tpu.dot_dimension_numbers<[1], [0], [0], [1], [0, 0, 1, 1], [], []>} : vector<8x256xf32>, vector<256x256xf32>, vector<8x256xf32> -> vector<8x256xf32>
    %100 = arith.addf %83, %99 : vector<8x256xf32>
    %c15_i32_43 = arith.constant 15 : i32
    %101 = vector.broadcast %c15_i32_43 : i32 to vector<1x256xi32>
    %102 = arith.addi %3, %101 : vector<1x256xi32>
    %103 = vector.broadcast %2 : vector<256x1xi32> to vector<256x256xi32>
    %104 = vector.broadcast %102 : vector<1x256xi32> to vector<256x256xi32>
    %105 = arith.cmpi eq, %103, %104 : vector<256x256xi32>
    %c1_i32_44 = arith.constant 1 : i32
    %106 = vector.broadcast %c1_i32_44 : i32 to vector<1x256xi32>
    %107 = arith.cmpi sge, %5, %106 : vector<1x256xi32>
    %108 = vector.broadcast %107 : vector<1x256xi1> to vector<256x256xi1>
    %109 = arith.andi %105, %108 : vector<256x256xi1>
    %cst_45 = arith.constant 1.000000e+00 : f32
    %cst_46 = arith.constant 0.000000e+00 : f32
    %110 = vector.broadcast %cst_45 : f32 to vector<256x256xf32>
    %111 = vector.broadcast %cst_46 : f32 to vector<256x256xf32>
    %112 = arith.select %109, %110, %111 : vector<256x256xi1>, vector<256x256xf32>
    %c6 = arith.constant 6 : index
    %c0_47 = arith.constant 0 : index
    %c0_48 = arith.constant 0 : index
    %113 = vector.load %arg2[%c6, %c0_47, %c0_48] : memref<9x8x4xf32, #tpu.memory_space<vmem>>, vector<1x8x4xf32>
    %114 = vector.shape_cast %113 : vector<1x8x4xf32> to vector<8x4xf32>
    %cst_49 = arith.constant dense<0.000000e+00> : vector<8x256xf32>
    %115 = tpu.matmul %114, %1, %cst_49 {dimension_numbers = #tpu.dot_dimension_numbers<[1], [0], [0], [1], [0, 0, 1, 1], [], []>} : vector<8x4xf32>, vector<4x256xf32>, vector<8x256xf32> -> vector<8x256xf32>
    %cst_50 = arith.constant dense<0.000000e+00> : vector<8x256xf32>
    %116 = tpu.matmul %115, %112, %cst_50 {dimension_numbers = #tpu.dot_dimension_numbers<[1], [0], [0], [1], [0, 0, 1, 1], [], []>} : vector<8x256xf32>, vector<256x256xf32>, vector<8x256xf32> -> vector<8x256xf32>
    %117 = arith.addf %100, %116 : vector<8x256xf32>
    %c16_i32 = arith.constant 16 : i32
    %118 = vector.broadcast %c16_i32 : i32 to vector<1x256xi32>
    %119 = arith.addi %3, %118 : vector<1x256xi32>
    %120 = vector.broadcast %2 : vector<256x1xi32> to vector<256x256xi32>
    %121 = vector.broadcast %119 : vector<1x256xi32> to vector<256x256xi32>
    %122 = arith.cmpi eq, %120, %121 : vector<256x256xi32>
    %cst_51 = arith.constant 1.000000e+00 : f32
    %cst_52 = arith.constant 0.000000e+00 : f32
    %123 = vector.broadcast %cst_51 : f32 to vector<256x256xf32>
    %124 = vector.broadcast %cst_52 : f32 to vector<256x256xf32>
    %125 = arith.select %122, %123, %124 : vector<256x256xi1>, vector<256x256xf32>
    %c7 = arith.constant 7 : index
    %c0_53 = arith.constant 0 : index
    %c0_54 = arith.constant 0 : index
    %126 = vector.load %arg2[%c7, %c0_53, %c0_54] : memref<9x8x4xf32, #tpu.memory_space<vmem>>, vector<1x8x4xf32>
    %127 = vector.shape_cast %126 : vector<1x8x4xf32> to vector<8x4xf32>
    %cst_55 = arith.constant dense<0.000000e+00> : vector<8x256xf32>
    %128 = tpu.matmul %127, %1, %cst_55 {dimension_numbers = #tpu.dot_dimension_numbers<[1], [0], [0], [1], [0, 0, 1, 1], [], []>} : vector<8x4xf32>, vector<4x256xf32>, vector<8x256xf32> -> vector<8x256xf32>
    %cst_56 = arith.constant dense<0.000000e+00> : vector<8x256xf32>
    %129 = tpu.matmul %128, %125, %cst_56 {dimension_numbers = #tpu.dot_dimension_numbers<[1], [0], [0], [1], [0, 0, 1, 1], [], []>} : vector<8x256xf32>, vector<256x256xf32>, vector<8x256xf32> -> vector<8x256xf32>
    %130 = arith.addf %117, %129 : vector<8x256xf32>
    %c17_i32 = arith.constant 17 : i32
    %131 = vector.broadcast %c17_i32 : i32 to vector<1x256xi32>
    %132 = arith.addi %3, %131 : vector<1x256xi32>
    %133 = vector.broadcast %2 : vector<256x1xi32> to vector<256x256xi32>
    %134 = vector.broadcast %132 : vector<1x256xi32> to vector<256x256xi32>
    %135 = arith.cmpi eq, %133, %134 : vector<256x256xi32>
    %c15_i32_57 = arith.constant 15 : i32
    %136 = vector.broadcast %c15_i32_57 : i32 to vector<1x256xi32>
    %137 = arith.cmpi slt, %5, %136 : vector<1x256xi32>
    %138 = vector.broadcast %137 : vector<1x256xi1> to vector<256x256xi1>
    %139 = arith.andi %135, %138 : vector<256x256xi1>
    %cst_58 = arith.constant 1.000000e+00 : f32
    %cst_59 = arith.constant 0.000000e+00 : f32
    %140 = vector.broadcast %cst_58 : f32 to vector<256x256xf32>
    %141 = vector.broadcast %cst_59 : f32 to vector<256x256xf32>
    %142 = arith.select %139, %140, %141 : vector<256x256xi1>, vector<256x256xf32>
    %c8 = arith.constant 8 : index
    %c0_60 = arith.constant 0 : index
    %c0_61 = arith.constant 0 : index
    %143 = vector.load %arg2[%c8, %c0_60, %c0_61] : memref<9x8x4xf32, #tpu.memory_space<vmem>>, vector<1x8x4xf32>
    %144 = vector.shape_cast %143 : vector<1x8x4xf32> to vector<8x4xf32>
    %cst_62 = arith.constant dense<0.000000e+00> : vector<8x256xf32>
    %145 = tpu.matmul %144, %1, %cst_62 {dimension_numbers = #tpu.dot_dimension_numbers<[1], [0], [0], [1], [0, 0, 1, 1], [], []>} : vector<8x4xf32>, vector<4x256xf32>, vector<8x256xf32> -> vector<8x256xf32>
    %cst_63 = arith.constant dense<0.000000e+00> : vector<8x256xf32>
    %146 = tpu.matmul %145, %142, %cst_63 {dimension_numbers = #tpu.dot_dimension_numbers<[1], [0], [0], [1], [0, 0, 1, 1], [], []>} : vector<8x256xf32>, vector<256x256xf32>, vector<8x256xf32> -> vector<8x256xf32>
    %147 = arith.addf %130, %146 : vector<8x256xf32>
    %c0_64 = arith.constant 0 : index
    %c0_65 = arith.constant 0 : index
    %148 = vector.load %arg3[%c0_64, %c0_65] : memref<8x1xf32, #tpu.memory_space<vmem>>, vector<8x1xf32>
    %149 = vector.broadcast %148 : vector<8x1xf32> to vector<8x256xf32>
    %150 = arith.addf %147, %149 : vector<8x256xf32>
    %151 = tpu.iota {dimensions = array<i32: 0>} : vector<256x1xi32>
    %152 = tpu.iota {dimensions = array<i32: 1>} : vector<1x64xi32>
    %c3_i32 = arith.constant 3 : i32
    %153 = vector.broadcast %c3_i32 : i32 to vector<1x64xi32>
    %154 = arith.shrsi %152, %153 : vector<1x64xi32>
    %c7_i32 = arith.constant 7 : i32
    %155 = vector.broadcast %c7_i32 : i32 to vector<1x64xi32>
    %156 = arith.andi %152, %155 : vector<1x64xi32>
    %c32_i32 = arith.constant 32 : i32
    %157 = vector.broadcast %c32_i32 : i32 to vector<1x64xi32>
    %158 = arith.muli %154, %157 : vector<1x64xi32>
    %c2_i32 = arith.constant 2 : i32
    %159 = vector.broadcast %c2_i32 : i32 to vector<1x64xi32>
    %160 = arith.muli %159, %156 : vector<1x64xi32>
    %161 = arith.addi %158, %160 : vector<1x64xi32>
    %c0_i32_66 = arith.constant 0 : i32
    %162 = vector.broadcast %c0_i32_66 : i32 to vector<1x64xi32>
    %163 = arith.addi %161, %162 : vector<1x64xi32>
    %164 = vector.broadcast %151 : vector<256x1xi32> to vector<256x64xi32>
    %165 = vector.broadcast %163 : vector<1x64xi32> to vector<256x64xi32>
    %166 = arith.cmpi eq, %164, %165 : vector<256x64xi32>
    %cst_67 = arith.constant 1.000000e+00 : f32
    %cst_68 = arith.constant 0.000000e+00 : f32
    %167 = vector.broadcast %cst_67 : f32 to vector<256x64xf32>
    %168 = vector.broadcast %cst_68 : f32 to vector<256x64xf32>
    %169 = arith.select %166, %167, %168 : vector<256x64xi1>, vector<256x64xf32>
    %cst_69 = arith.constant dense<0.000000e+00> : vector<8x64xf32>
    %170 = tpu.matmul %150, %169, %cst_69 {dimension_numbers = #tpu.dot_dimension_numbers<[1], [0], [0], [1], [0, 0, 1, 1], [], []>} : vector<8x256xf32>, vector<256x64xf32>, vector<8x64xf32> -> vector<8x64xf32>
    %c1_i32_70 = arith.constant 1 : i32
    %171 = vector.broadcast %c1_i32_70 : i32 to vector<1x64xi32>
    %172 = arith.addi %161, %171 : vector<1x64xi32>
    %173 = vector.broadcast %151 : vector<256x1xi32> to vector<256x64xi32>
    %174 = vector.broadcast %172 : vector<1x64xi32> to vector<256x64xi32>
    %175 = arith.cmpi eq, %173, %174 : vector<256x64xi32>
    %cst_71 = arith.constant 1.000000e+00 : f32
    %cst_72 = arith.constant 0.000000e+00 : f32
    %176 = vector.broadcast %cst_71 : f32 to vector<256x64xf32>
    %177 = vector.broadcast %cst_72 : f32 to vector<256x64xf32>
    %178 = arith.select %175, %176, %177 : vector<256x64xi1>, vector<256x64xf32>
    %cst_73 = arith.constant dense<0.000000e+00> : vector<8x64xf32>
    %179 = tpu.matmul %150, %178, %cst_73 {dimension_numbers = #tpu.dot_dimension_numbers<[1], [0], [0], [1], [0, 0, 1, 1], [], []>} : vector<8x256xf32>, vector<256x64xf32>, vector<8x64xf32> -> vector<8x64xf32>
    %180 = arith.maximumf %170, %179 : vector<8x64xf32>
    %c16_i32_74 = arith.constant 16 : i32
    %181 = vector.broadcast %c16_i32_74 : i32 to vector<1x64xi32>
    %182 = arith.addi %161, %181 : vector<1x64xi32>
    %183 = vector.broadcast %151 : vector<256x1xi32> to vector<256x64xi32>
    %184 = vector.broadcast %182 : vector<1x64xi32> to vector<256x64xi32>
    %185 = arith.cmpi eq, %183, %184 : vector<256x64xi32>
    %cst_75 = arith.constant 1.000000e+00 : f32
    %cst_76 = arith.constant 0.000000e+00 : f32
    %186 = vector.broadcast %cst_75 : f32 to vector<256x64xf32>
    %187 = vector.broadcast %cst_76 : f32 to vector<256x64xf32>
    %188 = arith.select %185, %186, %187 : vector<256x64xi1>, vector<256x64xf32>
    %cst_77 = arith.constant dense<0.000000e+00> : vector<8x64xf32>
    %189 = tpu.matmul %150, %188, %cst_77 {dimension_numbers = #tpu.dot_dimension_numbers<[1], [0], [0], [1], [0, 0, 1, 1], [], []>} : vector<8x256xf32>, vector<256x64xf32>, vector<8x64xf32> -> vector<8x64xf32>
    %190 = arith.maximumf %180, %189 : vector<8x64xf32>
    %c17_i32_78 = arith.constant 17 : i32
    %191 = vector.broadcast %c17_i32_78 : i32 to vector<1x64xi32>
    %192 = arith.addi %161, %191 : vector<1x64xi32>
    %193 = vector.broadcast %151 : vector<256x1xi32> to vector<256x64xi32>
    %194 = vector.broadcast %192 : vector<1x64xi32> to vector<256x64xi32>
    %195 = arith.cmpi eq, %193, %194 : vector<256x64xi32>
    %cst_79 = arith.constant 1.000000e+00 : f32
    %cst_80 = arith.constant 0.000000e+00 : f32
    %196 = vector.broadcast %cst_79 : f32 to vector<256x64xf32>
    %197 = vector.broadcast %cst_80 : f32 to vector<256x64xf32>
    %198 = arith.select %195, %196, %197 : vector<256x64xi1>, vector<256x64xf32>
    %cst_81 = arith.constant dense<0.000000e+00> : vector<8x64xf32>
    %199 = tpu.matmul %150, %198, %cst_81 {dimension_numbers = #tpu.dot_dimension_numbers<[1], [0], [0], [1], [0, 0, 1, 1], [], []>} : vector<8x256xf32>, vector<256x64xf32>, vector<8x64xf32> -> vector<8x64xf32>
    %200 = arith.maximumf %190, %199 : vector<8x64xf32>
    %201 = tpu.iota {dimensions = array<i32: 0>} : vector<64x1xi32>
    %202 = tpu.iota {dimensions = array<i32: 1>} : vector<1x64xi32>
    %c7_i32_82 = arith.constant 7 : i32
    %203 = vector.broadcast %c7_i32_82 : i32 to vector<1x64xi32>
    %204 = arith.andi %202, %203 : vector<1x64xi32>
    %cst_83 = arith.constant 0.000000e+00 : f32
    %205 = vector.broadcast %cst_83 : f32 to vector<16x64xf32>
    %c-9_i32 = arith.constant -9 : i32
    %206 = vector.broadcast %c-9_i32 : i32 to vector<1x64xi32>
    %207 = arith.addi %202, %206 : vector<1x64xi32>
    %208 = vector.broadcast %201 : vector<64x1xi32> to vector<64x64xi32>
    %209 = vector.broadcast %207 : vector<1x64xi32> to vector<64x64xi32>
    %210 = arith.cmpi eq, %208, %209 : vector<64x64xi32>
    %c1_i32_84 = arith.constant 1 : i32
    %211 = vector.broadcast %c1_i32_84 : i32 to vector<1x64xi32>
    %212 = arith.cmpi sge, %204, %211 : vector<1x64xi32>
    %213 = vector.broadcast %212 : vector<1x64xi1> to vector<64x64xi1>
    %214 = arith.andi %210, %213 : vector<64x64xi1>
    %cst_85 = arith.constant 1.000000e+00 : f32
    %cst_86 = arith.constant 0.000000e+00 : f32
    %215 = vector.broadcast %cst_85 : f32 to vector<64x64xf32>
    %216 = vector.broadcast %cst_86 : f32 to vector<64x64xf32>
    %217 = arith.select %214, %215, %216 : vector<64x64xi1>, vector<64x64xf32>
    %c0_87 = arith.constant 0 : index
    %c0_88 = arith.constant 0 : index
    %c0_89 = arith.constant 0 : index
    %218 = vector.load %arg4[%c0_87, %c0_88, %c0_89] : memref<9x16x8xf32, #tpu.memory_space<vmem>>, vector<1x16x8xf32>
    %219 = vector.shape_cast %218 : vector<1x16x8xf32> to vector<16x8xf32>
    %cst_90 = arith.constant dense<0.000000e+00> : vector<16x64xf32>
    %220 = tpu.matmul %219, %200, %cst_90 {dimension_numbers = #tpu.dot_dimension_numbers<[1], [0], [0], [1], [0, 0, 1, 1], [], []>} : vector<16x8xf32>, vector<8x64xf32>, vector<16x64xf32> -> vector<16x64xf32>
    %cst_91 = arith.constant dense<0.000000e+00> : vector<16x64xf32>
    %221 = tpu.matmul %220, %217, %cst_91 {dimension_numbers = #tpu.dot_dimension_numbers<[1], [0], [0], [1], [0, 0, 1, 1], [], []>} : vector<16x64xf32>, vector<64x64xf32>, vector<16x64xf32> -> vector<16x64xf32>
    %222 = arith.addf %205, %221 : vector<16x64xf32>
    %c-8_i32 = arith.constant -8 : i32
    %223 = vector.broadcast %c-8_i32 : i32 to vector<1x64xi32>
    %224 = arith.addi %202, %223 : vector<1x64xi32>
    %225 = vector.broadcast %201 : vector<64x1xi32> to vector<64x64xi32>
    %226 = vector.broadcast %224 : vector<1x64xi32> to vector<64x64xi32>
    %227 = arith.cmpi eq, %225, %226 : vector<64x64xi32>
    %cst_92 = arith.constant 1.000000e+00 : f32
    %cst_93 = arith.constant 0.000000e+00 : f32
    %228 = vector.broadcast %cst_92 : f32 to vector<64x64xf32>
    %229 = vector.broadcast %cst_93 : f32 to vector<64x64xf32>
    %230 = arith.select %227, %228, %229 : vector<64x64xi1>, vector<64x64xf32>
    %c1_94 = arith.constant 1 : index
    %c0_95 = arith.constant 0 : index
    %c0_96 = arith.constant 0 : index
    %231 = vector.load %arg4[%c1_94, %c0_95, %c0_96] : memref<9x16x8xf32, #tpu.memory_space<vmem>>, vector<1x16x8xf32>
    %232 = vector.shape_cast %231 : vector<1x16x8xf32> to vector<16x8xf32>
    %cst_97 = arith.constant dense<0.000000e+00> : vector<16x64xf32>
    %233 = tpu.matmul %232, %200, %cst_97 {dimension_numbers = #tpu.dot_dimension_numbers<[1], [0], [0], [1], [0, 0, 1, 1], [], []>} : vector<16x8xf32>, vector<8x64xf32>, vector<16x64xf32> -> vector<16x64xf32>
    %cst_98 = arith.constant dense<0.000000e+00> : vector<16x64xf32>
    %234 = tpu.matmul %233, %230, %cst_98 {dimension_numbers = #tpu.dot_dimension_numbers<[1], [0], [0], [1], [0, 0, 1, 1], [], []>} : vector<16x64xf32>, vector<64x64xf32>, vector<16x64xf32> -> vector<16x64xf32>
    %235 = arith.addf %222, %234 : vector<16x64xf32>
    %c-7_i32 = arith.constant -7 : i32
    %236 = vector.broadcast %c-7_i32 : i32 to vector<1x64xi32>
    %237 = arith.addi %202, %236 : vector<1x64xi32>
    %238 = vector.broadcast %201 : vector<64x1xi32> to vector<64x64xi32>
    %239 = vector.broadcast %237 : vector<1x64xi32> to vector<64x64xi32>
    %240 = arith.cmpi eq, %238, %239 : vector<64x64xi32>
    %c7_i32_99 = arith.constant 7 : i32
    %241 = vector.broadcast %c7_i32_99 : i32 to vector<1x64xi32>
    %242 = arith.cmpi slt, %204, %241 : vector<1x64xi32>
    %243 = vector.broadcast %242 : vector<1x64xi1> to vector<64x64xi1>
    %244 = arith.andi %240, %243 : vector<64x64xi1>
    %cst_100 = arith.constant 1.000000e+00 : f32
    %cst_101 = arith.constant 0.000000e+00 : f32
    %245 = vector.broadcast %cst_100 : f32 to vector<64x64xf32>
    %246 = vector.broadcast %cst_101 : f32 to vector<64x64xf32>
    %247 = arith.select %244, %245, %246 : vector<64x64xi1>, vector<64x64xf32>
    %c2_102 = arith.constant 2 : index
    %c0_103 = arith.constant 0 : index
    %c0_104 = arith.constant 0 : index
    %248 = vector.load %arg4[%c2_102, %c0_103, %c0_104] : memref<9x16x8xf32, #tpu.memory_space<vmem>>, vector<1x16x8xf32>
    %249 = vector.shape_cast %248 : vector<1x16x8xf32> to vector<16x8xf32>
    %cst_105 = arith.constant dense<0.000000e+00> : vector<16x64xf32>
    %250 = tpu.matmul %249, %200, %cst_105 {dimension_numbers = #tpu.dot_dimension_numbers<[1], [0], [0], [1], [0, 0, 1, 1], [], []>} : vector<16x8xf32>, vector<8x64xf32>, vector<16x64xf32> -> vector<16x64xf32>
    %cst_106 = arith.constant dense<0.000000e+00> : vector<16x64xf32>
    %251 = tpu.matmul %250, %247, %cst_106 {dimension_numbers = #tpu.dot_dimension_numbers<[1], [0], [0], [1], [0, 0, 1, 1], [], []>} : vector<16x64xf32>, vector<64x64xf32>, vector<16x64xf32> -> vector<16x64xf32>
    %252 = arith.addf %235, %251 : vector<16x64xf32>
    %c-1_i32_107 = arith.constant -1 : i32
    %253 = vector.broadcast %c-1_i32_107 : i32 to vector<1x64xi32>
    %254 = arith.addi %202, %253 : vector<1x64xi32>
    %255 = vector.broadcast %201 : vector<64x1xi32> to vector<64x64xi32>
    %256 = vector.broadcast %254 : vector<1x64xi32> to vector<64x64xi32>
    %257 = arith.cmpi eq, %255, %256 : vector<64x64xi32>
    %c1_i32_108 = arith.constant 1 : i32
    %258 = vector.broadcast %c1_i32_108 : i32 to vector<1x64xi32>
    %259 = arith.cmpi sge, %204, %258 : vector<1x64xi32>
    %260 = vector.broadcast %259 : vector<1x64xi1> to vector<64x64xi1>
    %261 = arith.andi %257, %260 : vector<64x64xi1>
    %cst_109 = arith.constant 1.000000e+00 : f32
    %cst_110 = arith.constant 0.000000e+00 : f32
    %262 = vector.broadcast %cst_109 : f32 to vector<64x64xf32>
    %263 = vector.broadcast %cst_110 : f32 to vector<64x64xf32>
    %264 = arith.select %261, %262, %263 : vector<64x64xi1>, vector<64x64xf32>
    %c3_111 = arith.constant 3 : index
    %c0_112 = arith.constant 0 : index
    %c0_113 = arith.constant 0 : index
    %265 = vector.load %arg4[%c3_111, %c0_112, %c0_113] : memref<9x16x8xf32, #tpu.memory_space<vmem>>, vector<1x16x8xf32>
    %266 = vector.shape_cast %265 : vector<1x16x8xf32> to vector<16x8xf32>
    %cst_114 = arith.constant dense<0.000000e+00> : vector<16x64xf32>
    %267 = tpu.matmul %266, %200, %cst_114 {dimension_numbers = #tpu.dot_dimension_numbers<[1], [0], [0], [1], [0, 0, 1, 1], [], []>} : vector<16x8xf32>, vector<8x64xf32>, vector<16x64xf32> -> vector<16x64xf32>
    %cst_115 = arith.constant dense<0.000000e+00> : vector<16x64xf32>
    %268 = tpu.matmul %267, %264, %cst_115 {dimension_numbers = #tpu.dot_dimension_numbers<[1], [0], [0], [1], [0, 0, 1, 1], [], []>} : vector<16x64xf32>, vector<64x64xf32>, vector<16x64xf32> -> vector<16x64xf32>
    %269 = arith.addf %252, %268 : vector<16x64xf32>
    %c0_i32_116 = arith.constant 0 : i32
    %270 = vector.broadcast %c0_i32_116 : i32 to vector<1x64xi32>
    %271 = arith.addi %202, %270 : vector<1x64xi32>
    %272 = vector.broadcast %201 : vector<64x1xi32> to vector<64x64xi32>
    %273 = vector.broadcast %271 : vector<1x64xi32> to vector<64x64xi32>
    %274 = arith.cmpi eq, %272, %273 : vector<64x64xi32>
    %cst_117 = arith.constant 1.000000e+00 : f32
    %cst_118 = arith.constant 0.000000e+00 : f32
    %275 = vector.broadcast %cst_117 : f32 to vector<64x64xf32>
    %276 = vector.broadcast %cst_118 : f32 to vector<64x64xf32>
    %277 = arith.select %274, %275, %276 : vector<64x64xi1>, vector<64x64xf32>
    %c4_119 = arith.constant 4 : index
    %c0_120 = arith.constant 0 : index
    %c0_121 = arith.constant 0 : index
    %278 = vector.load %arg4[%c4_119, %c0_120, %c0_121] : memref<9x16x8xf32, #tpu.memory_space<vmem>>, vector<1x16x8xf32>
    %279 = vector.shape_cast %278 : vector<1x16x8xf32> to vector<16x8xf32>
    %cst_122 = arith.constant dense<0.000000e+00> : vector<16x64xf32>
    %280 = tpu.matmul %279, %200, %cst_122 {dimension_numbers = #tpu.dot_dimension_numbers<[1], [0], [0], [1], [0, 0, 1, 1], [], []>} : vector<16x8xf32>, vector<8x64xf32>, vector<16x64xf32> -> vector<16x64xf32>
    %cst_123 = arith.constant dense<0.000000e+00> : vector<16x64xf32>
    %281 = tpu.matmul %280, %277, %cst_123 {dimension_numbers = #tpu.dot_dimension_numbers<[1], [0], [0], [1], [0, 0, 1, 1], [], []>} : vector<16x64xf32>, vector<64x64xf32>, vector<16x64xf32> -> vector<16x64xf32>
    %282 = arith.addf %269, %281 : vector<16x64xf32>
    %c1_i32_124 = arith.constant 1 : i32
    %283 = vector.broadcast %c1_i32_124 : i32 to vector<1x64xi32>
    %284 = arith.addi %202, %283 : vector<1x64xi32>
    %285 = vector.broadcast %201 : vector<64x1xi32> to vector<64x64xi32>
    %286 = vector.broadcast %284 : vector<1x64xi32> to vector<64x64xi32>
    %287 = arith.cmpi eq, %285, %286 : vector<64x64xi32>
    %c7_i32_125 = arith.constant 7 : i32
    %288 = vector.broadcast %c7_i32_125 : i32 to vector<1x64xi32>
    %289 = arith.cmpi slt, %204, %288 : vector<1x64xi32>
    %290 = vector.broadcast %289 : vector<1x64xi1> to vector<64x64xi1>
    %291 = arith.andi %287, %290 : vector<64x64xi1>
    %cst_126 = arith.constant 1.000000e+00 : f32
    %cst_127 = arith.constant 0.000000e+00 : f32
    %292 = vector.broadcast %cst_126 : f32 to vector<64x64xf32>
    %293 = vector.broadcast %cst_127 : f32 to vector<64x64xf32>
    %294 = arith.select %291, %292, %293 : vector<64x64xi1>, vector<64x64xf32>
    %c5_128 = arith.constant 5 : index
    %c0_129 = arith.constant 0 : index
    %c0_130 = arith.constant 0 : index
    %295 = vector.load %arg4[%c5_128, %c0_129, %c0_130] : memref<9x16x8xf32, #tpu.memory_space<vmem>>, vector<1x16x8xf32>
    %296 = vector.shape_cast %295 : vector<1x16x8xf32> to vector<16x8xf32>
    %cst_131 = arith.constant dense<0.000000e+00> : vector<16x64xf32>
    %297 = tpu.matmul %296, %200, %cst_131 {dimension_numbers = #tpu.dot_dimension_numbers<[1], [0], [0], [1], [0, 0, 1, 1], [], []>} : vector<16x8xf32>, vector<8x64xf32>, vector<16x64xf32> -> vector<16x64xf32>
    %cst_132 = arith.constant dense<0.000000e+00> : vector<16x64xf32>
    %298 = tpu.matmul %297, %294, %cst_132 {dimension_numbers = #tpu.dot_dimension_numbers<[1], [0], [0], [1], [0, 0, 1, 1], [], []>} : vector<16x64xf32>, vector<64x64xf32>, vector<16x64xf32> -> vector<16x64xf32>
    %299 = arith.addf %282, %298 : vector<16x64xf32>
    %c7_i32_133 = arith.constant 7 : i32
    %300 = vector.broadcast %c7_i32_133 : i32 to vector<1x64xi32>
    %301 = arith.addi %202, %300 : vector<1x64xi32>
    %302 = vector.broadcast %201 : vector<64x1xi32> to vector<64x64xi32>
    %303 = vector.broadcast %301 : vector<1x64xi32> to vector<64x64xi32>
    %304 = arith.cmpi eq, %302, %303 : vector<64x64xi32>
    %c1_i32_134 = arith.constant 1 : i32
    %305 = vector.broadcast %c1_i32_134 : i32 to vector<1x64xi32>
    %306 = arith.cmpi sge, %204, %305 : vector<1x64xi32>
    %307 = vector.broadcast %306 : vector<1x64xi1> to vector<64x64xi1>
    %308 = arith.andi %304, %307 : vector<64x64xi1>
    %cst_135 = arith.constant 1.000000e+00 : f32
    %cst_136 = arith.constant 0.000000e+00 : f32
    %309 = vector.broadcast %cst_135 : f32 to vector<64x64xf32>
    %310 = vector.broadcast %cst_136 : f32 to vector<64x64xf32>
    %311 = arith.select %308, %309, %310 : vector<64x64xi1>, vector<64x64xf32>
    %c6_137 = arith.constant 6 : index
    %c0_138 = arith.constant 0 : index
    %c0_139 = arith.constant 0 : index
    %312 = vector.load %arg4[%c6_137, %c0_138, %c0_139] : memref<9x16x8xf32, #tpu.memory_space<vmem>>, vector<1x16x8xf32>
    %313 = vector.shape_cast %312 : vector<1x16x8xf32> to vector<16x8xf32>
    %cst_140 = arith.constant dense<0.000000e+00> : vector<16x64xf32>
    %314 = tpu.matmul %313, %200, %cst_140 {dimension_numbers = #tpu.dot_dimension_numbers<[1], [0], [0], [1], [0, 0, 1, 1], [], []>} : vector<16x8xf32>, vector<8x64xf32>, vector<16x64xf32> -> vector<16x64xf32>
    %cst_141 = arith.constant dense<0.000000e+00> : vector<16x64xf32>
    %315 = tpu.matmul %314, %311, %cst_141 {dimension_numbers = #tpu.dot_dimension_numbers<[1], [0], [0], [1], [0, 0, 1, 1], [], []>} : vector<16x64xf32>, vector<64x64xf32>, vector<16x64xf32> -> vector<16x64xf32>
    %316 = arith.addf %299, %315 : vector<16x64xf32>
    %c8_i32 = arith.constant 8 : i32
    %317 = vector.broadcast %c8_i32 : i32 to vector<1x64xi32>
    %318 = arith.addi %202, %317 : vector<1x64xi32>
    %319 = vector.broadcast %201 : vector<64x1xi32> to vector<64x64xi32>
    %320 = vector.broadcast %318 : vector<1x64xi32> to vector<64x64xi32>
    %321 = arith.cmpi eq, %319, %320 : vector<64x64xi32>
    %cst_142 = arith.constant 1.000000e+00 : f32
    %cst_143 = arith.constant 0.000000e+00 : f32
    %322 = vector.broadcast %cst_142 : f32 to vector<64x64xf32>
    %323 = vector.broadcast %cst_143 : f32 to vector<64x64xf32>
    %324 = arith.select %321, %322, %323 : vector<64x64xi1>, vector<64x64xf32>
    %c7_144 = arith.constant 7 : index
    %c0_145 = arith.constant 0 : index
    %c0_146 = arith.constant 0 : index
    %325 = vector.load %arg4[%c7_144, %c0_145, %c0_146] : memref<9x16x8xf32, #tpu.memory_space<vmem>>, vector<1x16x8xf32>
    %326 = vector.shape_cast %325 : vector<1x16x8xf32> to vector<16x8xf32>
    %cst_147 = arith.constant dense<0.000000e+00> : vector<16x64xf32>
    %327 = tpu.matmul %326, %200, %cst_147 {dimension_numbers = #tpu.dot_dimension_numbers<[1], [0], [0], [1], [0, 0, 1, 1], [], []>} : vector<16x8xf32>, vector<8x64xf32>, vector<16x64xf32> -> vector<16x64xf32>
    %cst_148 = arith.constant dense<0.000000e+00> : vector<16x64xf32>
    %328 = tpu.matmul %327, %324, %cst_148 {dimension_numbers = #tpu.dot_dimension_numbers<[1], [0], [0], [1], [0, 0, 1, 1], [], []>} : vector<16x64xf32>, vector<64x64xf32>, vector<16x64xf32> -> vector<16x64xf32>
    %329 = arith.addf %316, %328 : vector<16x64xf32>
    %c9_i32 = arith.constant 9 : i32
    %330 = vector.broadcast %c9_i32 : i32 to vector<1x64xi32>
    %331 = arith.addi %202, %330 : vector<1x64xi32>
    %332 = vector.broadcast %201 : vector<64x1xi32> to vector<64x64xi32>
    %333 = vector.broadcast %331 : vector<1x64xi32> to vector<64x64xi32>
    %334 = arith.cmpi eq, %332, %333 : vector<64x64xi32>
    %c7_i32_149 = arith.constant 7 : i32
    %335 = vector.broadcast %c7_i32_149 : i32 to vector<1x64xi32>
    %336 = arith.cmpi slt, %204, %335 : vector<1x64xi32>
    %337 = vector.broadcast %336 : vector<1x64xi1> to vector<64x64xi1>
    %338 = arith.andi %334, %337 : vector<64x64xi1>
    %cst_150 = arith.constant 1.000000e+00 : f32
    %cst_151 = arith.constant 0.000000e+00 : f32
    %339 = vector.broadcast %cst_150 : f32 to vector<64x64xf32>
    %340 = vector.broadcast %cst_151 : f32 to vector<64x64xf32>
    %341 = arith.select %338, %339, %340 : vector<64x64xi1>, vector<64x64xf32>
    %c8_152 = arith.constant 8 : index
    %c0_153 = arith.constant 0 : index
    %c0_154 = arith.constant 0 : index
    %342 = vector.load %arg4[%c8_152, %c0_153, %c0_154] : memref<9x16x8xf32, #tpu.memory_space<vmem>>, vector<1x16x8xf32>
    %343 = vector.shape_cast %342 : vector<1x16x8xf32> to vector<16x8xf32>
    %cst_155 = arith.constant dense<0.000000e+00> : vector<16x64xf32>
    %344 = tpu.matmul %343, %200, %cst_155 {dimension_numbers = #tpu.dot_dimension_numbers<[1], [0], [0], [1], [0, 0, 1, 1], [], []>} : vector<16x8xf32>, vector<8x64xf32>, vector<16x64xf32> -> vector<16x64xf32>
    %cst_156 = arith.constant dense<0.000000e+00> : vector<16x64xf32>
    %345 = tpu.matmul %344, %341, %cst_156 {dimension_numbers = #tpu.dot_dimension_numbers<[1], [0], [0], [1], [0, 0, 1, 1], [], []>} : vector<16x64xf32>, vector<64x64xf32>, vector<16x64xf32> -> vector<16x64xf32>
    %346 = arith.addf %329, %345 : vector<16x64xf32>
    %c0_157 = arith.constant 0 : index
    %c0_158 = arith.constant 0 : index
    %347 = vector.load %arg5[%c0_157, %c0_158] : memref<16x1xf32, #tpu.memory_space<vmem>>, vector<16x1xf32>
    %348 = vector.broadcast %347 : vector<16x1xf32> to vector<16x64xf32>
    %349 = arith.addf %346, %348 : vector<16x64xf32>
    %350 = tpu.iota {dimensions = array<i32: 0>} : vector<64x1xi32>
    %351 = tpu.iota {dimensions = array<i32: 1>} : vector<1x16xi32>
    %c2_i32_159 = arith.constant 2 : i32
    %352 = vector.broadcast %c2_i32_159 : i32 to vector<1x16xi32>
    %353 = arith.shrsi %351, %352 : vector<1x16xi32>
    %c3_i32_160 = arith.constant 3 : i32
    %354 = vector.broadcast %c3_i32_160 : i32 to vector<1x16xi32>
    %355 = arith.andi %351, %354 : vector<1x16xi32>
    %c16_i32_161 = arith.constant 16 : i32
    %356 = vector.broadcast %c16_i32_161 : i32 to vector<1x16xi32>
    %357 = arith.muli %353, %356 : vector<1x16xi32>
    %c2_i32_162 = arith.constant 2 : i32
    %358 = vector.broadcast %c2_i32_162 : i32 to vector<1x16xi32>
    %359 = arith.muli %358, %355 : vector<1x16xi32>
    %360 = arith.addi %357, %359 : vector<1x16xi32>
    %c0_i32_163 = arith.constant 0 : i32
    %361 = vector.broadcast %c0_i32_163 : i32 to vector<1x16xi32>
    %362 = arith.addi %360, %361 : vector<1x16xi32>
    %363 = vector.broadcast %350 : vector<64x1xi32> to vector<64x16xi32>
    %364 = vector.broadcast %362 : vector<1x16xi32> to vector<64x16xi32>
    %365 = arith.cmpi eq, %363, %364 : vector<64x16xi32>
    %cst_164 = arith.constant 1.000000e+00 : f32
    %cst_165 = arith.constant 0.000000e+00 : f32
    %366 = vector.broadcast %cst_164 : f32 to vector<64x16xf32>
    %367 = vector.broadcast %cst_165 : f32 to vector<64x16xf32>
    %368 = arith.select %365, %366, %367 : vector<64x16xi1>, vector<64x16xf32>
    %cst_166 = arith.constant dense<0.000000e+00> : vector<16x16xf32>
    %369 = tpu.matmul %349, %368, %cst_166 {dimension_numbers = #tpu.dot_dimension_numbers<[1], [0], [0], [1], [0, 0, 1, 1], [], []>} : vector<16x64xf32>, vector<64x16xf32>, vector<16x16xf32> -> vector<16x16xf32>
    %c1_i32_167 = arith.constant 1 : i32
    %370 = vector.broadcast %c1_i32_167 : i32 to vector<1x16xi32>
    %371 = arith.addi %360, %370 : vector<1x16xi32>
    %372 = vector.broadcast %350 : vector<64x1xi32> to vector<64x16xi32>
    %373 = vector.broadcast %371 : vector<1x16xi32> to vector<64x16xi32>
    %374 = arith.cmpi eq, %372, %373 : vector<64x16xi32>
    %cst_168 = arith.constant 1.000000e+00 : f32
    %cst_169 = arith.constant 0.000000e+00 : f32
    %375 = vector.broadcast %cst_168 : f32 to vector<64x16xf32>
    %376 = vector.broadcast %cst_169 : f32 to vector<64x16xf32>
    %377 = arith.select %374, %375, %376 : vector<64x16xi1>, vector<64x16xf32>
    %cst_170 = arith.constant dense<0.000000e+00> : vector<16x16xf32>
    %378 = tpu.matmul %349, %377, %cst_170 {dimension_numbers = #tpu.dot_dimension_numbers<[1], [0], [0], [1], [0, 0, 1, 1], [], []>} : vector<16x64xf32>, vector<64x16xf32>, vector<16x16xf32> -> vector<16x16xf32>
    %379 = arith.maximumf %369, %378 : vector<16x16xf32>
    %c8_i32_171 = arith.constant 8 : i32
    %380 = vector.broadcast %c8_i32_171 : i32 to vector<1x16xi32>
    %381 = arith.addi %360, %380 : vector<1x16xi32>
    %382 = vector.broadcast %350 : vector<64x1xi32> to vector<64x16xi32>
    %383 = vector.broadcast %381 : vector<1x16xi32> to vector<64x16xi32>
    %384 = arith.cmpi eq, %382, %383 : vector<64x16xi32>
    %cst_172 = arith.constant 1.000000e+00 : f32
    %cst_173 = arith.constant 0.000000e+00 : f32
    %385 = vector.broadcast %cst_172 : f32 to vector<64x16xf32>
    %386 = vector.broadcast %cst_173 : f32 to vector<64x16xf32>
    %387 = arith.select %384, %385, %386 : vector<64x16xi1>, vector<64x16xf32>
    %cst_174 = arith.constant dense<0.000000e+00> : vector<16x16xf32>
    %388 = tpu.matmul %349, %387, %cst_174 {dimension_numbers = #tpu.dot_dimension_numbers<[1], [0], [0], [1], [0, 0, 1, 1], [], []>} : vector<16x64xf32>, vector<64x16xf32>, vector<16x16xf32> -> vector<16x16xf32>
    %389 = arith.maximumf %379, %388 : vector<16x16xf32>
    %c9_i32_175 = arith.constant 9 : i32
    %390 = vector.broadcast %c9_i32_175 : i32 to vector<1x16xi32>
    %391 = arith.addi %360, %390 : vector<1x16xi32>
    %392 = vector.broadcast %350 : vector<64x1xi32> to vector<64x16xi32>
    %393 = vector.broadcast %391 : vector<1x16xi32> to vector<64x16xi32>
    %394 = arith.cmpi eq, %392, %393 : vector<64x16xi32>
    %cst_176 = arith.constant 1.000000e+00 : f32
    %cst_177 = arith.constant 0.000000e+00 : f32
    %395 = vector.broadcast %cst_176 : f32 to vector<64x16xf32>
    %396 = vector.broadcast %cst_177 : f32 to vector<64x16xf32>
    %397 = arith.select %394, %395, %396 : vector<64x16xi1>, vector<64x16xf32>
    %cst_178 = arith.constant dense<0.000000e+00> : vector<16x16xf32>
    %398 = tpu.matmul %349, %397, %cst_178 {dimension_numbers = #tpu.dot_dimension_numbers<[1], [0], [0], [1], [0, 0, 1, 1], [], []>} : vector<16x64xf32>, vector<64x16xf32>, vector<16x16xf32> -> vector<16x16xf32>
    %399 = arith.maximumf %389, %398 : vector<16x16xf32>
    %400 = tpu.iota {dimensions = array<i32: 0>} : vector<16x1xi32>
    %401 = tpu.iota {dimensions = array<i32: 1>} : vector<1x16xi32>
    %c3_i32_179 = arith.constant 3 : i32
    %402 = vector.broadcast %c3_i32_179 : i32 to vector<1x16xi32>
    %403 = arith.andi %401, %402 : vector<1x16xi32>
    %cst_180 = arith.constant 0.000000e+00 : f32
    %404 = vector.broadcast %cst_180 : f32 to vector<16x16xf32>
    %c-5_i32 = arith.constant -5 : i32
    %405 = vector.broadcast %c-5_i32 : i32 to vector<1x16xi32>
    %406 = arith.addi %401, %405 : vector<1x16xi32>
    %407 = vector.broadcast %400 : vector<16x1xi32> to vector<16x16xi32>
    %408 = vector.broadcast %406 : vector<1x16xi32> to vector<16x16xi32>
    %409 = arith.cmpi eq, %407, %408 : vector<16x16xi32>
    %c1_i32_181 = arith.constant 1 : i32
    %410 = vector.broadcast %c1_i32_181 : i32 to vector<1x16xi32>
    %411 = arith.cmpi sge, %403, %410 : vector<1x16xi32>
    %412 = vector.broadcast %411 : vector<1x16xi1> to vector<16x16xi1>
    %413 = arith.andi %409, %412 : vector<16x16xi1>
    %cst_182 = arith.constant 1.000000e+00 : f32
    %cst_183 = arith.constant 0.000000e+00 : f32
    %414 = vector.broadcast %cst_182 : f32 to vector<16x16xf32>
    %415 = vector.broadcast %cst_183 : f32 to vector<16x16xf32>
    %416 = arith.select %413, %414, %415 : vector<16x16xi1>, vector<16x16xf32>
    %c0_184 = arith.constant 0 : index
    %c0_185 = arith.constant 0 : index
    %c0_186 = arith.constant 0 : index
    %417 = vector.load %arg6[%c0_184, %c0_185, %c0_186] : memref<9x16x16xf32, #tpu.memory_space<vmem>>, vector<1x16x16xf32>
    %418 = vector.shape_cast %417 : vector<1x16x16xf32> to vector<16x16xf32>
    %cst_187 = arith.constant dense<0.000000e+00> : vector<16x16xf32>
    %419 = tpu.matmul %418, %399, %cst_187 {dimension_numbers = #tpu.dot_dimension_numbers<[1], [0], [0], [1], [0, 0, 1, 1], [], []>} : vector<16x16xf32>, vector<16x16xf32>, vector<16x16xf32> -> vector<16x16xf32>
    %cst_188 = arith.constant dense<0.000000e+00> : vector<16x16xf32>
    %420 = tpu.matmul %419, %416, %cst_188 {dimension_numbers = #tpu.dot_dimension_numbers<[1], [0], [0], [1], [0, 0, 1, 1], [], []>} : vector<16x16xf32>, vector<16x16xf32>, vector<16x16xf32> -> vector<16x16xf32>
    %421 = arith.addf %404, %420 : vector<16x16xf32>
    %c-4_i32 = arith.constant -4 : i32
    %422 = vector.broadcast %c-4_i32 : i32 to vector<1x16xi32>
    %423 = arith.addi %401, %422 : vector<1x16xi32>
    %424 = vector.broadcast %400 : vector<16x1xi32> to vector<16x16xi32>
    %425 = vector.broadcast %423 : vector<1x16xi32> to vector<16x16xi32>
    %426 = arith.cmpi eq, %424, %425 : vector<16x16xi32>
    %cst_189 = arith.constant 1.000000e+00 : f32
    %cst_190 = arith.constant 0.000000e+00 : f32
    %427 = vector.broadcast %cst_189 : f32 to vector<16x16xf32>
    %428 = vector.broadcast %cst_190 : f32 to vector<16x16xf32>
    %429 = arith.select %426, %427, %428 : vector<16x16xi1>, vector<16x16xf32>
    %c1_191 = arith.constant 1 : index
    %c0_192 = arith.constant 0 : index
    %c0_193 = arith.constant 0 : index
    %430 = vector.load %arg6[%c1_191, %c0_192, %c0_193] : memref<9x16x16xf32, #tpu.memory_space<vmem>>, vector<1x16x16xf32>
    %431 = vector.shape_cast %430 : vector<1x16x16xf32> to vector<16x16xf32>
    %cst_194 = arith.constant dense<0.000000e+00> : vector<16x16xf32>
    %432 = tpu.matmul %431, %399, %cst_194 {dimension_numbers = #tpu.dot_dimension_numbers<[1], [0], [0], [1], [0, 0, 1, 1], [], []>} : vector<16x16xf32>, vector<16x16xf32>, vector<16x16xf32> -> vector<16x16xf32>
    %cst_195 = arith.constant dense<0.000000e+00> : vector<16x16xf32>
    %433 = tpu.matmul %432, %429, %cst_195 {dimension_numbers = #tpu.dot_dimension_numbers<[1], [0], [0], [1], [0, 0, 1, 1], [], []>} : vector<16x16xf32>, vector<16x16xf32>, vector<16x16xf32> -> vector<16x16xf32>
    %434 = arith.addf %421, %433 : vector<16x16xf32>
    %c-3_i32 = arith.constant -3 : i32
    %435 = vector.broadcast %c-3_i32 : i32 to vector<1x16xi32>
    %436 = arith.addi %401, %435 : vector<1x16xi32>
    %437 = vector.broadcast %400 : vector<16x1xi32> to vector<16x16xi32>
    %438 = vector.broadcast %436 : vector<1x16xi32> to vector<16x16xi32>
    %439 = arith.cmpi eq, %437, %438 : vector<16x16xi32>
    %c3_i32_196 = arith.constant 3 : i32
    %440 = vector.broadcast %c3_i32_196 : i32 to vector<1x16xi32>
    %441 = arith.cmpi slt, %403, %440 : vector<1x16xi32>
    %442 = vector.broadcast %441 : vector<1x16xi1> to vector<16x16xi1>
    %443 = arith.andi %439, %442 : vector<16x16xi1>
    %cst_197 = arith.constant 1.000000e+00 : f32
    %cst_198 = arith.constant 0.000000e+00 : f32
    %444 = vector.broadcast %cst_197 : f32 to vector<16x16xf32>
    %445 = vector.broadcast %cst_198 : f32 to vector<16x16xf32>
    %446 = arith.select %443, %444, %445 : vector<16x16xi1>, vector<16x16xf32>
    %c2_199 = arith.constant 2 : index
    %c0_200 = arith.constant 0 : index
    %c0_201 = arith.constant 0 : index
    %447 = vector.load %arg6[%c2_199, %c0_200, %c0_201] : memref<9x16x16xf32, #tpu.memory_space<vmem>>, vector<1x16x16xf32>
    %448 = vector.shape_cast %447 : vector<1x16x16xf32> to vector<16x16xf32>
    %cst_202 = arith.constant dense<0.000000e+00> : vector<16x16xf32>
    %449 = tpu.matmul %448, %399, %cst_202 {dimension_numbers = #tpu.dot_dimension_numbers<[1], [0], [0], [1], [0, 0, 1, 1], [], []>} : vector<16x16xf32>, vector<16x16xf32>, vector<16x16xf32> -> vector<16x16xf32>
    %cst_203 = arith.constant dense<0.000000e+00> : vector<16x16xf32>
    %450 = tpu.matmul %449, %446, %cst_203 {dimension_numbers = #tpu.dot_dimension_numbers<[1], [0], [0], [1], [0, 0, 1, 1], [], []>} : vector<16x16xf32>, vector<16x16xf32>, vector<16x16xf32> -> vector<16x16xf32>
    %451 = arith.addf %434, %450 : vector<16x16xf32>
    %c-1_i32_204 = arith.constant -1 : i32
    %452 = vector.broadcast %c-1_i32_204 : i32 to vector<1x16xi32>
    %453 = arith.addi %401, %452 : vector<1x16xi32>
    %454 = vector.broadcast %400 : vector<16x1xi32> to vector<16x16xi32>
    %455 = vector.broadcast %453 : vector<1x16xi32> to vector<16x16xi32>
    %456 = arith.cmpi eq, %454, %455 : vector<16x16xi32>
    %c1_i32_205 = arith.constant 1 : i32
    %457 = vector.broadcast %c1_i32_205 : i32 to vector<1x16xi32>
    %458 = arith.cmpi sge, %403, %457 : vector<1x16xi32>
    %459 = vector.broadcast %458 : vector<1x16xi1> to vector<16x16xi1>
    %460 = arith.andi %456, %459 : vector<16x16xi1>
    %cst_206 = arith.constant 1.000000e+00 : f32
    %cst_207 = arith.constant 0.000000e+00 : f32
    %461 = vector.broadcast %cst_206 : f32 to vector<16x16xf32>
    %462 = vector.broadcast %cst_207 : f32 to vector<16x16xf32>
    %463 = arith.select %460, %461, %462 : vector<16x16xi1>, vector<16x16xf32>
    %c3_208 = arith.constant 3 : index
    %c0_209 = arith.constant 0 : index
    %c0_210 = arith.constant 0 : index
    %464 = vector.load %arg6[%c3_208, %c0_209, %c0_210] : memref<9x16x16xf32, #tpu.memory_space<vmem>>, vector<1x16x16xf32>
    %465 = vector.shape_cast %464 : vector<1x16x16xf32> to vector<16x16xf32>
    %cst_211 = arith.constant dense<0.000000e+00> : vector<16x16xf32>
    %466 = tpu.matmul %465, %399, %cst_211 {dimension_numbers = #tpu.dot_dimension_numbers<[1], [0], [0], [1], [0, 0, 1, 1], [], []>} : vector<16x16xf32>, vector<16x16xf32>, vector<16x16xf32> -> vector<16x16xf32>
    %cst_212 = arith.constant dense<0.000000e+00> : vector<16x16xf32>
    %467 = tpu.matmul %466, %463, %cst_212 {dimension_numbers = #tpu.dot_dimension_numbers<[1], [0], [0], [1], [0, 0, 1, 1], [], []>} : vector<16x16xf32>, vector<16x16xf32>, vector<16x16xf32> -> vector<16x16xf32>
    %468 = arith.addf %451, %467 : vector<16x16xf32>
    %c0_i32_213 = arith.constant 0 : i32
    %469 = vector.broadcast %c0_i32_213 : i32 to vector<1x16xi32>
    %470 = arith.addi %401, %469 : vector<1x16xi32>
    %471 = vector.broadcast %400 : vector<16x1xi32> to vector<16x16xi32>
    %472 = vector.broadcast %470 : vector<1x16xi32> to vector<16x16xi32>
    %473 = arith.cmpi eq, %471, %472 : vector<16x16xi32>
    %cst_214 = arith.constant 1.000000e+00 : f32
    %cst_215 = arith.constant 0.000000e+00 : f32
    %474 = vector.broadcast %cst_214 : f32 to vector<16x16xf32>
    %475 = vector.broadcast %cst_215 : f32 to vector<16x16xf32>
    %476 = arith.select %473, %474, %475 : vector<16x16xi1>, vector<16x16xf32>
    %c4_216 = arith.constant 4 : index
    %c0_217 = arith.constant 0 : index
    %c0_218 = arith.constant 0 : index
    %477 = vector.load %arg6[%c4_216, %c0_217, %c0_218] : memref<9x16x16xf32, #tpu.memory_space<vmem>>, vector<1x16x16xf32>
    %478 = vector.shape_cast %477 : vector<1x16x16xf32> to vector<16x16xf32>
    %cst_219 = arith.constant dense<0.000000e+00> : vector<16x16xf32>
    %479 = tpu.matmul %478, %399, %cst_219 {dimension_numbers = #tpu.dot_dimension_numbers<[1], [0], [0], [1], [0, 0, 1, 1], [], []>} : vector<16x16xf32>, vector<16x16xf32>, vector<16x16xf32> -> vector<16x16xf32>
    %cst_220 = arith.constant dense<0.000000e+00> : vector<16x16xf32>
    %480 = tpu.matmul %479, %476, %cst_220 {dimension_numbers = #tpu.dot_dimension_numbers<[1], [0], [0], [1], [0, 0, 1, 1], [], []>} : vector<16x16xf32>, vector<16x16xf32>, vector<16x16xf32> -> vector<16x16xf32>
    %481 = arith.addf %468, %480 : vector<16x16xf32>
    %c1_i32_221 = arith.constant 1 : i32
    %482 = vector.broadcast %c1_i32_221 : i32 to vector<1x16xi32>
    %483 = arith.addi %401, %482 : vector<1x16xi32>
    %484 = vector.broadcast %400 : vector<16x1xi32> to vector<16x16xi32>
    %485 = vector.broadcast %483 : vector<1x16xi32> to vector<16x16xi32>
    %486 = arith.cmpi eq, %484, %485 : vector<16x16xi32>
    %c3_i32_222 = arith.constant 3 : i32
    %487 = vector.broadcast %c3_i32_222 : i32 to vector<1x16xi32>
    %488 = arith.cmpi slt, %403, %487 : vector<1x16xi32>
    %489 = vector.broadcast %488 : vector<1x16xi1> to vector<16x16xi1>
    %490 = arith.andi %486, %489 : vector<16x16xi1>
    %cst_223 = arith.constant 1.000000e+00 : f32
    %cst_224 = arith.constant 0.000000e+00 : f32
    %491 = vector.broadcast %cst_223 : f32 to vector<16x16xf32>
    %492 = vector.broadcast %cst_224 : f32 to vector<16x16xf32>
    %493 = arith.select %490, %491, %492 : vector<16x16xi1>, vector<16x16xf32>
    %c5_225 = arith.constant 5 : index
    %c0_226 = arith.constant 0 : index
    %c0_227 = arith.constant 0 : index
    %494 = vector.load %arg6[%c5_225, %c0_226, %c0_227] : memref<9x16x16xf32, #tpu.memory_space<vmem>>, vector<1x16x16xf32>
    %495 = vector.shape_cast %494 : vector<1x16x16xf32> to vector<16x16xf32>
    %cst_228 = arith.constant dense<0.000000e+00> : vector<16x16xf32>
    %496 = tpu.matmul %495, %399, %cst_228 {dimension_numbers = #tpu.dot_dimension_numbers<[1], [0], [0], [1], [0, 0, 1, 1], [], []>} : vector<16x16xf32>, vector<16x16xf32>, vector<16x16xf32> -> vector<16x16xf32>
    %cst_229 = arith.constant dense<0.000000e+00> : vector<16x16xf32>
    %497 = tpu.matmul %496, %493, %cst_229 {dimension_numbers = #tpu.dot_dimension_numbers<[1], [0], [0], [1], [0, 0, 1, 1], [], []>} : vector<16x16xf32>, vector<16x16xf32>, vector<16x16xf32> -> vector<16x16xf32>
    %498 = arith.addf %481, %497 : vector<16x16xf32>
    %c3_i32_230 = arith.constant 3 : i32
    %499 = vector.broadcast %c3_i32_230 : i32 to vector<1x16xi32>
    %500 = arith.addi %401, %499 : vector<1x16xi32>
    %501 = vector.broadcast %400 : vector<16x1xi32> to vector<16x16xi32>
    %502 = vector.broadcast %500 : vector<1x16xi32> to vector<16x16xi32>
    %503 = arith.cmpi eq, %501, %502 : vector<16x16xi32>
    %c1_i32_231 = arith.constant 1 : i32
    %504 = vector.broadcast %c1_i32_231 : i32 to vector<1x16xi32>
    %505 = arith.cmpi sge, %403, %504 : vector<1x16xi32>
    %506 = vector.broadcast %505 : vector<1x16xi1> to vector<16x16xi1>
    %507 = arith.andi %503, %506 : vector<16x16xi1>
    %cst_232 = arith.constant 1.000000e+00 : f32
    %cst_233 = arith.constant 0.000000e+00 : f32
    %508 = vector.broadcast %cst_232 : f32 to vector<16x16xf32>
    %509 = vector.broadcast %cst_233 : f32 to vector<16x16xf32>
    %510 = arith.select %507, %508, %509 : vector<16x16xi1>, vector<16x16xf32>
    %c6_234 = arith.constant 6 : index
    %c0_235 = arith.constant 0 : index
    %c0_236 = arith.constant 0 : index
    %511 = vector.load %arg6[%c6_234, %c0_235, %c0_236] : memref<9x16x16xf32, #tpu.memory_space<vmem>>, vector<1x16x16xf32>
    %512 = vector.shape_cast %511 : vector<1x16x16xf32> to vector<16x16xf32>
    %cst_237 = arith.constant dense<0.000000e+00> : vector<16x16xf32>
    %513 = tpu.matmul %512, %399, %cst_237 {dimension_numbers = #tpu.dot_dimension_numbers<[1], [0], [0], [1], [0, 0, 1, 1], [], []>} : vector<16x16xf32>, vector<16x16xf32>, vector<16x16xf32> -> vector<16x16xf32>
    %cst_238 = arith.constant dense<0.000000e+00> : vector<16x16xf32>
    %514 = tpu.matmul %513, %510, %cst_238 {dimension_numbers = #tpu.dot_dimension_numbers<[1], [0], [0], [1], [0, 0, 1, 1], [], []>} : vector<16x16xf32>, vector<16x16xf32>, vector<16x16xf32> -> vector<16x16xf32>
    %515 = arith.addf %498, %514 : vector<16x16xf32>
    %c4_i32 = arith.constant 4 : i32
    %516 = vector.broadcast %c4_i32 : i32 to vector<1x16xi32>
    %517 = arith.addi %401, %516 : vector<1x16xi32>
    %518 = vector.broadcast %400 : vector<16x1xi32> to vector<16x16xi32>
    %519 = vector.broadcast %517 : vector<1x16xi32> to vector<16x16xi32>
    %520 = arith.cmpi eq, %518, %519 : vector<16x16xi32>
    %cst_239 = arith.constant 1.000000e+00 : f32
    %cst_240 = arith.constant 0.000000e+00 : f32
    %521 = vector.broadcast %cst_239 : f32 to vector<16x16xf32>
    %522 = vector.broadcast %cst_240 : f32 to vector<16x16xf32>
    %523 = arith.select %520, %521, %522 : vector<16x16xi1>, vector<16x16xf32>
    %c7_241 = arith.constant 7 : index
    %c0_242 = arith.constant 0 : index
    %c0_243 = arith.constant 0 : index
    %524 = vector.load %arg6[%c7_241, %c0_242, %c0_243] : memref<9x16x16xf32, #tpu.memory_space<vmem>>, vector<1x16x16xf32>
    %525 = vector.shape_cast %524 : vector<1x16x16xf32> to vector<16x16xf32>
    %cst_244 = arith.constant dense<0.000000e+00> : vector<16x16xf32>
    %526 = tpu.matmul %525, %399, %cst_244 {dimension_numbers = #tpu.dot_dimension_numbers<[1], [0], [0], [1], [0, 0, 1, 1], [], []>} : vector<16x16xf32>, vector<16x16xf32>, vector<16x16xf32> -> vector<16x16xf32>
    %cst_245 = arith.constant dense<0.000000e+00> : vector<16x16xf32>
    %527 = tpu.matmul %526, %523, %cst_245 {dimension_numbers = #tpu.dot_dimension_numbers<[1], [0], [0], [1], [0, 0, 1, 1], [], []>} : vector<16x16xf32>, vector<16x16xf32>, vector<16x16xf32> -> vector<16x16xf32>
    %528 = arith.addf %515, %527 : vector<16x16xf32>
    %c5_i32 = arith.constant 5 : i32
    %529 = vector.broadcast %c5_i32 : i32 to vector<1x16xi32>
    %530 = arith.addi %401, %529 : vector<1x16xi32>
    %531 = vector.broadcast %400 : vector<16x1xi32> to vector<16x16xi32>
    %532 = vector.broadcast %530 : vector<1x16xi32> to vector<16x16xi32>
    %533 = arith.cmpi eq, %531, %532 : vector<16x16xi32>
    %c3_i32_246 = arith.constant 3 : i32
    %534 = vector.broadcast %c3_i32_246 : i32 to vector<1x16xi32>
    %535 = arith.cmpi slt, %403, %534 : vector<1x16xi32>
    %536 = vector.broadcast %535 : vector<1x16xi1> to vector<16x16xi1>
    %537 = arith.andi %533, %536 : vector<16x16xi1>
    %cst_247 = arith.constant 1.000000e+00 : f32
    %cst_248 = arith.constant 0.000000e+00 : f32
    %538 = vector.broadcast %cst_247 : f32 to vector<16x16xf32>
    %539 = vector.broadcast %cst_248 : f32 to vector<16x16xf32>
    %540 = arith.select %537, %538, %539 : vector<16x16xi1>, vector<16x16xf32>
    %c8_249 = arith.constant 8 : index
    %c0_250 = arith.constant 0 : index
    %c0_251 = arith.constant 0 : index
    %541 = vector.load %arg6[%c8_249, %c0_250, %c0_251] : memref<9x16x16xf32, #tpu.memory_space<vmem>>, vector<1x16x16xf32>
    %542 = vector.shape_cast %541 : vector<1x16x16xf32> to vector<16x16xf32>
    %cst_252 = arith.constant dense<0.000000e+00> : vector<16x16xf32>
    %543 = tpu.matmul %542, %399, %cst_252 {dimension_numbers = #tpu.dot_dimension_numbers<[1], [0], [0], [1], [0, 0, 1, 1], [], []>} : vector<16x16xf32>, vector<16x16xf32>, vector<16x16xf32> -> vector<16x16xf32>
    %cst_253 = arith.constant dense<0.000000e+00> : vector<16x16xf32>
    %544 = tpu.matmul %543, %540, %cst_253 {dimension_numbers = #tpu.dot_dimension_numbers<[1], [0], [0], [1], [0, 0, 1, 1], [], []>} : vector<16x16xf32>, vector<16x16xf32>, vector<16x16xf32> -> vector<16x16xf32>
    %545 = arith.addf %528, %544 : vector<16x16xf32>
    %c0_254 = arith.constant 0 : index
    %c0_255 = arith.constant 0 : index
    %546 = vector.load %arg7[%c0_254, %c0_255] : memref<16x1xf32, #tpu.memory_space<vmem>>, vector<16x1xf32>
    %547 = vector.broadcast %546 : vector<16x1xf32> to vector<16x16xf32>
    %548 = arith.addf %545, %547 : vector<16x16xf32>
    %549 = tpu.iota {dimensions = array<i32: 0>} : vector<16x1xi32>
    %550 = tpu.iota {dimensions = array<i32: 1>} : vector<1x64xi32>
    %c3_i32_256 = arith.constant 3 : i32
    %551 = vector.broadcast %c3_i32_256 : i32 to vector<1x64xi32>
    %552 = arith.shrsi %550, %551 : vector<1x64xi32>
    %c7_i32_257 = arith.constant 7 : i32
    %553 = vector.broadcast %c7_i32_257 : i32 to vector<1x64xi32>
    %554 = arith.andi %550, %553 : vector<1x64xi32>
    %c1_i32_258 = arith.constant 1 : i32
    %555 = vector.broadcast %c1_i32_258 : i32 to vector<1x64xi32>
    %556 = arith.shrsi %552, %555 : vector<1x64xi32>
    %c4_i32_259 = arith.constant 4 : i32
    %557 = vector.broadcast %c4_i32_259 : i32 to vector<1x64xi32>
    %558 = arith.muli %556, %557 : vector<1x64xi32>
    %c1_i32_260 = arith.constant 1 : i32
    %559 = vector.broadcast %c1_i32_260 : i32 to vector<1x64xi32>
    %560 = arith.shrsi %554, %559 : vector<1x64xi32>
    %561 = arith.addi %558, %560 : vector<1x64xi32>
    %562 = vector.broadcast %549 : vector<16x1xi32> to vector<16x64xi32>
    %563 = vector.broadcast %561 : vector<1x64xi32> to vector<16x64xi32>
    %564 = arith.cmpi eq, %562, %563 : vector<16x64xi32>
    %cst_261 = arith.constant 1.000000e+00 : f32
    %cst_262 = arith.constant 0.000000e+00 : f32
    %565 = vector.broadcast %cst_261 : f32 to vector<16x64xf32>
    %566 = vector.broadcast %cst_262 : f32 to vector<16x64xf32>
    %567 = arith.select %564, %565, %566 : vector<16x64xi1>, vector<16x64xf32>
    %cst_263 = arith.constant dense<0.000000e+00> : vector<16x64xf32>
    %568 = tpu.matmul %548, %567, %cst_263 {dimension_numbers = #tpu.dot_dimension_numbers<[1], [0], [0], [1], [0, 0, 1, 1], [], []>} : vector<16x16xf32>, vector<16x64xf32>, vector<16x64xf32> -> vector<16x64xf32>
    %569 = arith.addf %349, %568 : vector<16x64xf32>
    %570 = tpu.iota {dimensions = array<i32: 0>} : vector<64x1xi32>
    %571 = tpu.iota {dimensions = array<i32: 1>} : vector<1x64xi32>
    %c7_i32_264 = arith.constant 7 : i32
    %572 = vector.broadcast %c7_i32_264 : i32 to vector<1x64xi32>
    %573 = arith.andi %571, %572 : vector<1x64xi32>
    %cst_265 = arith.constant 0.000000e+00 : f32
    %574 = vector.broadcast %cst_265 : f32 to vector<8x64xf32>
    %c-9_i32_266 = arith.constant -9 : i32
    %575 = vector.broadcast %c-9_i32_266 : i32 to vector<1x64xi32>
    %576 = arith.addi %571, %575 : vector<1x64xi32>
    %577 = vector.broadcast %570 : vector<64x1xi32> to vector<64x64xi32>
    %578 = vector.broadcast %576 : vector<1x64xi32> to vector<64x64xi32>
    %579 = arith.cmpi eq, %577, %578 : vector<64x64xi32>
    %c1_i32_267 = arith.constant 1 : i32
    %580 = vector.broadcast %c1_i32_267 : i32 to vector<1x64xi32>
    %581 = arith.cmpi sge, %573, %580 : vector<1x64xi32>
    %582 = vector.broadcast %581 : vector<1x64xi1> to vector<64x64xi1>
    %583 = arith.andi %579, %582 : vector<64x64xi1>
    %cst_268 = arith.constant 1.000000e+00 : f32
    %cst_269 = arith.constant 0.000000e+00 : f32
    %584 = vector.broadcast %cst_268 : f32 to vector<64x64xf32>
    %585 = vector.broadcast %cst_269 : f32 to vector<64x64xf32>
    %586 = arith.select %583, %584, %585 : vector<64x64xi1>, vector<64x64xf32>
    %c0_270 = arith.constant 0 : index
    %c0_271 = arith.constant 0 : index
    %c0_272 = arith.constant 0 : index
    %587 = vector.load %arg8[%c0_270, %c0_271, %c0_272] : memref<9x8x16xf32, #tpu.memory_space<vmem>>, vector<1x8x16xf32>
    %588 = vector.shape_cast %587 : vector<1x8x16xf32> to vector<8x16xf32>
    %cst_273 = arith.constant dense<0.000000e+00> : vector<8x64xf32>
    %589 = tpu.matmul %588, %569, %cst_273 {dimension_numbers = #tpu.dot_dimension_numbers<[1], [0], [0], [1], [0, 0, 1, 1], [], []>} : vector<8x16xf32>, vector<16x64xf32>, vector<8x64xf32> -> vector<8x64xf32>
    %cst_274 = arith.constant dense<0.000000e+00> : vector<8x64xf32>
    %590 = tpu.matmul %589, %586, %cst_274 {dimension_numbers = #tpu.dot_dimension_numbers<[1], [0], [0], [1], [0, 0, 1, 1], [], []>} : vector<8x64xf32>, vector<64x64xf32>, vector<8x64xf32> -> vector<8x64xf32>
    %591 = arith.addf %574, %590 : vector<8x64xf32>
    %c-8_i32_275 = arith.constant -8 : i32
    %592 = vector.broadcast %c-8_i32_275 : i32 to vector<1x64xi32>
    %593 = arith.addi %571, %592 : vector<1x64xi32>
    %594 = vector.broadcast %570 : vector<64x1xi32> to vector<64x64xi32>
    %595 = vector.broadcast %593 : vector<1x64xi32> to vector<64x64xi32>
    %596 = arith.cmpi eq, %594, %595 : vector<64x64xi32>
    %cst_276 = arith.constant 1.000000e+00 : f32
    %cst_277 = arith.constant 0.000000e+00 : f32
    %597 = vector.broadcast %cst_276 : f32 to vector<64x64xf32>
    %598 = vector.broadcast %cst_277 : f32 to vector<64x64xf32>
    %599 = arith.select %596, %597, %598 : vector<64x64xi1>, vector<64x64xf32>
    %c1_278 = arith.constant 1 : index
    %c0_279 = arith.constant 0 : index
    %c0_280 = arith.constant 0 : index
    %600 = vector.load %arg8[%c1_278, %c0_279, %c0_280] : memref<9x8x16xf32, #tpu.memory_space<vmem>>, vector<1x8x16xf32>
    %601 = vector.shape_cast %600 : vector<1x8x16xf32> to vector<8x16xf32>
    %cst_281 = arith.constant dense<0.000000e+00> : vector<8x64xf32>
    %602 = tpu.matmul %601, %569, %cst_281 {dimension_numbers = #tpu.dot_dimension_numbers<[1], [0], [0], [1], [0, 0, 1, 1], [], []>} : vector<8x16xf32>, vector<16x64xf32>, vector<8x64xf32> -> vector<8x64xf32>
    %cst_282 = arith.constant dense<0.000000e+00> : vector<8x64xf32>
    %603 = tpu.matmul %602, %599, %cst_282 {dimension_numbers = #tpu.dot_dimension_numbers<[1], [0], [0], [1], [0, 0, 1, 1], [], []>} : vector<8x64xf32>, vector<64x64xf32>, vector<8x64xf32> -> vector<8x64xf32>
    %604 = arith.addf %591, %603 : vector<8x64xf32>
    %c-7_i32_283 = arith.constant -7 : i32
    %605 = vector.broadcast %c-7_i32_283 : i32 to vector<1x64xi32>
    %606 = arith.addi %571, %605 : vector<1x64xi32>
    %607 = vector.broadcast %570 : vector<64x1xi32> to vector<64x64xi32>
    %608 = vector.broadcast %606 : vector<1x64xi32> to vector<64x64xi32>
    %609 = arith.cmpi eq, %607, %608 : vector<64x64xi32>
    %c7_i32_284 = arith.constant 7 : i32
    %610 = vector.broadcast %c7_i32_284 : i32 to vector<1x64xi32>
    %611 = arith.cmpi slt, %573, %610 : vector<1x64xi32>
    %612 = vector.broadcast %611 : vector<1x64xi1> to vector<64x64xi1>
    %613 = arith.andi %609, %612 : vector<64x64xi1>
    %cst_285 = arith.constant 1.000000e+00 : f32
    %cst_286 = arith.constant 0.000000e+00 : f32
    %614 = vector.broadcast %cst_285 : f32 to vector<64x64xf32>
    %615 = vector.broadcast %cst_286 : f32 to vector<64x64xf32>
    %616 = arith.select %613, %614, %615 : vector<64x64xi1>, vector<64x64xf32>
    %c2_287 = arith.constant 2 : index
    %c0_288 = arith.constant 0 : index
    %c0_289 = arith.constant 0 : index
    %617 = vector.load %arg8[%c2_287, %c0_288, %c0_289] : memref<9x8x16xf32, #tpu.memory_space<vmem>>, vector<1x8x16xf32>
    %618 = vector.shape_cast %617 : vector<1x8x16xf32> to vector<8x16xf32>
    %cst_290 = arith.constant dense<0.000000e+00> : vector<8x64xf32>
    %619 = tpu.matmul %618, %569, %cst_290 {dimension_numbers = #tpu.dot_dimension_numbers<[1], [0], [0], [1], [0, 0, 1, 1], [], []>} : vector<8x16xf32>, vector<16x64xf32>, vector<8x64xf32> -> vector<8x64xf32>
    %cst_291 = arith.constant dense<0.000000e+00> : vector<8x64xf32>
    %620 = tpu.matmul %619, %616, %cst_291 {dimension_numbers = #tpu.dot_dimension_numbers<[1], [0], [0], [1], [0, 0, 1, 1], [], []>} : vector<8x64xf32>, vector<64x64xf32>, vector<8x64xf32> -> vector<8x64xf32>
    %621 = arith.addf %604, %620 : vector<8x64xf32>
    %c-1_i32_292 = arith.constant -1 : i32
    %622 = vector.broadcast %c-1_i32_292 : i32 to vector<1x64xi32>
    %623 = arith.addi %571, %622 : vector<1x64xi32>
    %624 = vector.broadcast %570 : vector<64x1xi32> to vector<64x64xi32>
    %625 = vector.broadcast %623 : vector<1x64xi32> to vector<64x64xi32>
    %626 = arith.cmpi eq, %624, %625 : vector<64x64xi32>
    %c1_i32_293 = arith.constant 1 : i32
    %627 = vector.broadcast %c1_i32_293 : i32 to vector<1x64xi32>
    %628 = arith.cmpi sge, %573, %627 : vector<1x64xi32>
    %629 = vector.broadcast %628 : vector<1x64xi1> to vector<64x64xi1>
    %630 = arith.andi %626, %629 : vector<64x64xi1>
    %cst_294 = arith.constant 1.000000e+00 : f32
    %cst_295 = arith.constant 0.000000e+00 : f32
    %631 = vector.broadcast %cst_294 : f32 to vector<64x64xf32>
    %632 = vector.broadcast %cst_295 : f32 to vector<64x64xf32>
    %633 = arith.select %630, %631, %632 : vector<64x64xi1>, vector<64x64xf32>
    %c3_296 = arith.constant 3 : index
    %c0_297 = arith.constant 0 : index
    %c0_298 = arith.constant 0 : index
    %634 = vector.load %arg8[%c3_296, %c0_297, %c0_298] : memref<9x8x16xf32, #tpu.memory_space<vmem>>, vector<1x8x16xf32>
    %635 = vector.shape_cast %634 : vector<1x8x16xf32> to vector<8x16xf32>
    %cst_299 = arith.constant dense<0.000000e+00> : vector<8x64xf32>
    %636 = tpu.matmul %635, %569, %cst_299 {dimension_numbers = #tpu.dot_dimension_numbers<[1], [0], [0], [1], [0, 0, 1, 1], [], []>} : vector<8x16xf32>, vector<16x64xf32>, vector<8x64xf32> -> vector<8x64xf32>
    %cst_300 = arith.constant dense<0.000000e+00> : vector<8x64xf32>
    %637 = tpu.matmul %636, %633, %cst_300 {dimension_numbers = #tpu.dot_dimension_numbers<[1], [0], [0], [1], [0, 0, 1, 1], [], []>} : vector<8x64xf32>, vector<64x64xf32>, vector<8x64xf32> -> vector<8x64xf32>
    %638 = arith.addf %621, %637 : vector<8x64xf32>
    %c0_i32_301 = arith.constant 0 : i32
    %639 = vector.broadcast %c0_i32_301 : i32 to vector<1x64xi32>
    %640 = arith.addi %571, %639 : vector<1x64xi32>
    %641 = vector.broadcast %570 : vector<64x1xi32> to vector<64x64xi32>
    %642 = vector.broadcast %640 : vector<1x64xi32> to vector<64x64xi32>
    %643 = arith.cmpi eq, %641, %642 : vector<64x64xi32>
    %cst_302 = arith.constant 1.000000e+00 : f32
    %cst_303 = arith.constant 0.000000e+00 : f32
    %644 = vector.broadcast %cst_302 : f32 to vector<64x64xf32>
    %645 = vector.broadcast %cst_303 : f32 to vector<64x64xf32>
    %646 = arith.select %643, %644, %645 : vector<64x64xi1>, vector<64x64xf32>
    %c4_304 = arith.constant 4 : index
    %c0_305 = arith.constant 0 : index
    %c0_306 = arith.constant 0 : index
    %647 = vector.load %arg8[%c4_304, %c0_305, %c0_306] : memref<9x8x16xf32, #tpu.memory_space<vmem>>, vector<1x8x16xf32>
    %648 = vector.shape_cast %647 : vector<1x8x16xf32> to vector<8x16xf32>
    %cst_307 = arith.constant dense<0.000000e+00> : vector<8x64xf32>
    %649 = tpu.matmul %648, %569, %cst_307 {dimension_numbers = #tpu.dot_dimension_numbers<[1], [0], [0], [1], [0, 0, 1, 1], [], []>} : vector<8x16xf32>, vector<16x64xf32>, vector<8x64xf32> -> vector<8x64xf32>
    %cst_308 = arith.constant dense<0.000000e+00> : vector<8x64xf32>
    %650 = tpu.matmul %649, %646, %cst_308 {dimension_numbers = #tpu.dot_dimension_numbers<[1], [0], [0], [1], [0, 0, 1, 1], [], []>} : vector<8x64xf32>, vector<64x64xf32>, vector<8x64xf32> -> vector<8x64xf32>
    %651 = arith.addf %638, %650 : vector<8x64xf32>
    %c1_i32_309 = arith.constant 1 : i32
    %652 = vector.broadcast %c1_i32_309 : i32 to vector<1x64xi32>
    %653 = arith.addi %571, %652 : vector<1x64xi32>
    %654 = vector.broadcast %570 : vector<64x1xi32> to vector<64x64xi32>
    %655 = vector.broadcast %653 : vector<1x64xi32> to vector<64x64xi32>
    %656 = arith.cmpi eq, %654, %655 : vector<64x64xi32>
    %c7_i32_310 = arith.constant 7 : i32
    %657 = vector.broadcast %c7_i32_310 : i32 to vector<1x64xi32>
    %658 = arith.cmpi slt, %573, %657 : vector<1x64xi32>
    %659 = vector.broadcast %658 : vector<1x64xi1> to vector<64x64xi1>
    %660 = arith.andi %656, %659 : vector<64x64xi1>
    %cst_311 = arith.constant 1.000000e+00 : f32
    %cst_312 = arith.constant 0.000000e+00 : f32
    %661 = vector.broadcast %cst_311 : f32 to vector<64x64xf32>
    %662 = vector.broadcast %cst_312 : f32 to vector<64x64xf32>
    %663 = arith.select %660, %661, %662 : vector<64x64xi1>, vector<64x64xf32>
    %c5_313 = arith.constant 5 : index
    %c0_314 = arith.constant 0 : index
    %c0_315 = arith.constant 0 : index
    %664 = vector.load %arg8[%c5_313, %c0_314, %c0_315] : memref<9x8x16xf32, #tpu.memory_space<vmem>>, vector<1x8x16xf32>
    %665 = vector.shape_cast %664 : vector<1x8x16xf32> to vector<8x16xf32>
    %cst_316 = arith.constant dense<0.000000e+00> : vector<8x64xf32>
    %666 = tpu.matmul %665, %569, %cst_316 {dimension_numbers = #tpu.dot_dimension_numbers<[1], [0], [0], [1], [0, 0, 1, 1], [], []>} : vector<8x16xf32>, vector<16x64xf32>, vector<8x64xf32> -> vector<8x64xf32>
    %cst_317 = arith.constant dense<0.000000e+00> : vector<8x64xf32>
    %667 = tpu.matmul %666, %663, %cst_317 {dimension_numbers = #tpu.dot_dimension_numbers<[1], [0], [0], [1], [0, 0, 1, 1], [], []>} : vector<8x64xf32>, vector<64x64xf32>, vector<8x64xf32> -> vector<8x64xf32>
    %668 = arith.addf %651, %667 : vector<8x64xf32>
    %c7_i32_318 = arith.constant 7 : i32
    %669 = vector.broadcast %c7_i32_318 : i32 to vector<1x64xi32>
    %670 = arith.addi %571, %669 : vector<1x64xi32>
    %671 = vector.broadcast %570 : vector<64x1xi32> to vector<64x64xi32>
    %672 = vector.broadcast %670 : vector<1x64xi32> to vector<64x64xi32>
    %673 = arith.cmpi eq, %671, %672 : vector<64x64xi32>
    %c1_i32_319 = arith.constant 1 : i32
    %674 = vector.broadcast %c1_i32_319 : i32 to vector<1x64xi32>
    %675 = arith.cmpi sge, %573, %674 : vector<1x64xi32>
    %676 = vector.broadcast %675 : vector<1x64xi1> to vector<64x64xi1>
    %677 = arith.andi %673, %676 : vector<64x64xi1>
    %cst_320 = arith.constant 1.000000e+00 : f32
    %cst_321 = arith.constant 0.000000e+00 : f32
    %678 = vector.broadcast %cst_320 : f32 to vector<64x64xf32>
    %679 = vector.broadcast %cst_321 : f32 to vector<64x64xf32>
    %680 = arith.select %677, %678, %679 : vector<64x64xi1>, vector<64x64xf32>
    %c6_322 = arith.constant 6 : index
    %c0_323 = arith.constant 0 : index
    %c0_324 = arith.constant 0 : index
    %681 = vector.load %arg8[%c6_322, %c0_323, %c0_324] : memref<9x8x16xf32, #tpu.memory_space<vmem>>, vector<1x8x16xf32>
    %682 = vector.shape_cast %681 : vector<1x8x16xf32> to vector<8x16xf32>
    %cst_325 = arith.constant dense<0.000000e+00> : vector<8x64xf32>
    %683 = tpu.matmul %682, %569, %cst_325 {dimension_numbers = #tpu.dot_dimension_numbers<[1], [0], [0], [1], [0, 0, 1, 1], [], []>} : vector<8x16xf32>, vector<16x64xf32>, vector<8x64xf32> -> vector<8x64xf32>
    %cst_326 = arith.constant dense<0.000000e+00> : vector<8x64xf32>
    %684 = tpu.matmul %683, %680, %cst_326 {dimension_numbers = #tpu.dot_dimension_numbers<[1], [0], [0], [1], [0, 0, 1, 1], [], []>} : vector<8x64xf32>, vector<64x64xf32>, vector<8x64xf32> -> vector<8x64xf32>
    %685 = arith.addf %668, %684 : vector<8x64xf32>
    %c8_i32_327 = arith.constant 8 : i32
    %686 = vector.broadcast %c8_i32_327 : i32 to vector<1x64xi32>
    %687 = arith.addi %571, %686 : vector<1x64xi32>
    %688 = vector.broadcast %570 : vector<64x1xi32> to vector<64x64xi32>
    %689 = vector.broadcast %687 : vector<1x64xi32> to vector<64x64xi32>
    %690 = arith.cmpi eq, %688, %689 : vector<64x64xi32>
    %cst_328 = arith.constant 1.000000e+00 : f32
    %cst_329 = arith.constant 0.000000e+00 : f32
    %691 = vector.broadcast %cst_328 : f32 to vector<64x64xf32>
    %692 = vector.broadcast %cst_329 : f32 to vector<64x64xf32>
    %693 = arith.select %690, %691, %692 : vector<64x64xi1>, vector<64x64xf32>
    %c7_330 = arith.constant 7 : index
    %c0_331 = arith.constant 0 : index
    %c0_332 = arith.constant 0 : index
    %694 = vector.load %arg8[%c7_330, %c0_331, %c0_332] : memref<9x8x16xf32, #tpu.memory_space<vmem>>, vector<1x8x16xf32>
    %695 = vector.shape_cast %694 : vector<1x8x16xf32> to vector<8x16xf32>
    %cst_333 = arith.constant dense<0.000000e+00> : vector<8x64xf32>
    %696 = tpu.matmul %695, %569, %cst_333 {dimension_numbers = #tpu.dot_dimension_numbers<[1], [0], [0], [1], [0, 0, 1, 1], [], []>} : vector<8x16xf32>, vector<16x64xf32>, vector<8x64xf32> -> vector<8x64xf32>
    %cst_334 = arith.constant dense<0.000000e+00> : vector<8x64xf32>
    %697 = tpu.matmul %696, %693, %cst_334 {dimension_numbers = #tpu.dot_dimension_numbers<[1], [0], [0], [1], [0, 0, 1, 1], [], []>} : vector<8x64xf32>, vector<64x64xf32>, vector<8x64xf32> -> vector<8x64xf32>
    %698 = arith.addf %685, %697 : vector<8x64xf32>
    %c9_i32_335 = arith.constant 9 : i32
    %699 = vector.broadcast %c9_i32_335 : i32 to vector<1x64xi32>
    %700 = arith.addi %571, %699 : vector<1x64xi32>
    %701 = vector.broadcast %570 : vector<64x1xi32> to vector<64x64xi32>
    %702 = vector.broadcast %700 : vector<1x64xi32> to vector<64x64xi32>
    %703 = arith.cmpi eq, %701, %702 : vector<64x64xi32>
    %c7_i32_336 = arith.constant 7 : i32
    %704 = vector.broadcast %c7_i32_336 : i32 to vector<1x64xi32>
    %705 = arith.cmpi slt, %573, %704 : vector<1x64xi32>
    %706 = vector.broadcast %705 : vector<1x64xi1> to vector<64x64xi1>
    %707 = arith.andi %703, %706 : vector<64x64xi1>
    %cst_337 = arith.constant 1.000000e+00 : f32
    %cst_338 = arith.constant 0.000000e+00 : f32
    %708 = vector.broadcast %cst_337 : f32 to vector<64x64xf32>
    %709 = vector.broadcast %cst_338 : f32 to vector<64x64xf32>
    %710 = arith.select %707, %708, %709 : vector<64x64xi1>, vector<64x64xf32>
    %c8_339 = arith.constant 8 : index
    %c0_340 = arith.constant 0 : index
    %c0_341 = arith.constant 0 : index
    %711 = vector.load %arg8[%c8_339, %c0_340, %c0_341] : memref<9x8x16xf32, #tpu.memory_space<vmem>>, vector<1x8x16xf32>
    %712 = vector.shape_cast %711 : vector<1x8x16xf32> to vector<8x16xf32>
    %cst_342 = arith.constant dense<0.000000e+00> : vector<8x64xf32>
    %713 = tpu.matmul %712, %569, %cst_342 {dimension_numbers = #tpu.dot_dimension_numbers<[1], [0], [0], [1], [0, 0, 1, 1], [], []>} : vector<8x16xf32>, vector<16x64xf32>, vector<8x64xf32> -> vector<8x64xf32>
    %cst_343 = arith.constant dense<0.000000e+00> : vector<8x64xf32>
    %714 = tpu.matmul %713, %710, %cst_343 {dimension_numbers = #tpu.dot_dimension_numbers<[1], [0], [0], [1], [0, 0, 1, 1], [], []>} : vector<8x64xf32>, vector<64x64xf32>, vector<8x64xf32> -> vector<8x64xf32>
    %715 = arith.addf %698, %714 : vector<8x64xf32>
    %c0_344 = arith.constant 0 : index
    %c0_345 = arith.constant 0 : index
    %716 = vector.load %arg9[%c0_344, %c0_345] : memref<8x1xf32, #tpu.memory_space<vmem>>, vector<8x1xf32>
    %717 = vector.broadcast %716 : vector<8x1xf32> to vector<8x64xf32>
    %718 = arith.addf %715, %717 : vector<8x64xf32>
    %719 = tpu.iota {dimensions = array<i32: 0>} : vector<64x1xi32>
    %720 = tpu.iota {dimensions = array<i32: 1>} : vector<1x256xi32>
    %c4_i32_346 = arith.constant 4 : i32
    %721 = vector.broadcast %c4_i32_346 : i32 to vector<1x256xi32>
    %722 = arith.shrsi %720, %721 : vector<1x256xi32>
    %c15_i32_347 = arith.constant 15 : i32
    %723 = vector.broadcast %c15_i32_347 : i32 to vector<1x256xi32>
    %724 = arith.andi %720, %723 : vector<1x256xi32>
    %c1_i32_348 = arith.constant 1 : i32
    %725 = vector.broadcast %c1_i32_348 : i32 to vector<1x256xi32>
    %726 = arith.shrsi %722, %725 : vector<1x256xi32>
    %c8_i32_349 = arith.constant 8 : i32
    %727 = vector.broadcast %c8_i32_349 : i32 to vector<1x256xi32>
    %728 = arith.muli %726, %727 : vector<1x256xi32>
    %c1_i32_350 = arith.constant 1 : i32
    %729 = vector.broadcast %c1_i32_350 : i32 to vector<1x256xi32>
    %730 = arith.shrsi %724, %729 : vector<1x256xi32>
    %731 = arith.addi %728, %730 : vector<1x256xi32>
    %732 = vector.broadcast %719 : vector<64x1xi32> to vector<64x256xi32>
    %733 = vector.broadcast %731 : vector<1x256xi32> to vector<64x256xi32>
    %734 = arith.cmpi eq, %732, %733 : vector<64x256xi32>
    %cst_351 = arith.constant 1.000000e+00 : f32
    %cst_352 = arith.constant 0.000000e+00 : f32
    %735 = vector.broadcast %cst_351 : f32 to vector<64x256xf32>
    %736 = vector.broadcast %cst_352 : f32 to vector<64x256xf32>
    %737 = arith.select %734, %735, %736 : vector<64x256xi1>, vector<64x256xf32>
    %cst_353 = arith.constant dense<0.000000e+00> : vector<8x256xf32>
    %738 = tpu.matmul %718, %737, %cst_353 {dimension_numbers = #tpu.dot_dimension_numbers<[1], [0], [0], [1], [0, 0, 1, 1], [], []>} : vector<8x64xf32>, vector<64x256xf32>, vector<8x256xf32> -> vector<8x256xf32>
    %739 = arith.addf %150, %738 : vector<8x256xf32>
    %740 = tpu.iota {dimensions = array<i32: 0>} : vector<256x1xi32>
    %741 = tpu.iota {dimensions = array<i32: 1>} : vector<1x256xi32>
    %c15_i32_354 = arith.constant 15 : i32
    %742 = vector.broadcast %c15_i32_354 : i32 to vector<1x256xi32>
    %743 = arith.andi %741, %742 : vector<1x256xi32>
    %cst_355 = arith.constant 0.000000e+00 : f32
    %744 = vector.broadcast %cst_355 : f32 to vector<8x256xf32>
    %c-17_i32_356 = arith.constant -17 : i32
    %745 = vector.broadcast %c-17_i32_356 : i32 to vector<1x256xi32>
    %746 = arith.addi %741, %745 : vector<1x256xi32>
    %747 = vector.broadcast %740 : vector<256x1xi32> to vector<256x256xi32>
    %748 = vector.broadcast %746 : vector<1x256xi32> to vector<256x256xi32>
    %749 = arith.cmpi eq, %747, %748 : vector<256x256xi32>
    %c1_i32_357 = arith.constant 1 : i32
    %750 = vector.broadcast %c1_i32_357 : i32 to vector<1x256xi32>
    %751 = arith.cmpi sge, %743, %750 : vector<1x256xi32>
    %752 = vector.broadcast %751 : vector<1x256xi1> to vector<256x256xi1>
    %753 = arith.andi %749, %752 : vector<256x256xi1>
    %cst_358 = arith.constant 1.000000e+00 : f32
    %cst_359 = arith.constant 0.000000e+00 : f32
    %754 = vector.broadcast %cst_358 : f32 to vector<256x256xf32>
    %755 = vector.broadcast %cst_359 : f32 to vector<256x256xf32>
    %756 = arith.select %753, %754, %755 : vector<256x256xi1>, vector<256x256xf32>
    %c0_360 = arith.constant 0 : index
    %c0_361 = arith.constant 0 : index
    %c0_362 = arith.constant 0 : index
    %757 = vector.load %arg10[%c0_360, %c0_361, %c0_362] : memref<9x8x8xf32, #tpu.memory_space<vmem>>, vector<1x8x8xf32>
    %758 = vector.shape_cast %757 : vector<1x8x8xf32> to vector<8x8xf32>
    %cst_363 = arith.constant dense<0.000000e+00> : vector<8x256xf32>
    %759 = tpu.matmul %758, %739, %cst_363 {dimension_numbers = #tpu.dot_dimension_numbers<[1], [0], [0], [1], [0, 0, 1, 1], [], []>} : vector<8x8xf32>, vector<8x256xf32>, vector<8x256xf32> -> vector<8x256xf32>
    %cst_364 = arith.constant dense<0.000000e+00> : vector<8x256xf32>
    %760 = tpu.matmul %759, %756, %cst_364 {dimension_numbers = #tpu.dot_dimension_numbers<[1], [0], [0], [1], [0, 0, 1, 1], [], []>} : vector<8x256xf32>, vector<256x256xf32>, vector<8x256xf32> -> vector<8x256xf32>
    %761 = arith.addf %744, %760 : vector<8x256xf32>
    %c-16_i32_365 = arith.constant -16 : i32
    %762 = vector.broadcast %c-16_i32_365 : i32 to vector<1x256xi32>
    %763 = arith.addi %741, %762 : vector<1x256xi32>
    %764 = vector.broadcast %740 : vector<256x1xi32> to vector<256x256xi32>
    %765 = vector.broadcast %763 : vector<1x256xi32> to vector<256x256xi32>
    %766 = arith.cmpi eq, %764, %765 : vector<256x256xi32>
    %cst_366 = arith.constant 1.000000e+00 : f32
    %cst_367 = arith.constant 0.000000e+00 : f32
    %767 = vector.broadcast %cst_366 : f32 to vector<256x256xf32>
    %768 = vector.broadcast %cst_367 : f32 to vector<256x256xf32>
    %769 = arith.select %766, %767, %768 : vector<256x256xi1>, vector<256x256xf32>
    %c1_368 = arith.constant 1 : index
    %c0_369 = arith.constant 0 : index
    %c0_370 = arith.constant 0 : index
    %770 = vector.load %arg10[%c1_368, %c0_369, %c0_370] : memref<9x8x8xf32, #tpu.memory_space<vmem>>, vector<1x8x8xf32>
    %771 = vector.shape_cast %770 : vector<1x8x8xf32> to vector<8x8xf32>
    %cst_371 = arith.constant dense<0.000000e+00> : vector<8x256xf32>
    %772 = tpu.matmul %771, %739, %cst_371 {dimension_numbers = #tpu.dot_dimension_numbers<[1], [0], [0], [1], [0, 0, 1, 1], [], []>} : vector<8x8xf32>, vector<8x256xf32>, vector<8x256xf32> -> vector<8x256xf32>
    %cst_372 = arith.constant dense<0.000000e+00> : vector<8x256xf32>
    %773 = tpu.matmul %772, %769, %cst_372 {dimension_numbers = #tpu.dot_dimension_numbers<[1], [0], [0], [1], [0, 0, 1, 1], [], []>} : vector<8x256xf32>, vector<256x256xf32>, vector<8x256xf32> -> vector<8x256xf32>
    %774 = arith.addf %761, %773 : vector<8x256xf32>
    %c-15_i32_373 = arith.constant -15 : i32
    %775 = vector.broadcast %c-15_i32_373 : i32 to vector<1x256xi32>
    %776 = arith.addi %741, %775 : vector<1x256xi32>
    %777 = vector.broadcast %740 : vector<256x1xi32> to vector<256x256xi32>
    %778 = vector.broadcast %776 : vector<1x256xi32> to vector<256x256xi32>
    %779 = arith.cmpi eq, %777, %778 : vector<256x256xi32>
    %c15_i32_374 = arith.constant 15 : i32
    %780 = vector.broadcast %c15_i32_374 : i32 to vector<1x256xi32>
    %781 = arith.cmpi slt, %743, %780 : vector<1x256xi32>
    %782 = vector.broadcast %781 : vector<1x256xi1> to vector<256x256xi1>
    %783 = arith.andi %779, %782 : vector<256x256xi1>
    %cst_375 = arith.constant 1.000000e+00 : f32
    %cst_376 = arith.constant 0.000000e+00 : f32
    %784 = vector.broadcast %cst_375 : f32 to vector<256x256xf32>
    %785 = vector.broadcast %cst_376 : f32 to vector<256x256xf32>
    %786 = arith.select %783, %784, %785 : vector<256x256xi1>, vector<256x256xf32>
    %c2_377 = arith.constant 2 : index
    %c0_378 = arith.constant 0 : index
    %c0_379 = arith.constant 0 : index
    %787 = vector.load %arg10[%c2_377, %c0_378, %c0_379] : memref<9x8x8xf32, #tpu.memory_space<vmem>>, vector<1x8x8xf32>
    %788 = vector.shape_cast %787 : vector<1x8x8xf32> to vector<8x8xf32>
    %cst_380 = arith.constant dense<0.000000e+00> : vector<8x256xf32>
    %789 = tpu.matmul %788, %739, %cst_380 {dimension_numbers = #tpu.dot_dimension_numbers<[1], [0], [0], [1], [0, 0, 1, 1], [], []>} : vector<8x8xf32>, vector<8x256xf32>, vector<8x256xf32> -> vector<8x256xf32>
    %cst_381 = arith.constant dense<0.000000e+00> : vector<8x256xf32>
    %790 = tpu.matmul %789, %786, %cst_381 {dimension_numbers = #tpu.dot_dimension_numbers<[1], [0], [0], [1], [0, 0, 1, 1], [], []>} : vector<8x256xf32>, vector<256x256xf32>, vector<8x256xf32> -> vector<8x256xf32>
    %791 = arith.addf %774, %790 : vector<8x256xf32>
    %c-1_i32_382 = arith.constant -1 : i32
    %792 = vector.broadcast %c-1_i32_382 : i32 to vector<1x256xi32>
    %793 = arith.addi %741, %792 : vector<1x256xi32>
    %794 = vector.broadcast %740 : vector<256x1xi32> to vector<256x256xi32>
    %795 = vector.broadcast %793 : vector<1x256xi32> to vector<256x256xi32>
    %796 = arith.cmpi eq, %794, %795 : vector<256x256xi32>
    %c1_i32_383 = arith.constant 1 : i32
    %797 = vector.broadcast %c1_i32_383 : i32 to vector<1x256xi32>
    %798 = arith.cmpi sge, %743, %797 : vector<1x256xi32>
    %799 = vector.broadcast %798 : vector<1x256xi1> to vector<256x256xi1>
    %800 = arith.andi %796, %799 : vector<256x256xi1>
    %cst_384 = arith.constant 1.000000e+00 : f32
    %cst_385 = arith.constant 0.000000e+00 : f32
    %801 = vector.broadcast %cst_384 : f32 to vector<256x256xf32>
    %802 = vector.broadcast %cst_385 : f32 to vector<256x256xf32>
    %803 = arith.select %800, %801, %802 : vector<256x256xi1>, vector<256x256xf32>
    %c3_386 = arith.constant 3 : index
    %c0_387 = arith.constant 0 : index
    %c0_388 = arith.constant 0 : index
    %804 = vector.load %arg10[%c3_386, %c0_387, %c0_388] : memref<9x8x8xf32, #tpu.memory_space<vmem>>, vector<1x8x8xf32>
    %805 = vector.shape_cast %804 : vector<1x8x8xf32> to vector<8x8xf32>
    %cst_389 = arith.constant dense<0.000000e+00> : vector<8x256xf32>
    %806 = tpu.matmul %805, %739, %cst_389 {dimension_numbers = #tpu.dot_dimension_numbers<[1], [0], [0], [1], [0, 0, 1, 1], [], []>} : vector<8x8xf32>, vector<8x256xf32>, vector<8x256xf32> -> vector<8x256xf32>
    %cst_390 = arith.constant dense<0.000000e+00> : vector<8x256xf32>
    %807 = tpu.matmul %806, %803, %cst_390 {dimension_numbers = #tpu.dot_dimension_numbers<[1], [0], [0], [1], [0, 0, 1, 1], [], []>} : vector<8x256xf32>, vector<256x256xf32>, vector<8x256xf32> -> vector<8x256xf32>
    %808 = arith.addf %791, %807 : vector<8x256xf32>
    %c0_i32_391 = arith.constant 0 : i32
    %809 = vector.broadcast %c0_i32_391 : i32 to vector<1x256xi32>
    %810 = arith.addi %741, %809 : vector<1x256xi32>
    %811 = vector.broadcast %740 : vector<256x1xi32> to vector<256x256xi32>
    %812 = vector.broadcast %810 : vector<1x256xi32> to vector<256x256xi32>
    %813 = arith.cmpi eq, %811, %812 : vector<256x256xi32>
    %cst_392 = arith.constant 1.000000e+00 : f32
    %cst_393 = arith.constant 0.000000e+00 : f32
    %814 = vector.broadcast %cst_392 : f32 to vector<256x256xf32>
    %815 = vector.broadcast %cst_393 : f32 to vector<256x256xf32>
    %816 = arith.select %813, %814, %815 : vector<256x256xi1>, vector<256x256xf32>
    %c4_394 = arith.constant 4 : index
    %c0_395 = arith.constant 0 : index
    %c0_396 = arith.constant 0 : index
    %817 = vector.load %arg10[%c4_394, %c0_395, %c0_396] : memref<9x8x8xf32, #tpu.memory_space<vmem>>, vector<1x8x8xf32>
    %818 = vector.shape_cast %817 : vector<1x8x8xf32> to vector<8x8xf32>
    %cst_397 = arith.constant dense<0.000000e+00> : vector<8x256xf32>
    %819 = tpu.matmul %818, %739, %cst_397 {dimension_numbers = #tpu.dot_dimension_numbers<[1], [0], [0], [1], [0, 0, 1, 1], [], []>} : vector<8x8xf32>, vector<8x256xf32>, vector<8x256xf32> -> vector<8x256xf32>
    %cst_398 = arith.constant dense<0.000000e+00> : vector<8x256xf32>
    %820 = tpu.matmul %819, %816, %cst_398 {dimension_numbers = #tpu.dot_dimension_numbers<[1], [0], [0], [1], [0, 0, 1, 1], [], []>} : vector<8x256xf32>, vector<256x256xf32>, vector<8x256xf32> -> vector<8x256xf32>
    %821 = arith.addf %808, %820 : vector<8x256xf32>
    %c1_i32_399 = arith.constant 1 : i32
    %822 = vector.broadcast %c1_i32_399 : i32 to vector<1x256xi32>
    %823 = arith.addi %741, %822 : vector<1x256xi32>
    %824 = vector.broadcast %740 : vector<256x1xi32> to vector<256x256xi32>
    %825 = vector.broadcast %823 : vector<1x256xi32> to vector<256x256xi32>
    %826 = arith.cmpi eq, %824, %825 : vector<256x256xi32>
    %c15_i32_400 = arith.constant 15 : i32
    %827 = vector.broadcast %c15_i32_400 : i32 to vector<1x256xi32>
    %828 = arith.cmpi slt, %743, %827 : vector<1x256xi32>
    %829 = vector.broadcast %828 : vector<1x256xi1> to vector<256x256xi1>
    %830 = arith.andi %826, %829 : vector<256x256xi1>
    %cst_401 = arith.constant 1.000000e+00 : f32
    %cst_402 = arith.constant 0.000000e+00 : f32
    %831 = vector.broadcast %cst_401 : f32 to vector<256x256xf32>
    %832 = vector.broadcast %cst_402 : f32 to vector<256x256xf32>
    %833 = arith.select %830, %831, %832 : vector<256x256xi1>, vector<256x256xf32>
    %c5_403 = arith.constant 5 : index
    %c0_404 = arith.constant 0 : index
    %c0_405 = arith.constant 0 : index
    %834 = vector.load %arg10[%c5_403, %c0_404, %c0_405] : memref<9x8x8xf32, #tpu.memory_space<vmem>>, vector<1x8x8xf32>
    %835 = vector.shape_cast %834 : vector<1x8x8xf32> to vector<8x8xf32>
    %cst_406 = arith.constant dense<0.000000e+00> : vector<8x256xf32>
    %836 = tpu.matmul %835, %739, %cst_406 {dimension_numbers = #tpu.dot_dimension_numbers<[1], [0], [0], [1], [0, 0, 1, 1], [], []>} : vector<8x8xf32>, vector<8x256xf32>, vector<8x256xf32> -> vector<8x256xf32>
    %cst_407 = arith.constant dense<0.000000e+00> : vector<8x256xf32>
    %837 = tpu.matmul %836, %833, %cst_407 {dimension_numbers = #tpu.dot_dimension_numbers<[1], [0], [0], [1], [0, 0, 1, 1], [], []>} : vector<8x256xf32>, vector<256x256xf32>, vector<8x256xf32> -> vector<8x256xf32>
    %838 = arith.addf %821, %837 : vector<8x256xf32>
    %c15_i32_408 = arith.constant 15 : i32
    %839 = vector.broadcast %c15_i32_408 : i32 to vector<1x256xi32>
    %840 = arith.addi %741, %839 : vector<1x256xi32>
    %841 = vector.broadcast %740 : vector<256x1xi32> to vector<256x256xi32>
    %842 = vector.broadcast %840 : vector<1x256xi32> to vector<256x256xi32>
    %843 = arith.cmpi eq, %841, %842 : vector<256x256xi32>
    %c1_i32_409 = arith.constant 1 : i32
    %844 = vector.broadcast %c1_i32_409 : i32 to vector<1x256xi32>
    %845 = arith.cmpi sge, %743, %844 : vector<1x256xi32>
    %846 = vector.broadcast %845 : vector<1x256xi1> to vector<256x256xi1>
    %847 = arith.andi %843, %846 : vector<256x256xi1>
    %cst_410 = arith.constant 1.000000e+00 : f32
    %cst_411 = arith.constant 0.000000e+00 : f32
    %848 = vector.broadcast %cst_410 : f32 to vector<256x256xf32>
    %849 = vector.broadcast %cst_411 : f32 to vector<256x256xf32>
    %850 = arith.select %847, %848, %849 : vector<256x256xi1>, vector<256x256xf32>
    %c6_412 = arith.constant 6 : index
    %c0_413 = arith.constant 0 : index
    %c0_414 = arith.constant 0 : index
    %851 = vector.load %arg10[%c6_412, %c0_413, %c0_414] : memref<9x8x8xf32, #tpu.memory_space<vmem>>, vector<1x8x8xf32>
    %852 = vector.shape_cast %851 : vector<1x8x8xf32> to vector<8x8xf32>
    %cst_415 = arith.constant dense<0.000000e+00> : vector<8x256xf32>
    %853 = tpu.matmul %852, %739, %cst_415 {dimension_numbers = #tpu.dot_dimension_numbers<[1], [0], [0], [1], [0, 0, 1, 1], [], []>} : vector<8x8xf32>, vector<8x256xf32>, vector<8x256xf32> -> vector<8x256xf32>
    %cst_416 = arith.constant dense<0.000000e+00> : vector<8x256xf32>
    %854 = tpu.matmul %853, %850, %cst_416 {dimension_numbers = #tpu.dot_dimension_numbers<[1], [0], [0], [1], [0, 0, 1, 1], [], []>} : vector<8x256xf32>, vector<256x256xf32>, vector<8x256xf32> -> vector<8x256xf32>
    %855 = arith.addf %838, %854 : vector<8x256xf32>
    %c16_i32_417 = arith.constant 16 : i32
    %856 = vector.broadcast %c16_i32_417 : i32 to vector<1x256xi32>
    %857 = arith.addi %741, %856 : vector<1x256xi32>
    %858 = vector.broadcast %740 : vector<256x1xi32> to vector<256x256xi32>
    %859 = vector.broadcast %857 : vector<1x256xi32> to vector<256x256xi32>
    %860 = arith.cmpi eq, %858, %859 : vector<256x256xi32>
    %cst_418 = arith.constant 1.000000e+00 : f32
    %cst_419 = arith.constant 0.000000e+00 : f32
    %861 = vector.broadcast %cst_418 : f32 to vector<256x256xf32>
    %862 = vector.broadcast %cst_419 : f32 to vector<256x256xf32>
    %863 = arith.select %860, %861, %862 : vector<256x256xi1>, vector<256x256xf32>
    %c7_420 = arith.constant 7 : index
    %c0_421 = arith.constant 0 : index
    %c0_422 = arith.constant 0 : index
    %864 = vector.load %arg10[%c7_420, %c0_421, %c0_422] : memref<9x8x8xf32, #tpu.memory_space<vmem>>, vector<1x8x8xf32>
    %865 = vector.shape_cast %864 : vector<1x8x8xf32> to vector<8x8xf32>
    %cst_423 = arith.constant dense<0.000000e+00> : vector<8x256xf32>
    %866 = tpu.matmul %865, %739, %cst_423 {dimension_numbers = #tpu.dot_dimension_numbers<[1], [0], [0], [1], [0, 0, 1, 1], [], []>} : vector<8x8xf32>, vector<8x256xf32>, vector<8x256xf32> -> vector<8x256xf32>
    %cst_424 = arith.constant dense<0.000000e+00> : vector<8x256xf32>
    %867 = tpu.matmul %866, %863, %cst_424 {dimension_numbers = #tpu.dot_dimension_numbers<[1], [0], [0], [1], [0, 0, 1, 1], [], []>} : vector<8x256xf32>, vector<256x256xf32>, vector<8x256xf32> -> vector<8x256xf32>
    %868 = arith.addf %855, %867 : vector<8x256xf32>
    %c17_i32_425 = arith.constant 17 : i32
    %869 = vector.broadcast %c17_i32_425 : i32 to vector<1x256xi32>
    %870 = arith.addi %741, %869 : vector<1x256xi32>
    %871 = vector.broadcast %740 : vector<256x1xi32> to vector<256x256xi32>
    %872 = vector.broadcast %870 : vector<1x256xi32> to vector<256x256xi32>
    %873 = arith.cmpi eq, %871, %872 : vector<256x256xi32>
    %c15_i32_426 = arith.constant 15 : i32
    %874 = vector.broadcast %c15_i32_426 : i32 to vector<1x256xi32>
    %875 = arith.cmpi slt, %743, %874 : vector<1x256xi32>
    %876 = vector.broadcast %875 : vector<1x256xi1> to vector<256x256xi1>
    %877 = arith.andi %873, %876 : vector<256x256xi1>
    %cst_427 = arith.constant 1.000000e+00 : f32
    %cst_428 = arith.constant 0.000000e+00 : f32
    %878 = vector.broadcast %cst_427 : f32 to vector<256x256xf32>
    %879 = vector.broadcast %cst_428 : f32 to vector<256x256xf32>
    %880 = arith.select %877, %878, %879 : vector<256x256xi1>, vector<256x256xf32>
    %c8_429 = arith.constant 8 : index
    %c0_430 = arith.constant 0 : index
    %c0_431 = arith.constant 0 : index
    %881 = vector.load %arg10[%c8_429, %c0_430, %c0_431] : memref<9x8x8xf32, #tpu.memory_space<vmem>>, vector<1x8x8xf32>
    %882 = vector.shape_cast %881 : vector<1x8x8xf32> to vector<8x8xf32>
    %cst_432 = arith.constant dense<0.000000e+00> : vector<8x256xf32>
    %883 = tpu.matmul %882, %739, %cst_432 {dimension_numbers = #tpu.dot_dimension_numbers<[1], [0], [0], [1], [0, 0, 1, 1], [], []>} : vector<8x8xf32>, vector<8x256xf32>, vector<8x256xf32> -> vector<8x256xf32>
    %cst_433 = arith.constant dense<0.000000e+00> : vector<8x256xf32>
    %884 = tpu.matmul %883, %880, %cst_433 {dimension_numbers = #tpu.dot_dimension_numbers<[1], [0], [0], [1], [0, 0, 1, 1], [], []>} : vector<8x256xf32>, vector<256x256xf32>, vector<8x256xf32> -> vector<8x256xf32>
    %885 = arith.addf %868, %884 : vector<8x256xf32>
    %c0_434 = arith.constant 0 : index
    %c0_435 = arith.constant 0 : index
    %886 = vector.load %arg11[%c0_434, %c0_435] : memref<8x1xf32, #tpu.memory_space<vmem>>, vector<8x1xf32>
    %887 = vector.broadcast %886 : vector<8x1xf32> to vector<8x256xf32>
    %888 = arith.addf %885, %887 : vector<8x256xf32>
    %c0_436 = arith.constant 0 : index
    %c0_437 = arith.constant 0 : index
    %c0_438 = arith.constant 0 : index
    %889 = vector.load %arg12[%c0_436, %c0_437, %c0_438] : memref<1x8x256xf32, #tpu.memory_space<vmem>>, vector<1x8x256xf32>
    %890 = vector.shape_cast %889 : vector<1x8x256xf32> to vector<8x256xf32>
    %891 = vector.shape_cast %888 : vector<8x256xf32> to vector<1x8x256xf32>
    tpu.vector_store %arg12[%c0_436, %c0_437, %c0_438], %891 {strides = array<i32>} : memref<1x8x256xf32, #tpu.memory_space<vmem>>, vector<1x8x256xf32>,
    return
  }
  func.func @transform_0(%arg0: i32) -> (i32, i32, i32) {
    %c0_i32 = arith.constant 0 : i32
    %c0_i32_0 = arith.constant 0 : i32
    %c0_i32_1 = arith.constant 0 : i32
    return %arg0, %c0_i32, %c0_i32_0 : i32, i32, i32
  }
  func.func @transform_1(%arg0: i32) -> (i32, i32, i32) {
    %c0_i32 = arith.constant 0 : i32
    %c0_i32_0 = arith.constant 0 : i32
    %c0_i32_1 = arith.constant 0 : i32
    %c0_i32_2 = arith.constant 0 : i32
    return %c0_i32, %c0_i32_0, %c0_i32_1 : i32, i32, i32
  }
  func.func @transform_2(%arg0: i32) -> (i32, i32) {
    %c0_i32 = arith.constant 0 : i32
    %c0_i32_0 = arith.constant 0 : i32
    %c0_i32_1 = arith.constant 0 : i32
    return %c0_i32, %c0_i32_0 : i32, i32
  }
  func.func @transform_3(%arg0: i32) -> (i32, i32, i32) {
    %c0_i32 = arith.constant 0 : i32
    %c0_i32_0 = arith.constant 0 : i32
    %c0_i32_1 = arith.constant 0 : i32
    %c0_i32_2 = arith.constant 0 : i32
    return %c0_i32, %c0_i32_0, %c0_i32_1 : i32, i32, i32
  }
  func.func @transform_4(%arg0: i32) -> (i32, i32) {
    %c0_i32 = arith.constant 0 : i32
    %c0_i32_0 = arith.constant 0 : i32
    %c0_i32_1 = arith.constant 0 : i32
    return %c0_i32, %c0_i32_0 : i32, i32
  }
  func.func @transform_5(%arg0: i32) -> (i32, i32, i32) {
    %c0_i32 = arith.constant 0 : i32
    %c0_i32_0 = arith.constant 0 : i32
    %c0_i32_1 = arith.constant 0 : i32
    %c0_i32_2 = arith.constant 0 : i32
    return %c0_i32, %c0_i32_0, %c0_i32_1 : i32, i32, i32
  }
  func.func @transform_6(%arg0: i32) -> (i32, i32) {
    %c0_i32 = arith.constant 0 : i32
    %c0_i32_0 = arith.constant 0 : i32
    %c0_i32_1 = arith.constant 0 : i32
    return %c0_i32, %c0_i32_0 : i32, i32
  }
  func.func @transform_7(%arg0: i32) -> (i32, i32, i32) {
    %c0_i32 = arith.constant 0 : i32
    %c0_i32_0 = arith.constant 0 : i32
    %c0_i32_1 = arith.constant 0 : i32
    %c0_i32_2 = arith.constant 0 : i32
    return %c0_i32, %c0_i32_0, %c0_i32_1 : i32, i32, i32
  }
  func.func @transform_8(%arg0: i32) -> (i32, i32) {
    %c0_i32 = arith.constant 0 : i32
    %c0_i32_0 = arith.constant 0 : i32
    %c0_i32_1 = arith.constant 0 : i32
    return %c0_i32, %c0_i32_0 : i32, i32
  }
  func.func @transform_9(%arg0: i32) -> (i32, i32, i32) {
    %c0_i32 = arith.constant 0 : i32
    %c0_i32_0 = arith.constant 0 : i32
    %c0_i32_1 = arith.constant 0 : i32
    %c0_i32_2 = arith.constant 0 : i32
    return %c0_i32, %c0_i32_0, %c0_i32_1 : i32, i32, i32
  }
  func.func @transform_10(%arg0: i32) -> (i32, i32) {
    %c0_i32 = arith.constant 0 : i32
    %c0_i32_0 = arith.constant 0 : i32
    %c0_i32_1 = arith.constant 0 : i32
    return %c0_i32, %c0_i32_0 : i32, i32
  }
  func.func @transform_11(%arg0: i32) -> (i32, i32, i32) {
    %c0_i32 = arith.constant 0 : i32
    %c0_i32_0 = arith.constant 0 : i32
    %c0_i32_1 = arith.constant 0 : i32
    return %arg0, %c0_i32, %c0_i32_0 : i32, i32, i32
  }
}

</mosaic_0001>

<bundles_post_ra>
// kernel: fpn_forward.1
= control target key start
LH: loop header
LB: loop body
LE: loop exit
PB: predicated region body
PF: predicated region fallthrough
CT: control target
= control target key end

     0   :  { %s12817_s17 = smov 0   ;;  %s19733_s0 = inlined_call_operand.vmem [shape: f32[2,4,256], index: 0, kind: input, shape index: {}]   ;;  %s19734_s1 = inlined_call_operand.vmem [shape: f32[9,8,4], index: 1, kind: input, shape index: {}]   ;;  %s19735_s2 = inlined_call_operand.vmem [shape: f32[8,1], index: 2, kind: input, shape index: {}]   ;;  %s19736_s3 = inlined_call_operand.vmem [shape: f32[9,16,8], index: 3, kind: input, shape index: {}]   ;;  %s19737_s4 = inlined_call_operand.vmem [shape: f32[16,1], index: 4, kind: input, shape index: {}]   ;;  %s19738_s5 = inlined_call_operand.vmem [shape: f32[9,16,16], index: 5, kind: input, shape index: {}]   ;;  %s19739_s6 = inlined_call_operand.vmem [shape: f32[16,1], index: 6, kind: input, shape index: {}]   ;;  %s19740_s7 = inlined_call_operand.vmem [shape: f32[9,8,16], index: 7, kind: input, shape index: {}]   ;;  %s19741_s8 = inlined_call_operand.vmem [shape: f32[8,1], index: 8, kind: input, shape index: {}]   ;;  %s19742_s9 = inlined_call_operand.vmem [shape: f32[9,8,8], index: 9, kind: input, shape index: {}]   ;;  %s19743_s10 = inlined_call_operand.vmem [shape: f32[8,1], index: 10, kind: input, shape index: {}]   ;;  %s19744_s11 = inlined_call_operand.vmem [shape: f32[2,8,256], index: 11, kind: output, shape index: {}]  }
   0x1 LB: > { %s10479_s18 = sadd.s32 4294967295, %s12751_s17   ;;  %p10483_p0 = scmp.ge.s32.totalorder %s12751_s17, 1  ;;  %s12751_s17 = sphi %s12817_s17, %s21_s17  }
   0x2   : > { %p337_p1 = scmp.lt.s32.totalorder %s12751_s17, 3 }
   0x4   : > { %p338_p2 = pnand %p10483_p0, %p337_p1 }
   0x6   : > { %341 = sbr.rel (%p338_p2) target bundleno = 6075 (0x17bb), region = 64 }
   0xb   : > { %p377_p3 = scmp.lt.s32.totalorder %s10479_s18, 1  ;;  %v388_v0 = vlaneseq  ;;  %v19800_v1 = vmov 0.0   ;;  %vm19752_vm0 = vcmask 1043456   ;;  %v626_v15 = vld [vmem:[%s19734_s1] sm:$0xff]  ;;  %vm19750_vm1 = vcmask 31744   ;;  %v10491_v16 = vld [vmem:[%s19734_s1 + $0x8] sm:$0xff] }
   0xc   : > { %702 = vmatprep.mubr.f32.mxu0 %v19800_v1  ;;  %908 = vmatprep.mubr.f32.mxu1 %v19800_v1  ;;  %v20371_v17 = vmov 0  ;;  %v20376_v20 = vmov 0  ;;  %v19791_v22 = vmov 1.0   ;;  %v20380_v23 = vmov 0 }
   0xd   : > { %s22045_s18 = smov (!%p377_p3, %s10479_s18), 1  ;;  %v12829_v2 = vshrl.u32 %v388_v0, 7  ;;  %v12831_v3 = vand.u32 127, %v388_v0  ;;  %v20384_v25 = vmov 0  ;;  %v20388_v27 = vmov 0 }
   0xe   : > { %s11587_s19 = sshll.u32 %s22045_s18, 3  ;;  %v20392_v29 = vmov 0  ;;  %v20395_v31 = vmov 0  ;;  %v20398_v33 = vmov 0  ;;  %v20401_v35 = vmov 0  ;;  %s11588_s27 = sshll.u32 %s22045_s18, 4 }
   0xf   : > { %20363 = vst [vmem:[#allocation2_spill] sm:$0xff] %v12831_v3  ;;  %v12835_v4 = vadd.s32 120, %v12829_v2  ;;  %v12838_v5 = vadd.s32 128, %v12831_v3  ;;  %s12843_s22 = scalar_lea.vmem %s19733_s0, %s11587_s19  ;;  %v12846_v6 = vadd.s32 112, %v12829_v2  ;;  %v12861_v11 = vadd.s32 104, %v12829_v2  ;;  %s386_s30 = scalar_lea.vmem %s19744_s11, %s11588_s27 }
  0x10   : > { %v12849_v7 = vld [vmem:[%s12843_s22] sm:$0xff]  ;;  %v12868_v13 = vand.u32 15, %v12831_v3  ;;  %v12871_v14 = vadd.s32 4294967279, %v12831_v3  ;;  %v12897_v18 = vadd.s32 96, %v12829_v2  ;;  %v12906_v19 = vadd.s32 4294967280, %v12831_v3 }
  0x11   : > { %20364 = vst [vmem:[#allocation3_spill] sm:$0xff] %v12835_v4  ;;  %20365 = vst [vmem:[#allocation4_spill] sm:$0xff] %v12838_v5  ;;  %v12852_v8 = vadd.s32 4294967280, %v12838_v5  ;;  %v12855_v9 = vand.u32 15, %v12838_v5  ;;  %v12858_v10 = vadd.s32 4294967279, %v12838_v5  ;;  %v12865_v12 = vcombine.high %v12849_v7, %v12849_v7 }
  0x12   : > { %20366 = vst [vmem:[#allocation5_spill] sm:$0xff] %v12846_v6  ;;  %20369 = vst [vmem:[#allocation8_spill] sm:$0xff] %v12861_v11  ;;  %vm454_vm10 = vcmp.eq.s32.totalorder %v12861_v11, %v12871_v14  ;;  %vm19766_vm11 = vcmp.ge.s32.totalorder %v12868_v13, 1  ;;  %v12922_v21 = vadd.s32 88, %v12829_v2  ;;  %vm452_vm13 = vcmp.eq.s32.totalorder %v12897_v18, %v12871_v14 }
  0x13   : > { %20367 = vst [vmem:[#allocation6_spill] sm:$0xff] %v12852_v8  ;;  %20368 = vst [vmem:[#allocation7_spill] sm:$0xff] %v12855_v9  ;;  %vm459_vm2 = vcmp.eq.s32.totalorder %v12835_v4, %v12858_v10  ;;  %vm19754_vm3 = vcmp.ge.s32.totalorder %v12855_v9, 1  ;;  %10488 = vmatprep.subr.msk.mxu0 %vm19752_vm0, %v12865_v12  ;;  %10492 = vmatprep.subr.msk.mxu1 %vm19752_vm0, %v12865_v12  ;;  %vm19748_vm4 = vcmp.eq.s32.totalorder %v12835_v4, %v12852_v8  ;;  %v20404_v37 = vmov 0 }
  0x14   : > { %20370 = vst [vmem:[#allocation9_spill] sm:$0xff] %v12868_v13  ;;  %vm12890_vm5 = vmand %vm459_vm2, %vm19754_vm3  ;;  %vm457_vm6 = vcmp.eq.s32.totalorder %v12846_v6, %v12858_v10  ;;  %10489 = vmatpush1.msk.msra.mxu0 %vm19752_vm0, %v12849_v7  ;;  %10493 = vmatpush1.msk.msra.mxu1 %vm19752_vm0, %v12849_v7  ;;  %vm455_vm7 = vcmp.eq.s32.totalorder %v12861_v11, %v12858_v10  ;;  %v12942_v24 = vadd.s32 80, %v12829_v2  ;;  %v12964_v26 = vadd.s32 72, %v12829_v2 }
  0x15   : > { %v20372_v17 = vsel %vm12890_vm5, 4294967295, %v20371_v17  ;;  %20374 = vst [vmem:[#allocation11_spill] sm:$0xff] %v12897_v18  ;;  %20375 = vst [vmem:[#allocation12_spill] sm:$0xff] %v12906_v19  ;;  %10490 = vmatmul.mubr.msk.f32.vlgmr.msra.gmra.mxu0 %vm19750_vm1, %v626_v15  ;;  %10494 = vmatmul.mubr.msk.f32.vlgmr.msra.gmra.mxu1 %vm19750_vm1, %v10491_v16  ;;  %vm19746_vm8 = vcmp.eq.s32.totalorder %v12846_v6, %v12852_v8  ;;  %vm19745_vm14 = vcmp.eq.s32.totalorder %v12861_v11, %v12906_v19  ;;  %v20407_v39 = vmov 0 }
  0x16   : > { %20373 = vst [vmem:[#allocation10_spill] sm:$0xff] %v20372_v17  ;;  %vm12914_vm9 = vmand %vm457_vm6, %vm19754_vm3  ;;  %10495 = vmatprep.subr.msk.mxu0 %vm19748_vm4, %v19791_v22  ;;  %10525 = vmatprep.subr.msk.mxu1 %vm12890_vm5, %v19791_v22  ;;  %vm450_vm2 = vcmp.eq.s32.totalorder %v12922_v21, %v12871_v14  ;;  %vm19747_vm6 = vcmp.eq.s32.totalorder %v12897_v18, %v12906_v19  ;;  %v12988_v28 = vadd.s32 64, %v12829_v2  ;;  %v13010_v30 = vadd.s32 56, %v12829_v2 }
  0x17   : > { %v20377_v20 = vsel %vm12914_vm9, 4294967295, %v20376_v20  ;;  %20379 = vst [vmem:[#allocation14_spill] sm:$0xff] %v12922_v21  ;;  %916 = vmatpush1.msra.mxu0 %v19800_v1  ;;  %987 = vmatpush1.msra.mxu1 %v19800_v1  ;;  %vm12935_vm12 = vmand %vm455_vm7, %vm19754_vm3  ;;  %v13032_v32 = vadd.s32 48, %v12829_v2  ;;  %v13054_v34 = vadd.s32 40, %v12829_v2  ;;  %v13076_v36 = vadd.s32 32, %v12829_v2 }
  0x18   : > { %20378 = vst [vmem:[#allocation13_spill] sm:$0xff] %v20377_v20  ;;  %v20381_v23 = vsel %vm12935_vm12, 4294967295, %v20380_v23  ;;  %20383 = vst [vmem:[#allocation16_spill] sm:$0xff] %v12942_v24  ;;  %10496 = vmatprep.subr.msk.mxu0 %vm19746_vm8, %v19791_v22  ;;  %10526 = vmatprep.subr.msk.mxu1 %vm12914_vm9, %v19791_v22  ;;  %vm446_vm8 = vcmp.eq.s32.totalorder %v12964_v26, %v12871_v14  ;;  %vm444_vm4 = vcmp.eq.s32.totalorder %v12988_v28, %v12871_v14  ;;  %v20410_v41 = vmov 0 }
  0x19   : > { %20382 = vst [vmem:[#allocation15_spill] sm:$0xff] %v20381_v23  ;;  %vm12955_vm15 = vmand %vm454_vm10, %vm19766_vm11  ;;  %918 = vmatpush1.msra.mxu0 %v19800_v1  ;;  %989 = vmatpush1.msra.mxu1 %v19800_v1  ;;  %vm448_vm10 = vcmp.eq.s32.totalorder %v12942_v24, %v12871_v14  ;;  %vm442_vm1 = vcmp.eq.s32.totalorder %v13010_v30, %v12871_v14  ;;  %v13098_v38 = vadd.s32 24, %v12829_v2  ;;  %v13120_v40 = vadd.s32 16, %v12829_v2 }
  0x1a   : > { %v20385_v25 = vsel %vm12955_vm15, 4294967295, %v20384_v25  ;;  %20387 = vst [vmem:[#allocation18_spill] sm:$0xff] %v12964_v26  ;;  %919 = vmatprep.subr.mxu0 %v19800_v1  ;;  %10527 = vmatprep.subr.msk.mxu1 %vm12935_vm12, %v19791_v22  ;;  %vm12974_vm7 = vmand %vm452_vm13, %vm19766_vm11  ;;  %vm19749_vm13 = vcmp.eq.s32.totalorder %v12922_v21, %v12906_v19  ;;  %vm440_vm0 = vcmp.eq.s32.totalorder %v13032_v32, %v12871_v14  ;;  %v13142_v42 = vadd.s32 8, %v12829_v2 }
  0x1b   : > { %20386 = vst [vmem:[#allocation17_spill] sm:$0xff] %v20385_v25  ;;  %v20389_v27 = vsel %vm12974_vm7, 4294967295, %v20388_v27  ;;  %10497 = vmatpush1.msk.msra.mxu0 %vm19745_vm14, %v19791_v22  ;;  %10528 = vmatpush1.msk.msra.mxu1 %vm12955_vm15, %v19791_v22  ;;  %20391 = vst [vmem:[#allocation20_spill] sm:$0xff] %v12988_v28  ;;  %vm438_vm3 = vcmp.eq.s32.totalorder %v13054_v34, %v12871_v14  ;;  %v20413_v43 = vmov 0  ;;  %v20416_v44 = vmov 0 }
  0x1c   : > { %20390 = vst [vmem:[#allocation19_spill] sm:$0xff] %v20389_v27  ;;  %921 = vmatprep.subr.mxu0 %v19800_v1  ;;  %992 = vmatprep.subr.mxu1 %v19800_v1  ;;  %vm12996_vm14 = vmand %vm450_vm2, %vm19766_vm11  ;;  %vm19751_vm2 = vcmp.eq.s32.totalorder %v12942_v24, %v12906_v19  ;;  %v13174_v45 = vadd.s32 232, %v12829_v2  ;;  %v20421_v46 = vmov 0  ;;  %v13196_v47 = vadd.s32 224, %v12829_v2 }
  0x1d   : > { %v20393_v29 = vsel %vm12996_vm14, 4294967295, %v20392_v29  ;;  %10498 = vmatpush1.msk.msra.mxu0 %vm19747_vm6, %v19791_v22  ;;  %10529 = vmatpush1.msk.msra.mxu1 %vm12974_vm7, %v19791_v22  ;;  %vm13018_vm6 = vmand %vm448_vm10, %vm19766_vm11  ;;  %vm19753_vm10 = vcmp.eq.s32.totalorder %v12964_v26, %v12906_v19  ;;  %v20426_v48 = vmov 0  ;;  %v13220_v49 = vadd.s32 216, %v12829_v2 }
  0x1e   : > { %20394 = vst [vmem:[#allocation21_spill] sm:$0xff] %v20393_v29  ;;  %923 = vmatprep.subr.mxu0 %v19800_v1  ;;  %994 = vmatprep.subr.mxu1 %v19800_v1  ;;  %v20396_v31 = vsel %vm13018_vm6, 4294967295, %v20395_v31  ;;  %20419 = vst [vmem:[#allocation30_spill] sm:$0xff] %v13174_v45  ;;  %v20431_v50 = vmov 0  ;;  %v13242_v51 = vadd.s32 208, %v12829_v2  ;;  %v20437_v52 = vmov 0 }
  0x1f   : > { %20397 = vst [vmem:[#allocation22_spill] sm:$0xff] %v20396_v31  ;;  %10499 = vmatpush1.msk.msra.mxu0 %vm19749_vm13, %v19791_v22  ;;  %10530 = vmatpush1.msk.msra.mxu1 %vm12996_vm14, %v19791_v22  ;;  %vm13040_vm13 = vmand %vm446_vm8, %vm19766_vm11  ;;  %vm19755_vm8 = vcmp.eq.s32.totalorder %v12988_v28, %v12906_v19  ;;  %v13264_v53 = vadd.s32 200, %v12829_v2  ;;  %v20443_v54 = vmov 0  ;;  %v13291_v55 = vadd.s32 192, %v12829_v2 }
  0x20   : > { %925 = vmatprep.subr.mxu0 %v19800_v1  ;;  %996 = vmatprep.subr.mxu1 %v19800_v1  ;;  %v20399_v33 = vsel %vm13040_vm13, 4294967295, %v20398_v33  ;;  %20424 = vst [vmem:[#allocation32_spill] sm:$0xff] %v13196_v47  ;;  %20429 = vst [vmem:[#allocation34_spill] sm:$0xff] %v13220_v49  ;;  %v20448_v56 = vmov 0  ;;  %v13313_v57 = vadd.s32 184, %v12829_v2  ;;  %v20452_v58 = vmov 0 }
  0x21   : > { %20400 = vst [vmem:[#allocation23_spill] sm:$0xff] %v20399_v33  ;;  %10500 = vmatpush1.msk.msra.mxu0 %vm19751_vm2, %v19791_v22  ;;  %10531 = vmatpush1.msk.msra.mxu1 %vm13018_vm6, %v19791_v22  ;;  %vm13062_vm2 = vmand %vm444_vm4, %vm19766_vm11  ;;  %vm19757_vm4 = vcmp.eq.s32.totalorder %v13010_v30, %v12906_v19  ;;  %v13335_v59 = vadd.s32 176, %v12829_v2  ;;  %v20456_v60 = vmov 0  ;;  %v13357_v61 = vadd.s32 168, %v12829_v2 }
  0x22   : > { %927 = vmatprep.subr.mxu0 %v19800_v1  ;;  %998 = vmatprep.subr.mxu1 %v19800_v1  ;;  %v20402_v35 = vsel %vm13062_vm2, 4294967295, %v20401_v35  ;;  %20434 = vst [vmem:[#allocation36_spill] sm:$0xff] %v13242_v51  ;;  %20440 = vst [vmem:[#allocation38_spill] sm:$0xff] %v13264_v53  ;;  %v20460_v62 = vmov 0  ;;  %v13379_v63 = vadd.s32 160, %v12829_v2  ;;  %v20464_v0 = vmov 0 }
  0x23   : > { %20403 = vst [vmem:[#allocation24_spill] sm:$0xff] %v20402_v35  ;;  %10501 = vmatpush1.msk.msra.mxu0 %vm19753_vm10, %v19791_v22  ;;  %10532 = vmatpush1.msk.msra.mxu1 %vm13040_vm13, %v19791_v22  ;;  %vm13084_vm10 = vmand %vm442_vm1, %vm19766_vm11  ;;  %vm19759_vm1 = vcmp.eq.s32.totalorder %v13032_v32, %v12906_v19  ;;  %vm20446_vm13 = vcmp.eq.s32.totalorder %v13174_v45, %v12852_v8  ;;  %v20468_v15 = vmov 0  ;;  %v13423_v16 = vadd.s32 144, %v12829_v2 }
  0x24   : > { %929 = vmatprep.subr.mxu0 %v19800_v1  ;;  %1000 = vmatprep.subr.mxu1 %v19800_v1  ;;  %v20405_v37 = vsel %vm13084_vm10, 4294967295, %v20404_v37  ;;  %20447 = vst [vmem:[#allocation40_spill] sm:$0xff] %v13291_v55  ;;  %20451 = vst [vmem:[#allocation42_spill] sm:$0xff] %v13313_v57  ;;  %v20828_v35 = vmov 0  ;;  %v20836_v33 = vmov 0  ;;  %v20844_v31 = vmov 0 }
  0x25   : > { %20406 = vst [vmem:[#allocation25_spill] sm:$0xff] %v20405_v37  ;;  %10502 = vmatpush1.msk.msra.mxu0 %vm19755_vm8, %v19791_v22  ;;  %10533 = vmatpush1.msk.msra.mxu1 %vm13062_vm2, %v19791_v22  ;;  %vm13106_vm8 = vmand %vm440_vm0, %vm19766_vm11  ;;  %vm436_vm2 = vcmp.eq.s32.totalorder %v13076_v36, %v12871_v14  ;;  %vm19761_vm0 = vcmp.eq.s32.totalorder %v13054_v34, %v12906_v19  ;;  %v14697_v37 = vadd.s32 1, %v12838_v5  ;;  %v15094_v20 = vadd.s32 15, %v12831_v3 }
  0x26   : > { %931 = vmatprep.subr.mxu0 %v19800_v1  ;;  %1002 = vmatprep.subr.mxu1 %v19800_v1  ;;  %v20408_v39 = vsel %vm13106_vm8, 4294967295, %v20407_v39  ;;  %20455 = vst [vmem:[#allocation44_spill] sm:$0xff] %v13335_v59  ;;  %20459 = vst [vmem:[#allocation46_spill] sm:$0xff] %v13357_v61 }
  0x27   : > { %20409 = vst [vmem:[#allocation26_spill] sm:$0xff] %v20408_v39  ;;  %10503 = vmatpush1.msk.msra.mxu0 %vm19757_vm4, %v19791_v22  ;;  %10534 = vmatpush1.msk.msra.mxu1 %vm13084_vm10, %v19791_v22  ;;  %vm13128_vm4 = vmand %vm438_vm3, %vm19766_vm11  ;;  %vm434_vm10 = vcmp.eq.s32.totalorder %v13098_v38, %v12871_v14  ;;  %v20821_v39 = vmov 0 }
  0x28   : > { %933 = vmatprep.subr.mxu0 %v19800_v1  ;;  %1004 = vmatprep.subr.mxu1 %v19800_v1  ;;  %v20411_v41 = vsel %vm13128_vm4, 4294967295, %v20410_v41  ;;  %vm13169_vm3 = vmand %vm434_vm10, %vm19766_vm11  ;;  %vm428_vm10 = vcmp.eq.s32.totalorder %v12829_v2, %v12871_v14  ;;  %20463 = vst [vmem:[#allocation48_spill] sm:$0xff] %v13379_v63 }
  0x29   : > { %20412 = vst [vmem:[#allocation27_spill] sm:$0xff] %v20411_v41  ;;  %10504 = vmatpush1.msk.msra.mxu0 %vm19759_vm1, %v19791_v22  ;;  %10535 = vmatpush1.msk.msra.mxu1 %vm13106_vm8, %v19791_v22  ;;  %vm13150_vm1 = vmand %vm436_vm2, %vm19766_vm11  ;;  %vm432_vm8 = vcmp.eq.s32.totalorder %v13120_v40, %v12871_v14  ;;  %v20417_v44 = vsel %vm13169_vm3, 4294967295, %v20416_v44  ;;  %vm430_vm2 = vcmp.eq.s32.totalorder %v13142_v42, %v12871_v14  ;;  %v13401_v14 = vadd.s32 152, %v12829_v2 }
  0x2a   : > { %935 = vmatprep.subr.mxu0 %v19800_v1  ;;  %1006 = vmatprep.subr.mxu1 %v19800_v1  ;;  %v20414_v43 = vsel %vm13150_vm1, 4294967295, %v20413_v43  ;;  %20418 = vst [vmem:[#allocation29_spill] sm:$0xff] %v20417_v44  ;;  %20471 = vst [vmem:[#allocation52_spill] sm:$0xff] %v13423_v16  ;;  %v14402_v44 = vld [vmem:[%s12843_s22] sm:$0xff]  ;;  %v20814_v41 = vmov 0 }
  0x2b   : > { %20415 = vst [vmem:[#allocation28_spill] sm:$0xff] %v20414_v43  ;;  %10505 = vmatpush1.msk.msra.mxu0 %vm19761_vm0, %v19791_v22  ;;  %10536 = vmatpush1.msk.msra.mxu1 %vm13128_vm4, %v19791_v22  ;;  %vm20420_vm0 = vcmp.eq.s32.totalorder %v13076_v36, %v12906_v19  ;;  %vm13191_vm4 = vmand %vm432_vm8, %vm19766_vm11  ;;  %v20807_v43 = vmov 0 }
  0x2c   : > { %937 = vmatprep.subr.mxu0 %v19800_v1  ;;  %1008 = vmatprep.subr.mxu1 %v19800_v1  ;;  %v20422_v46 = vsel %vm13191_vm4, 4294967295, %v20421_v46  ;;  %vm13235_vm8 = vmand %vm428_vm10, %vm19766_vm11  ;;  %vm20441_vm10 = vcmp.eq.s32.totalorder %v12829_v2, %v12906_v19  ;;  %20467 = vst [vmem:[#allocation50_spill] sm:$0xff] %v13401_v14 }
  0x2d   : > { %10506 = vmatpush1.msk.msra.mxu0 %vm20420_vm0, %v19791_v22  ;;  %10537 = vmatpush1.msk.msra.mxu1 %vm13150_vm1, %v19791_v22  ;;  %20423 = vst [vmem:[#allocation31_spill] sm:$0xff] %v20422_v46  ;;  %vm20425_vm0 = vcmp.eq.s32.totalorder %v13098_v38, %v12906_v19  ;;  %vm13213_vm1 = vmand %vm430_vm2, %vm19766_vm11  ;;  %v20432_v50 = vsel %vm13235_vm8, 4294967295, %v20431_v50  ;;  %vm20436_vm11 = vcmp.ge.s32.totalorder %v12855_v9, 1  ;;  %v20538_v46 = vmov 0 }
  0x2e   : > { %939 = vmatprep.subr.mxu0 %v19800_v1  ;;  %1010 = vmatprep.subr.mxu1 %v19800_v1  ;;  %v20427_v48 = vsel %vm13213_vm1, 4294967295, %v20426_v48  ;;  %20433 = vst [vmem:[#allocation35_spill] sm:$0xff] %v20432_v50 }
  0x2f   : > { %10507 = vmatpush1.msk.msra.mxu0 %vm20425_vm0, %v19791_v22  ;;  %10538 = vmatpush1.msk.msra.mxu1 %vm13169_vm3, %v19791_v22  ;;  %20428 = vst [vmem:[#allocation33_spill] sm:$0xff] %v20427_v48  ;;  %vm487_vm0 = vcmp.eq.s32.totalorder %v13174_v45, %v12858_v10  ;;  %vm20430_vm3 = vcmp.eq.s32.totalorder %v13120_v40, %v12906_v19  ;;  %v20507_v48 = vmov 0.0  }
  0x30   : > { %941 = vmatprep.subr.mxu0 %v19800_v1  ;;  %1012 = vmatprep.subr.mxu1 %v19800_v1  ;;  %vm13255_vm2 = vmand %vm487_vm0, %vm20436_vm11  ;;  %vm19770_vm11 = vcmp.eq.s32.totalorder %v13196_v47, %v12852_v8  ;;  %vm20442_vm0 = vcmp.ge.s32.totalorder %v12855_v9, 1 }
  0x31   : > { %10508 = vmatpush1.msk.msra.mxu0 %vm20430_vm3, %v19791_v22  ;;  %10539 = vmatpush1.msk.msra.mxu1 %vm13191_vm4, %v19791_v22  ;;  %vm485_vm3 = vcmp.eq.s32.totalorder %v13196_v47, %v12858_v10  ;;  %vm20435_vm4 = vcmp.eq.s32.totalorder %v13142_v42, %v12906_v19  ;;  %v20438_v52 = vsel %vm13255_vm2, 4294967295, %v20437_v52 }
  0x32   : > { %943 = vmatprep.subr.mxu0 %v19800_v1  ;;  %1014 = vmatprep.subr.mxu1 %v19800_v1  ;;  %20439 = vst [vmem:[#allocation37_spill] sm:$0xff] %v20438_v52 }
  0x33   : > { %10509 = vmatpush1.msk.msra.mxu0 %vm20435_vm4, %v19791_v22  ;;  %10540 = vmatpush1.msk.msra.mxu1 %vm13213_vm1, %v19791_v22  ;;  %vm483_vm4 = vcmp.eq.s32.totalorder %v13220_v49, %v12858_v10  ;;  %vm13277_vm1 = vmand %vm485_vm3, %vm20442_vm0  ;;  %vm19772_vm3 = vcmp.eq.s32.totalorder %v13220_v49, %v12852_v8 }
  0x34   : > { %945 = vmatprep.subr.mxu0 %v19800_v1  ;;  %1016 = vmatprep.subr.mxu1 %v19800_v1  ;;  %v20444_v54 = vsel %vm13277_vm1, 4294967295, %v20443_v54 }
  0x35   : > { %10510 = vmatpush1.msk.msra.mxu0 %vm20441_vm10, %v19791_v22  ;;  %10541 = vmatpush1.msk.msra.mxu1 %vm13235_vm8, %v19791_v22  ;;  %20445 = vst [vmem:[#allocation39_spill] sm:$0xff] %v20444_v54  ;;  %vm481_vm10 = vcmp.eq.s32.totalorder %v13242_v51, %v12858_v10  ;;  %v13576_v54 = vadd.s32 4294967295, %v12831_v3 }
  0x36   : > { %10511 = vmatprep.subr.msk.mxu0 %vm20446_vm13, %v19791_v22  ;;  %10542 = vmatprep.subr.msk.mxu1 %vm13255_vm2, %v19791_v22  ;;  %vm13299_vm13 = vmand %vm483_vm4, %vm20442_vm0  ;;  %vm479_vm2 = vcmp.eq.s32.totalorder %v13264_v53, %v12858_v10  ;;  %vm19774_vm4 = vcmp.eq.s32.totalorder %v13242_v51, %v12852_v8 }
  0x37   : > { %952 = vmatpush2.msra.mxu0 %v19800_v1  ;;  %1023 = vmatpush2.msra.mxu1 %v19800_v1  ;;  %v20449_v56 = vsel %vm13299_vm13, 4294967295, %v20448_v56 }
  0x38   : > { %20450 = vst [vmem:[#allocation41_spill] sm:$0xff] %v20449_v56  ;;  %10512 = vmatprep.subr.msk.mxu0 %vm19770_vm11, %v19791_v22  ;;  %10543 = vmatprep.subr.msk.mxu1 %vm13277_vm1, %v19791_v22  ;;  %vm13321_vm11 = vmand %vm481_vm10, %vm20442_vm0  ;;  %vm477_vm1 = vcmp.eq.s32.totalorder %v13291_v55, %v12858_v10  ;;  %vm19776_vm10 = vcmp.eq.s32.totalorder %v13264_v53, %v12852_v8 }
  0x39   : > { %954 = vmatpush2.msra.mxu0 %v19800_v1  ;;  %1025 = vmatpush2.msra.mxu1 %v19800_v1  ;;  %v20453_v58 = vsel %vm13321_vm11, 4294967295, %v20452_v58 }
  0x3a   : > { %20454 = vst [vmem:[#allocation43_spill] sm:$0xff] %v20453_v58  ;;  %10513 = vmatprep.subr.msk.mxu0 %vm19772_vm3, %v19791_v22  ;;  %10544 = vmatprep.subr.msk.mxu1 %vm13299_vm13, %v19791_v22  ;;  %vm13343_vm3 = vmand %vm479_vm2, %vm20442_vm0  ;;  %vm475_vm13 = vcmp.eq.s32.totalorder %v13313_v57, %v12858_v10  ;;  %vm19778_vm2 = vcmp.eq.s32.totalorder %v13291_v55, %v12852_v8 }
  0x3b   : > { %956 = vmatpush2.msra.mxu0 %v19800_v1  ;;  %1027 = vmatpush2.msra.mxu1 %v19800_v1  ;;  %v20457_v60 = vsel %vm13343_vm3, 4294967295, %v20456_v60 }
  0x3c   : > { %20458 = vst [vmem:[#allocation45_spill] sm:$0xff] %v20457_v60  ;;  %10514 = vmatprep.subr.msk.mxu0 %vm19774_vm4, %v19791_v22  ;;  %10545 = vmatprep.subr.msk.mxu1 %vm13321_vm11, %v19791_v22  ;;  %vm13365_vm4 = vmand %vm477_vm1, %vm20442_vm0  ;;  %vm473_vm11 = vcmp.eq.s32.totalorder %v13335_v59, %v12858_v10  ;;  %vm19780_vm1 = vcmp.eq.s32.totalorder %v13313_v57, %v12852_v8  ;;  %v20495_v60 = vmov 0 }
  0x3d   : > { %958 = vmatpush2.msra.mxu0 %v19800_v1  ;;  %1029 = vmatpush2.msra.mxu1 %v19800_v1  ;;  %v20461_v62 = vsel %vm13365_vm4, 4294967295, %v20460_v62 }
  0x3e   : > { %20462 = vst [vmem:[#allocation47_spill] sm:$0xff] %v20461_v62  ;;  %10515 = vmatprep.subr.msk.mxu0 %vm19776_vm10, %v19791_v22  ;;  %10546 = vmatprep.subr.msk.mxu1 %vm13343_vm3, %v19791_v22  ;;  %vm13387_vm10 = vmand %vm475_vm13, %vm20442_vm0  ;;  %vm471_vm3 = vcmp.eq.s32.totalorder %v13357_v61, %v12858_v10  ;;  %vm19784_vm13 = vcmp.eq.s32.totalorder %v13335_v59, %v12852_v8  ;;  %v20472_v62 = vmov 0 }
  0x3f   : > { %960 = vmatpush2.msra.mxu0 %v19800_v1  ;;  %1031 = vmatpush2.msra.mxu1 %v19800_v1  ;;  %v20465_v0 = vsel %vm13387_vm10, 4294967295, %v20464_v0 }
  0x40   : > { %20466 = vst [vmem:[#allocation49_spill] sm:$0xff] %v20465_v0  ;;  %10516 = vmatprep.subr.msk.mxu0 %vm19778_vm2, %v19791_v22  ;;  %10547 = vmatprep.subr.msk.mxu1 %vm13365_vm4, %v19791_v22  ;;  %vm13409_vm2 = vmand %vm473_vm11, %vm20442_vm0  ;;  %vm469_vm4 = vcmp.eq.s32.totalorder %v13379_v63, %v12858_v10  ;;  %v20475_v0 = vmov 0 }
  0x41   : > { %962 = vmatpush2.msra.mxu0 %v19800_v1  ;;  %1033 = vmatpush2.msra.mxu1 %v19800_v1  ;;  %v20469_v15 = vsel %vm13409_vm2, 4294967295, %v20468_v15  ;;  %vm13450_vm11 = vmand %vm469_vm4, %vm20442_vm0  ;;  %vm19790_vm4 = vcmp.eq.s32.totalorder %v13423_v16, %v12852_v8 }
  0x42   : > { %20470 = vst [vmem:[#allocation51_spill] sm:$0xff] %v20469_v15  ;;  %10517 = vmatprep.subr.msk.mxu0 %vm19780_vm1, %v19791_v22  ;;  %10548 = vmatprep.subr.msk.mxu1 %vm13387_vm10, %v19791_v22  ;;  %vm13431_vm1 = vmand %vm471_vm3, %vm20442_vm0  ;;  %vm467_vm10 = vcmp.eq.s32.totalorder %v13401_v14, %v12858_v10  ;;  %v20476_v0 = vsel %vm13450_vm11, 4294967295, %v20475_v0  ;;  %v20479_v15 = vmov 0 }
  0x43   : > { %964 = vmatpush2.msra.mxu0 %v19800_v1  ;;  %1035 = vmatpush2.msra.mxu1 %v19800_v1  ;;  %v20473_v62 = vsel %vm13431_vm1, 4294967295, %v20472_v62  ;;  %20477 = vst [vmem:[#allocation54_spill] sm:$0xff] %v20476_v0  ;;  %vm13469_vm3 = vmand %vm467_vm10, %vm20442_vm0  ;;  %v13514_v0 = vadd.s32 128, %v12829_v2 }
  0x44   : > { %20474 = vst [vmem:[#allocation53_spill] sm:$0xff] %v20473_v62  ;;  %10518 = vmatprep.subr.msk.mxu0 %vm19784_vm13, %v19791_v22  ;;  %10549 = vmatprep.subr.msk.mxu1 %vm13409_vm2, %v19791_v22  ;;  %vm20478_vm13 = vcmp.eq.s32.totalorder %v13357_v61, %v12852_v8  ;;  %vm465_vm2 = vcmp.eq.s32.totalorder %v13423_v16, %v12858_v10  ;;  %v20480_v15 = vsel %vm13469_vm3, 4294967295, %v20479_v15  ;;  %vm20483_vm10 = vmmov %vm20442_vm0  ;;  %v20484_v62 = vmov 0 }
  0x45   : > { %966 = vmatpush2.msra.mxu0 %v19800_v1  ;;  %1037 = vmatpush2.msra.mxu1 %v19800_v1  ;;  %20481 = vst [vmem:[#allocation55_spill] sm:$0xff] %v20480_v15  ;;  %vm13486_vm0 = vmand %vm465_vm2, %vm20483_vm10  ;;  %v13509_v15 = vadd.s32 136, %v12829_v2 }
  0x46   : > { %10519 = vmatprep.subr.msk.mxu0 %vm20478_vm13, %v19791_v22  ;;  %10550 = vmatprep.subr.msk.mxu1 %vm13431_vm1, %v19791_v22  ;;  %vm20482_vm13 = vcmp.eq.s32.totalorder %v13379_v63, %v12852_v8  ;;  %v20485_v62 = vsel %vm13486_vm0, 4294967295, %v20484_v62  ;;  %20489 = vst [vmem:[#allocation58_spill] sm:$0xff] %v13514_v0  ;;  %vm20508_vm1 = vcmp.lt.s32.totalorder %v12868_v13, 15 }
  0x47   : > { %968 = vmatpush2.msra.mxu0 %v19800_v1  ;;  %1039 = vmatpush2.msra.mxu1 %v19800_v1  ;;  %20486 = vst [vmem:[#allocation56_spill] sm:$0xff] %v20485_v62  ;;  %20488 = vst [vmem:[#allocation57_spill] sm:$0xff] %v13509_v15  ;;  %vm463_vm2 = vcmp.eq.s32.totalorder %v13509_v15, %v12858_v10  ;;  %vm19797_vm10 = vcmp.eq.s32.totalorder %v13509_v15, %v12852_v8  ;;  %v20494_v62 = vmov 1.0  }
  0x48   : > { %10520 = vmatprep.subr.msk.mxu0 %vm20482_vm13, %v19791_v22  ;;  %10551 = vmatprep.subr.msk.mxu1 %vm13450_vm11, %v19791_v22  ;;  %vm20487_vm13 = vcmp.eq.s32.totalorder %v13401_v14, %v12852_v8  ;;  %vm20506_vm11 = vcmask 1043456  }
  0x49   : > { %970 = vmatpush2.msra.mxu0 %v19800_v1  ;;  %1041 = vmatpush2.msra.mxu1 %v19800_v1 }
  0x4a   : > { %10521 = vmatprep.subr.msk.mxu0 %vm20487_vm13, %v19791_v22  ;;  %10552 = vmatprep.subr.msk.mxu1 %vm13469_vm3, %v19791_v22  ;;  %vm20490_vm13 = vcmp.ge.s32.totalorder %v12855_v9, 1 }
  0x4b   : > { %972 = vmatpush2.msra.mxu0 %v19800_v1  ;;  %1043 = vmatpush2.msra.mxu1 %v19800_v1 }
  0x4c   : > { %10522 = vmatprep.subr.msk.mxu0 %vm19790_vm4, %v19791_v22  ;;  %10553 = vmatprep.subr.msk.mxu1 %vm13486_vm0, %v19791_v22  ;;  %vm13520_vm4 = vmand %vm463_vm2, %vm20490_vm13  ;;  %v20491_v22 = vmov 0  ;;  %vm461_vm0 = vcmp.eq.s32.totalorder %v13514_v0, %v12858_v10  ;;  %vm19798_vm2 = vcmp.eq.s32.totalorder %v13514_v0, %v12852_v8  ;;  %v13555_v10 = vadd.s32 4294967281, %v12838_v5 }
  0x4d   : > { %974 = vmatpush2.msra.mxu0 %v19800_v1  ;;  %1045 = vmatpush2.msra.mxu1 %v19800_v1  ;;  %v20492_v22 = vsel %vm13520_vm4, 4294967295, %v20491_v22  ;;  %vm13539_vm3 = vmand %vm461_vm0, %vm20490_vm13  ;;  %vm19808_vm0 = vcmp.lt.s32.totalorder %v12855_v9, 15 }
  0x4e   : > { %20493 = vst [vmem:[#allocation59_spill] sm:$0xff] %v20492_v22  ;;  %10523 = vmatprep.subr.msk.mxu0 %vm19797_vm10, %v20494_v62  ;;  %10554 = vmatprep.subr.msk.mxu1 %vm13520_vm4, %v20494_v62  ;;  %v20496_v60 = vsel %vm13539_vm3, 4294967295, %v20495_v60  ;;  %vm20498_vm10 = vcmask 1043456   ;;  %vm1090_vm13 = vcmp.eq.s32.totalorder %v12835_v4, %v13555_v10  ;;  %v13573_v22 = vadd.s32 4294967295, %v12838_v5 }
  0x4f   : > { %976 = vmatpush2.msra.mxu0 %v19800_v1  ;;  %1047 = vmatpush2.msra.mxu1 %v19800_v1  ;;  %20497 = vst [vmem:[#allocation60_spill] sm:$0xff] %v20496_v60  ;;  %v20499_v60 = vmov 0 }
  0x50   : > { %10524 = vmatprep.subr.msk.mxu0 %vm19798_vm2, %v20494_v62  ;;  %10555 = vmatprep.subr.msk.mxu1 %vm13539_vm3, %v20494_v62  ;;  %vm13562_vm2 = vmand %vm1090_vm13, %vm19808_vm0  ;;  %vm20502_vm3 = vcmp.lt.s32.totalorder %v12855_v9, 15  ;;  %vm1438_vm13 = vcmp.eq.s32.totalorder %v12835_v4, %v13576_v54 }
  0x51   : > { %978 = vmatpush2.msra.mxu0 %v19800_v1  ;;  %1049 = vmatpush2.msra.mxu1 %v19800_v1  ;;  %v20500_v60 = vsel %vm13562_vm2, 4294967295, %v20499_v60  ;;  %v13570_v1 = vadd.s32 4294967281, %v12831_v3 }
  0x52   : > { %10557 = vmatprep.subr.msk.mxu0 %vm20498_vm10, %v12865_v12  ;;  %20501 = vst [vmem:[#allocation61_spill] sm:$0xff] %v20500_v60  ;;  %10560 = vmatprep.subr.msk.mxu1 %vm13562_vm2, %v20494_v62  ;;  %vm1088_vm10 = vcmp.eq.s32.totalorder %v12846_v6, %v13555_v10  ;;  %vm1439_vm2 = vcmp.eq.s32.totalorder %v12835_v4, %v13573_v22  ;;  %v20503_v60 = vmov 0 }
  0x53   : > { %vm1087_vm0 = vcmp.eq.s32.totalorder %v12846_v6, %v13570_v1  ;;  %vm13587_vm4 = vmand %vm1088_vm10, %vm20502_vm3  ;;  %vm1085_vm3 = vcmp.eq.s32.totalorder %v12861_v11, %v13570_v1 }
  0x54   : > { %v20504_v60 = vsel %vm13587_vm4, 4294967295, %v20503_v60  ;;  %vm13601_vm8 = vmand %vm1087_vm0, %vm20508_vm1  ;;  %vm1436_vm1 = vcmp.eq.s32.totalorder %v12846_v6, %v13576_v54  ;;  %vm20517_vm0 = vcmp.ge.s32.totalorder %v12868_v13, 1 }
  0x55   : > { %20505 = vst [vmem:[#allocation62_spill] sm:$0xff] %v20504_v60  ;;  %vm20512_vm10 = vmmov %vm20506_vm11  ;;  %v20523_v60 = vmov 0 }
  0x56   : > { %vm13623_vm14 = vmand %vm1438_vm13, %vm20517_vm0  ;;  %vm1434_vm13 = vcmp.eq.s32.totalorder %v12861_v11, %v13576_v54  ;;  %vm20526_vm0 = vcmask 1043456  }
  0xd5   : > { %v704_v58 = vpop.f32.mrf.mxu0  ;;  %v910_v56 = vpop.f32.mrf.mxu1 }
  0xd7   : > { %v706_v52 = vpop.f32.mrf.mxu0  ;;  %v912_v50 = vpop.f32.mrf.mxu1 }
  0xd8   : > { %979 = vmatprep.mubr.f32.mxu0 %v912_v50  ;;  %1050 = vmatprep.mubr.f32.mxu1 %v706_v52  ;;  %v10556_v50 = vld [vmem:[%s19734_s1 + $0x10] sm:$0xff]  ;;  %v20509_v52 = vmov 0 }
  0xd9   : > { %980 = vmatmul.mubr.f32.vlgmr.msra.gmra.mxu0 %v910_v56  ;;  %1051 = vmatmul.mubr.f32.vlgmr.msra.gmra.mxu1 %v704_v58  ;;  %v20510_v52 = vsel %vm13601_vm8, 4294967295, %v20509_v52  ;;  %v20514_v56 = vmov 0  ;;  %v20518_v58 = vmov 0 }
  0xda   : > { %10558 = vmatpush1.msk.msra.mxu0 %vm20506_vm11, %v12849_v7  ;;  %1326 = vmatprep.mubr.f32.mxu0 %v20507_v48  ;;  %20511 = vst [vmem:[#allocation63_spill] sm:$0xff] %v20510_v52  ;;  %vm20513_vm11 = vcmp.ge.s32.totalorder %v12855_v9, 1  ;;  %v20519_v58 = vsel %vm13623_vm14, 4294967295, %v20518_v58  ;;  %v20528_v52 = vmov 0 }
  0xdb   : > { %10593 = vmatprep.subr.msk.mxu0 %vm20512_vm10, %v12865_v12  ;;  %1334 = vmatpush1.msra.mxu1 %v20507_v48  ;;  %vm13612_vm6 = vmand %vm1439_vm2, %vm20513_vm11  ;;  %20520 = vst [vmem:[#allocation65_spill] sm:$0xff] %v20519_v58  ;;  %vm1083_vm10 = vcmp.eq.s32.totalorder %v12897_v18, %v13570_v1  ;;  %vm20521_vm2 = vcmask 31744   ;;  %vm20522_vm11 = vcmp.lt.s32.totalorder %v12868_v13, 15  ;;  %v20546_v58 = vmov 0 }
  0xdc   : > { %v20515_v56 = vsel %vm13612_vm6, 4294967295, %v20514_v56  ;;  %10561 = vmatprep.subr.msk.mxu1 %vm13587_vm4, %v20494_v62  ;;  %vm13635_vm7 = vmand %vm1085_vm3, %vm20522_vm11  ;;  %vm1081_vm3 = vcmp.eq.s32.totalorder %v12922_v21, %v13570_v1 }
  0xdd   : > { %20516 = vst [vmem:[#allocation64_spill] sm:$0xff] %v20515_v56  ;;  %10559 = vmatmul.mubr.msk.f32.vlgmr.msra.gmra.mxu0 %vm20521_vm2, %v10556_v50  ;;  %10562 = vmatpush1.msk.msra.mxu1 %vm13601_vm8, %v20494_v62  ;;  %v20524_v60 = vsel %vm13635_vm7, 4294967295, %v20523_v60  ;;  %v10592_v50 = vld [vmem:[%s19734_s1 + $0x18] sm:$0xff]  ;;  %vm20527_vm2 = vcmp.ge.s32.totalorder %v12868_v13, 1  ;;  %v20534_v56 = vmov 0  ;;  %vm13682_vm15 = vmand %vm1081_vm3, %vm20522_vm11  ;;  %vm1077_vm3 = vcmp.eq.s32.totalorder %v12964_v26, %v13570_v1 }
  0xde   : > { %20525 = vst [vmem:[#allocation66_spill] sm:$0xff] %v20524_v60  ;;  %10594 = vmatpush1.msk.msra.mxu0 %vm20526_vm0, %v12849_v7  ;;  %1669 = vmatprep.mubr.f32.mxu0 %v20507_v48  ;;  %vm13649_vm8 = vmand %vm1436_vm1, %vm20527_vm2  ;;  %v20531_v7 = vmov 0  ;;  %vm1432_vm1 = vcmp.eq.s32.totalorder %v12897_v18, %v13576_v54  ;;  %v20539_v46 = vsel %vm13682_vm15, 4294967295, %v20538_v46  ;;  %v20604_v60 = vmov 0 }
  0xdf   : > { %v20529_v52 = vsel %vm13649_vm8, 4294967295, %v20528_v52  ;;  %10596 = vmatprep.subr.msk.mxu0 %vm13612_vm6, %v20494_v62  ;;  %1337 = vmatprep.subr.mxu1 %v20507_v48  ;;  %vm13661_vm0 = vmand %vm1083_vm10, %vm20522_vm11  ;;  %vm1079_vm6 = vcmp.eq.s32.totalorder %v12942_v24, %v13570_v1  ;;  %vm20537_vm10 = vcmask 31744   ;;  %20540 = vst [vmem:[#allocation70_spill] sm:$0xff] %v20539_v46  ;;  %v20557_v46 = vmov 0 }
  0xe0   : > { %20530 = vst [vmem:[#allocation67_spill] sm:$0xff] %v20529_v52  ;;  %v20532_v7 = vsel %vm13661_vm0, 4294967295, %v20531_v7  ;;  %10563 = vmatpush1.msk.msra.mxu1 %vm13635_vm7, %v20494_v62  ;;  %vm13672_vm4 = vmand %vm1434_vm13, %vm20527_vm2  ;;  %vm1430_vm7 = vcmp.eq.s32.totalorder %v12922_v21, %v13576_v54  ;;  %v20553_v52 = vmov 0 }
  0xe1   : > { %20533 = vst [vmem:[#allocation68_spill] sm:$0xff] %v20532_v7  ;;  %v20535_v56 = vsel %vm13672_vm4, 4294967295, %v20534_v56  ;;  %10595 = vmatmul.mubr.msk.f32.vlgmr.msra.gmra.mxu0 %vm20537_vm10, %v10592_v50  ;;  %1339 = vmatprep.subr.mxu1 %v20507_v48  ;;  %vm20541_vm13 = vmmov %vm20527_vm2  ;;  %v20542_v50 = vmov 0  ;;  %v20550_v7 = vmov 0 }
  0xe2   : > { %20536 = vst [vmem:[#allocation69_spill] sm:$0xff] %v20535_v56  ;;  %10597 = vmatpush1.msk.msra.mxu0 %vm13623_vm14, %v20494_v62  ;;  %10564 = vmatpush1.msk.msra.mxu1 %vm13661_vm0, %v20494_v62  ;;  %vm13696_vm2 = vmand %vm1432_vm1, %vm20541_vm13  ;;  %vm1428_vm14 = vcmp.eq.s32.totalorder %v12942_v24, %v13576_v54  ;;  %v20560_v56 = vmov 0 }
  0xe3   : > { %v20543_v50 = vsel %vm13696_vm2, 4294967295, %v20542_v50  ;;  %1678 = vmatprep.subr.mxu0 %v20507_v48  ;;  %1341 = vmatprep.subr.mxu1 %v20507_v48  ;;  %vm20545_vm10 = vmmov %vm20522_vm11 }
  0xe4   : > { %20544 = vst [vmem:[#allocation71_spill] sm:$0xff] %v20543_v50  ;;  %vm13706_vm11 = vmand %vm1079_vm6, %vm20545_vm10  ;;  %10598 = vmatpush1.msk.msra.mxu0 %vm13649_vm8, %v20494_v62  ;;  %10565 = vmatpush1.msk.msra.mxu1 %vm13682_vm15, %v20494_v62  ;;  %vm1075_vm6 = vcmp.eq.s32.totalorder %v12988_v28, %v13570_v1  ;;  %vm1426_vm15 = vcmp.eq.s32.totalorder %v12964_v26, %v13576_v54  ;;  %v20567_v50 = vmov 0 }
  0xe5   : > { %v20547_v58 = vsel %vm13706_vm11, 4294967295, %v20546_v58  ;;  %vm20549_vm1 = vmmov %vm20541_vm13  ;;  %1680 = vmatprep.subr.mxu0 %v20507_v48  ;;  %1343 = vmatprep.subr.mxu1 %v20507_v48 }
  0xe6   : > { %20548 = vst [vmem:[#allocation72_spill] sm:$0xff] %v20547_v58  ;;  %vm13720_vm13 = vmand %vm1430_vm7, %vm20549_vm1  ;;  %10599 = vmatpush1.msk.msra.mxu0 %vm13672_vm4, %v20494_v62  ;;  %10566 = vmatpush1.msk.msra.mxu1 %vm13706_vm11, %v20494_v62  ;;  %vm1424_vm11 = vcmp.eq.s32.totalorder %v12988_v28, %v13576_v54  ;;  %v20564_v58 = vmov 0 }
  0xe7   : > { %v20551_v7 = vsel %vm13720_vm13, 4294967295, %v20550_v7  ;;  %vm13730_vm8 = vmand %vm1077_vm3, %vm20545_vm10  ;;  %vm1073_vm3 = vcmp.eq.s32.totalorder %v13010_v30, %v13570_v1  ;;  %1682 = vmatprep.subr.mxu0 %v20507_v48  ;;  %1345 = vmatprep.subr.mxu1 %v20507_v48 }
  0xe8   : > { %20552 = vst [vmem:[#allocation73_spill] sm:$0xff] %v20551_v7  ;;  %v20554_v52 = vsel %vm13730_vm8, 4294967295, %v20553_v52  ;;  %vm20556_vm7 = vmmov %vm20549_vm1  ;;  %10600 = vmatpush1.msk.msra.mxu0 %vm13696_vm2, %v20494_v62  ;;  %10567 = vmatpush1.msk.msra.mxu1 %vm13730_vm8, %v20494_v62  ;;  %v20574_v7 = vmov 0 }
  0xe9   : > { %20555 = vst [vmem:[#allocation74_spill] sm:$0xff] %v20554_v52  ;;  %vm13744_vm1 = vmand %vm1428_vm14, %vm20556_vm7  ;;  %1684 = vmatprep.subr.mxu0 %v20507_v48  ;;  %1347 = vmatprep.subr.mxu1 %v20507_v48  ;;  %v20571_v52 = vmov 0 }
  0xea   : > { %v20558_v46 = vsel %vm13744_vm1, 4294967295, %v20557_v46  ;;  %vm13754_vm4 = vmand %vm1075_vm6, %vm20545_vm10  ;;  %vm1071_vm6 = vcmp.eq.s32.totalorder %v13032_v32, %v13570_v1  ;;  %10601 = vmatpush1.msk.msra.mxu0 %vm13720_vm13, %v20494_v62  ;;  %vm20582_vm13 = vcmp.lt.s32.totalorder %v12868_v13, 15 }
  0xeb   : > { %20559 = vst [vmem:[#allocation75_spill] sm:$0xff] %v20558_v46  ;;  %v20561_v56 = vsel %vm13754_vm4, 4294967295, %v20560_v56  ;;  %vm20563_vm14 = vmmov %vm20556_vm7  ;;  %10568 = vmatpush1.msk.msra.mxu1 %vm13754_vm4, %v20494_v62  ;;  %1686 = vmatprep.subr.mxu0 %v20507_v48  ;;  %v20583_v46 = vmov 0 }
  0xec   : > { %20562 = vst [vmem:[#allocation76_spill] sm:$0xff] %v20561_v56  ;;  %vm13768_vm7 = vmand %vm1426_vm15, %vm20563_vm14  ;;  %1349 = vmatprep.subr.mxu1 %v20507_v48  ;;  %10602 = vmatpush1.msk.msra.mxu0 %vm13744_vm1, %v20494_v62  ;;  %v20579_v56 = vmov 0 }
  0xed   : > { %v20565_v58 = vsel %vm13768_vm7, 4294967295, %v20564_v58  ;;  %vm13778_vm2 = vmand %vm1073_vm3, %vm20545_vm10  ;;  %vm1069_vm3 = vcmp.eq.s32.totalorder %v13054_v34, %v13570_v1  ;;  %1688 = vmatprep.subr.mxu0 %v20507_v48 }
  0xee   : > { %20566 = vst [vmem:[#allocation77_spill] sm:$0xff] %v20565_v58  ;;  %v20568_v50 = vsel %vm13778_vm2, 4294967295, %v20567_v50  ;;  %vm20570_vm15 = vmmov %vm20563_vm14  ;;  %10569 = vmatpush1.msk.msra.mxu1 %vm13778_vm2, %v20494_v62  ;;  %10603 = vmatpush1.msk.msra.mxu0 %vm13768_vm7, %v20494_v62  ;;  %vm20590_vm2 = vcmp.lt.s32.totalorder %v12868_v13, 15  ;;  %v20591_v58 = vmov 0 }
  0xef   : > { %20569 = vst [vmem:[#allocation78_spill] sm:$0xff] %v20568_v50  ;;  %vm13792_vm14 = vmand %vm1424_vm11, %vm20570_vm15  ;;  %1351 = vmatprep.subr.mxu1 %v20507_v48  ;;  %v20587_v50 = vmov 0  ;;  %1690 = vmatprep.subr.mxu0 %v20507_v48 }
  0xf0   : > { %v20572_v52 = vsel %vm13792_vm14, 4294967295, %v20571_v52  ;;  %vm13802_vm8 = vmand %vm1071_vm6, %vm20545_vm10  ;;  %vm1067_vm10 = vcmp.eq.s32.totalorder %v13076_v36, %v13570_v1  ;;  %10604 = vmatpush1.msk.msra.mxu0 %vm13792_vm14, %v20494_v62 }
  0xf1   : > { %20573 = vst [vmem:[#allocation79_spill] sm:$0xff] %v20572_v52  ;;  %v20575_v7 = vsel %vm13802_vm8, 4294967295, %v20574_v7  ;;  %vm20577_vm11 = vmmov %vm20570_vm15  ;;  %vm20578_vm15 = vcmp.eq.s32.totalorder %v13010_v30, %v13576_v54  ;;  %10570 = vmatpush1.msk.msra.mxu1 %vm13802_vm8, %v20494_v62  ;;  %1692 = vmatprep.subr.mxu0 %v20507_v48  ;;  %vm20598_vm8 = vcmp.lt.s32.totalorder %v12868_v13, 15  ;;  %v20599_v52 = vmov 0 }
  0xf2   : > { %20576 = vst [vmem:[#allocation80_spill] sm:$0xff] %v20575_v7  ;;  %vm13819_vm6 = vmand %vm20578_vm15, %vm20577_vm11  ;;  %vm20586_vm15 = vcmp.eq.s32.totalorder %v13032_v32, %v13576_v54  ;;  %1353 = vmatprep.subr.mxu1 %v20507_v48  ;;  %v20595_v7 = vmov 0 }
  0xf3   : > { %v20580_v56 = vsel %vm13819_vm6, 4294967295, %v20579_v56  ;;  %vm13829_vm1 = vmand %vm1069_vm3, %vm20582_vm13  ;;  %vm1065_vm3 = vcmp.eq.s32.totalorder %v13098_v38, %v13570_v1  ;;  %10605 = vmatpush1.msk.msra.mxu0 %vm13819_vm6, %v20494_v62 }
  0xf4   : > { %20581 = vst [vmem:[#allocation81_spill] sm:$0xff] %v20580_v56  ;;  %v20584_v46 = vsel %vm13829_vm1, 4294967295, %v20583_v46  ;;  %vm13846_vm13 = vmand %vm20586_vm15, %vm20577_vm11  ;;  %10571 = vmatpush1.msk.msra.mxu1 %vm13829_vm1, %v20494_v62  ;;  %vm20594_vm15 = vcmp.eq.s32.totalorder %v13054_v34, %v13576_v54  ;;  %1694 = vmatprep.subr.mxu0 %v20507_v48  ;;  %vm20607_vm1 = vcmp.lt.s32.totalorder %v12868_v13, 15  ;;  %v20608_v56 = vmov 0 }
  0xf5   : > { %20585 = vst [vmem:[#allocation82_spill] sm:$0xff] %v20584_v46  ;;  %v20588_v50 = vsel %vm13846_vm13, 4294967295, %v20587_v50  ;;  %vm13856_vm7 = vmand %vm1067_vm10, %vm20590_vm2  ;;  %vm1063_vm10 = vcmp.eq.s32.totalorder %v13120_v40, %v13570_v1  ;;  %1355 = vmatprep.subr.mxu1 %v20507_v48  ;;  %v13890_v46 = vadd.s32 240, %v12829_v2  ;;  %10606 = vmatpush1.msk.msra.mxu0 %vm13846_vm13, %v20494_v62 }
  0xf6   : > { %20589 = vst [vmem:[#allocation83_spill] sm:$0xff] %v20588_v50  ;;  %v20592_v58 = vsel %vm13856_vm7, 4294967295, %v20591_v58  ;;  %vm13873_vm2 = vmand %vm20594_vm15, %vm20577_vm11  ;;  %10572 = vmatpush1.msk.msra.mxu1 %vm13856_vm7, %v20494_v62  ;;  %vm1061_vm15 = vcmp.eq.s32.totalorder %v13142_v42, %v13570_v1  ;;  %1696 = vmatprep.subr.mxu0 %v20507_v48  ;;  %vm20615_vm7 = vcmp.lt.s32.totalorder %v12868_v13, 15  ;;  %v20616_v50 = vmov 0 }
  0xf7   : > { %20593 = vst [vmem:[#allocation84_spill] sm:$0xff] %v20592_v58  ;;  %v20596_v7 = vsel %vm13873_vm2, 4294967295, %v20595_v7  ;;  %vm13883_vm14 = vmand %vm1065_vm3, %vm20598_vm8  ;;  %vm20603_vm8 = vcmp.eq.s32.totalorder %v13076_v36, %v13576_v54  ;;  %1357 = vmatprep.subr.mxu1 %v20507_v48  ;;  %v20612_v58 = vmov 0  ;;  %10607 = vmatpush1.msk.msra.mxu0 %vm13873_vm2, %v20494_v62  ;;  %vm20624_vm2 = vcmp.lt.s32.totalorder %v12868_v13, 15 }
  0xf8   : > { %20597 = vst [vmem:[#allocation85_spill] sm:$0xff] %v20596_v7  ;;  %v20600_v52 = vsel %vm13883_vm14, 4294967295, %v20599_v52  ;;  %20602 = vst [vmem:[#allocation87_spill] sm:$0xff] %v13890_v46  ;;  %10573 = vmatpush1.msk.msra.mxu1 %vm13883_vm14, %v20494_v62  ;;  %vm1120_vm14 = vcmp.eq.s32.totalorder %v13890_v46, %v13555_v10  ;;  %1698 = vmatprep.subr.mxu0 %v20507_v48  ;;  %v20625_v7 = vmov 0 }
  0xf9   : > { %20601 = vst [vmem:[#allocation86_spill] sm:$0xff] %v20600_v52  ;;  %vm13903_vm3 = vmand %vm20603_vm8, %vm20577_vm11  ;;  %vm20611_vm8 = vcmp.eq.s32.totalorder %v13098_v38, %v13576_v54  ;;  %1359 = vmatprep.subr.mxu1 %v20507_v48  ;;  %v13964_v52 = vadd.s32 248, %v12829_v2 }
  0xfa   : > { %v20605_v60 = vsel %vm13903_vm3, 4294967295, %v20604_v60  ;;  %vm13913_vm6 = vmand %vm1063_vm10, %vm20607_vm1  ;;  %vm1059_vm10 = vcmp.eq.s32.totalorder %v12829_v2, %v13570_v1  ;;  %v20620_v1 = vmov 0  ;;  %10608 = vmatpush1.msk.msra.mxu0 %vm13903_vm3, %v20494_v62  ;;  %vm20633_vm3 = vcmp.eq.s32.totalorder %v13142_v42, %v13576_v54 }
  0xfb   : > { %20606 = vst [vmem:[#allocation88_spill] sm:$0xff] %v20605_v60  ;;  %v20609_v56 = vsel %vm13913_vm6, 4294967295, %v20608_v56  ;;  %vm13930_vm1 = vmand %vm20611_vm8, %vm20577_vm11  ;;  %10574 = vmatpush1.msk.msra.mxu1 %vm13913_vm6, %v20494_v62  ;;  %vm20619_vm8 = vcmp.eq.s32.totalorder %v13120_v40, %v13576_v54  ;;  %1700 = vmatprep.subr.mxu0 %v20507_v48  ;;  %v20634_v60 = vmov 0  ;;  %vm2091_vm0 = vcmp.eq.s32.totalorder %v13964_v52, %v14697_v37 }
  0xfc   : > { %20610 = vst [vmem:[#allocation89_spill] sm:$0xff] %v20609_v56  ;;  %v20613_v58 = vsel %vm13930_vm1, 4294967295, %v20612_v58  ;;  %vm13940_vm13 = vmand %vm1061_vm15, %vm20615_vm7  ;;  %1361 = vmatprep.subr.mxu1 %v20507_v48  ;;  %v20629_v56 = vmov 0  ;;  %10609 = vmatpush1.msk.msra.mxu0 %vm13930_vm1, %v20494_v62  ;;  %vm20640_vm1 = vcmp.eq.s32.totalorder %v12829_v2, %v13576_v54  ;;  %vm20847_vm5 = vcmp.eq.s32.totalorder %v13964_v52, %v12838_v5 }
  0xfd   : > { %20614 = vst [vmem:[#allocation90_spill] sm:$0xff] %v20613_v58  ;;  %v20617_v50 = vsel %vm13940_vm13, 4294967295, %v20616_v50  ;;  %vm13957_vm7 = vmand %vm20619_vm8, %vm20577_vm11  ;;  %vm1118_vm11 = vcmp.eq.s32.totalorder %v13174_v45, %v13555_v10  ;;  %10575 = vmatpush1.msk.msra.mxu1 %vm13940_vm13, %v20494_v62  ;;  %vm20628_vm8 = vcmp.lt.s32.totalorder %v12855_v9, 15  ;;  %1702 = vmatprep.subr.mxu0 %v20507_v48  ;;  %v20641_v58 = vmov 0 }
  0xfe   : > { %20618 = vst [vmem:[#allocation91_spill] sm:$0xff] %v20617_v50  ;;  %v20621_v1 = vsel %vm13957_vm7, 4294967295, %v20620_v1  ;;  %20623 = vst [vmem:[#allocation93_spill] sm:$0xff] %v13964_v52  ;;  %1363 = vmatprep.subr.mxu1 %v20507_v48  ;;  %v20637_v50 = vmov 0  ;;  %10610 = vmatpush1.msk.msra.mxu0 %vm13957_vm7, %v20494_v62 }
  0xff   : > { %20622 = vst [vmem:[#allocation92_spill] sm:$0xff] %v20621_v1  ;;  %vm13970_vm6 = vmand %vm1059_vm10, %vm20624_vm2  ;;  %vm20632_vm10 = vcmp.ge.s32.totalorder %v12868_v13, 1  ;;  %1704 = vmatprep.subr.mxu0 %v20507_v48  ;;  %v20648_v1 = vmov 0 }
 0x100   : > { %v20626_v7 = vsel %vm13970_vm6, 4294967295, %v20625_v7  ;;  %vm13984_vm15 = vmand %vm1120_vm14, %vm20628_vm8  ;;  %vm1116_vm14 = vcmp.eq.s32.totalorder %v13196_v47, %v13555_v10  ;;  %10576 = vmatpush1.msk.msra.mxu1 %vm13970_vm6, %v20494_v62 }
 0x101   : > { %20627 = vst [vmem:[#allocation94_spill] sm:$0xff] %v20626_v7  ;;  %v20630_v56 = vsel %vm13984_vm15, 4294967295, %v20629_v56  ;;  %vm13997_vm4 = vmand %vm20633_vm3, %vm20632_vm10  ;;  %vm1471_vm3 = vcmp.eq.s32.totalorder %v13964_v52, %v13573_v22  ;;  %10577 = vmatprep.subr.msk.mxu1 %vm13984_vm15, %v20494_v62  ;;  %v14399_v7 = vadd.s32 1, %v12831_v3 }
 0x102   : > { %20631 = vst [vmem:[#allocation95_spill] sm:$0xff] %v20630_v56  ;;  %v20635_v60 = vsel %vm13997_vm4, 4294967295, %v20634_v60  ;;  %vm14011_vm2 = vmand %vm1118_vm11, %vm20628_vm8  ;;  %vm1114_vm11 = vcmp.eq.s32.totalorder %v13220_v49, %v13555_v10  ;;  %1368 = vmatpush2.msra.mxu1 %v20507_v48  ;;  %v20644_v56 = vmov 0  ;;  %10611 = vmatpush1.msk.msra.mxu0 %vm13997_vm4, %v20494_v62 }
 0x103   : > { %20636 = vst [vmem:[#allocation96_spill] sm:$0xff] %v20635_v60  ;;  %v20638_v50 = vsel %vm14011_vm2, 4294967295, %v20637_v50  ;;  %vm14026_vm6 = vmand %vm20640_vm1, %vm20632_vm10  ;;  %vm1469_vm1 = vcmp.eq.s32.totalorder %v13890_v46, %v13573_v22  ;;  %10578 = vmatprep.subr.msk.mxu1 %vm14011_vm2, %v20494_v62  ;;  %vm20647_vm10 = vcmp.ge.s32.totalorder %v12855_v9, 1  ;;  %1706 = vmatprep.subr.mxu0 %v20507_v48  ;;  %v20654_v60 = vmov 0 }
 0x104   : > { %20639 = vst [vmem:[#allocation97_spill] sm:$0xff] %v20638_v50  ;;  %v20642_v58 = vsel %vm14026_vm6, 4294967295, %v20641_v58  ;;  %vm14038_vm15 = vmand %vm1116_vm14, %vm20628_vm8  ;;  %vm1112_vm14 = vcmp.eq.s32.totalorder %v13242_v51, %v13555_v10  ;;  %1370 = vmatpush2.msra.mxu1 %v20507_v48  ;;  %v20651_v50 = vmov 0  ;;  %10612 = vmatpush1.msk.msra.mxu0 %vm14026_vm6, %v20494_v62 }
 0x105   : > { %20643 = vst [vmem:[#allocation98_spill] sm:$0xff] %v20642_v58  ;;  %v20645_v56 = vsel %vm14038_vm15, 4294967295, %v20644_v56  ;;  %vm14050_vm7 = vmand %vm1471_vm3, %vm20647_vm10  ;;  %vm1467_vm3 = vcmp.eq.s32.totalorder %v13174_v45, %v13573_v22  ;;  %10579 = vmatprep.subr.msk.mxu1 %vm14038_vm15, %v20494_v62  ;;  %v20660_v58 = vmov 0 }
 0x106   : > { %20646 = vst [vmem:[#allocation99_spill] sm:$0xff] %v20645_v56  ;;  %v20649_v1 = vsel %vm14050_vm7, 4294967295, %v20648_v1  ;;  %vm14062_vm13 = vmand %vm1114_vm11, %vm20628_vm8  ;;  %vm1110_vm11 = vcmp.eq.s32.totalorder %v13264_v53, %v13555_v10  ;;  %1372 = vmatpush2.msra.mxu1 %v20507_v48  ;;  %v20657_v56 = vmov 0  ;;  %10613 = vmatprep.subr.msk.mxu0 %vm14050_vm7, %v20494_v62 }
 0x107   : > { %20650 = vst [vmem:[#allocation100_spill] sm:$0xff] %v20649_v1  ;;  %v20652_v50 = vsel %vm14062_vm13, 4294967295, %v20651_v50  ;;  %vm14074_vm4 = vmand %vm1469_vm1, %vm20647_vm10  ;;  %vm1465_vm1 = vcmp.eq.s32.totalorder %v13196_v47, %v13573_v22  ;;  %10580 = vmatprep.subr.msk.mxu1 %vm14062_vm13, %v20494_v62  ;;  %1709 = vmatpush2.msra.mxu0 %v20507_v48  ;;  %v20663_v1 = vmov 0  ;;  %vm1463_vm13 = vcmp.eq.s32.totalorder %v13220_v49, %v13573_v22 }
 0x108   : > { %20653 = vst [vmem:[#allocation101_spill] sm:$0xff] %v20652_v50  ;;  %v20655_v60 = vsel %vm14074_vm4, 4294967295, %v20654_v60  ;;  %vm14086_vm2 = vmand %vm1112_vm14, %vm20628_vm8  ;;  %vm1108_vm14 = vcmp.eq.s32.totalorder %v13291_v55, %v13555_v10  ;;  %1374 = vmatpush2.msra.mxu1 %v20507_v48  ;;  %10614 = vmatprep.subr.msk.mxu0 %vm14074_vm4, %v20494_v62  ;;  %v20667_v50 = vmov 0 }
 0x109   : > { %20656 = vst [vmem:[#allocation102_spill] sm:$0xff] %v20655_v60  ;;  %v20658_v56 = vsel %vm14086_vm2, 4294967295, %v20657_v56  ;;  %vm14100_vm6 = vmand %vm1467_vm3, %vm20647_vm10  ;;  %10581 = vmatprep.subr.msk.mxu1 %vm14086_vm2, %v20494_v62  ;;  %1711 = vmatpush2.msra.mxu0 %v20507_v48  ;;  %v20670_v60 = vmov 0  ;;  %vm1461_vm2 = vcmp.eq.s32.totalorder %v13242_v51, %v13573_v22 }
 0x10a   : > { %20659 = vst [vmem:[#allocation103_spill] sm:$0xff] %v20658_v56  ;;  %v20661_v58 = vsel %vm14100_vm6, 4294967295, %v20660_v58  ;;  %vm14110_vm7 = vmand %vm1110_vm11, %vm20628_vm8  ;;  %vm1106_vm11 = vcmp.eq.s32.totalorder %v13313_v57, %v13555_v10  ;;  %1376 = vmatpush2.msra.mxu1 %v20507_v48  ;;  %10615 = vmatprep.subr.msk.mxu0 %vm14100_vm6, %v20494_v62  ;;  %v20674_v56 = vmov 0 }
 0x10b   : > { %20662 = vst [vmem:[#allocation104_spill] sm:$0xff] %v20661_v58  ;;  %v20664_v1 = vsel %vm14110_vm7, 4294967295, %v20663_v1  ;;  %vm20666_vm3 = vmmov %vm20647_vm10  ;;  %10582 = vmatprep.subr.msk.mxu1 %vm14110_vm7, %v20494_v62  ;;  %1713 = vmatpush2.msra.mxu0 %v20507_v48  ;;  %v20677_v58 = vmov 0  ;;  %vm1459_vm7 = vcmp.eq.s32.totalorder %v13264_v53, %v13573_v22 }
 0x10c   : > { %20665 = vst [vmem:[#allocation105_spill] sm:$0xff] %v20664_v1  ;;  %vm14124_vm10 = vmand %vm1465_vm1, %vm20666_vm3  ;;  %1378 = vmatpush2.msra.mxu1 %v20507_v48  ;;  %v20681_v1 = vmov 0 }
 0x10d   : > { %v20668_v50 = vsel %vm14124_vm10, 4294967295, %v20667_v50  ;;  %vm14134_vm4 = vmand %vm1108_vm14, %vm20628_vm8  ;;  %vm1104_vm14 = vcmp.eq.s32.totalorder %v13335_v59, %v13555_v10  ;;  %10616 = vmatprep.subr.msk.mxu0 %vm14124_vm10, %v20494_v62 }
 0x10e   : > { %20669 = vst [vmem:[#allocation106_spill] sm:$0xff] %v20668_v50  ;;  %v20671_v60 = vsel %vm14134_vm4, 4294967295, %v20670_v60  ;;  %vm20673_vm1 = vmmov %vm20666_vm3  ;;  %10583 = vmatprep.subr.msk.mxu1 %vm14134_vm4, %v20494_v62  ;;  %1715 = vmatpush2.msra.mxu0 %v20507_v48  ;;  %v20684_v50 = vmov 0  ;;  %vm1457_vm4 = vcmp.eq.s32.totalorder %v13291_v55, %v13573_v22 }
 0x10f   : > { %20672 = vst [vmem:[#allocation107_spill] sm:$0xff] %v20671_v60  ;;  %vm14148_vm3 = vmand %vm1463_vm13, %vm20673_vm1  ;;  %1380 = vmatpush2.msra.mxu1 %v20507_v48  ;;  %v20688_v60 = vmov 0 }
 0x110   : > { %v20675_v56 = vsel %vm14148_vm3, 4294967295, %v20674_v56  ;;  %vm14158_vm6 = vmand %vm1106_vm11, %vm20628_vm8  ;;  %vm1102_vm11 = vcmp.eq.s32.totalorder %v13357_v61, %v13555_v10  ;;  %10617 = vmatprep.subr.msk.mxu0 %vm14148_vm3, %v20494_v62 }
 0x111   : > { %20676 = vst [vmem:[#allocation108_spill] sm:$0xff] %v20675_v56  ;;  %v20678_v58 = vsel %vm14158_vm6, 4294967295, %v20677_v58  ;;  %vm20680_vm13 = vmmov %vm20673_vm1  ;;  %10584 = vmatprep.subr.msk.mxu1 %vm14158_vm6, %v20494_v62  ;;  %1717 = vmatpush2.msra.mxu0 %v20507_v48  ;;  %v20691_v56 = vmov 0  ;;  %vm14705_vm6 = vcmp.eq.s32.totalorder %v13142_v42, %v12831_v3 }
 0x112   : > { %20679 = vst [vmem:[#allocation109_spill] sm:$0xff] %v20678_v58  ;;  %vm14172_vm1 = vmand %vm1461_vm2, %vm20680_vm13  ;;  %1382 = vmatpush2.msra.mxu1 %v20507_v48  ;;  %v20695_v58 = vmov 0  ;;  %v20829_v35 = vsel %vm14705_vm6, 4294967295, %v20828_v35 }
 0x113   : > { %v20682_v1 = vsel %vm14172_vm1, 4294967295, %v20681_v1  ;;  %vm14182_vm10 = vmand %vm1104_vm14, %vm20628_vm8  ;;  %vm1100_vm14 = vcmp.eq.s32.totalorder %v13379_v63, %v13555_v10  ;;  %10618 = vmatprep.subr.msk.mxu0 %vm14172_vm1, %v20494_v62  ;;  %20830 = vst [vmem:[#allocation147_spill] sm:$0xff] %v20829_v35 }
 0x114   : > { %20683 = vst [vmem:[#allocation110_spill] sm:$0xff] %v20682_v1  ;;  %v20685_v50 = vsel %vm14182_vm10, 4294967295, %v20684_v50  ;;  %vm20687_vm2 = vmmov %vm20680_vm13  ;;  %10585 = vmatprep.subr.msk.mxu1 %vm14182_vm10, %v20494_v62  ;;  %1719 = vmatpush2.msra.mxu0 %v20507_v48  ;;  %v20698_v1 = vmov 0 }
 0x115   : > { %20686 = vst [vmem:[#allocation111_spill] sm:$0xff] %v20685_v50  ;;  %vm14196_vm13 = vmand %vm1459_vm7, %vm20687_vm2  ;;  %1384 = vmatpush2.msra.mxu1 %v20507_v48  ;;  %v20701_v50 = vmov 0 }
 0x116   : > { %v20689_v60 = vsel %vm14196_vm13, 4294967295, %v20688_v60  ;;  %vm14206_vm3 = vmand %vm1102_vm11, %vm20628_vm8  ;;  %vm1455_vm11 = vcmp.eq.s32.totalorder %v13313_v57, %v13573_v22  ;;  %10619 = vmatprep.subr.msk.mxu0 %vm14196_vm13, %v20494_v62  ;;  %vm1449_vm13 = vcmp.eq.s32.totalorder %v13379_v63, %v13573_v22 }
 0x117   : > { %20690 = vst [vmem:[#allocation112_spill] sm:$0xff] %v20689_v60  ;;  %v20692_v56 = vsel %vm14206_vm3, 4294967295, %v20691_v56  ;;  %vm20694_vm7 = vmmov %vm20687_vm2  ;;  %10586 = vmatprep.subr.msk.mxu1 %vm14206_vm3, %v20494_v62  ;;  %1721 = vmatpush2.msra.mxu0 %v20507_v48  ;;  %v20705_v60 = vmov 0  ;;  %vm14677_vm3 = vcmp.eq.s32.totalorder %v13120_v40, %v12831_v3 }
 0x118   : > { %20693 = vst [vmem:[#allocation113_spill] sm:$0xff] %v20692_v56  ;;  %vm14218_vm2 = vmand %vm1457_vm4, %vm20694_vm7  ;;  %vm1453_vm4 = vcmp.eq.s32.totalorder %v13335_v59, %v13573_v22  ;;  %1386 = vmatpush2.msra.mxu1 %v20507_v48  ;;  %v20822_v39 = vsel %vm14677_vm3, 4294967295, %v20821_v39 }
 0x119   : > { %v20696_v58 = vsel %vm14218_vm2, 4294967295, %v20695_v58  ;;  %vm14228_vm1 = vmand %vm1100_vm14, %vm20628_vm8  ;;  %10620 = vmatprep.subr.msk.mxu0 %vm14218_vm2, %v20494_v62  ;;  %vm1096_vm2 = vcmp.eq.s32.totalorder %v13423_v16, %v13555_v10  ;;  %20823 = vst [vmem:[#allocation145_spill] sm:$0xff] %v20822_v39 }
 0x11a   : > { %20697 = vst [vmem:[#allocation114_spill] sm:$0xff] %v20696_v58  ;;  %v20699_v1 = vsel %vm14228_vm1, 4294967295, %v20698_v1  ;;  %vm14243_vm10 = vmand %vm1455_vm11, %vm20694_vm7  ;;  %10587 = vmatprep.subr.msk.mxu1 %vm14228_vm1, %v20494_v62  ;;  %1723 = vmatpush2.msra.mxu0 %v20507_v48  ;;  %vm1098_vm11 = vcmp.eq.s32.totalorder %v13401_v14, %v13555_v10  ;;  %v20709_v58 = vmov 0  ;;  %vm14652_vm1 = vcmp.eq.s32.totalorder %v13098_v38, %v12831_v3 }
 0x11b   : > { %20700 = vst [vmem:[#allocation115_spill] sm:$0xff] %v20699_v1  ;;  %v20702_v50 = vsel %vm14243_vm10, 4294967295, %v20701_v50  ;;  %vm20704_vm14 = vmmov %vm20694_vm7  ;;  %1388 = vmatpush2.msra.mxu1 %v20507_v48  ;;  %10621 = vmatprep.subr.msk.mxu0 %vm14243_vm10, %v20494_v62  ;;  %vm20708_vm7 = vcmp.lt.s32.totalorder %v12855_v9, 15  ;;  %v20815_v41 = vsel %vm14652_vm1, 4294967295, %v20814_v41 }
 0x11c   : > { %20703 = vst [vmem:[#allocation116_spill] sm:$0xff] %v20702_v50  ;;  %vm14257_vm8 = vmand %vm1453_vm4, %vm20704_vm14  ;;  %1725 = vmatpush2.msra.mxu0 %v20507_v48  ;;  %vm1451_vm4 = vcmp.eq.s32.totalorder %v13357_v61, %v13573_v22  ;;  %v20717_v50 = vmov 0 }
 0x11d   : > { %v20706_v60 = vsel %vm14257_vm8, 4294967295, %v20705_v60  ;;  %10622 = vmatprep.subr.msk.mxu0 %vm14257_vm8, %v20494_v62  ;;  %vm14276_vm14 = vmand %vm1098_vm11, %vm20708_vm7  ;;  %vm20712_vm8 = vcmp.ge.s32.totalorder %v12855_v9, 1  ;;  %20816 = vst [vmem:[#allocation143_spill] sm:$0xff] %v20815_v41  ;;  %v11017_v41 = vld [vmem:[%s19736_s3 + $0x60] sm:$0xff] }
 0x11e   : > { %20707 = vst [vmem:[#allocation117_spill] sm:$0xff] %v20706_v60  ;;  %1727 = vmatpush2.msra.mxu0 %v20507_v48  ;;  %v20710_v58 = vsel %vm14276_vm14, 4294967295, %v20709_v58  ;;  %10588 = vmatprep.subr.msk.mxu1 %vm14276_vm14, %v20494_v62  ;;  %vm14285_vm10 = vmand %vm1451_vm4, %vm20712_vm8  ;;  %v20713_v60 = vmov 0  ;;  %vm20754_vm14 = vcmask 31744  }
 0x11f   : > { %20711 = vst [vmem:[#allocation118_spill] sm:$0xff] %v20710_v58  ;;  %v20714_v60 = vsel %vm14285_vm10, 4294967295, %v20713_v60  ;;  %10623 = vmatprep.subr.msk.mxu0 %vm14285_vm10, %v20494_v62  ;;  %1390 = vmatpush2.msra.mxu1 %v20507_v48  ;;  %vm20716_vm11 = vmmov %vm20708_vm7  ;;  %v20720_v58 = vmov 0  ;;  %vm1094_vm10 = vcmp.eq.s32.totalorder %v13509_v15, %v13555_v10 }
 0x120   : > { %20715 = vst [vmem:[#allocation119_spill] sm:$0xff] %v20714_v60  ;;  %vm14299_vm7 = vmand %vm1096_vm2, %vm20716_vm11  ;;  %1729 = vmatpush2.msra.mxu0 %v20507_v48  ;;  %vm1447_vm2 = vcmp.eq.s32.totalorder %v13401_v14, %v13573_v22  ;;  %v20723_v60 = vmov 0 }
 0x121   : > { %v20718_v50 = vsel %vm14299_vm7, 4294967295, %v20717_v50  ;;  %10589 = vmatprep.subr.msk.mxu1 %vm14299_vm7, %v20494_v62  ;;  %vm14309_vm4 = vmand %vm1449_vm13, %vm20712_vm8 }
 0x122   : > { %20719 = vst [vmem:[#allocation120_spill] sm:$0xff] %v20718_v50  ;;  %v20721_v58 = vsel %vm14309_vm4, 4294967295, %v20720_v58  ;;  %10624 = vmatprep.subr.msk.mxu0 %vm14309_vm4, %v20494_v62  ;;  %1392 = vmatpush2.msra.mxu1 %v20507_v48  ;;  %vm14323_vm7 = vmand %vm1094_vm10, %vm20716_vm11  ;;  %v20727_v50 = vmov 0  ;;  %vm1092_vm4 = vcmp.eq.s32.totalorder %v13514_v0, %v13555_v10  ;;  %vm1445_vm10 = vcmp.eq.s32.totalorder %v13423_v16, %v13573_v22 }
 0x123   : > { %20722 = vst [vmem:[#allocation121_spill] sm:$0xff] %v20721_v58  ;;  %v20724_v60 = vsel %vm14323_vm7, 4294967295, %v20723_v60  ;;  %1731 = vmatpush2.msra.mxu0 %v20507_v48  ;;  %10590 = vmatprep.subr.msk.mxu1 %vm14323_vm7, %v20494_v62  ;;  %vm20726_vm13 = vmmov %vm20712_vm8  ;;  %v20730_v58 = vmov 0  ;;  %v20734_v10 = vmov 0 }
 0x124   : > { %20725 = vst [vmem:[#allocation122_spill] sm:$0xff] %v20724_v60  ;;  %vm14333_vm8 = vmand %vm1447_vm2, %vm20726_vm13  ;;  %1394 = vmatpush2.msra.mxu1 %v20507_v48 }
 0x125   : > { %v20728_v50 = vsel %vm14333_vm8, 4294967295, %v20727_v50  ;;  %10625 = vmatprep.subr.msk.mxu0 %vm14333_vm8, %v20494_v62  ;;  %vm14347_vm7 = vmand %vm1092_vm4, %vm20716_vm11  ;;  %vm1443_vm8 = vcmp.eq.s32.totalorder %v13509_v15, %v13573_v22 }
 0x126   : > { %20729 = vst [vmem:[#allocation123_spill] sm:$0xff] %v20728_v50  ;;  %v20731_v58 = vsel %vm14347_vm7, 4294967295, %v20730_v58  ;;  %1733 = vmatpush2.msra.mxu0 %v20507_v48  ;;  %10591 = vmatprep.subr.msk.mxu1 %vm14347_vm7, %v20494_v62  ;;  %vm20733_vm2 = vmmov %vm20726_vm13  ;;  %v20738_v50 = vmov 0 }
 0x127   : > { %20732 = vst [vmem:[#allocation124_spill] sm:$0xff] %v20731_v58  ;;  %vm14357_vm13 = vmand %vm1445_vm10, %vm20733_vm2  ;;  %1396 = vmatpush2.msra.mxu1 %v20507_v48  ;;  %vm1441_vm10 = vcmp.eq.s32.totalorder %v13514_v0, %v13573_v22 }
 0x128   : > { %v20735_v10 = vsel %vm14357_vm13, 4294967295, %v20734_v10  ;;  %10626 = vmatprep.subr.msk.mxu0 %vm14357_vm13, %v20494_v62  ;;  %vm20737_vm4 = vmmov %vm20733_vm2  ;;  %vm20741_vm2 = vcmask 1043456  }
 0x129   : > { %20736 = vst [vmem:[#allocation125_spill] sm:$0xff] %v20735_v10  ;;  %vm14369_vm11 = vmand %vm1443_vm8, %vm20737_vm4  ;;  %1735 = vmatpush2.msra.mxu0 %v20507_v48  ;;  %10630 = vmatprep.subr.msk.mxu1 %vm20741_vm2, %v12865_v12  ;;  %v20743_v10 = vmov 0 }
 0x12a   : > { %v20739_v50 = vsel %vm14369_vm11, 4294967295, %v20738_v50  ;;  %10627 = vmatprep.subr.msk.mxu0 %vm14369_vm11, %v20494_v62  ;;  %vm20742_vm13 = vmmov %vm20737_vm4  ;;  %vm2056_vm4 = vcmp.eq.s32.totalorder %v12846_v6, %v14399_v7  ;;  %vm2054_vm11 = vcmp.eq.s32.totalorder %v12861_v11, %v14399_v7 }
 0x12b   : > { %20740 = vst [vmem:[#allocation126_spill] sm:$0xff] %v20739_v50  ;;  %vm14383_vm7 = vmand %vm1441_vm10, %vm20742_vm13  ;;  %1737 = vmatpush2.msra.mxu0 %v20507_v48  ;;  %vm2058_vm10 = vcmp.eq.s32.totalorder %v12835_v4, %v14399_v7 }
 0x12c   : > { %v20744_v10 = vsel %vm14383_vm7, 4294967295, %v20743_v10  ;;  %10628 = vmatprep.subr.msk.mxu0 %vm14383_vm7, %v20494_v62  ;;  %vm20746_vm8 = vmmov %vm20741_vm2  ;;  %vm20749_vm7 = vcmp.eq.s32.totalorder %v12835_v4, %v12831_v3 }
 0x12d   : > { %20745 = vst [vmem:[#allocation127_spill] sm:$0xff] %v20744_v10  ;;  %1739 = vmatpush2.msra.mxu0 %v20507_v48  ;;  %vm20747_vm13 = vmmov %vm20741_vm2  ;;  %vm20748_vm2 = vcmask 31744  }
 0x12e   : > { %10666 = vmatprep.subr.msk.mxu0 %vm20746_vm8, %v12865_v12 }
 0x199   : > { %v981_v22 = vpop.f32.mrf.mxu0  ;;  %v1052_v50 = vpop.f32.mrf.mxu1 }
 0x19a   : > { %v14394_v58 = vadd.f32 %v1052_v50, %v981_v22  ;;  %v10629_v50 = vld [vmem:[%s19734_s1 + $0x20] sm:$0xff] }
 0x19b   : > { %v14396_v60 = vpop.f32.mrf.mxu0 }
 0x19d   : > { %v1328_v1 = vpop.f32.mrf.mxu0 }
 0x19f   : > { %v1330_v56 = vpop.f32.mrf.mxu0 }
 0x1a0   : > { %1397 = vmatprep.mubr.f32.mxu1 %v1330_v56  ;;  %v10665_v56 = vld [vmem:[%s19734_s1 + $0x28] sm:$0xff] }
 0x1a1   : > { %1398 = vmatmul.mubr.f32.vlgmr.msra.gmra.mxu1 %v1328_v1  ;;  %v1671_v10 = vpop.f32.mrf.mxu0  ;;  %v20751_v1 = vmov 0 }
 0x1a2   : > { %10631 = vmatpush1.msk.msra.mxu1 %vm20747_vm13, %v14402_v44  ;;  %1946 = vmatprep.mubr.f32.mxu1 %v20507_v48  ;;  %vm2052_vm13 = vcmp.eq.s32.totalorder %v12897_v18, %v14399_v7 }
 0x1a3   : > { %v1673_v22 = vpop.f32.mrf.mxu0  ;;  %1953 = vmatprep.subr.mxu1 %v20507_v48 }
 0x1a4   : > { %1740 = vmatprep.mubr.f32.mxu0 %v1673_v22  ;;  %v20767_v22 = vmov 0 }
 0x1a5   : > { %1741 = vmatmul.mubr.f32.vlgmr.msra.gmra.mxu0 %v1671_v10  ;;  %10632 = vmatmul.mubr.msk.f32.vlgmr.msra.gmra.mxu1 %vm20748_vm2, %v10629_v50  ;;  %vm20750_vm2 = vcmp.lt.s32.totalorder %v12868_v13, 15  ;;  %v20757_v10 = vmov 0  ;;  %v20762_v50 = vmov 0 }
 0x1a6   : > { %10667 = vmatpush1.msk.msra.mxu0 %vm20746_vm8, %v14402_v44  ;;  %2289 = vmatprep.mubr.f32.mxu0 %v20507_v48  ;;  %vm14433_vm8 = vmand %vm2058_vm10, %vm20750_vm2 }
 0x1a7   : > { %10633 = vmatpush1.msk.msra.mxu1 %vm20749_vm7, %v20494_v62  ;;  %2296 = vmatprep.subr.mxu0 %v20507_v48  ;;  %v20752_v1 = vsel %vm14433_vm8, 4294967295, %v20751_v1  ;;  %vm20755_vm7 = vcmp.eq.s32.totalorder %v12846_v6, %v12831_v3  ;;  %vm20756_vm10 = vmmov %vm20750_vm2 }
 0x1a8   : > { %20753 = vst [vmem:[#allocation128_spill] sm:$0xff] %v20752_v1  ;;  %1955 = vmatprep.subr.mxu1 %v20507_v48  ;;  %vm14449_vm2 = vmand %vm2056_vm4, %vm20756_vm10  ;;  %v20800_v1 = vmov 0 }
 0x1a9   : > { %10668 = vmatmul.mubr.msk.f32.vlgmr.msra.gmra.mxu0 %vm20754_vm14, %v10665_v56  ;;  %10634 = vmatpush1.msk.msra.mxu1 %vm20755_vm7, %v20494_v62  ;;  %v20758_v10 = vsel %vm14449_vm2, 4294967295, %v20757_v10  ;;  %vm20760_vm7 = vcmp.eq.s32.totalorder %v12861_v11, %v12831_v3  ;;  %vm20761_vm4 = vmmov %vm20756_vm10  ;;  %v20772_v56 = vmov 0  ;;  %vm14554_vm14 = vcmp.eq.s32.totalorder %v13010_v30, %v12831_v3 }
 0x1aa   : > { %20759 = vst [vmem:[#allocation129_spill] sm:$0xff] %v20758_v10  ;;  %1957 = vmatprep.subr.mxu1 %v20507_v48  ;;  %10669 = vmatpush1.msk.msra.mxu0 %vm14433_vm8, %v20494_v62  ;;  %vm14468_vm10 = vmand %vm2054_vm11, %vm20761_vm4  ;;  %vm20765_vm8 = vcmp.eq.s32.totalorder %v12897_v18, %v12831_v3  ;;  %v20792_v10 = vmov 0 }
 0x1ab   : > { %10635 = vmatpush1.msk.msra.mxu1 %vm20760_vm7, %v20494_v62  ;;  %2298 = vmatprep.subr.mxu0 %v20507_v48  ;;  %v20763_v50 = vsel %vm14468_vm10, 4294967295, %v20762_v50  ;;  %vm2050_vm7 = vcmp.eq.s32.totalorder %v12922_v21, %v14399_v7  ;;  %vm20766_vm11 = vmmov %vm20761_vm4 }
 0x1ac   : > { %20764 = vst [vmem:[#allocation130_spill] sm:$0xff] %v20763_v50  ;;  %1959 = vmatprep.subr.mxu1 %v20507_v48  ;;  %10670 = vmatpush1.msk.msra.mxu0 %vm14449_vm2, %v20494_v62  ;;  %vm14487_vm4 = vmand %vm2052_vm13, %vm20766_vm11  ;;  %vm20770_vm2 = vcmp.eq.s32.totalorder %v12922_v21, %v12831_v3  ;;  %v20777_v50 = vmov 0 }
 0x1ad   : > { %10636 = vmatpush1.msk.msra.mxu1 %vm20765_vm8, %v20494_v62  ;;  %2300 = vmatprep.subr.mxu0 %v20507_v48  ;;  %v20768_v22 = vsel %vm14487_vm4, 4294967295, %v20767_v22  ;;  %vm2048_vm8 = vcmp.eq.s32.totalorder %v12942_v24, %v14399_v7  ;;  %vm20771_vm13 = vmmov %vm20766_vm11 }
 0x1ae   : > { %20769 = vst [vmem:[#allocation131_spill] sm:$0xff] %v20768_v22  ;;  %1961 = vmatprep.subr.mxu1 %v20507_v48  ;;  %10671 = vmatpush1.msk.msra.mxu0 %vm14468_vm10, %v20494_v62  ;;  %vm14506_vm11 = vmand %vm2050_vm7, %vm20771_vm13  ;;  %vm20775_vm10 = vcmp.eq.s32.totalorder %v12942_v24, %v12831_v3  ;;  %v20782_v22 = vmov 0 }
 0x1af   : > { %10637 = vmatpush1.msk.msra.mxu1 %vm20770_vm2, %v20494_v62  ;;  %2302 = vmatprep.subr.mxu0 %v20507_v48  ;;  %v20773_v56 = vsel %vm14506_vm11, 4294967295, %v20772_v56  ;;  %vm2046_vm2 = vcmp.eq.s32.totalorder %v12964_v26, %v14399_v7  ;;  %vm20776_vm7 = vmmov %vm20771_vm13 }
 0x1b0   : > { %20774 = vst [vmem:[#allocation132_spill] sm:$0xff] %v20773_v56  ;;  %1963 = vmatprep.subr.mxu1 %v20507_v48  ;;  %10672 = vmatpush1.msk.msra.mxu0 %vm14487_vm4, %v20494_v62  ;;  %vm14525_vm13 = vmand %vm2048_vm8, %vm20776_vm7  ;;  %vm20780_vm4 = vcmp.eq.s32.totalorder %v12964_v26, %v12831_v3  ;;  %v20785_v56 = vmov 0 }
 0x1b1   : > { %10638 = vmatpush1.msk.msra.mxu1 %vm20775_vm10, %v20494_v62  ;;  %2304 = vmatprep.subr.mxu0 %v20507_v48  ;;  %v20778_v50 = vsel %vm14525_vm13, 4294967295, %v20777_v50  ;;  %vm2044_vm10 = vcmp.eq.s32.totalorder %v12988_v28, %v14399_v7  ;;  %vm20781_vm8 = vmmov %vm20776_vm7  ;;  %v20786_v56 = vsel %vm14554_vm14, 4294967295, %v20785_v56 }
 0x1b2   : > { %20779 = vst [vmem:[#allocation133_spill] sm:$0xff] %v20778_v50  ;;  %1965 = vmatprep.subr.mxu1 %v20507_v48  ;;  %10673 = vmatpush1.msk.msra.mxu0 %vm14506_vm11, %v20494_v62  ;;  %vm14544_vm7 = vmand %vm2046_vm2, %vm20781_vm8  ;;  %vm20788_vm2 = vcmp.eq.s32.totalorder %v12988_v28, %v12831_v3  ;;  %v20789_v50 = vmov 0 }
 0x1b3   : > { %10639 = vmatpush1.msk.msra.mxu1 %vm20780_vm4, %v20494_v62  ;;  %2306 = vmatprep.subr.mxu0 %v20507_v48  ;;  %v20783_v22 = vsel %vm14544_vm7, 4294967295, %v20782_v22  ;;  %20787 = vst [vmem:[#allocation135_spill] sm:$0xff] %v20786_v56  ;;  %vm14567_vm11 = vmand %vm2044_vm10, %vm20781_vm8  ;;  %vm14577_vm4 = vcmp.eq.s32.totalorder %v13032_v32, %v12831_v3 }
 0x1b4   : > { %20784 = vst [vmem:[#allocation134_spill] sm:$0xff] %v20783_v22  ;;  %1967 = vmatprep.subr.mxu1 %v20507_v48  ;;  %10674 = vmatpush1.msk.msra.mxu0 %vm14525_vm13, %v20494_v62  ;;  %v20790_v50 = vsel %vm14567_vm11, 4294967295, %v20789_v50  ;;  %v20793_v10 = vsel %vm14577_vm4, 4294967295, %v20792_v10  ;;  %vm20795_vm10 = vmmov %vm20781_vm8  ;;  %vm20796_vm8 = vcmp.eq.s32.totalorder %v13010_v30, %v14399_v7  ;;  %v20797_v22 = vmov 0 }
 0x1b5   : > { %10640 = vmatpush1.msk.msra.mxu1 %vm20788_vm2, %v20494_v62  ;;  %2308 = vmatprep.subr.mxu0 %v20507_v48  ;;  %20791 = vst [vmem:[#allocation136_spill] sm:$0xff] %v20790_v50  ;;  %20794 = vst [vmem:[#allocation137_spill] sm:$0xff] %v20793_v10  ;;  %vm14602_vm2 = vcmp.eq.s32.totalorder %v13054_v34, %v12831_v3  ;;  %v20804_v50 = vmov 0  ;;  %vm14627_vm13 = vcmp.eq.s32.totalorder %v13076_v36, %v12831_v3 }
 0x1b6   : > { %1969 = vmatprep.subr.mxu1 %v20507_v48  ;;  %10675 = vmatpush1.msk.msra.mxu0 %vm14544_vm7, %v20494_v62  ;;  %vm14592_vm7 = vmand %vm20796_vm8, %vm20795_vm10  ;;  %v20801_v1 = vsel %vm14602_vm2, 4294967295, %v20800_v1  ;;  %vm20803_vm8 = vcmp.eq.s32.totalorder %v13032_v32, %v14399_v7  ;;  %v20808_v43 = vsel %vm14627_vm13, 4294967295, %v20807_v43 }
 0x1b7   : > { %10641 = vmatpush1.msk.msra.mxu1 %vm14554_vm14, %v20494_v62  ;;  %2310 = vmatprep.subr.mxu0 %v20507_v48  ;;  %v20798_v22 = vsel %vm14592_vm7, 4294967295, %v20797_v22  ;;  %20802 = vst [vmem:[#allocation139_spill] sm:$0xff] %v20801_v1  ;;  %20809 = vst [vmem:[#allocation141_spill] sm:$0xff] %v20808_v43 }
 0x1b8   : > { %20799 = vst [vmem:[#allocation138_spill] sm:$0xff] %v20798_v22  ;;  %1971 = vmatprep.subr.mxu1 %v20507_v48  ;;  %10676 = vmatpush1.msk.msra.mxu0 %vm14567_vm11, %v20494_v62  ;;  %vm14617_vm11 = vmand %vm20803_vm8, %vm20795_vm10  ;;  %vm20810_vm8 = vcmp.eq.s32.totalorder %v13054_v34, %v14399_v7  ;;  %v20811_v22 = vmov 0 }
 0x1b9   : > { %10642 = vmatpush1.msk.msra.mxu1 %vm14577_vm4, %v20494_v62  ;;  %2312 = vmatprep.subr.mxu0 %v20507_v48  ;;  %v20805_v50 = vsel %vm14617_vm11, 4294967295, %v20804_v50 }
 0x1ba   : > { %20806 = vst [vmem:[#allocation140_spill] sm:$0xff] %v20805_v50  ;;  %1973 = vmatprep.subr.mxu1 %v20507_v48  ;;  %10677 = vmatpush1.msk.msra.mxu0 %vm14592_vm7, %v20494_v62  ;;  %vm14642_vm7 = vmand %vm20810_vm8, %vm20795_vm10  ;;  %vm20817_vm8 = vcmp.eq.s32.totalorder %v13076_v36, %v14399_v7  ;;  %v20818_v50 = vmov 0 }
 0x1bb   : > { %10643 = vmatpush1.msk.msra.mxu1 %vm14602_vm2, %v20494_v62  ;;  %2314 = vmatprep.subr.mxu0 %v20507_v48  ;;  %v20812_v22 = vsel %vm14642_vm7, 4294967295, %v20811_v22 }
 0x1bc   : > { %20813 = vst [vmem:[#allocation142_spill] sm:$0xff] %v20812_v22  ;;  %1975 = vmatprep.subr.mxu1 %v20507_v48  ;;  %10678 = vmatpush1.msk.msra.mxu0 %vm14617_vm11, %v20494_v62  ;;  %vm14667_vm11 = vmand %vm20817_vm8, %vm20795_vm10  ;;  %vm20824_vm8 = vcmp.eq.s32.totalorder %v13098_v38, %v14399_v7  ;;  %v20825_v22 = vmov 0 }
 0x1bd   : > { %10644 = vmatpush1.msk.msra.mxu1 %vm14627_vm13, %v20494_v62  ;;  %2316 = vmatprep.subr.mxu0 %v20507_v48  ;;  %v20819_v50 = vsel %vm14667_vm11, 4294967295, %v20818_v50 }
 0x1be   : > { %20820 = vst [vmem:[#allocation144_spill] sm:$0xff] %v20819_v50  ;;  %1977 = vmatprep.subr.mxu1 %v20507_v48  ;;  %10679 = vmatpush1.msk.msra.mxu0 %vm14642_vm7, %v20494_v62  ;;  %vm14692_vm7 = vmand %vm20824_vm8, %vm20795_vm10  ;;  %v20833_v50 = vmov 0 }
 0x1bf   : > { %10645 = vmatpush1.msk.msra.mxu1 %vm14652_vm1, %v20494_v62  ;;  %2318 = vmatprep.subr.mxu0 %v20507_v48  ;;  %v20826_v22 = vsel %vm14692_vm7, 4294967295, %v20825_v22  ;;  %vm20831_vm8 = vmmov %vm20795_vm10  ;;  %vm14730_vm10 = vcmp.eq.s32.totalorder %v12829_v2, %v12831_v3 }
 0x1c0   : > { %20827 = vst [vmem:[#allocation146_spill] sm:$0xff] %v20826_v22  ;;  %1979 = vmatprep.subr.mxu1 %v20507_v48  ;;  %10680 = vmatpush1.msk.msra.mxu0 %vm14667_vm11, %v20494_v62  ;;  %vm20832_vm11 = vcmp.eq.s32.totalorder %v13120_v40, %v14399_v7  ;;  %v20837_v33 = vsel %vm14730_vm10, 4294967295, %v20836_v33  ;;  %v20840_v22 = vmov 0 }
 0x1c1   : > { %10646 = vmatpush1.msk.msra.mxu1 %vm14677_vm3, %v20494_v62  ;;  %2320 = vmatprep.subr.mxu0 %v20507_v48  ;;  %vm14720_vm15 = vmand %vm20832_vm11, %vm20831_vm8  ;;  %20838 = vst [vmem:[#allocation149_spill] sm:$0xff] %v20837_v33  ;;  %vm20843_vm11 = vcmp.eq.s32.totalorder %v12829_v2, %v14399_v7 }
 0x1c2   : > { %v20834_v50 = vsel %vm14720_vm15, 4294967295, %v20833_v50  ;;  %1981 = vmatprep.subr.mxu1 %v20507_v48  ;;  %10681 = vmatpush1.msk.msra.mxu0 %vm14692_vm7, %v20494_v62  ;;  %vm20839_vm7 = vcmp.eq.s32.totalorder %v13142_v42, %v14399_v7  ;;  %vm14768_vm9 = vmand %vm20843_vm11, %vm20831_vm8  ;;  %vm20009_vm11 = vcmp.eq.s32.totalorder %v13379_v63, %v12838_v5 }
 0x1c3   : > { %20835 = vst [vmem:[#allocation148_spill] sm:$0xff] %v20834_v50  ;;  %10647 = vmatpush1.msk.msra.mxu1 %vm14705_vm6, %v20494_v62  ;;  %2322 = vmatprep.subr.mxu0 %v20507_v48  ;;  %vm14747_vm12 = vmand %vm20839_vm7, %vm20831_vm8  ;;  %v20845_v31 = vsel %vm14768_vm9, 4294967295, %v20844_v31  ;;  %vm20848_vm7 = vcmp.lt.s32.totalorder %v12855_v9, 15  ;;  %v20849_v50 = vmov 0  ;;  %vm20852_vm8 = vcmp.eq.s32.totalorder %v13890_v46, %v12838_v5 }
 0x1c4   : > { %v20841_v22 = vsel %vm14747_vm12, 4294967295, %v20840_v22  ;;  %1983 = vmatprep.subr.mxu1 %v20507_v48  ;;  %10682 = vmatpush1.msk.msra.mxu0 %vm14720_vm15, %v20494_v62  ;;  %20846 = vst [vmem:[#allocation151_spill] sm:$0xff] %v20845_v31  ;;  %vm2089_vm15 = vcmp.eq.s32.totalorder %v13890_v46, %v14697_v37  ;;  %v20859_v31 = vmov 0 }
 0x1c5   : > { %20842 = vst [vmem:[#allocation150_spill] sm:$0xff] %v20841_v22  ;;  %10648 = vmatpush1.msk.msra.mxu1 %vm14730_vm10, %v20494_v62  ;;  %2324 = vmatprep.subr.mxu0 %v20507_v48  ;;  %vm14783_vm10 = vmand %vm2091_vm0, %vm20848_vm7  ;;  %v20854_v22 = vmov 0 }
 0x1c6   : > { %10649 = vmatprep.subr.msk.mxu1 %vm20847_vm5, %v20494_v62  ;;  %10683 = vmatpush1.msk.msra.mxu0 %vm14747_vm12, %v20494_v62  ;;  %v20850_v50 = vsel %vm14783_vm10, 4294967295, %v20849_v50  ;;  %vm2087_vm5 = vcmp.eq.s32.totalorder %v13174_v45, %v14697_v37  ;;  %vm20853_vm0 = vmmov %vm20848_vm7 }
 0x1c7   : > { %20851 = vst [vmem:[#allocation152_spill] sm:$0xff] %v20850_v50  ;;  %1986 = vmatpush2.msra.mxu1 %v20507_v48  ;;  %2326 = vmatprep.subr.mxu0 %v20507_v48  ;;  %vm14802_vm7 = vmand %vm2089_vm15, %vm20853_vm0  ;;  %v20864_v50 = vmov 0 }
 0x1c8   : > { %10650 = vmatprep.subr.msk.mxu1 %vm20852_vm8, %v20494_v62  ;;  %10684 = vmatpush1.msk.msra.mxu0 %vm14768_vm9, %v20494_v62  ;;  %v20855_v22 = vsel %vm14802_vm7, 4294967295, %v20854_v22  ;;  %vm2085_vm8 = vcmp.eq.s32.totalorder %v13196_v47, %v14697_v37  ;;  %vm20857_vm9 = vcmp.eq.s32.totalorder %v13174_v45, %v12838_v5  ;;  %vm20858_vm15 = vmmov %vm20853_vm0 }
 0x1c9   : > { %20856 = vst [vmem:[#allocation153_spill] sm:$0xff] %v20855_v22  ;;  %1988 = vmatpush2.msra.mxu1 %v20507_v48  ;;  %10685 = vmatprep.subr.msk.mxu0 %vm14783_vm10, %v20494_v62  ;;  %vm14821_vm0 = vmand %vm2087_vm5, %vm20858_vm15  ;;  %vm20862_vm10 = vcmp.eq.s32.totalorder %v13196_v47, %v12838_v5  ;;  %v20869_v22 = vmov 0 }
 0x1ca   : > { %10651 = vmatprep.subr.msk.mxu1 %vm20857_vm9, %v20494_v62  ;;  %2329 = vmatpush2.msra.mxu0 %v20507_v48  ;;  %v20860_v31 = vsel %vm14821_vm0, 4294967295, %v20859_v31  ;;  %vm2083_vm9 = vcmp.eq.s32.totalorder %v13220_v49, %v14697_v37  ;;  %vm20863_vm5 = vmmov %vm20858_vm15 }
 0x1cb   : > { %20861 = vst [vmem:[#allocation154_spill] sm:$0xff] %v20860_v31  ;;  %1990 = vmatpush2.msra.mxu1 %v20507_v48  ;;  %10686 = vmatprep.subr.msk.mxu0 %vm14802_vm7, %v20494_v62  ;;  %vm14840_vm15 = vmand %vm2085_vm8, %vm20863_vm5  ;;  %vm20867_vm7 = vcmp.eq.s32.totalorder %v13220_v49, %v12838_v5  ;;  %v20874_v31 = vmov 0 }
 0x1cc   : > { %10652 = vmatprep.subr.msk.mxu1 %vm20862_vm10, %v20494_v62  ;;  %2331 = vmatpush2.msra.mxu0 %v20507_v48  ;;  %v20865_v50 = vsel %vm14840_vm15, 4294967295, %v20864_v50  ;;  %vm2081_vm10 = vcmp.eq.s32.totalorder %v13242_v51, %v14697_v37  ;;  %vm20868_vm8 = vmmov %vm20863_vm5 }
 0x1cd   : > { %20866 = vst [vmem:[#allocation155_spill] sm:$0xff] %v20865_v50  ;;  %1992 = vmatpush2.msra.mxu1 %v20507_v48  ;;  %10687 = vmatprep.subr.msk.mxu0 %vm14821_vm0, %v20494_v62  ;;  %vm14859_vm5 = vmand %vm2083_vm9, %vm20868_vm8  ;;  %vm20872_vm0 = vcmp.eq.s32.totalorder %v13242_v51, %v12838_v5  ;;  %v20879_v50 = vmov 0 }
 0x1ce   : > { %10653 = vmatprep.subr.msk.mxu1 %vm20867_vm7, %v20494_v62  ;;  %2333 = vmatpush2.msra.mxu0 %v20507_v48  ;;  %v20870_v22 = vsel %vm14859_vm5, 4294967295, %v20869_v22  ;;  %vm2079_vm7 = vcmp.eq.s32.totalorder %v13264_v53, %v14697_v37  ;;  %vm20873_vm9 = vmmov %vm20868_vm8 }
 0x1cf   : > { %20871 = vst [vmem:[#allocation156_spill] sm:$0xff] %v20870_v22  ;;  %1994 = vmatpush2.msra.mxu1 %v20507_v48  ;;  %10688 = vmatprep.subr.msk.mxu0 %vm14840_vm15, %v20494_v62  ;;  %vm14878_vm8 = vmand %vm2081_vm10, %vm20873_vm9  ;;  %vm20877_vm15 = vcmp.eq.s32.totalorder %v13264_v53, %v12838_v5  ;;  %v20884_v22 = vmov 0 }
 0x1d0   : > { %10654 = vmatprep.subr.msk.mxu1 %vm20872_vm0, %v20494_v62  ;;  %2335 = vmatpush2.msra.mxu0 %v20507_v48  ;;  %v20875_v31 = vsel %vm14878_vm8, 4294967295, %v20874_v31  ;;  %vm2077_vm0 = vcmp.eq.s32.totalorder %v13291_v55, %v14697_v37  ;;  %vm20878_vm10 = vmmov %vm20873_vm9 }
 0x1d1   : > { %20876 = vst [vmem:[#allocation157_spill] sm:$0xff] %v20875_v31  ;;  %1996 = vmatpush2.msra.mxu1 %v20507_v48  ;;  %10689 = vmatprep.subr.msk.mxu0 %vm14859_vm5, %v20494_v62  ;;  %vm14897_vm9 = vmand %vm2079_vm7, %vm20878_vm10  ;;  %vm20882_vm5 = vcmp.eq.s32.totalorder %v13291_v55, %v12838_v5  ;;  %v20889_v31 = vmov 0 }
 0x1d2   : > { %10655 = vmatprep.subr.msk.mxu1 %vm20877_vm15, %v20494_v62  ;;  %2337 = vmatpush2.msra.mxu0 %v20507_v48  ;;  %v20880_v50 = vsel %vm14897_vm9, 4294967295, %v20879_v50  ;;  %vm2075_vm15 = vcmp.eq.s32.totalorder %v13313_v57, %v14697_v37  ;;  %vm20883_vm7 = vmmov %vm20878_vm10 }
 0x1d3   : > { %20881 = vst [vmem:[#allocation158_spill] sm:$0xff] %v20880_v50  ;;  %1998 = vmatpush2.msra.mxu1 %v20507_v48  ;;  %10690 = vmatprep.subr.msk.mxu0 %vm14878_vm8, %v20494_v62  ;;  %vm14916_vm10 = vmand %vm2077_vm0, %vm20883_vm7  ;;  %vm20887_vm8 = vcmp.eq.s32.totalorder %v13313_v57, %v12838_v5  ;;  %v20894_v50 = vmov 0 }
 0x1d4   : > { %10656 = vmatprep.subr.msk.mxu1 %vm20882_vm5, %v20494_v62  ;;  %2339 = vmatpush2.msra.mxu0 %v20507_v48  ;;  %v20885_v22 = vsel %vm14916_vm10, 4294967295, %v20884_v22  ;;  %vm2073_vm5 = vcmp.eq.s32.totalorder %v13335_v59, %v14697_v37  ;;  %vm20888_vm0 = vmmov %vm20883_vm7 }
 0x1d5   : > { %20886 = vst [vmem:[#allocation159_spill] sm:$0xff] %v20885_v22  ;;  %2000 = vmatpush2.msra.mxu1 %v20507_v48  ;;  %10691 = vmatprep.subr.msk.mxu0 %vm14897_vm9, %v20494_v62  ;;  %vm14935_vm7 = vmand %vm2075_vm15, %vm20888_vm0 }
 0x1d6   : > { %10657 = vmatprep.subr.msk.mxu1 %vm20887_vm8, %v20494_v62  ;;  %2341 = vmatpush2.msra.mxu0 %v20507_v48  ;;  %v20890_v31 = vsel %vm14935_vm7, 4294967295, %v20889_v31  ;;  %vm20892_vm8 = vcmp.eq.s32.totalorder %v13335_v59, %v12838_v5  ;;  %vm20893_vm15 = vmmov %vm20888_vm0 }
 0x1d7   : > { %20891 = vst [vmem:[#allocation160_spill] sm:$0xff] %v20890_v31  ;;  %2002 = vmatpush2.msra.mxu1 %v20507_v48  ;;  %10692 = vmatprep.subr.msk.mxu0 %vm14916_vm10, %v20494_v62  ;;  %vm14952_vm0 = vmand %vm2073_vm5, %vm20893_vm15  ;;  %vm2071_vm5 = vcmp.eq.s32.totalorder %v13357_v61, %v14697_v37  ;;  %vm20012_vm15 = vcmp.eq.s32.totalorder %v13401_v14, %v12838_v5  ;;  %v20902_v31 = vmov 0 }
 0x1d8   : > { %10658 = vmatprep.subr.msk.mxu1 %vm20892_vm8, %v20494_v62  ;;  %2343 = vmatpush2.msra.mxu0 %v20507_v48  ;;  %v20895_v50 = vsel %vm14952_vm0, 4294967295, %v20894_v50  ;;  %vm20897_vm8 = vcmp.eq.s32.totalorder %v13357_v61, %v12838_v5 }
 0x1d9   : > { %20896 = vst [vmem:[#allocation161_spill] sm:$0xff] %v20895_v50  ;;  %2004 = vmatpush2.msra.mxu1 %v20507_v48  ;;  %10693 = vmatprep.subr.msk.mxu0 %vm14935_vm7, %v20494_v62  ;;  %v20899_v50 = vmov 0 }
 0x1da   : > { %10659 = vmatprep.subr.msk.mxu1 %vm20897_vm8, %v20494_v62  ;;  %2345 = vmatpush2.msra.mxu0 %v20507_v48  ;;  %vm20898_vm8 = vcmp.lt.s32.totalorder %v12855_v9, 15 }
 0x1db   : > { %2006 = vmatpush2.msra.mxu1 %v20507_v48  ;;  %10694 = vmatprep.subr.msk.mxu0 %vm14952_vm0, %v20494_v62  ;;  %vm14983_vm7 = vmand %vm2071_vm5, %vm20898_vm8  ;;  %vm20015_vm5 = vcmp.eq.s32.totalorder %v13423_v16, %v12838_v5 }
 0x1dc   : > { %10660 = vmatprep.subr.msk.mxu1 %vm20009_vm11, %v20494_v62  ;;  %2347 = vmatpush2.msra.mxu0 %v20507_v48  ;;  %v20900_v50 = vsel %vm14983_vm7, 4294967295, %v20899_v50  ;;  %vm2069_vm11 = vcmp.eq.s32.totalorder %v13379_v63, %v14697_v37 }
 0x1dd   : > { %2008 = vmatpush2.msra.mxu1 %v20507_v48  ;;  %20901 = vst [vmem:[#allocation162_spill] sm:$0xff] %v20900_v50  ;;  %10695 = vmatprep.subr.msk.mxu0 %vm14983_vm7, %v20494_v62  ;;  %vm15002_vm0 = vmand %vm2069_vm11, %vm20898_vm8  ;;  %vm20018_vm11 = vcmp.eq.s32.totalorder %v13509_v15, %v12838_v5  ;;  %v20905_v50 = vmov 0 }
 0x1de   : > { %10661 = vmatprep.subr.msk.mxu1 %vm20012_vm15, %v20494_v62  ;;  %2349 = vmatpush2.msra.mxu0 %v20507_v48  ;;  %v20903_v31 = vsel %vm15002_vm0, 4294967295, %v20902_v31  ;;  %vm2067_vm15 = vcmp.eq.s32.totalorder %v13401_v14, %v14697_v37 }
 0x1df   : > { %2010 = vmatpush2.msra.mxu1 %v20507_v48  ;;  %20904 = vst [vmem:[#allocation163_spill] sm:$0xff] %v20903_v31  ;;  %10696 = vmatprep.subr.msk.mxu0 %vm15002_vm0, %v20494_v62  ;;  %vm15021_vm7 = vmand %vm2067_vm15, %vm20898_vm8  ;;  %vm20020_vm15 = vcmp.eq.s32.totalorder %v13514_v0, %v12838_v5  ;;  %v20908_v31 = vmov 0 }
 0x1e0   : > { %10662 = vmatprep.subr.msk.mxu1 %vm20015_vm5, %v20494_v62  ;;  %2351 = vmatpush2.msra.mxu0 %v20507_v48  ;;  %v20906_v50 = vsel %vm15021_vm7, 4294967295, %v20905_v50  ;;  %vm2065_vm5 = vcmp.eq.s32.totalorder %v13423_v16, %v14697_v37 }
 0x1e1   : > { %2012 = vmatpush2.msra.mxu1 %v20507_v48  ;;  %20907 = vst [vmem:[#allocation164_spill] sm:$0xff] %v20906_v50  ;;  %10697 = vmatprep.subr.msk.mxu0 %vm15021_vm7, %v20494_v62  ;;  %vm15040_vm0 = vmand %vm2065_vm5, %vm20898_vm8  ;;  %v20912_v50 = vmov 0 }
 0x1e2   : > { %10663 = vmatprep.subr.msk.mxu1 %vm20018_vm11, %v20494_v62  ;;  %2353 = vmatpush2.msra.mxu0 %v20507_v48  ;;  %v20909_v31 = vsel %vm15040_vm0, 4294967295, %v20908_v31  ;;  %vm2063_vm11 = vcmp.eq.s32.totalorder %v13509_v15, %v14697_v37  ;;  %vm20911_vm5 = vmmov %vm20898_vm8 }
 0x1e3   : > { %2014 = vmatpush2.msra.mxu1 %v20507_v48  ;;  %20910 = vst [vmem:[#allocation165_spill] sm:$0xff] %v20909_v31  ;;  %10698 = vmatprep.subr.msk.mxu0 %vm15040_vm0, %v20494_v62  ;;  %vm15057_vm8 = vmand %vm2063_vm11, %vm20911_vm5  ;;  %vm20915_vm0 = vcmask 1043456   ;;  %v20917_v31 = vmov 0  ;;  %vm2060_vm11 = vcmp.eq.s32.totalorder %v13514_v0, %v14399_v7 }
 0x1e4   : > { %10664 = vmatprep.subr.msk.mxu1 %vm20020_vm15, %v20494_v62  ;;  %2355 = vmatpush2.msra.mxu0 %v20507_v48  ;;  %v20913_v50 = vsel %vm15057_vm8, 4294967295, %v20912_v50  ;;  %vm2061_vm15 = vcmp.eq.s32.totalorder %v13514_v0, %v14697_v37  ;;  %vm20916_vm7 = vmmov %vm20911_vm5  ;;  %vm20920_vm5 = vcmp.lt.s32.totalorder %v12868_v13, 15  ;;  %v20921_v37 = vmov 0 }
 0x1e5   : > { %2016 = vmatpush2.msra.mxu1 %v20507_v48  ;;  %20914 = vst [vmem:[#allocation166_spill] sm:$0xff] %v20913_v50  ;;  %10699 = vmatprep.subr.msk.mxu0 %vm15057_vm8, %v20494_v62  ;;  %vm15071_vm10 = vmand %vm2061_vm15, %vm20916_vm7  ;;  %v1054_v50 = vpop.f32.mrf.mxu1 }
 0x1e6   : > { %10703 = vmatprep.subr.msk.mxu1 %vm20915_vm0, %v12865_v12  ;;  %2357 = vmatpush2.msra.mxu0 %v20507_v48  ;;  %v20918_v31 = vsel %vm15071_vm10, 4294967295, %v20917_v31  ;;  %vm15082_vm8 = vmand %vm2060_vm11, %vm20920_vm5  ;;  %v1055_v29 = vadd.f32 %v1054_v50, %v14396_v60  ;;  %vm2399_vm11 = vcmp.eq.s32.totalorder %v12846_v6, %v15094_v20  ;;  %vm20927_vm5 = vcmp.ge.s32.totalorder %v12868_v13, 1 }
 0x1e7   : > { %20919 = vst [vmem:[#allocation167_spill] sm:$0xff] %v20918_v31  ;;  %10700 = vmatprep.subr.msk.mxu0 %vm15071_vm10, %v20494_v62  ;;  %v20922_v37 = vsel %vm15082_vm8, 4294967295, %v20921_v37  ;;  %vm20924_vm7 = vmmov %vm20915_vm0  ;;  %vm2401_vm0 = vcmp.eq.s32.totalorder %v12835_v4, %v15094_v20  ;;  %vm20932_vm10 = vcmask 1043456   ;;  %v20949_v60 = vmov 0 }
 0x1e8   : > { %20923 = vst [vmem:[#allocation168_spill] sm:$0xff] %v20922_v37  ;;  %10701 = vmatpush2.msk.msra.mxu0 %vm15082_vm8, %v20494_v62  ;;  %vm20925_vm15 = vmmov %vm20924_vm7  ;;  %vm2397_vm8 = vcmp.eq.s32.totalorder %v12861_v11, %v15094_v20  ;;  %v20959_v50 = vmov 0 }
 0x1e9   : > { %10739 = vmatprep.subr.msk.mxu0 %vm20924_vm7, %v12865_v12  ;;  %vm15116_vm7 = vmand %vm2401_vm0, %vm20927_vm5 }
 0x1ea   : > { %vm20933_vm0 = vmmov %vm20927_vm5 }
 0x1eb   : > { %vm15131_vm5 = vmand %vm2399_vm11, %vm20933_vm0 }
 0x1ec   : > { %vm20937_vm9 = vmmov %vm20933_vm0  ;;  %vm20941_vm0 = vcmask 31744  }
 0x1ed   : > { %vm15146_vm11 = vmand %vm2397_vm8, %vm20937_vm9  ;;  %vm20943_vm8 = vcmp.ge.s32.totalorder %v12868_v13, 1 }
 0x261   : > { %v1399_v22 = vpop.f32.mrf.mxu1 }
 0x262   : > { %v1404_v31 = vadd.f32 %v1399_v22, %v14394_v58  ;;  %v20954_v58 = vmov 0  ;;  %v20964_v22 = vmov 0 }
 0x263   : > { %v1401_v27 = vpop.f32.mrf.mxu1 }
 0x264   : > { %v1405_v25 = vadd.f32 %v1401_v27, %v1055_v29  ;;  %v20934_v29 = vmov 0 }
 0x265   : > { %v1742_v19 = vpop.f32.mrf.mxu0  ;;  %v1948_v23 = vpop.f32.mrf.mxu1  ;;  %v20935_v29 = vsel %vm15131_vm5, 4294967295, %v20934_v29 }
 0x266   : > { %v15096_v17 = vadd.f32 %v1742_v19, %v1404_v31  ;;  %v10702_v19 = vld [vmem:[%s19734_s1 + $0x30] sm:$0xff]  ;;  %20936 = vst [vmem:[#allocation171_spill] sm:$0xff] %v20935_v29  ;;  %v20938_v31 = vmov 0 }
 0x267   : > { %v1744_v37 = vpop.f32.mrf.mxu0  ;;  %v1950_v8 = vpop.f32.mrf.mxu1  ;;  %v20939_v31 = vsel %vm15146_vm11, 4294967295, %v20938_v31 }
 0x268   : > { %v15098_v33 = vadd.f32 %v1744_v37, %v1405_v25  ;;  %2017 = vmatprep.mubr.f32.mxu1 %v1950_v8  ;;  %v15112_v8 = vadd.s32 16, %v12831_v3  ;;  %v10738_v25 = vld [vmem:[%s19734_s1 + $0x38] sm:$0xff]  ;;  %20940 = vst [vmem:[#allocation172_spill] sm:$0xff] %v20939_v31  ;;  %v20969_v37 = vmov 0 }
 0x269   : > { %2018 = vmatmul.mubr.f32.vlgmr.msra.gmra.mxu1 %v1948_v23  ;;  %v2291_v35 = vpop.f32.mrf.mxu0  ;;  %v20928_v23 = vmov 0 }
 0x26a   : > { %10704 = vmatpush1.msk.msra.mxu1 %vm20925_vm15, %v14402_v44  ;;  %2632 = vmatprep.mubr.f32.mxu1 %v20507_v48  ;;  %20926 = vst [vmem:[#allocation169_spill] sm:$0xff] %v15112_v8  ;;  %v20929_v23 = vsel %vm15116_vm7, 4294967295, %v20928_v23  ;;  %vm20931_vm15 = vcmask 31744   ;;  %vm20942_vm9 = vcmp.eq.s32.totalorder %v12835_v4, %v15112_v8 }
 0x26b   : > { %v2293_v27 = vpop.f32.mrf.mxu0  ;;  %2639 = vmatprep.subr.mxu1 %v20507_v48  ;;  %20930 = vst [vmem:[#allocation170_spill] sm:$0xff] %v20929_v23  ;;  %v3889_v23 = vadd.s32 4294967287, %v12831_v3 }
 0x26c   : > { %2360 = vmatprep.mubr.f32.mxu0 %v2293_v27  ;;  %v20979_v27 = vmov 0 }
 0x26d   : > { %2361 = vmatmul.mubr.f32.vlgmr.msra.gmra.mxu0 %v2291_v35  ;;  %10705 = vmatmul.mubr.msk.f32.vlgmr.msra.gmra.mxu1 %vm20931_vm15, %v10702_v19  ;;  %vm2395_vm15 = vcmp.eq.s32.totalorder %v12897_v18, %v15094_v20  ;;  %v20944_v35 = vmov 0  ;;  %v20974_v19 = vmov 0 }
 0x26e   : > { %10740 = vmatpush1.msk.msra.mxu0 %vm20932_vm10, %v14402_v44  ;;  %2911 = vmatprep.mubr.f32.mxu0 %v20507_v48 }
 0x26f   : > { %10706 = vmatpush1.msk.msra.mxu1 %vm15116_vm7, %v20494_v62  ;;  %2918 = vmatprep.subr.mxu0 %v20507_v48  ;;  %vm2393_vm7 = vcmp.eq.s32.totalorder %v12922_v21, %v15094_v20 }
 0x270   : > { %2641 = vmatprep.subr.mxu1 %v20507_v48 }
 0x271   : > { %10741 = vmatmul.mubr.msk.f32.vlgmr.msra.gmra.mxu0 %vm20941_vm0, %v10738_v25  ;;  %10707 = vmatpush1.msk.msra.mxu1 %vm15131_vm5, %v20494_v62  ;;  %vm15165_vm0 = vmand %vm2395_vm15, %vm20943_vm8  ;;  %vm2391_vm5 = vcmp.eq.s32.totalorder %v12942_v24, %v15094_v20  ;;  %vm20947_vm15 = vcmp.eq.s32.totalorder %v12846_v6, %v15112_v8  ;;  %v20984_v25 = vmov 0 }
 0x272   : > { %2643 = vmatprep.subr.mxu1 %v20507_v48  ;;  %10742 = vmatpush1.msk.msra.mxu0 %vm20942_vm9, %v20494_v62  ;;  %v20945_v35 = vsel %vm15165_vm0, 4294967295, %v20944_v35  ;;  %vm20948_vm9 = vmmov %vm20943_vm8 }
 0x273   : > { %20946 = vst [vmem:[#allocation173_spill] sm:$0xff] %v20945_v35  ;;  %10708 = vmatpush1.msk.msra.mxu1 %vm15146_vm11, %v20494_v62  ;;  %2920 = vmatprep.subr.mxu0 %v20507_v48  ;;  %vm15184_vm8 = vmand %vm2393_vm7, %vm20948_vm9  ;;  %vm2389_vm11 = vcmp.eq.s32.totalorder %v12964_v26, %v15094_v20  ;;  %vm20952_vm7 = vcmp.eq.s32.totalorder %v12861_v11, %v15112_v8 }
 0x274   : > { %2645 = vmatprep.subr.mxu1 %v20507_v48  ;;  %10743 = vmatpush1.msk.msra.mxu0 %vm20947_vm15, %v20494_v62  ;;  %v20950_v60 = vsel %vm15184_vm8, 4294967295, %v20949_v60  ;;  %vm20953_vm15 = vmmov %vm20948_vm9 }
 0x275   : > { %20951 = vst [vmem:[#allocation174_spill] sm:$0xff] %v20950_v60  ;;  %10709 = vmatpush1.msk.msra.mxu1 %vm15165_vm0, %v20494_v62  ;;  %2922 = vmatprep.subr.mxu0 %v20507_v48  ;;  %vm15203_vm9 = vmand %vm2391_vm5, %vm20953_vm15  ;;  %vm2387_vm0 = vcmp.eq.s32.totalorder %v12988_v28, %v15094_v20  ;;  %vm20957_vm5 = vcmp.eq.s32.totalorder %v12897_v18, %v15112_v8 }
 0x276   : > { %2647 = vmatprep.subr.mxu1 %v20507_v48  ;;  %10744 = vmatpush1.msk.msra.mxu0 %vm20952_vm7, %v20494_v62  ;;  %v20955_v58 = vsel %vm15203_vm9, 4294967295, %v20954_v58  ;;  %vm20958_vm7 = vmmov %vm20953_vm15 }
 0x277   : > { %20956 = vst [vmem:[#allocation175_spill] sm:$0xff] %v20955_v58  ;;  %10710 = vmatpush1.msk.msra.mxu1 %vm15184_vm8, %v20494_v62  ;;  %2924 = vmatprep.subr.mxu0 %v20507_v48  ;;  %vm15222_vm15 = vmand %vm2389_vm11, %vm20958_vm7  ;;  %vm2385_vm8 = vcmp.eq.s32.totalorder %v13010_v30, %v15094_v20  ;;  %vm20962_vm11 = vcmp.eq.s32.totalorder %v12922_v21, %v15112_v8 }
 0x278   : > { %2649 = vmatprep.subr.mxu1 %v20507_v48  ;;  %10745 = vmatpush1.msk.msra.mxu0 %vm20957_vm5, %v20494_v62  ;;  %v20960_v50 = vsel %vm15222_vm15, 4294967295, %v20959_v50  ;;  %vm20963_vm5 = vmmov %vm20958_vm7 }
 0x279   : > { %20961 = vst [vmem:[#allocation176_spill] sm:$0xff] %v20960_v50  ;;  %10711 = vmatpush1.msk.msra.mxu1 %vm15203_vm9, %v20494_v62  ;;  %2926 = vmatprep.subr.mxu0 %v20507_v48  ;;  %vm15241_vm7 = vmand %vm2387_vm0, %vm20963_vm5  ;;  %vm2383_vm9 = vcmp.eq.s32.totalorder %v13032_v32, %v15094_v20  ;;  %vm20967_vm0 = vcmp.eq.s32.totalorder %v12942_v24, %v15112_v8 }
 0x27a   : > { %2651 = vmatprep.subr.mxu1 %v20507_v48  ;;  %10746 = vmatpush1.msk.msra.mxu0 %vm20962_vm11, %v20494_v62  ;;  %v20965_v22 = vsel %vm15241_vm7, 4294967295, %v20964_v22  ;;  %vm20968_vm11 = vmmov %vm20963_vm5 }
 0x27b   : > { %20966 = vst [vmem:[#allocation177_spill] sm:$0xff] %v20965_v22  ;;  %10712 = vmatpush1.msk.msra.mxu1 %vm15222_vm15, %v20494_v62  ;;  %2928 = vmatprep.subr.mxu0 %v20507_v48  ;;  %vm15260_vm5 = vmand %vm2385_vm8, %vm20968_vm11  ;;  %vm2381_vm15 = vcmp.eq.s32.totalorder %v13054_v34, %v15094_v20  ;;  %vm20972_vm8 = vcmp.eq.s32.totalorder %v12964_v26, %v15112_v8  ;;  %v21013_v22 = vmov 0 }
 0x27c   : > { %2653 = vmatprep.subr.mxu1 %v20507_v48  ;;  %10747 = vmatpush1.msk.msra.mxu0 %vm20967_vm0, %v20494_v62  ;;  %v20970_v37 = vsel %vm15260_vm5, 4294967295, %v20969_v37  ;;  %vm20973_vm0 = vmmov %vm20968_vm11 }
 0x27d   : > { %20971 = vst [vmem:[#allocation178_spill] sm:$0xff] %v20970_v37  ;;  %10713 = vmatpush1.msk.msra.mxu1 %vm15241_vm7, %v20494_v62  ;;  %2930 = vmatprep.subr.mxu0 %v20507_v48  ;;  %vm15279_vm11 = vmand %vm2383_vm9, %vm20973_vm0  ;;  %vm2379_vm7 = vcmp.eq.s32.totalorder %v13076_v36, %v15094_v20  ;;  %vm20977_vm9 = vcmp.eq.s32.totalorder %v12988_v28, %v15112_v8  ;;  %v20998_v37 = vmov 0 }
 0x27e   : > { %2655 = vmatprep.subr.mxu1 %v20507_v48  ;;  %10748 = vmatpush1.msk.msra.mxu0 %vm20972_vm8, %v20494_v62  ;;  %v20975_v19 = vsel %vm15279_vm11, 4294967295, %v20974_v19  ;;  %vm20978_vm8 = vmmov %vm20973_vm0 }
 0x27f   : > { %20976 = vst [vmem:[#allocation179_spill] sm:$0xff] %v20975_v19  ;;  %10714 = vmatpush1.msk.msra.mxu1 %vm15260_vm5, %v20494_v62  ;;  %2932 = vmatprep.subr.mxu0 %v20507_v48  ;;  %vm15298_vm0 = vmand %vm2381_vm15, %vm20978_vm8  ;;  %vm2377_vm5 = vcmp.eq.s32.totalorder %v13098_v38, %v15094_v20  ;;  %vm20982_vm15 = vcmp.eq.s32.totalorder %v13010_v30, %v15112_v8  ;;  %v15341_v19 = vadd.s32 15, %v12838_v5 }
 0x280   : > { %2657 = vmatprep.subr.mxu1 %v20507_v48  ;;  %10749 = vmatpush1.msk.msra.mxu0 %vm20977_vm9, %v20494_v62  ;;  %v20980_v27 = vsel %vm15298_vm0, 4294967295, %v20979_v27  ;;  %vm20983_vm9 = vmmov %vm20978_vm8 }
 0x281   : > { %20981 = vst [vmem:[#allocation180_spill] sm:$0xff] %v20980_v27  ;;  %10715 = vmatpush1.msk.msra.mxu1 %vm15279_vm11, %v20494_v62  ;;  %2934 = vmatprep.subr.mxu0 %v20507_v48  ;;  %vm15317_vm8 = vmand %vm2379_vm7, %vm20983_vm9  ;;  %vm2375_vm11 = vcmp.eq.s32.totalorder %v13120_v40, %v15094_v20  ;;  %vm20987_vm7 = vcmp.eq.s32.totalorder %v13032_v32, %v15112_v8  ;;  %v20989_v27 = vmov 0 }
 0x282   : > { %2659 = vmatprep.subr.mxu1 %v20507_v48  ;;  %10750 = vmatpush1.msk.msra.mxu0 %vm20982_vm15, %v20494_v62  ;;  %v20985_v25 = vsel %vm15317_vm8, 4294967295, %v20984_v25  ;;  %vm20988_vm15 = vmmov %vm20983_vm9 }
 0x283   : > { %20986 = vst [vmem:[#allocation181_spill] sm:$0xff] %v20985_v25  ;;  %10716 = vmatpush1.msk.msra.mxu1 %vm15298_vm0, %v20494_v62  ;;  %2936 = vmatprep.subr.mxu0 %v20507_v48  ;;  %vm15336_vm9 = vmand %vm2377_vm5, %vm20988_vm15  ;;  %vm20992_vm5 = vcmp.eq.s32.totalorder %v13054_v34, %v15112_v8  ;;  %v20993_v25 = vmov 0 }
 0x284   : > { %2661 = vmatprep.subr.mxu1 %v20507_v48  ;;  %10751 = vmatpush1.msk.msra.mxu0 %vm20987_vm7, %v20494_v62  ;;  %v20990_v27 = vsel %vm15336_vm9, 4294967295, %v20989_v27  ;;  %vm2373_vm7 = vcmp.eq.s32.totalorder %v13142_v42, %v15094_v20  ;;  %vm15358_vm0 = vmand %vm2375_vm11, %vm20988_vm15 }
 0x285   : > { %20991 = vst [vmem:[#allocation182_spill] sm:$0xff] %v20990_v27  ;;  %10717 = vmatpush1.msk.msra.mxu1 %vm15317_vm8, %v20494_v62  ;;  %2938 = vmatprep.subr.mxu0 %v20507_v48  ;;  %v20994_v25 = vsel %vm15358_vm0, 4294967295, %v20993_v25  ;;  %vm20997_vm11 = vmmov %vm20988_vm15  ;;  %v15395_v27 = vadd.s32 16, %v12838_v5 }
 0x286   : > { %2663 = vmatprep.subr.mxu1 %v20507_v48  ;;  %10752 = vmatpush1.msk.msra.mxu0 %vm20992_vm5, %v20494_v62  ;;  %20995 = vst [vmem:[#allocation183_spill] sm:$0xff] %v20994_v25  ;;  %vm20996_vm5 = vcmp.eq.s32.totalorder %v13076_v36, %v15112_v8  ;;  %vm15375_vm15 = vmand %vm2373_vm7, %vm20997_vm11  ;;  %vm21001_vm7 = vcmp.eq.s32.totalorder %v13098_v38, %v15112_v8  ;;  %vm21003_vm11 = vcmp.ge.s32.totalorder %v12855_v9, 1  ;;  %v21004_v25 = vmov 0 }
 0x287   : > { %10718 = vmatpush1.msk.msra.mxu1 %vm15336_vm9, %v20494_v62  ;;  %2940 = vmatprep.subr.mxu0 %v20507_v48  ;;  %v20999_v37 = vsel %vm15375_vm15, 4294967295, %v20998_v37  ;;  %vm2434_vm9 = vcmp.eq.s32.totalorder %v13964_v52, %v15341_v19  ;;  %21002 = vst [vmem:[#allocation185_spill] sm:$0xff] %v15395_v27 }
 0x288   : > { %2665 = vmatprep.subr.mxu1 %v20507_v48  ;;  %10753 = vmatpush1.msk.msra.mxu0 %vm20996_vm5, %v20494_v62  ;;  %21000 = vst [vmem:[#allocation184_spill] sm:$0xff] %v20999_v37  ;;  %vm2432_vm5 = vcmp.eq.s32.totalorder %v13890_v46, %v15341_v19  ;;  %vm15403_vm10 = vmand %vm2434_vm9, %vm21003_vm11  ;;  %v21009_v37 = vmov 0 }
 0x289   : > { %10719 = vmatpush1.msk.msra.mxu1 %vm15358_vm0, %v20494_v62  ;;  %2942 = vmatprep.subr.mxu0 %v20507_v48  ;;  %v21005_v25 = vsel %vm15403_vm10, 4294967295, %v21004_v25  ;;  %vm2430_vm0 = vcmp.eq.s32.totalorder %v13174_v45, %v15341_v19 }
 0x28a   : > { %2667 = vmatprep.subr.mxu1 %v20507_v48  ;;  %10754 = vmatpush1.msk.msra.mxu0 %vm21001_vm7, %v20494_v62  ;;  %21006 = vst [vmem:[#allocation186_spill] sm:$0xff] %v21005_v25  ;;  %vm21007_vm7 = vcmp.eq.s32.totalorder %v13120_v40, %v15112_v8  ;;  %v21058_v25 = vmov 0 }
 0x28b   : > { %10720 = vmatpush1.msk.msra.mxu1 %vm15375_vm15, %v20494_v62  ;;  %2944 = vmatprep.subr.mxu0 %v20507_v48  ;;  %vm21008_vm15 = vmmov %vm21003_vm11 }
 0x28c   : > { %2669 = vmatprep.subr.mxu1 %v20507_v48  ;;  %10755 = vmatpush1.msk.msra.mxu0 %vm21007_vm7, %v20494_v62  ;;  %vm15418_vm9 = vmand %vm2432_vm5, %vm21008_vm15  ;;  %vm2428_vm7 = vcmp.eq.s32.totalorder %v13196_v47, %v15341_v19 }
 0x28d   : > { %2670 = vmatpush1.msra.mxu1 %v20507_v48  ;;  %2946 = vmatprep.subr.mxu0 %v20507_v48  ;;  %v21010_v37 = vsel %vm15418_vm9, 4294967295, %v21009_v37  ;;  %vm21012_vm15 = vmmov %vm21003_vm11 }
 0x28e   : > { %21011 = vst [vmem:[#allocation187_spill] sm:$0xff] %v21010_v37  ;;  %10721 = vmatprep.subr.msk.mxu1 %vm15403_vm10, %v20494_v62  ;;  %2947 = vmatpush1.msra.mxu0 %v20507_v48  ;;  %vm15434_vm5 = vmand %vm2430_vm0, %vm21012_vm15  ;;  %vm2426_vm10 = vcmp.eq.s32.totalorder %v13220_v49, %v15341_v19  ;;  %vm21016_vm0 = vcmp.eq.s32.totalorder %v13964_v52, %v15395_v27  ;;  %v21018_v37 = vmov 0 }
 0x28f   : > { %2672 = vmatpush2.msra.mxu1 %v20507_v48  ;;  %2948 = vmatprep.subr.mxu0 %v20507_v48  ;;  %v21014_v22 = vsel %vm15434_vm5, 4294967295, %v21013_v22  ;;  %vm21017_vm15 = vmmov %vm21003_vm11 }
 0x290   : > { %21015 = vst [vmem:[#allocation188_spill] sm:$0xff] %v21014_v22  ;;  %10722 = vmatprep.subr.msk.mxu1 %vm15418_vm9, %v20494_v62  ;;  %2949 = vmatpush1.msra.mxu0 %v20507_v48  ;;  %vm15453_vm8 = vmand %vm2428_vm7, %vm21017_vm15  ;;  %vm2424_vm9 = vcmp.eq.s32.totalorder %v13242_v51, %v15341_v19  ;;  %vm21021_vm7 = vcmp.eq.s32.totalorder %v13890_v46, %v15395_v27  ;;  %v21023_v22 = vmov 0 }
 0x291   : > { %2674 = vmatpush2.msra.mxu1 %v20507_v48  ;;  %10756 = vmatprep.subr.msk.mxu0 %vm21016_vm0, %v20494_v62  ;;  %v21019_v37 = vsel %vm15453_vm8, 4294967295, %v21018_v37  ;;  %vm21022_vm0 = vmmov %vm21003_vm11  ;;  %vm20088_vm11 = vcmp.eq.s32.totalorder %v13335_v59, %v15395_v27 }
 0x292   : > { %21020 = vst [vmem:[#allocation189_spill] sm:$0xff] %v21019_v37  ;;  %10723 = vmatprep.subr.msk.mxu1 %vm15434_vm5, %v20494_v62  ;;  %2951 = vmatpush2.msra.mxu0 %v20507_v48  ;;  %vm15472_vm15 = vmand %vm2426_vm10, %vm21022_vm0  ;;  %vm2422_vm5 = vcmp.eq.s32.totalorder %v13264_v53, %v15341_v19  ;;  %vm21026_vm10 = vcmp.eq.s32.totalorder %v13174_v45, %v15395_v27  ;;  %v21028_v37 = vmov 0 }
 0x293   : > { %2676 = vmatpush2.msra.mxu1 %v20507_v48  ;;  %10757 = vmatprep.subr.msk.mxu0 %vm21021_vm7, %v20494_v62  ;;  %v21024_v22 = vsel %vm15472_vm15, 4294967295, %v21023_v22  ;;  %vm21027_vm7 = vmmov %vm21022_vm0 }
 0x294   : > { %21025 = vst [vmem:[#allocation190_spill] sm:$0xff] %v21024_v22  ;;  %10724 = vmatprep.subr.msk.mxu1 %vm15453_vm8, %v20494_v62  ;;  %2953 = vmatpush2.msra.mxu0 %v20507_v48  ;;  %vm15491_vm0 = vmand %vm2424_vm9, %vm21027_vm7  ;;  %vm2420_vm8 = vcmp.eq.s32.totalorder %v13291_v55, %v15341_v19  ;;  %vm21031_vm9 = vcmp.eq.s32.totalorder %v13196_v47, %v15395_v27  ;;  %v21033_v22 = vmov 0 }
 0x295   : > { %2678 = vmatpush2.msra.mxu1 %v20507_v48  ;;  %10758 = vmatprep.subr.msk.mxu0 %vm21026_vm10, %v20494_v62  ;;  %v21029_v37 = vsel %vm15491_vm0, 4294967295, %v21028_v37  ;;  %vm21032_vm10 = vmmov %vm21027_vm7 }
 0x296   : > { %21030 = vst [vmem:[#allocation191_spill] sm:$0xff] %v21029_v37  ;;  %10725 = vmatprep.subr.msk.mxu1 %vm15472_vm15, %v20494_v62  ;;  %2955 = vmatpush2.msra.mxu0 %v20507_v48  ;;  %vm15510_vm7 = vmand %vm2422_vm5, %vm21032_vm10  ;;  %vm2418_vm15 = vcmp.eq.s32.totalorder %v13313_v57, %v15341_v19  ;;  %vm21036_vm5 = vcmp.eq.s32.totalorder %v13220_v49, %v15395_v27  ;;  %v21038_v37 = vmov 0 }
 0x297   : > { %2680 = vmatpush2.msra.mxu1 %v20507_v48  ;;  %10759 = vmatprep.subr.msk.mxu0 %vm21031_vm9, %v20494_v62  ;;  %v21034_v22 = vsel %vm15510_vm7, 4294967295, %v21033_v22  ;;  %vm21037_vm9 = vmmov %vm21032_vm10 }
 0x298   : > { %21035 = vst [vmem:[#allocation192_spill] sm:$0xff] %v21034_v22  ;;  %10726 = vmatprep.subr.msk.mxu1 %vm15491_vm0, %v20494_v62  ;;  %2957 = vmatpush2.msra.mxu0 %v20507_v48  ;;  %vm15529_vm10 = vmand %vm2420_vm8, %vm21037_vm9  ;;  %vm2416_vm0 = vcmp.eq.s32.totalorder %v13335_v59, %v15341_v19  ;;  %vm21041_vm8 = vcmp.eq.s32.totalorder %v13242_v51, %v15395_v27  ;;  %v21043_v22 = vmov 0 }
 0x299   : > { %2682 = vmatpush2.msra.mxu1 %v20507_v48  ;;  %10760 = vmatprep.subr.msk.mxu0 %vm21036_vm5, %v20494_v62  ;;  %v21039_v37 = vsel %vm15529_vm10, 4294967295, %v21038_v37  ;;  %vm21042_vm5 = vmmov %vm21037_vm9 }
 0x29a   : > { %21040 = vst [vmem:[#allocation193_spill] sm:$0xff] %v21039_v37  ;;  %10727 = vmatprep.subr.msk.mxu1 %vm15510_vm7, %v20494_v62  ;;  %2959 = vmatpush2.msra.mxu0 %v20507_v48  ;;  %vm15548_vm9 = vmand %vm2418_vm15, %vm21042_vm5  ;;  %vm2414_vm7 = vcmp.eq.s32.totalorder %v13357_v61, %v15341_v19  ;;  %vm21046_vm15 = vcmp.eq.s32.totalorder %v13264_v53, %v15395_v27  ;;  %v21048_v37 = vmov 0 }
 0x29b   : > { %2684 = vmatpush2.msra.mxu1 %v20507_v48  ;;  %10761 = vmatprep.subr.msk.mxu0 %vm21041_vm8, %v20494_v62  ;;  %v21044_v22 = vsel %vm15548_vm9, 4294967295, %v21043_v22  ;;  %vm21047_vm8 = vmmov %vm21042_vm5 }
 0x29c   : > { %21045 = vst [vmem:[#allocation194_spill] sm:$0xff] %v21044_v22  ;;  %10728 = vmatprep.subr.msk.mxu1 %vm15529_vm10, %v20494_v62  ;;  %2961 = vmatpush2.msra.mxu0 %v20507_v48  ;;  %vm15567_vm5 = vmand %vm2416_vm0, %vm21047_vm8  ;;  %vm2412_vm10 = vcmp.eq.s32.totalorder %v13379_v63, %v15341_v19  ;;  %vm21051_vm0 = vcmp.eq.s32.totalorder %v13291_v55, %v15395_v27  ;;  %v21053_v22 = vmov 0 }
 0x29d   : > { %2686 = vmatpush2.msra.mxu1 %v20507_v48  ;;  %10762 = vmatprep.subr.msk.mxu0 %vm21046_vm15, %v20494_v62  ;;  %v21049_v37 = vsel %vm15567_vm5, 4294967295, %v21048_v37  ;;  %vm21052_vm15 = vmmov %vm21047_vm8 }
 0x29e   : > { %21050 = vst [vmem:[#allocation195_spill] sm:$0xff] %v21049_v37  ;;  %10729 = vmatprep.subr.msk.mxu1 %vm15548_vm9, %v20494_v62  ;;  %2963 = vmatpush2.msra.mxu0 %v20507_v48  ;;  %vm15586_vm8 = vmand %vm2414_vm7, %vm21052_vm15 }
 0x29f   : > { %2688 = vmatpush2.msra.mxu1 %v20507_v48  ;;  %10763 = vmatprep.subr.msk.mxu0 %vm21051_vm0, %v20494_v62  ;;  %v21054_v22 = vsel %vm15586_vm8, 4294967295, %v21053_v22  ;;  %vm21056_vm0 = vcmp.eq.s32.totalorder %v13313_v57, %v15395_v27  ;;  %vm21057_vm7 = vmmov %vm21052_vm15 }
 0x2a0   : > { %21055 = vst [vmem:[#allocation196_spill] sm:$0xff] %v21054_v22  ;;  %10730 = vmatprep.subr.msk.mxu1 %vm15567_vm5, %v20494_v62  ;;  %2965 = vmatpush2.msra.mxu0 %v20507_v48  ;;  %vm15603_vm15 = vmand %vm2412_vm10, %vm21057_vm7  ;;  %vm2410_vm10 = vcmp.eq.s32.totalorder %v13401_v14, %v15341_v19  ;;  %v21062_v22 = vmov 0 }
 0x2a1   : > { %2690 = vmatpush2.msra.mxu1 %v20507_v48  ;;  %10764 = vmatprep.subr.msk.mxu0 %vm21056_vm0, %v20494_v62  ;;  %v21059_v25 = vsel %vm15603_vm15, 4294967295, %v21058_v25  ;;  %vm21061_vm0 = vmmov %vm21057_vm7 }
 0x2a2   : > { %21060 = vst [vmem:[#allocation197_spill] sm:$0xff] %v21059_v25  ;;  %10731 = vmatprep.subr.msk.mxu1 %vm15586_vm8, %v20494_v62  ;;  %2967 = vmatpush2.msra.mxu0 %v20507_v48  ;;  %vm15625_vm7 = vmand %vm2410_vm10, %vm21061_vm0  ;;  %v21066_v25 = vmov 0  ;;  %vm2405_vm8 = vcmp.eq.s32.totalorder %v13509_v15, %v15094_v20 }
 0x2a3   : > { %2692 = vmatpush2.msra.mxu1 %v20507_v48  ;;  %10765 = vmatprep.subr.msk.mxu0 %vm20088_vm11, %v20494_v62  ;;  %v21063_v22 = vsel %vm15625_vm7, 4294967295, %v21062_v22  ;;  %vm20092_vm11 = vcmp.eq.s32.totalorder %v13357_v61, %v15395_v27  ;;  %vm21065_vm10 = vmmov %vm21061_vm0 }
 0x2a4   : > { %10732 = vmatprep.subr.msk.mxu1 %vm15603_vm15, %v20494_v62  ;;  %2969 = vmatpush2.msra.mxu0 %v20507_v48  ;;  %21064 = vst [vmem:[#allocation198_spill] sm:$0xff] %v21063_v22  ;;  %vm2408_vm15 = vcmp.eq.s32.totalorder %v13423_v16, %v15341_v19  ;;  %v21070_v22 = vmov 0 }
 0x2a5   : > { %2694 = vmatpush2.msra.mxu1 %v20507_v48  ;;  %10766 = vmatprep.subr.msk.mxu0 %vm20092_vm11, %v20494_v62  ;;  %vm15644_vm0 = vmand %vm2408_vm15, %vm21065_vm10  ;;  %vm2406_vm11 = vcmp.eq.s32.totalorder %v13509_v15, %v15341_v19  ;;  %v21074_v19 = vmov 0 }
 0x2a6   : > { %10733 = vmatprep.subr.msk.mxu1 %vm15625_vm7, %v20494_v62  ;;  %2971 = vmatpush2.msra.mxu0 %v20507_v48  ;;  %v21067_v25 = vsel %vm15644_vm0, 4294967295, %v21066_v25  ;;  %vm20096_vm7 = vcmp.eq.s32.totalorder %v13379_v63, %v15395_v27  ;;  %vm21069_vm15 = vmmov %vm21065_vm10 }
 0x2a7   : > { %2696 = vmatpush2.msra.mxu1 %v20507_v48  ;;  %21068 = vst [vmem:[#allocation199_spill] sm:$0xff] %v21067_v25  ;;  %10767 = vmatprep.subr.msk.mxu0 %vm20096_vm7, %v20494_v62  ;;  %vm15663_vm10 = vmand %vm2406_vm11, %vm21069_vm15  ;;  %vm21073_vm11 = vcmp.ge.s32.totalorder %v12868_v13, 1  ;;  %vm20113_vm7 = vcmp.eq.s32.totalorder %v13423_v16, %v15395_v27  ;;  %v15726_v25 = vadd.s32 17, %v12831_v3 }
 0x2a8   : > { %10734 = vmatprep.subr.msk.mxu1 %vm15644_vm0, %v20494_v62  ;;  %2973 = vmatpush2.msra.mxu0 %v20507_v48  ;;  %v21071_v22 = vsel %vm15663_vm10, 4294967295, %v21070_v22  ;;  %vm20099_vm0 = vcmp.eq.s32.totalorder %v13401_v14, %v15395_v27  ;;  %vm15680_vm15 = vmand %vm2405_vm8, %vm21073_vm11 }
 0x2a9   : > { %2698 = vmatpush2.msra.mxu1 %v20507_v48  ;;  %21072 = vst [vmem:[#allocation200_spill] sm:$0xff] %v21071_v22  ;;  %10768 = vmatprep.subr.msk.mxu0 %vm20099_vm0, %v20494_v62  ;;  %v21075_v19 = vsel %vm15680_vm15, 4294967295, %v21074_v19  ;;  %vm21077_vm8 = vmmov %vm21073_vm11  ;;  %vm20112_vm0 = vcmp.eq.s32.totalorder %v13509_v15, %v15112_v8 }
 0x2aa   : > { %10735 = vmatprep.subr.msk.mxu1 %vm15663_vm10, %v20494_v62  ;;  %21076 = vst [vmem:[#allocation201_spill] sm:$0xff] %v21075_v19  ;;  %2975 = vmatpush2.msra.mxu0 %v20507_v48  ;;  %vm2403_vm10 = vcmp.eq.s32.totalorder %v13514_v0, %v15094_v20  ;;  %v21078_v19 = vmov 0 }
 0x2ab   : > { %10736 = vmatpush2.msk.msra.mxu1 %vm15680_vm15, %v20494_v62  ;;  %10769 = vmatprep.subr.msk.mxu0 %vm20113_vm7, %v20494_v62  ;;  %vm15699_vm11 = vmand %vm2403_vm10, %vm21077_vm8  ;;  %vm21081_vm15 = vcmask 1043456   ;;  %vm20111_vm10 = vcmp.eq.s32.totalorder %v13514_v0, %v15112_v8  ;;  %vm21082_vm8 = vcmask 1043456  }
 0x2ac   : > { %2701 = vmatprep.subr.mxu1 %v20507_v48  ;;  %v21079_v19 = vsel %vm15699_vm11, 4294967295, %v21078_v19  ;;  %2977 = vmatpush2.msra.mxu0 %v20507_v48 }
 0x2ad   : > { %21080 = vst [vmem:[#allocation202_spill] sm:$0xff] %v21079_v19  ;;  %10737 = vmatpush2.msk.msra.mxu1 %vm15699_vm11, %v20494_v62  ;;  %2978 = vmatprep.subr.mxu0 %v20507_v48  ;;  %vm21087_vm11 = vcmask 31744  }
 0x2ae   : > { %10773 = vmatprep.subr.msk.mxu1 %vm21081_vm15, %v12865_v12  ;;  %10770 = vmatpush2.msk.msra.mxu0 %vm20112_vm0, %v20494_v62  ;;  %vm3023_vm15 = vcmp.eq.s32.totalorder %v12835_v4, %v15726_v25  ;;  %vm21083_vm0 = vcmp.lt.s32.totalorder %v12868_v13, 15 }
 0x2af   : > { %2980 = vmatprep.subr.mxu0 %v20507_v48  ;;  %vm15745_vm7 = vmand %vm3023_vm15, %vm21083_vm0 }
 0x2b0   : > { %10771 = vmatpush2.msk.msra.mxu0 %vm20111_vm10, %v20494_v62  ;;  %vm3021_vm10 = vcmp.eq.s32.totalorder %v12846_v6, %v15726_v25  ;;  %vm21088_vm5 = vmmov %vm21083_vm0  ;;  %vm3017_vm0 = vcmp.eq.s32.totalorder %v12897_v18, %v15726_v25 }
 0x2b1   : > { %vm15754_vm9 = vmand %vm3021_vm10, %vm21088_vm5 }
 0x2b2   : > { %vm21092_vm15 = vmmov %vm21088_vm5  ;;  %vm3015_vm5 = vcmp.eq.s32.totalorder %v12922_v21, %v15726_v25 }
 0x329   : > { %v2019_v20 = vpop.f32.mrf.mxu1 }
 0x32a   : > { %v2024_v19 = vadd.f32 %v2019_v20, %v15096_v17  ;;  %v21108_v20 = vmov 0 }
 0x32b   : > { %v2021_v22 = vpop.f32.mrf.mxu1 }
 0x32c   : > { %v2025_v12 = vadd.f32 %v2021_v22, %v15098_v33  ;;  %v10772_v33 = vld [vmem:[%s19734_s1 + $0x40] sm:$0xff]  ;;  %v21093_v22 = vmov 0 }
 0x32d   : > { %v2362_v37 = vpop.f32.mrf.mxu0  ;;  %v2634_v27 = vpop.f32.mrf.mxu1 }
 0x32e   : > { %v15728_v50 = vadd.f32 %v2362_v37, %v2024_v19  ;;  %v21097_v37 = vmov 0  ;;  %v21104_v19 = vmov 0 }
 0x32f   : > { %v2364_v58 = vpop.f32.mrf.mxu0  ;;  %v2636_v60 = vpop.f32.mrf.mxu1 }
 0x330   : > { %v15730_v35 = vadd.f32 %v2364_v58, %v2025_v12  ;;  %2703 = vmatprep.mubr.f32.mxu1 %v2636_v60  ;;  %v21084_v60 = vmov 0  ;;  %v21111_v12 = vmov 0 }
 0x331   : > { %2704 = vmatmul.mubr.f32.vlgmr.msra.gmra.mxu1 %v2634_v27  ;;  %v2913_v17 = vpop.f32.mrf.mxu0  ;;  %v21085_v60 = vsel %vm15745_vm7, 4294967295, %v21084_v60  ;;  %v21101_v27 = vmov 0 }
 0x332   : > { %10774 = vmatpush1.msk.msra.mxu1 %vm21082_vm8, %v14402_v44  ;;  %3254 = vmatprep.mubr.f32.mxu1 %v20507_v48  ;;  %21086 = vst [vmem:[#allocation203_spill] sm:$0xff] %v21085_v60  ;;  %vm3019_vm8 = vcmp.eq.s32.totalorder %v12861_v11, %v15726_v25  ;;  %v21089_v44 = vmov 0 }
 0x333   : > { %v2915_v58 = vpop.f32.mrf.mxu0  ;;  %3261 = vmatprep.subr.mxu1 %v20507_v48  ;;  %v21090_v44 = vsel %vm15754_vm9, 4294967295, %v21089_v44  ;;  %vm15766_vm12 = vmand %vm3019_vm8, %vm21092_vm15  ;;  %vm3013_vm8 = vcmp.eq.s32.totalorder %v12942_v24, %v15726_v25 }
 0x334   : > { %2982 = vmatprep.mubr.f32.mxu0 %v2915_v58  ;;  %21091 = vst [vmem:[#allocation204_spill] sm:$0xff] %v21090_v44  ;;  %v21094_v22 = vsel %vm15766_vm12, 4294967295, %v21093_v22  ;;  %v21122_v58 = vmov 0 }
 0x335   : > { %2983 = vmatmul.mubr.f32.vlgmr.msra.gmra.mxu0 %v2913_v17  ;;  %10775 = vmatmul.mubr.msk.f32.vlgmr.msra.gmra.mxu1 %vm21087_vm11, %v10772_v33  ;;  %21095 = vst [vmem:[#allocation205_spill] sm:$0xff] %v21094_v22  ;;  %vm21096_vm11 = vmmov %vm21092_vm15  ;;  %v21115_v17 = vmov 0  ;;  %v21118_v33 = vmov 0 }
 0x336   : > { %10776 = vmatpush1.msk.msra.mxu1 %vm15745_vm7, %v20494_v62  ;;  %vm15778_vm10 = vmand %vm3017_vm0, %vm21096_vm11  ;;  %vm3011_vm0 = vcmp.eq.s32.totalorder %v12964_v26, %v15726_v25 }
 0x337   : > { %3263 = vmatprep.subr.mxu1 %v20507_v48  ;;  %v21098_v37 = vsel %vm15778_vm10, 4294967295, %v21097_v37  ;;  %vm21100_vm15 = vmmov %vm21096_vm11 }
 0x338   : > { %10777 = vmatpush1.msk.msra.mxu1 %vm15754_vm9, %v20494_v62  ;;  %21099 = vst [vmem:[#allocation206_spill] sm:$0xff] %v21098_v37  ;;  %vm15790_vm9 = vmand %vm3015_vm5, %vm21100_vm15  ;;  %vm3009_vm5 = vcmp.eq.s32.totalorder %v12988_v28, %v15726_v25 }
 0x339   : > { %3265 = vmatprep.subr.mxu1 %v20507_v48  ;;  %v21102_v27 = vsel %vm15790_vm9, 4294967295, %v21101_v27  ;;  %vm21107_vm15 = vmmov %vm21096_vm11 }
 0x33a   : > { %10778 = vmatpush1.msk.msra.mxu1 %vm15766_vm12, %v20494_v62  ;;  %21103 = vst [vmem:[#allocation207_spill] sm:$0xff] %v21102_v27  ;;  %vm15802_vm12 = vmand %vm3013_vm8, %vm21096_vm11  ;;  %vm3007_vm8 = vcmp.eq.s32.totalorder %v13010_v30, %v15726_v25 }
 0x33b   : > { %3267 = vmatprep.subr.mxu1 %v20507_v48  ;;  %v21105_v19 = vsel %vm15802_vm12, 4294967295, %v21104_v19 }
 0x33c   : > { %10779 = vmatpush1.msk.msra.mxu1 %vm15778_vm10, %v20494_v62  ;;  %21106 = vst [vmem:[#allocation208_spill] sm:$0xff] %v21105_v19  ;;  %vm15814_vm10 = vmand %vm3011_vm0, %vm21107_vm15  ;;  %vm3005_vm0 = vcmp.eq.s32.totalorder %v13032_v32, %v15726_v25 }
 0x33d   : > { %3269 = vmatprep.subr.mxu1 %v20507_v48  ;;  %v21109_v20 = vsel %vm15814_vm10, 4294967295, %v21108_v20  ;;  %vm21114_vm15 = vmmov %vm21096_vm11 }
 0x33e   : > { %10780 = vmatpush1.msk.msra.mxu1 %vm15790_vm9, %v20494_v62  ;;  %21110 = vst [vmem:[#allocation209_spill] sm:$0xff] %v21109_v20  ;;  %vm15826_vm9 = vmand %vm3009_vm5, %vm21096_vm11  ;;  %vm3003_vm5 = vcmp.eq.s32.totalorder %v13054_v34, %v15726_v25 }
 0x33f   : > { %3271 = vmatprep.subr.mxu1 %v20507_v48  ;;  %v21112_v12 = vsel %vm15826_vm9, 4294967295, %v21111_v12 }
 0x340   : > { %10781 = vmatpush1.msk.msra.mxu1 %vm15802_vm12, %v20494_v62  ;;  %21113 = vst [vmem:[#allocation210_spill] sm:$0xff] %v21112_v12  ;;  %vm15838_vm12 = vmand %vm3007_vm8, %vm21114_vm15  ;;  %vm3001_vm8 = vcmp.eq.s32.totalorder %v13076_v36, %v15726_v25  ;;  %v15891_v12 = vadd.s32 17, %v12838_v5 }
 0x341   : > { %3273 = vmatprep.subr.mxu1 %v20507_v48  ;;  %v21116_v17 = vsel %vm15838_vm12, 4294967295, %v21115_v17  ;;  %vm21121_vm15 = vmmov %vm21096_vm11 }
 0x342   : > { %10782 = vmatpush1.msk.msra.mxu1 %vm15814_vm10, %v20494_v62  ;;  %21117 = vst [vmem:[#allocation211_spill] sm:$0xff] %v21116_v17  ;;  %vm15850_vm10 = vmand %vm3005_vm0, %vm21096_vm11  ;;  %vm2999_vm0 = vcmp.eq.s32.totalorder %v13098_v38, %v15726_v25  ;;  %v21125_v17 = vmov 0 }
 0x343   : > { %3275 = vmatprep.subr.mxu1 %v20507_v48  ;;  %v21119_v33 = vsel %vm15850_vm10, 4294967295, %v21118_v33 }
 0x344   : > { %10783 = vmatpush1.msk.msra.mxu1 %vm15826_vm9, %v20494_v62  ;;  %21120 = vst [vmem:[#allocation212_spill] sm:$0xff] %v21119_v33  ;;  %vm15862_vm9 = vmand %vm3003_vm5, %vm21121_vm15  ;;  %vm2997_vm5 = vcmp.eq.s32.totalorder %v13120_v40, %v15726_v25  ;;  %v21129_v33 = vmov 0 }
 0x345   : > { %3277 = vmatprep.subr.mxu1 %v20507_v48  ;;  %v21123_v58 = vsel %vm15862_vm9, 4294967295, %v21122_v58  ;;  %vm21128_vm15 = vmmov %vm21096_vm11 }
 0x346   : > { %10784 = vmatpush1.msk.msra.mxu1 %vm15838_vm12, %v20494_v62  ;;  %21124 = vst [vmem:[#allocation213_spill] sm:$0xff] %v21123_v58  ;;  %vm15874_vm12 = vmand %vm3001_vm8, %vm21096_vm11  ;;  %v21133_v58 = vmov 0 }
 0x347   : > { %3279 = vmatprep.subr.mxu1 %v20507_v48  ;;  %v21126_v17 = vsel %vm15874_vm12, 4294967295, %v21125_v17  ;;  %vm21132_vm8 = vmmov %vm21096_vm11 }
 0x348   : > { %10785 = vmatpush1.msk.msra.mxu1 %vm15850_vm10, %v20494_v62  ;;  %21127 = vst [vmem:[#allocation214_spill] sm:$0xff] %v21126_v17  ;;  %vm15886_vm10 = vmand %vm2999_vm0, %vm21128_vm15  ;;  %vm3056_vm0 = vcmp.eq.s32.totalorder %v13964_v52, %v15891_v12  ;;  %vm21136_vm15 = vcmp.lt.s32.totalorder %v12855_v9, 15  ;;  %v21145_v17 = vmov 0 }
 0x349   : > { %3281 = vmatprep.subr.mxu1 %v20507_v48  ;;  %v21130_v33 = vsel %vm15886_vm10, 4294967295, %v21129_v33  ;;  %vm15899_vm11 = vmand %vm2997_vm5, %vm21132_vm8  ;;  %vm3054_vm5 = vcmp.eq.s32.totalorder %v13890_v46, %v15891_v12 }
 0x34a   : > { %10786 = vmatpush1.msk.msra.mxu1 %vm15862_vm9, %v20494_v62  ;;  %21131 = vst [vmem:[#allocation215_spill] sm:$0xff] %v21130_v33  ;;  %v21134_v58 = vsel %vm15899_vm11, 4294967295, %v21133_v58  ;;  %vm15918_vm8 = vmand %vm3056_vm0, %vm21136_vm15  ;;  %v21137_v33 = vmov 0  ;;  %vm3050_vm0 = vcmp.eq.s32.totalorder %v13196_v47, %v15891_v12 }
 0x34b   : > { %3283 = vmatprep.subr.mxu1 %v20507_v48  ;;  %21135 = vst [vmem:[#allocation216_spill] sm:$0xff] %v21134_v58  ;;  %v21138_v33 = vsel %vm15918_vm8, 4294967295, %v21137_v33  ;;  %v21141_v58 = vmov 0 }
 0x34c   : > { %10787 = vmatpush1.msk.msra.mxu1 %vm15874_vm12, %v20494_v62  ;;  %21139 = vst [vmem:[#allocation217_spill] sm:$0xff] %v21138_v33  ;;  %v21149_v33 = vmov 0 }
 0x34d   : > { %3285 = vmatprep.subr.mxu1 %v20507_v48 }
 0x34e   : > { %10788 = vmatpush1.msk.msra.mxu1 %vm15886_vm10, %v20494_v62  ;;  %vm3052_vm10 = vcmp.eq.s32.totalorder %v13174_v45, %v15891_v12 }
 0x34f   : > { %3287 = vmatprep.subr.mxu1 %v20507_v48 }
 0x350   : > { %10789 = vmatpush1.msk.msra.mxu1 %vm15899_vm11, %v20494_v62  ;;  %vm21140_vm11 = vmmov %vm21136_vm15 }
 0x351   : > { %3289 = vmatprep.subr.mxu1 %v20507_v48  ;;  %vm15928_vm12 = vmand %vm3054_vm5, %vm21140_vm11 }
 0x352   : > { %3290 = vmatpush1.msra.mxu1 %v20507_v48  ;;  %v21142_v58 = vsel %vm15928_vm12, 4294967295, %v21141_v58  ;;  %vm21144_vm15 = vmmov %vm21140_vm11  ;;  %vm3048_vm11 = vcmp.eq.s32.totalorder %v13220_v49, %v15891_v12 }
 0x353   : > { %3291 = vmatprep.subr.mxu1 %v20507_v48  ;;  %21143 = vst [vmem:[#allocation218_spill] sm:$0xff] %v21142_v58  ;;  %vm15940_vm9 = vmand %vm3052_vm10, %vm21144_vm15  ;;  %vm3046_vm10 = vcmp.eq.s32.totalorder %v13242_v51, %v15891_v12  ;;  %v21153_v58 = vmov 0 }
 0x354   : > { %3292 = vmatpush1.msra.mxu1 %v20507_v48  ;;  %v21146_v17 = vsel %vm15940_vm9, 4294967295, %v21145_v17  ;;  %vm21148_vm5 = vmmov %vm21144_vm15 }
 0x355   : > { %10790 = vmatprep.subr.msk.mxu1 %vm15918_vm8, %v20494_v62  ;;  %21147 = vst [vmem:[#allocation219_spill] sm:$0xff] %v21146_v17  ;;  %vm15952_vm8 = vmand %vm3050_vm0, %vm21148_vm5  ;;  %vm3044_vm0 = vcmp.eq.s32.totalorder %v13264_v53, %v15891_v12  ;;  %v21156_v17 = vmov 0 }
 0x356   : > { %3294 = vmatpush2.msra.mxu1 %v20507_v48  ;;  %v21150_v33 = vsel %vm15952_vm8, 4294967295, %v21149_v33  ;;  %vm21152_vm15 = vmmov %vm21148_vm5 }
 0x357   : > { %10791 = vmatprep.subr.msk.mxu1 %vm15928_vm12, %v20494_v62  ;;  %21151 = vst [vmem:[#allocation220_spill] sm:$0xff] %v21150_v33  ;;  %vm15964_vm12 = vmand %vm3048_vm11, %vm21152_vm15  ;;  %vm3042_vm11 = vcmp.eq.s32.totalorder %v13291_v55, %v15891_v12  ;;  %v21160_v33 = vmov 0 }
 0x358   : > { %3296 = vmatpush2.msra.mxu1 %v20507_v48  ;;  %v21154_v58 = vsel %vm15964_vm12, 4294967295, %v21153_v58  ;;  %vm21159_vm15 = vmmov %vm21148_vm5 }
 0x359   : > { %10792 = vmatprep.subr.msk.mxu1 %vm15940_vm9, %v20494_v62  ;;  %21155 = vst [vmem:[#allocation221_spill] sm:$0xff] %v21154_v58  ;;  %vm15976_vm9 = vmand %vm3046_vm10, %vm21148_vm5  ;;  %vm3040_vm10 = vcmp.eq.s32.totalorder %v13313_v57, %v15891_v12  ;;  %v21163_v58 = vmov 0 }
 0x35a   : > { %3298 = vmatpush2.msra.mxu1 %v20507_v48  ;;  %v21157_v17 = vsel %vm15976_vm9, 4294967295, %v21156_v17 }
 0x35b   : > { %10793 = vmatprep.subr.msk.mxu1 %vm15952_vm8, %v20494_v62  ;;  %21158 = vst [vmem:[#allocation222_spill] sm:$0xff] %v21157_v17  ;;  %vm15988_vm8 = vmand %vm3044_vm0, %vm21159_vm15  ;;  %vm3038_vm0 = vcmp.eq.s32.totalorder %v13335_v59, %v15891_v12  ;;  %v21167_v17 = vmov 0 }
 0x35c   : > { %3300 = vmatpush2.msra.mxu1 %v20507_v48  ;;  %v21161_v33 = vsel %vm15988_vm8, 4294967295, %v21160_v33  ;;  %vm21166_vm15 = vmmov %vm21148_vm5 }
 0x35d   : > { %10794 = vmatprep.subr.msk.mxu1 %vm15964_vm12, %v20494_v62  ;;  %21162 = vst [vmem:[#allocation223_spill] sm:$0xff] %v21161_v33  ;;  %vm16000_vm12 = vmand %vm3042_vm11, %vm21148_vm5  ;;  %vm3036_vm11 = vcmp.eq.s32.totalorder %v13357_v61, %v15891_v12  ;;  %v21170_v33 = vmov 0 }
 0x35e   : > { %3302 = vmatpush2.msra.mxu1 %v20507_v48  ;;  %v21164_v58 = vsel %vm16000_vm12, 4294967295, %v21163_v58 }
 0x35f   : > { %10795 = vmatprep.subr.msk.mxu1 %vm15976_vm9, %v20494_v62  ;;  %21165 = vst [vmem:[#allocation224_spill] sm:$0xff] %v21164_v58  ;;  %vm16012_vm9 = vmand %vm3040_vm10, %vm21166_vm15  ;;  %vm3034_vm10 = vcmp.eq.s32.totalorder %v13379_v63, %v15891_v12  ;;  %v21174_v58 = vmov 0 }
 0x360   : > { %3304 = vmatpush2.msra.mxu1 %v20507_v48  ;;  %v21168_v17 = vsel %vm16012_vm9, 4294967295, %v21167_v17  ;;  %vm21173_vm15 = vmmov %vm21148_vm5 }
 0x361   : > { %10796 = vmatprep.subr.msk.mxu1 %vm15988_vm8, %v20494_v62  ;;  %21169 = vst [vmem:[#allocation225_spill] sm:$0xff] %v21168_v17  ;;  %vm16024_vm8 = vmand %vm3038_vm0, %vm21148_vm5  ;;  %v21178_v17 = vmov 0 }
 0x362   : > { %3306 = vmatpush2.msra.mxu1 %v20507_v48  ;;  %v21171_v33 = vsel %vm16024_vm8, 4294967295, %v21170_v33  ;;  %vm21177_vm0 = vmmov %vm21148_vm5 }
 0x363   : > { %10797 = vmatprep.subr.msk.mxu1 %vm16000_vm12, %v20494_v62  ;;  %21172 = vst [vmem:[#allocation226_spill] sm:$0xff] %v21171_v33  ;;  %vm16036_vm12 = vmand %vm3036_vm11, %vm21173_vm15  ;;  %vm3032_vm11 = vcmp.eq.s32.totalorder %v13401_v14, %v15891_v12  ;;  %v21182_v33 = vmov 0 }
 0x364   : > { %3308 = vmatpush2.msra.mxu1 %v20507_v48  ;;  %v21175_v58 = vsel %vm16036_vm12, 4294967295, %v21174_v58  ;;  %vm16046_vm5 = vmand %vm3034_vm10, %vm21177_vm0 }
 0x365   : > { %10798 = vmatprep.subr.msk.mxu1 %vm16012_vm9, %v20494_v62  ;;  %21176 = vst [vmem:[#allocation227_spill] sm:$0xff] %v21175_v58  ;;  %v21179_v17 = vsel %vm16046_vm5, 4294967295, %v21178_v17  ;;  %vm21181_vm10 = vmmov %vm21177_vm0  ;;  %vm3030_vm0 = vcmp.eq.s32.totalorder %v13423_v16, %v15891_v12  ;;  %v21194_v12 = vmov 0  ;;  %v12755_v58 = vmov 0  }
 0x366   : > { %3310 = vmatpush2.msra.mxu1 %v20507_v48  ;;  %21180 = vst [vmem:[#allocation228_spill] sm:$0xff] %v21179_v17  ;;  %vm16062_vm15 = vmand %vm3032_vm11, %vm21181_vm10  ;;  %v21186_v17 = vmov 0  ;;  %vm3029_vm11 = vcmp.eq.s32.totalorder %v13423_v16, %v15726_v25  ;;  %12741 = vset.pattern.permute.xlu0 %v12755_v58 }
 0x367   : > { %10799 = vmatprep.subr.msk.mxu1 %vm16024_vm8, %v20494_v62  ;;  %v21183_v33 = vsel %vm16062_vm15, 4294967295, %v21182_v33  ;;  %12742 = vset.pattern.permute.xlu1 %v12755_v58  ;;  %v7511_v58 = vld [vmem:[%s19739_s6 + $0x8] sm:$0xff] }
 0x368   : > { %3312 = vmatpush2.msra.mxu1 %v20507_v48  ;;  %21184 = vst [vmem:[#allocation229_spill] sm:$0xff] %v21183_v33  ;;  %v21190_v33 = vmov 0 }
 0x369   : > { %10800 = vmatprep.subr.msk.mxu1 %vm16036_vm12, %v20494_v62 }
 0x36a   : > { %3314 = vmatpush2.msra.mxu1 %v20507_v48 }
 0x36b   : > { %10801 = vmatprep.subr.msk.mxu1 %vm16046_vm5, %v20494_v62  ;;  %vm21185_vm5 = vmmov %vm21181_vm10  ;;  %vm21189_vm10 = vcmp.lt.s32.totalorder %v12868_v13, 15 }
 0x36c   : > { %3316 = vmatpush2.msra.mxu1 %v20507_v48  ;;  %vm16074_vm12 = vmand %vm3030_vm0, %vm21185_vm5  ;;  %vm3027_vm5 = vcmp.eq.s32.totalorder %v13509_v15, %v15726_v25 }
 0x36d   : > { %10802 = vmatprep.subr.msk.mxu1 %vm16062_vm15, %v20494_v62  ;;  %v21187_v17 = vsel %vm16074_vm12, 4294967295, %v21186_v17  ;;  %vm16085_vm15 = vmand %vm3029_vm11, %vm21189_vm10  ;;  %vm3025_vm11 = vcmp.eq.s32.totalorder %v13514_v0, %v15726_v25  ;;  %v16121_v25 = vand.u32 7, %v12831_v3 }
 0x36e   : > { %3318 = vmatpush2.msra.mxu1 %v20507_v48  ;;  %21188 = vst [vmem:[#allocation230_spill] sm:$0xff] %v21187_v17  ;;  %v21191_v33 = vsel %vm16085_vm15, 4294967295, %v21190_v33  ;;  %vm21193_vm0 = vmmov %vm21189_vm10  ;;  %v20175_v17 = vshra.s32 %v12831_v3, 3 }
 0x36f   : > { %10803 = vmatprep.subr.msk.mxu1 %vm16074_vm12, %v20494_v62  ;;  %21192 = vst [vmem:[#allocation231_spill] sm:$0xff] %v21191_v33  ;;  %vm16097_vm8 = vmand %vm3027_vm5, %vm21193_vm0  ;;  %v21198_v33 = vmov 0  ;;  %v3345_v19 = vmul.u32 2, %v16121_v25 }
 0x370   : > { %10804 = vmatpush2.msk.msra.mxu1 %vm16085_vm15, %v20494_v62  ;;  %v21195_v12 = vsel %vm16097_vm8, 4294967295, %v21194_v12  ;;  %vm21197_vm10 = vmmov %vm21193_vm0  ;;  %v3344_v20 = vmul.u32 32, %v20175_v17 }
 0x371   : > { %3321 = vmatprep.subr.mxu1 %v20507_v48  ;;  %21196 = vst [vmem:[#allocation232_spill] sm:$0xff] %v21195_v12  ;;  %vm16109_vm15 = vmand %vm3025_vm11, %vm21197_vm10  ;;  %v3334_v12 = vld [vmem:[%s19735_s2] sm:$0xff] }
 0x372   : > { %10805 = vmatpush2.msk.msra.mxu1 %vm16097_vm8, %v20494_v62  ;;  %v21199_v33 = vsel %vm16109_vm15, 4294967295, %v21198_v33  ;;  %3337 = vperm.xlu0 %12741, %v3334_v12   ;;  %v16129_v27 = vadd.s32 %v3345_v19, %v3344_v20  ;;  %v10414_v19 = vld [vmem:[%s19743_s10] sm:$0xff] }
 0x373   : > { %3323 = vmatprep.subr.mxu1 %v20507_v48  ;;  %21200 = vst [vmem:[#allocation233_spill] sm:$0xff] %v21199_v33  ;;  %v5561_v33 = vld [vmem:[%s19737_s4] sm:$0xff] }
 0x374   : > { %10806 = vmatpush2.msk.msra.mxu1 %vm16109_vm15, %v20494_v62  ;;  %vm3378_vm5 = vcmp.eq.s32.totalorder %v13964_v52, %v16129_v27  ;;  %v16134_v37 = vadd.s32 1, %v16129_v27 }
 0x375   : > { %11589 = vmatprep.subr.msk.mxu1 %vm3378_vm5, %v20494_v62 }
 0x376   : > { %5565 = vperm.xlu0 %12741, %v5561_v33   ;;  %vm3513_vm0 = vcmp.eq.s32.totalorder %v13964_v52, %v16134_v37  ;;  %vm3497_vm11 = vcmp.eq.s32.totalorder %v12835_v4, %v16134_v37  ;;  %vm3512_vm10 = vcmp.eq.s32.totalorder %v13890_v46, %v16134_v37  ;;  %vm3496_vm15 = vcmp.eq.s32.totalorder %v12846_v6, %v16134_v37 }
 0x377   : > { %11624 = vmatprep.subr.msk.mxu0 %vm3513_vm0, %v20494_v62  ;;  %vm3511_vm5 = vcmp.eq.s32.totalorder %v13174_v45, %v16134_v37  ;;  %vm3495_vm8 = vcmp.eq.s32.totalorder %v12861_v11, %v16134_v37  ;;  %vm3510_vm0 = vcmp.eq.s32.totalorder %v13196_v47, %v16134_v37  ;;  %vm3509_vm12 = vcmp.eq.s32.totalorder %v13220_v49, %v16134_v37 }
 0x378   : > { %11625 = vmatpush3.msk.msra.mxu0 %vm3497_vm11, %v20494_v62  ;;  %vm3494_vm11 = vcmp.eq.s32.totalorder %v12897_v18, %v16134_v37 }
 0x379   : > { %11626 = vmatprep.subr.msk.mxu0 %vm3512_vm10, %v20494_v62  ;;  %vm3493_vm10 = vcmp.eq.s32.totalorder %v12922_v21, %v16134_v37 }
 0x37a   : > { %7519 = vperm.xlu0 %12741, %v7511_v58   ;;  %11627 = vmatpush3.msk.msra.mxu0 %vm3496_vm15, %v20494_v62  ;;  %vm3508_vm15 = vcmp.eq.s32.totalorder %v13242_v51, %v16134_v37 }
 0x37b   : > { %11628 = vmatprep.subr.msk.mxu0 %vm3511_vm5, %v20494_v62  ;;  %vm3492_vm5 = vcmp.eq.s32.totalorder %v12942_v24, %v16134_v37 }
 0x37c   : > { %11629 = vmatpush3.msk.msra.mxu0 %vm3495_vm8, %v20494_v62  ;;  %vm3507_vm8 = vcmp.eq.s32.totalorder %v13264_v53, %v16134_v37 }
 0x37d   : > { %11630 = vmatprep.subr.msk.mxu0 %vm3510_vm0, %v20494_v62  ;;  %vm3491_vm0 = vcmp.eq.s32.totalorder %v12964_v26, %v16134_v37 }
 0x37e   : > { %10417 = vperm.xlu0 %12741, %v10414_v19   ;;  %11631 = vmatpush3.msk.msra.mxu0 %vm3494_vm11, %v20494_v62  ;;  %vm3506_vm11 = vcmp.eq.s32.totalorder %v13291_v55, %v16134_v37 }
 0x37f   : > { %11632 = vmatprep.subr.msk.mxu0 %vm3509_vm12, %v20494_v62  ;;  %vm3490_vm12 = vcmp.eq.s32.totalorder %v12988_v28, %v16134_v37 }
 0x380   : > { %11633 = vmatpush3.msk.msra.mxu0 %vm3493_vm10, %v20494_v62  ;;  %vm3505_vm10 = vcmp.eq.s32.totalorder %v13313_v57, %v16134_v37 }
 0x381   : > { %11634 = vmatprep.subr.msk.mxu0 %vm3508_vm15, %v20494_v62  ;;  %vm3489_vm15 = vcmp.eq.s32.totalorder %v13010_v30, %v16134_v37 }
 0x382   : > { %11635 = vmatpush3.msk.msra.mxu0 %vm3492_vm5, %v20494_v62  ;;  %vm3504_vm5 = vcmp.eq.s32.totalorder %v13335_v59, %v16134_v37 }
 0x383   : > { %11636 = vmatprep.subr.msk.mxu0 %vm3507_vm8, %v20494_v62  ;;  %vm3488_vm8 = vcmp.eq.s32.totalorder %v13032_v32, %v16134_v37 }
 0x384   : > { %11637 = vmatpush3.msk.msra.mxu0 %vm3491_vm0, %v20494_v62  ;;  %vm3503_vm0 = vcmp.eq.s32.totalorder %v13357_v61, %v16134_v37 }
 0x385   : > { %11638 = vmatprep.subr.msk.mxu0 %vm3506_vm11, %v20494_v62  ;;  %vm3487_vm11 = vcmp.eq.s32.totalorder %v13054_v34, %v16134_v37 }
 0x386   : > { %11639 = vmatpush3.msk.msra.mxu0 %vm3490_vm12, %v20494_v62  ;;  %vm3502_vm12 = vcmp.eq.s32.totalorder %v13379_v63, %v16134_v37 }
 0x387   : > { %11640 = vmatprep.subr.msk.mxu0 %vm3505_vm10, %v20494_v62  ;;  %vm3486_vm10 = vcmp.eq.s32.totalorder %v13076_v36, %v16134_v37 }
 0x388   : > { %11641 = vmatpush3.msk.msra.mxu0 %vm3489_vm15, %v20494_v62  ;;  %vm3501_vm15 = vcmp.eq.s32.totalorder %v13401_v14, %v16134_v37 }
 0x389   : > { %11642 = vmatprep.subr.msk.mxu0 %vm3504_vm5, %v20494_v62  ;;  %vm3362_vm5 = vcmp.eq.s32.totalorder %v12835_v4, %v16129_v27 }
 0x38a   : > { %11643 = vmatpush3.msk.msra.mxu0 %vm3488_vm8, %v20494_v62  ;;  %vm3377_vm8 = vcmp.eq.s32.totalorder %v13890_v46, %v16129_v27 }
 0x38b   : > { %11644 = vmatprep.subr.msk.mxu0 %vm3503_vm0, %v20494_v62  ;;  %vm3361_vm0 = vcmp.eq.s32.totalorder %v12846_v6, %v16129_v27 }
 0x38c   : > { %11645 = vmatpush3.msk.msra.mxu0 %vm3487_vm11, %v20494_v62  ;;  %vm3376_vm11 = vcmp.eq.s32.totalorder %v13174_v45, %v16129_v27 }
 0x38d   : > { %11646 = vmatprep.subr.msk.mxu0 %vm3502_vm12, %v20494_v62  ;;  %vm3360_vm12 = vcmp.eq.s32.totalorder %v12861_v11, %v16129_v27 }
 0x38e   : > { %11647 = vmatpush3.msk.msra.mxu0 %vm3486_vm10, %v20494_v62  ;;  %vm3375_vm10 = vcmp.eq.s32.totalorder %v13196_v47, %v16129_v27 }
 0x38f   : > { %11648 = vmatprep.subr.msk.mxu0 %vm3501_vm15, %v20494_v62  ;;  %vm3359_vm15 = vcmp.eq.s32.totalorder %v12897_v18, %v16129_v27 }
 0x3ed   : > { %v3338_v60 = vpop.permute.xlu0 %3337 }
 0x3f1   : > { %v2705_v20 = vpop.f32.mrf.mxu1 }
 0x3f2   : > { %v16219_v33 = vadd.f32 %v2705_v20, %v15728_v50  ;;  %v16334_v50 = vadd.s32 17, %v16129_v27 }
 0x3f3   : > { %v2707_v12 = vpop.f32.mrf.mxu1 }
 0x3f4   : > { %v16222_v58 = vadd.f32 %v2707_v12, %v15730_v35  ;;  %v16331_v35 = vadd.s32 16, %v16129_v27  ;;  %vm3783_vm9 = vcmp.eq.s32.totalorder %v13174_v45, %v16334_v50  ;;  %vm3782_vm7 = vcmp.eq.s32.totalorder %v13196_v47, %v16334_v50 }
 0x3f5   : > { %v3256_v19 = vpop.f32.mrf.mxu1  ;;  %vm3766_vm6 = vcmp.eq.s32.totalorder %v12897_v18, %v16334_v50 }
 0x3f7   : > { %v3258_v17 = vpop.f32.mrf.mxu1 }
 0x3f8   : > { %3325 = vmatprep.mubr.f32.mxu1 %v3258_v17  ;;  %v2984_v17 = vpop.f32.mrf.mxu0 }
 0x3f9   : > { %3326 = vmatmul.mubr.f32.vlgmr.msra.gmra.mxu1 %v3256_v19 }
 0x3fa   : > { %11590 = vmatpush3.msk.msra.mxu1 %vm3362_vm5, %v20494_v62  ;;  %vm3374_vm5 = vcmp.eq.s32.totalorder %v13220_v49, %v16129_v27  ;;  %v2986_v20 = vpop.f32.mrf.mxu0 }
 0x3fb   : > { %11591 = vmatprep.subr.msk.mxu1 %vm3377_vm8, %v20494_v62  ;;  %vm3358_vm8 = vcmp.eq.s32.totalorder %v12922_v21, %v16129_v27 }
 0x3fc   : > { %11592 = vmatpush3.msk.msra.mxu1 %vm3361_vm0, %v20494_v62  ;;  %vm3373_vm0 = vcmp.eq.s32.totalorder %v13242_v51, %v16129_v27 }
 0x3fd   : > { %11593 = vmatprep.subr.msk.mxu1 %vm3376_vm11, %v20494_v62  ;;  %vm3357_vm11 = vcmp.eq.s32.totalorder %v12942_v24, %v16129_v27 }
 0x3fe   : > { %11594 = vmatpush3.msk.msra.mxu1 %vm3360_vm12, %v20494_v62  ;;  %vm3372_vm12 = vcmp.eq.s32.totalorder %v13264_v53, %v16129_v27 }
 0x3ff   : > { %11595 = vmatprep.subr.msk.mxu1 %vm3375_vm10, %v20494_v62  ;;  %vm3356_vm10 = vcmp.eq.s32.totalorder %v12964_v26, %v16129_v27 }
 0x400   : > { %11596 = vmatpush3.msk.msra.mxu1 %vm3359_vm15, %v20494_v62  ;;  %vm3371_vm15 = vcmp.eq.s32.totalorder %v13291_v55, %v16129_v27 }
 0x401   : > { %11597 = vmatprep.subr.msk.mxu1 %vm3374_vm5, %v20494_v62  ;;  %vm3355_vm5 = vcmp.eq.s32.totalorder %v12988_v28, %v16129_v27 }
 0x402   : > { %11598 = vmatpush3.msk.msra.mxu1 %vm3358_vm8, %v20494_v62  ;;  %vm3370_vm8 = vcmp.eq.s32.totalorder %v13313_v57, %v16129_v27 }
 0x403   : > { %11599 = vmatprep.subr.msk.mxu1 %vm3373_vm0, %v20494_v62  ;;  %vm3354_vm0 = vcmp.eq.s32.totalorder %v13010_v30, %v16129_v27 }
 0x404   : > { %11600 = vmatpush3.msk.msra.mxu1 %vm3357_vm11, %v20494_v62  ;;  %vm3369_vm11 = vcmp.eq.s32.totalorder %v13335_v59, %v16129_v27 }
 0x405   : > { %11601 = vmatprep.subr.msk.mxu1 %vm3372_vm12, %v20494_v62  ;;  %vm3353_vm12 = vcmp.eq.s32.totalorder %v13032_v32, %v16129_v27 }
 0x406   : > { %11602 = vmatpush3.msk.msra.mxu1 %vm3356_vm10, %v20494_v62  ;;  %vm3368_vm10 = vcmp.eq.s32.totalorder %v13357_v61, %v16129_v27 }
 0x407   : > { %11603 = vmatprep.subr.msk.mxu1 %vm3371_vm15, %v20494_v62  ;;  %vm3352_vm15 = vcmp.eq.s32.totalorder %v13054_v34, %v16129_v27 }
 0x408   : > { %11604 = vmatpush3.msk.msra.mxu1 %vm3355_vm5, %v20494_v62  ;;  %vm3367_vm5 = vcmp.eq.s32.totalorder %v13379_v63, %v16129_v27 }
 0x409   : > { %11605 = vmatprep.subr.msk.mxu1 %vm3370_vm8, %v20494_v62  ;;  %vm3351_vm8 = vcmp.eq.s32.totalorder %v13076_v36, %v16129_v27 }
 0x40a   : > { %11606 = vmatpush3.msk.msra.mxu1 %vm3354_vm0, %v20494_v62  ;;  %vm3366_vm0 = vcmp.eq.s32.totalorder %v13401_v14, %v16129_v27 }
 0x40b   : > { %11607 = vmatprep.subr.msk.mxu1 %vm3369_vm11, %v20494_v62  ;;  %vm3350_vm11 = vcmp.eq.s32.totalorder %v13098_v38, %v16129_v27 }
 0x40c   : > { %11608 = vmatpush3.msk.msra.mxu1 %vm3353_vm12, %v20494_v62  ;;  %vm3485_vm12 = vcmp.eq.s32.totalorder %v13098_v38, %v16134_v37 }
 0x40d   : > { %11609 = vmatprep.subr.msk.mxu1 %vm3368_vm10, %v20494_v62  ;;  %11649 = vmatpush3.msk.msra.mxu0 %vm3485_vm12, %v20494_v62  ;;  %vm3365_vm10 = vcmp.eq.s32.totalorder %v13423_v16, %v16129_v27  ;;  %vm3348_vm12 = vcmp.eq.s32.totalorder %v13142_v42, %v16129_v27 }
 0x40e   : > { %11610 = vmatpush3.msk.msra.mxu1 %vm3352_vm15, %v20494_v62  ;;  %vm3500_vm15 = vcmp.eq.s32.totalorder %v13423_v16, %v16134_v37 }
 0x40f   : > { %11611 = vmatprep.subr.msk.mxu1 %vm3367_vm5, %v20494_v62  ;;  %11650 = vmatprep.subr.msk.mxu0 %vm3500_vm15, %v20494_v62  ;;  %vm3349_vm5 = vcmp.eq.s32.totalorder %v13120_v40, %v16129_v27  ;;  %vm3363_vm15 = vcmp.eq.s32.totalorder %v13514_v0, %v16129_v27 }
 0x410   : > { %11612 = vmatpush3.msk.msra.mxu1 %vm3351_vm8, %v20494_v62  ;;  %vm3484_vm8 = vcmp.eq.s32.totalorder %v13120_v40, %v16134_v37 }
 0x411   : > { %11613 = vmatprep.subr.msk.mxu1 %vm3366_vm0, %v20494_v62  ;;  %11651 = vmatpush3.msk.msra.mxu0 %vm3484_vm8, %v20494_v62  ;;  %vm3364_vm0 = vcmp.eq.s32.totalorder %v13509_v15, %v16129_v27  ;;  %vm3347_vm8 = vcmp.eq.s32.totalorder %v12829_v2, %v16129_v27  ;;  %v2989_v27 = vadd.f32 %v2984_v17, %v16219_v33 }
 0x412   : > { %11614 = vmatpush3.msk.msra.mxu1 %vm3350_vm11, %v20494_v62  ;;  %vm3499_vm11 = vcmp.eq.s32.totalorder %v13509_v15, %v16134_v37 }
 0x413   : > { %11615 = vmatprep.subr.msk.mxu1 %vm3365_vm10, %v20494_v62  ;;  %11652 = vmatprep.subr.msk.mxu0 %vm3499_vm11, %v20494_v62  ;;  %vm3483_vm10 = vcmp.eq.s32.totalorder %v13142_v42, %v16134_v37  ;;  %vm3649_vm11 = vcmp.eq.s32.totalorder %v13964_v52, %v16331_v35 }
 0x414   : > { %11616 = vmatpush3.msk.msra.mxu1 %vm3349_vm5, %v20494_v62  ;;  %11653 = vmatpush3.msk.msra.mxu0 %vm3483_vm10, %v20494_v62  ;;  %vm3498_vm5 = vcmp.eq.s32.totalorder %v13514_v0, %v16134_v37  ;;  %vm3633_vm10 = vcmp.eq.s32.totalorder %v12835_v4, %v16331_v35 }
 0x415   : > { %11617 = vmatprep.subr.msk.mxu1 %vm3364_vm0, %v20494_v62  ;;  %11654 = vmatprep.subr.msk.mxu0 %vm3498_vm5, %v20494_v62  ;;  %vm3482_vm0 = vcmp.eq.s32.totalorder %v12829_v2, %v16134_v37  ;;  %v2990_v37 = vadd.f32 %v2986_v20, %v16222_v58  ;;  %vm3648_vm5 = vcmp.eq.s32.totalorder %v13890_v46, %v16331_v35 }
 0x416   : > { %11618 = vmatpush3.msk.msra.mxu1 %vm3348_vm12, %v20494_v62  ;;  %11655 = vmatpush3.msk.msra.mxu0 %vm3482_vm0, %v20494_v62  ;;  %vm3785_vm12 = vcmp.eq.s32.totalorder %v13964_v52, %v16334_v50  ;;  %vm3632_vm0 = vcmp.eq.s32.totalorder %v12846_v6, %v16331_v35 }
 0x417   : > { %11619 = vmatprep.subr.msk.mxu1 %vm3363_vm15, %v20494_v62  ;;  %11694 = vmatprep.subr.msk.mxu0 %vm3785_vm12, %v20494_v62  ;;  %vm3769_vm15 = vcmp.eq.s32.totalorder %v12835_v4, %v16334_v50  ;;  %vm3647_vm12 = vcmp.eq.s32.totalorder %v13174_v45, %v16331_v35 }
 0x418   : > { %11620 = vmatpush3.msk.msra.mxu1 %vm3347_vm8, %v20494_v62  ;;  %vm3784_vm8 = vcmp.eq.s32.totalorder %v13890_v46, %v16334_v50 }
 0x419   : > { %11659 = vmatprep.subr.msk.mxu1 %vm3649_vm11, %v20494_v62  ;;  %vm3768_vm11 = vcmp.eq.s32.totalorder %v12846_v6, %v16334_v50  ;;  %v21320_v6 = vmov 0 }
 0x4b9   : > { %v3327_v12 = vpop.f32.mrf.mxu1 }
 0x4ba   : > { %v3332_v19 = vadd.f32 %v3327_v12, %v2989_v27 }
 0x4bb   : > { %v3329_v22 = vpop.f32.mrf.mxu1 }
 0x4bc   : > { %v3333_v44 = vadd.f32 %v3329_v22, %v2990_v37  ;;  %v16354_v31 = vadd.f32 %v3338_v60, %v3332_v19 }
 0x4be   : > { %v16352_v8 = vadd.f32 %v3338_v60, %v3333_v44  ;;  %21202 = vst [vmem:[#allocation235_spill] sm:$0xff] %v16354_v31  ;;  %v16551_v60 = vadd.s32 4294967288, %v12831_v3  ;;  %v3917_v44 = vld [vmem:[%s19736_s3] sm:$0xff] }
 0x4c0   : > { %21201 = vst [vmem:[#allocation234_spill] sm:$0xff] %v16352_v8  ;;  %3475 = vmatprep.mubr.f32.mxu1 %v16352_v8  ;;  %3610 = vmatprep.mubr.f32.mxu0 %v16352_v8 }
 0x4c1   : > { %3476 = vmatmul.mubr.f32.vlgmr.msra.gmra.mxu1 %v16354_v31  ;;  %3611 = vmatmul.mubr.f32.vlgmr.msra.gmra.mxu0 %v16354_v31 }
 0x4c2   : > { %11660 = vmatpush3.msk.msra.mxu1 %vm3633_vm10, %v20494_v62  ;;  %11695 = vmatpush3.msk.msra.mxu0 %vm3769_vm15, %v20494_v62  ;;  %vm3631_vm10 = vcmp.eq.s32.totalorder %v12861_v11, %v16331_v35  ;;  %vm3767_vm15 = vcmp.eq.s32.totalorder %v12861_v11, %v16334_v50  ;;  %v21317_v11 = vld [vmem:[#allocation149_spill] sm:$0xff] }
 0x4c3   : > { %11661 = vmatprep.subr.msk.mxu1 %vm3648_vm5, %v20494_v62  ;;  %3746 = vmatprep.mubr.f32.mxu1 %v16352_v8  ;;  %vm3646_vm5 = vcmp.eq.s32.totalorder %v13196_v47, %v16331_v35 }
 0x4c4   : > { %11696 = vmatprep.subr.msk.mxu0 %vm3784_vm8, %v20494_v62  ;;  %3882 = vmatprep.mubr.f32.mxu0 %v16352_v8  ;;  %vm3630_vm8 = vcmp.eq.s32.totalorder %v12897_v18, %v16331_v35  ;;  %v21314_v18 = vmov 0  ;;  %v4993_v8 = vadd.s32 7, %v12831_v3 }
 0x4c5   : > { %11662 = vmatpush3.msk.msra.mxu1 %vm3632_vm0, %v20494_v62  ;;  %11697 = vmatpush3.msk.msra.mxu0 %vm3768_vm11, %v20494_v62  ;;  %vm3645_vm0 = vcmp.eq.s32.totalorder %v13220_v49, %v16331_v35  ;;  %vm3781_vm11 = vcmp.eq.s32.totalorder %v13220_v49, %v16334_v50 }
 0x4c6   : > { %11663 = vmatprep.subr.msk.mxu1 %vm3647_vm12, %v20494_v62  ;;  %11698 = vmatprep.subr.msk.mxu0 %vm3783_vm9, %v20494_v62  ;;  %vm3629_vm9 = vcmp.eq.s32.totalorder %v12922_v21, %v16331_v35  ;;  %vm3765_vm12 = vcmp.eq.s32.totalorder %v12922_v21, %v16334_v50  ;;  %v21311_v21 = vld [vmem:[#allocation147_spill] sm:$0xff] }
 0x4c7   : > { %11664 = vmatpush3.msk.msra.mxu1 %vm3631_vm10, %v20494_v62  ;;  %11699 = vmatpush3.msk.msra.mxu0 %vm3767_vm15, %v20494_v62  ;;  %vm3644_vm10 = vcmp.eq.s32.totalorder %v13242_v51, %v16331_v35  ;;  %vm3780_vm15 = vcmp.eq.s32.totalorder %v13242_v51, %v16334_v50 }
 0x4c8   : > { %11665 = vmatprep.subr.msk.mxu1 %vm3646_vm5, %v20494_v62  ;;  %11700 = vmatprep.subr.msk.mxu0 %vm3782_vm7, %v20494_v62  ;;  %vm3628_vm7 = vcmp.eq.s32.totalorder %v12942_v24, %v16331_v35  ;;  %vm3764_vm5 = vcmp.eq.s32.totalorder %v12942_v24, %v16334_v50 }
 0x4c9   : > { %11666 = vmatpush3.msk.msra.mxu1 %vm3630_vm8, %v20494_v62  ;;  %11701 = vmatpush3.msk.msra.mxu0 %vm3766_vm6, %v20494_v62  ;;  %vm3643_vm6 = vcmp.eq.s32.totalorder %v13264_v53, %v16331_v35  ;;  %vm3779_vm8 = vcmp.eq.s32.totalorder %v13264_v53, %v16334_v50 }
 0x4ca   : > { %11667 = vmatprep.subr.msk.mxu1 %vm3645_vm0, %v20494_v62  ;;  %11702 = vmatprep.subr.msk.mxu0 %vm3781_vm11, %v20494_v62  ;;  %vm3627_vm0 = vcmp.eq.s32.totalorder %v12964_v26, %v16331_v35  ;;  %vm3763_vm11 = vcmp.eq.s32.totalorder %v12964_v26, %v16334_v50  ;;  %v10989_v26 = vld [vmem:[%s19736_s3 + $0x40] sm:$0xff] }
 0x4cb   : > { %11668 = vmatpush3.msk.msra.mxu1 %vm3629_vm9, %v20494_v62  ;;  %11703 = vmatpush3.msk.msra.mxu0 %vm3765_vm12, %v20494_v62  ;;  %vm3642_vm9 = vcmp.eq.s32.totalorder %v13291_v55, %v16331_v35  ;;  %vm3778_vm12 = vcmp.eq.s32.totalorder %v13291_v55, %v16334_v50  ;;  %v21272_v55 = vmov 0 }
 0x4cc   : > { %11669 = vmatprep.subr.msk.mxu1 %vm3644_vm10, %v20494_v62  ;;  %11704 = vmatprep.subr.msk.mxu0 %vm3780_vm15, %v20494_v62  ;;  %vm3626_vm10 = vcmp.eq.s32.totalorder %v12988_v28, %v16331_v35  ;;  %vm3762_vm15 = vcmp.eq.s32.totalorder %v12988_v28, %v16334_v50 }
 0x4cd   : > { %11670 = vmatpush3.msk.msra.mxu1 %vm3628_vm7, %v20494_v62  ;;  %11705 = vmatpush3.msk.msra.mxu0 %vm3764_vm5, %v20494_v62  ;;  %vm3641_vm7 = vcmp.eq.s32.totalorder %v13313_v57, %v16331_v35  ;;  %vm3777_vm5 = vcmp.eq.s32.totalorder %v13313_v57, %v16334_v50  ;;  %v21267_v57 = vmov 0 }
 0x4ce   : > { %11671 = vmatprep.subr.msk.mxu1 %vm3643_vm6, %v20494_v62  ;;  %11706 = vmatprep.subr.msk.mxu0 %vm3779_vm8, %v20494_v62  ;;  %vm3625_vm6 = vcmp.eq.s32.totalorder %v13010_v30, %v16331_v35  ;;  %vm3761_vm8 = vcmp.eq.s32.totalorder %v13010_v30, %v16334_v50 }
 0x4cf   : > { %11672 = vmatpush3.msk.msra.mxu1 %vm3627_vm0, %v20494_v62  ;;  %11707 = vmatpush3.msk.msra.mxu0 %vm3763_vm11, %v20494_v62  ;;  %vm3640_vm0 = vcmp.eq.s32.totalorder %v13335_v59, %v16331_v35  ;;  %vm3776_vm11 = vcmp.eq.s32.totalorder %v13335_v59, %v16334_v50  ;;  %v21262_v59 = vmov 0 }
 0x4d0   : > { %11673 = vmatprep.subr.msk.mxu1 %vm3642_vm9, %v20494_v62  ;;  %11708 = vmatprep.subr.msk.mxu0 %vm3778_vm12, %v20494_v62  ;;  %vm3624_vm9 = vcmp.eq.s32.totalorder %v13032_v32, %v16331_v35  ;;  %vm3760_vm12 = vcmp.eq.s32.totalorder %v13032_v32, %v16334_v50 }
 0x4d1   : > { %11674 = vmatpush3.msk.msra.mxu1 %vm3626_vm10, %v20494_v62  ;;  %11709 = vmatpush3.msk.msra.mxu0 %vm3762_vm15, %v20494_v62  ;;  %vm3639_vm10 = vcmp.eq.s32.totalorder %v13357_v61, %v16331_v35  ;;  %vm3775_vm15 = vcmp.eq.s32.totalorder %v13357_v61, %v16334_v50  ;;  %v21258_v61 = vmov 0 }
 0x4d2   : > { %11675 = vmatprep.subr.msk.mxu1 %vm3641_vm7, %v20494_v62  ;;  %11710 = vmatprep.subr.msk.mxu0 %vm3777_vm5, %v20494_v62  ;;  %vm3623_vm7 = vcmp.eq.s32.totalorder %v13054_v34, %v16331_v35  ;;  %vm3759_vm5 = vcmp.eq.s32.totalorder %v13054_v34, %v16334_v50 }
 0x4d3   : > { %11676 = vmatpush3.msk.msra.mxu1 %vm3625_vm6, %v20494_v62  ;;  %11711 = vmatpush3.msk.msra.mxu0 %vm3761_vm8, %v20494_v62  ;;  %vm3638_vm6 = vcmp.eq.s32.totalorder %v13379_v63, %v16331_v35  ;;  %vm3774_vm8 = vcmp.eq.s32.totalorder %v13379_v63, %v16334_v50  ;;  %v21250_v63 = vmov 0 }
 0x4d4   : > { %11677 = vmatprep.subr.msk.mxu1 %vm3640_vm0, %v20494_v62  ;;  %11712 = vmatprep.subr.msk.mxu0 %vm3776_vm11, %v20494_v62  ;;  %vm3622_vm0 = vcmp.eq.s32.totalorder %v13076_v36, %v16331_v35  ;;  %vm3758_vm11 = vcmp.eq.s32.totalorder %v13076_v36, %v16334_v50 }
 0x4d5   : > { %11678 = vmatpush3.msk.msra.mxu1 %vm3624_vm9, %v20494_v62  ;;  %11713 = vmatpush3.msk.msra.mxu0 %vm3760_vm12, %v20494_v62  ;;  %vm3637_vm9 = vcmp.eq.s32.totalorder %v13401_v14, %v16331_v35  ;;  %vm3773_vm12 = vcmp.eq.s32.totalorder %v13401_v14, %v16334_v50  ;;  %v21241_v14 = vmov 0 }
 0x4d6   : > { %11679 = vmatprep.subr.msk.mxu1 %vm3639_vm10, %v20494_v62  ;;  %11714 = vmatprep.subr.msk.mxu0 %vm3775_vm15, %v20494_v62  ;;  %vm3621_vm10 = vcmp.eq.s32.totalorder %v13098_v38, %v16331_v35  ;;  %vm3757_vm15 = vcmp.eq.s32.totalorder %v13098_v38, %v16334_v50 }
 0x4d7   : > { %11680 = vmatpush3.msk.msra.mxu1 %vm3623_vm7, %v20494_v62  ;;  %11715 = vmatpush3.msk.msra.mxu0 %vm3759_vm5, %v20494_v62  ;;  %vm3636_vm7 = vcmp.eq.s32.totalorder %v13423_v16, %v16331_v35  ;;  %vm3772_vm5 = vcmp.eq.s32.totalorder %v13423_v16, %v16334_v50  ;;  %v10975_v16 = vld [vmem:[%s19736_s3 + $0x30] sm:$0xff] }
 0x4d8   : > { %11681 = vmatprep.subr.msk.mxu1 %vm3638_vm6, %v20494_v62  ;;  %11716 = vmatprep.subr.msk.mxu0 %vm3774_vm8, %v20494_v62  ;;  %vm3620_vm6 = vcmp.eq.s32.totalorder %v13120_v40, %v16331_v35  ;;  %vm3756_vm8 = vcmp.eq.s32.totalorder %v13120_v40, %v16334_v50 }
 0x4d9   : > { %11682 = vmatpush3.msk.msra.mxu1 %vm3622_vm0, %v20494_v62  ;;  %11717 = vmatpush3.msk.msra.mxu0 %vm3758_vm11, %v20494_v62  ;;  %vm3635_vm0 = vcmp.eq.s32.totalorder %v13509_v15, %v16331_v35  ;;  %vm3771_vm11 = vcmp.eq.s32.totalorder %v13509_v15, %v16334_v50  ;;  %v21230_v15 = vmov 0 }
 0x4da   : > { %11683 = vmatprep.subr.msk.mxu1 %vm3637_vm9, %v20494_v62  ;;  %11718 = vmatprep.subr.msk.mxu0 %vm3773_vm12, %v20494_v62  ;;  %vm3619_vm9 = vcmp.eq.s32.totalorder %v13142_v42, %v16331_v35  ;;  %vm3755_vm12 = vcmp.eq.s32.totalorder %v13142_v42, %v16334_v50 }
 0x4db   : > { %11684 = vmatpush3.msk.msra.mxu1 %vm3621_vm10, %v20494_v62  ;;  %11719 = vmatpush3.msk.msra.mxu0 %vm3757_vm15, %v20494_v62  ;;  %vm3634_vm10 = vcmp.eq.s32.totalorder %v13514_v0, %v16331_v35  ;;  %vm3770_vm15 = vcmp.eq.s32.totalorder %v13514_v0, %v16334_v50 }
 0x4dc   : > { %11685 = vmatprep.subr.msk.mxu1 %vm3636_vm7, %v20494_v62  ;;  %11720 = vmatprep.subr.msk.mxu0 %vm3772_vm5, %v20494_v62  ;;  %vm3618_vm7 = vcmp.eq.s32.totalorder %v12829_v2, %v16331_v35  ;;  %vm3754_vm5 = vcmp.eq.s32.totalorder %v12829_v2, %v16334_v50 }
 0x4dd   : > { %11686 = vmatpush3.msk.msra.mxu1 %vm3620_vm6, %v20494_v62  ;;  %11721 = vmatpush3.msk.msra.mxu0 %vm3756_vm8, %v20494_v62  ;;  %vm20201_vm6 = vcmp.eq.s32.totalorder %v13010_v30, %v16551_v60  ;;  %vm20200_vm8 = vcmp.eq.s32.totalorder %v13032_v32, %v16551_v60 }
 0x4de   : > { %11687 = vmatprep.subr.msk.mxu1 %vm3635_vm0, %v20494_v62  ;;  %11722 = vmatprep.subr.msk.mxu0 %vm3771_vm11, %v20494_v62  ;;  %vm20199_vm0 = vcmp.eq.s32.totalorder %v13054_v34, %v16551_v60  ;;  %vm20198_vm11 = vcmp.eq.s32.totalorder %v13076_v36, %v16551_v60 }
 0x4df   : > { %11688 = vmatpush3.msk.msra.mxu1 %vm3619_vm9, %v20494_v62  ;;  %11723 = vmatpush3.msk.msra.mxu0 %vm3755_vm12, %v20494_v62  ;;  %vm20197_vm9 = vcmp.eq.s32.totalorder %v13098_v38, %v16551_v60  ;;  %vm20196_vm12 = vcmp.eq.s32.totalorder %v13120_v40, %v16551_v60 }
 0x4e0   : > { %11689 = vmatprep.subr.msk.mxu1 %vm3634_vm10, %v20494_v62  ;;  %11724 = vmatprep.subr.msk.mxu0 %vm3770_vm15, %v20494_v62  ;;  %vm20195_vm10 = vcmp.eq.s32.totalorder %v13142_v42, %v16551_v60  ;;  %vm20194_vm15 = vcmp.eq.s32.totalorder %v12829_v2, %v16551_v60 }
 0x4e1   : > { %11690 = vmatpush3.msk.msra.mxu1 %vm3618_vm7, %v20494_v62  ;;  %11725 = vmatpush3.msk.msra.mxu0 %vm3754_vm5, %v20494_v62  ;;  %vm20202_vm7 = vcmask 64512   ;;  %vm3897_vm5 = vcmp.eq.s32.totalorder %v13010_v30, %v3889_v23 }
 0x4e2   : > { %3747 = vmatmul.mubr.f32.vlgmr.msra.gmra.mxu1 %v16354_v31  ;;  %3883 = vmatmul.mubr.f32.vlgmr.msra.gmra.mxu0 %v16354_v31 }
 0x4e3   : > { %12080 = vmatprep.subr.msk.mxu0 %vm20201_vm6, %v20494_v62  ;;  %12072 = vmatprep.mubr.msk.f32.mxu1 %vm20202_vm7, %v3917_v44  ;;  %v3918_v44 = vld [vmem:[%s19736_s3 + $0x8] sm:$0xff] }
 0x4e4   : > { %12081 = vmatpush3.msk.msra.mxu0 %vm20201_vm6, %v20494_v62 }
 0x4e5   : > { %12082 = vmatprep.subr.msk.mxu0 %vm20200_vm8, %v20494_v62 }
 0x4e6   : > { %12083 = vmatpush3.msk.msra.mxu0 %vm20200_vm8, %v20494_v62 }
 0x4e7   : > { %12084 = vmatprep.subr.msk.mxu0 %vm20199_vm0, %v20494_v62 }
 0x4e8   : > { %12085 = vmatpush3.msk.msra.mxu0 %vm20199_vm0, %v20494_v62 }
 0x4e9   : > { %12086 = vmatprep.subr.msk.mxu0 %vm20198_vm11, %v20494_v62 }
 0x4ea   : > { %12087 = vmatpush3.msk.msra.mxu0 %vm20198_vm11, %v20494_v62  ;;  %vm3894_vm11 = vcmp.eq.s32.totalorder %v13076_v36, %v3889_v23 }
 0x4eb   : > { %12088 = vmatprep.subr.msk.mxu0 %vm20197_vm9, %v20494_v62 }
 0x4ec   : > { %12089 = vmatpush3.msk.msra.mxu0 %vm20197_vm9, %v20494_v62 }
 0x4ed   : > { %12090 = vmatprep.subr.msk.mxu0 %vm20196_vm12, %v20494_v62 }
 0x4ee   : > { %12091 = vmatpush3.msk.msra.mxu0 %vm20196_vm12, %v20494_v62  ;;  %vm3896_vm12 = vcmp.eq.s32.totalorder %v13032_v32, %v3889_v23 }
 0x4ef   : > { %12092 = vmatprep.subr.msk.mxu0 %vm20195_vm10, %v20494_v62 }
 0x4f0   : > { %12093 = vmatpush3.msk.msra.mxu0 %vm20195_vm10, %v20494_v62 }
 0x4f1   : > { %12094 = vmatprep.subr.msk.mxu0 %vm20194_vm15, %v20494_v62 }
 0x4f2   : > { %12095 = vmatpush3.msk.msra.mxu0 %vm20194_vm15, %v20494_v62  ;;  %vm20206_vm15 = vcmp.ge.s32.totalorder %v16121_v25, 1 }
 0x4f3   : > { %vm16653_vm10 = vmand %vm3897_vm5, %vm20206_vm15  ;;  %vm3895_vm5 = vcmp.eq.s32.totalorder %v13054_v34, %v3889_v23 }
 0x4f4   : > { %vm16671_vm9 = vmand %vm3896_vm12, %vm20206_vm15  ;;  %vm3893_vm12 = vcmp.eq.s32.totalorder %v13098_v38, %v3889_v23 }
 0x4f5   : > { %vm16682_vm0 = vmand %vm3895_vm5, %vm20206_vm15  ;;  %vm3892_vm5 = vcmp.eq.s32.totalorder %v13120_v40, %v3889_v23 }
 0x4f6   : > { %vm16695_vm8 = vmand %vm3894_vm11, %vm20206_vm15  ;;  %vm3891_vm11 = vcmp.eq.s32.totalorder %v13142_v42, %v3889_v23 }
 0x4f7   : > { %vm16708_vm6 = vmand %vm3893_vm12, %vm20206_vm15 }
 0x4f8   : > { %vm16733_vm12 = vmand %vm3891_vm11, %vm20206_vm15 }
 0x581   : > { %v11621_v22 = vpop.f32.mrf.mxu1  ;;  %v11656_v33 = vpop.f32.mrf.mxu0 }
 0x583   : > { %v11622_v58 = vpop.f32.mrf.mxu1  ;;  %v11657_v35 = vpop.f32.mrf.mxu0 }
 0x584   : > { %v11623_v50 = vadd.f32 %v11622_v58, %v11621_v22  ;;  %v11658_v17 = vadd.f32 %v11657_v35, %v11656_v33  ;;  %v10937_v22 = vld [vmem:[%s19736_s3 + $0x10] sm:$0xff]  ;;  %v21207_v33 = vmov 0  ;;  %v21209_v58 = vmov 0 }
 0x585   : > { %v21208_v33 = vsel %vm16682_vm0, 4294967295, %v21207_v33  ;;  %v21210_v58 = vsel %vm16695_vm8, 4294967295, %v21209_v58  ;;  %v21211_v35 = vmov 0 }
 0x586   : > { %v3616_v19 = vmax.f32 %v11623_v50, %v11658_v17  ;;  %v21212_v35 = vsel %vm16708_vm6, 4294967295, %v21211_v35  ;;  %v21213_v50 = vmov 0  ;;  %v21215_v17 = vmov 0 }
 0x587   : > { %v21216_v17 = vsel %vm16733_vm12, 4294967295, %v21215_v17 }
 0x5a2   : > { %v11691_v20 = vpop.f32.mrf.mxu1  ;;  %v11726_v27 = vpop.f32.mrf.mxu0 }
 0x5a4   : > { %v11692_v12 = vpop.f32.mrf.mxu1  ;;  %v11727_v37 = vpop.f32.mrf.mxu0 }
 0x5a5   : > { %v11693_v29 = vadd.f32 %v11692_v12, %v11691_v20  ;;  %v11728_v52 = vadd.f32 %v11727_v37, %v11726_v27  ;;  %v4265_v20 = vadd.s32 4294967289, %v12831_v3  ;;  %v21217_v27 = vmov 0 }
 0x5a7   : > { %v3752_v46 = vmax.f32 %v3616_v19, %v11693_v29  ;;  %v21205_v29 = vmov 0  ;;  %v21221_v19 = vmov 0 }
 0x5a8   : > { %v21206_v29 = vsel %vm16671_vm9, 4294967295, %v21205_v29 }
 0x5a9   : > { %v16638_v0 = vmax.f32 %v3752_v46, %v11728_v52  ;;  %v21203_v46 = vmov 0  ;;  %v10938_v52 = vld [vmem:[%s19736_s3 + $0x18] sm:$0xff] }
 0x5aa   : > { %v21204_v46 = vsel %vm16653_vm10, 4294967295, %v21203_v46 }
 0x5ab   : > { %12070 = vmatprep.subr.mxu1 %v16638_v0  ;;  %12118 = vmatprep.subr.mxu0 %v16638_v0 }
 0x5ac   : > { %12071 = vmatpush3.msra.mxu1 %v16638_v0 }
 0x5ad   : > { %12073 = vmatmul.mubr.msk.f32.vlgmr.msra.gmra.mxu1 %vm20202_vm7, %v3918_v44  ;;  %12075 = vmatprep.subr.mxu1 %v16638_v0 }
 0x5ae   : > { %12076 = vmatpush3.msra.mxu1 %v16638_v0  ;;  %12077 = vmatprep.mubr.msk.f32.mxu1 %vm20202_vm7, %v10937_v22  ;;  %v21223_v22 = vmov 0 }
 0x5af   : > { %12099 = vmatprep.subr.msk.mxu1 %vm16653_vm10, %v20494_v62 }
 0x5b1   : > { %12078 = vmatmul.mubr.msk.f32.vlgmr.msra.gmra.mxu1 %vm20202_vm7, %v10938_v52  ;;  %vm16721_vm7 = vmand %vm3892_vm5, %vm20206_vm15  ;;  %vm3890_vm5 = vcmp.eq.s32.totalorder %v12829_v2, %v3889_v23  ;;  %v21219_v23 = vmov 0 }
 0x5b2   : > { %12100 = vmatpush3.msk.msra.mxu1 %vm16653_vm10, %v20494_v62  ;;  %v21214_v50 = vsel %vm16721_vm7, 4294967295, %v21213_v50  ;;  %vm16753_vm11 = vmand %vm3890_vm5, %vm20206_vm15  ;;  %vm20211_vm5 = vcmask 523264   ;;  %vm4272_vm15 = vcmp.eq.s32.totalorder %v13032_v32, %v4265_v20 }
 0x5b3   : > { %12101 = vmatprep.subr.msk.mxu1 %vm16671_vm9, %v20494_v62  ;;  %v21218_v27 = vsel %vm16753_vm11, 4294967295, %v21217_v27 }
 0x5b4   : > { %12102 = vmatpush3.msk.msra.mxu1 %vm16671_vm9, %v20494_v62 }
 0x5b5   : > { %12103 = vmatprep.subr.msk.mxu1 %vm16682_vm0, %v20494_v62 }
 0x5b6   : > { %12104 = vmatpush3.msk.msra.mxu1 %vm16682_vm0, %v20494_v62 }
 0x5b7   : > { %12105 = vmatprep.subr.msk.mxu1 %vm16695_vm8, %v20494_v62 }
 0x5b8   : > { %12106 = vmatpush3.msk.msra.mxu1 %vm16695_vm8, %v20494_v62  ;;  %vm4271_vm8 = vcmp.eq.s32.totalorder %v13054_v34, %v4265_v20 }
 0x5b9   : > { %12107 = vmatprep.subr.msk.mxu1 %vm16708_vm6, %v20494_v62 }
 0x5ba   : > { %12108 = vmatpush3.msk.msra.mxu1 %vm16708_vm6, %v20494_v62  ;;  %vm20219_vm6 = vcmp.lt.s32.totalorder %v16121_v25, 7 }
 0x5bb   : > { %12109 = vmatprep.subr.msk.mxu1 %vm16721_vm7, %v20494_v62  ;;  %vm16790_vm0 = vmand %vm4271_vm8, %vm20219_vm6  ;;  %vm4268_vm8 = vcmp.eq.s32.totalorder %v13120_v40, %v4265_v20 }
 0x5bc   : > { %12110 = vmatpush3.msk.msra.mxu1 %vm16721_vm7, %v20494_v62  ;;  %vm4273_vm7 = vcmp.eq.s32.totalorder %v13010_v30, %v4265_v20  ;;  %v21224_v22 = vsel %vm16790_vm0, 4294967295, %v21223_v22 }
 0x5bd   : > { %12111 = vmatprep.subr.msk.mxu1 %vm16733_vm12, %v20494_v62 }
 0x5be   : > { %12112 = vmatpush3.msk.msra.mxu1 %vm16733_vm12, %v20494_v62  ;;  %vm16767_vm12 = vmand %vm4273_vm7, %vm20219_vm6  ;;  %vm4270_vm7 = vcmp.eq.s32.totalorder %v13076_v36, %v4265_v20 }
 0x5bf   : > { %12113 = vmatprep.subr.msk.mxu1 %vm16753_vm11, %v20494_v62  ;;  %v21220_v23 = vsel %vm16767_vm12, 4294967295, %v21219_v23 }
 0x5c0   : > { %12114 = vmatpush3.msk.msra.mxu1 %vm16753_vm11, %v20494_v62  ;;  %vm16779_vm11 = vmand %vm4272_vm15, %vm20219_vm6  ;;  %vm4269_vm15 = vcmp.eq.s32.totalorder %v13098_v38, %v4265_v20 }
 0x5c1   : > { %12123 = vmatprep.subr.msk.mxu1 %vm16767_vm12, %v20494_v62  ;;  %v21222_v19 = vsel %vm16779_vm11, 4294967295, %v21221_v19 }
 0x66d   : > { %v12074_v12 = vpop.f32.mrf.mxu1 }
 0x66f   : > { %v3992_v37 = vpop.f32.mrf.mxu1 }
 0x670   : > { %12115 = vmatprep.mubr.msk.f32.mxu1 %vm20211_vm5, %v3992_v37  ;;  %v10961_v37 = vld [vmem:[%s19736_s3 + $0x20] sm:$0xff] }
 0x671   : > { %v12079_v44 = vpop.f32.mrf.mxu1  ;;  %12116 = vmatmul.mubr.msk.f32.vlgmr.msra.gmra.mxu1 %vm20211_vm5, %v12074_v12  ;;  %v21225_v12 = vmov 0 }
 0x672   : > { %12124 = vmatpush3.msk.msra.mxu1 %vm16767_vm12, %v20494_v62  ;;  %vm16804_vm12 = vmand %vm4270_vm7, %vm20219_vm6 }
 0x673   : > { %12125 = vmatprep.subr.msk.mxu1 %vm16779_vm11, %v20494_v62  ;;  %v4093_v52 = vpop.f32.mrf.mxu1  ;;  %v21226_v12 = vsel %vm16804_vm12, 4294967295, %v21225_v12  ;;  %vm16822_vm7 = vmand %vm4269_vm15, %vm20219_vm6  ;;  %vm21229_vm15 = vcmask 64512  }
 0x674   : > { %12126 = vmatpush3.msk.msra.mxu1 %vm16779_vm11, %v20494_v62  ;;  %12096 = vmatprep.mubr.msk.f32.mxu0 %vm20211_vm5, %v4093_v52  ;;  %vm4266_vm11 = vcmp.eq.s32.totalorder %v12829_v2, %v4265_v20  ;;  %vm21232_vm9 = vmmov %vm21229_vm15  ;;  %v21461_v52 = vld [vmem:[#allocation135_spill] sm:$0xff] }
 0x675   : > { %12127 = vmatprep.subr.msk.mxu1 %vm16790_vm0, %v20494_v62  ;;  %12097 = vmatmul.mubr.msk.f32.vlgmr.msra.gmra.mxu0 %vm20211_vm5, %v12079_v44  ;;  %v10962_v44 = vld [vmem:[%s19736_s3 + $0x28] sm:$0xff]  ;;  %vm4267_vm5 = vcmp.eq.s32.totalorder %v13142_v42, %v4265_v20  ;;  %v21238_v20 = vmov 0 }
 0x676   : > { %12119 = vmatpush3.msra.mxu0 %v16638_v0  ;;  %12128 = vmatpush3.msk.msra.mxu1 %vm16790_vm0, %v20494_v62  ;;  %vm16840_vm0 = vmand %vm4268_vm8, %vm20219_vm6  ;;  %vm21234_vm8 = vcmp.eq.s32.totalorder %v13010_v30, %v13576_v54 }
 0x677   : > { %12129 = vmatprep.subr.msk.mxu1 %vm16804_vm12, %v20494_v62  ;;  %12142 = vmatprep.subr.mxu0 %v16638_v0  ;;  %v21231_v15 = vsel %vm16840_vm0, 4294967295, %v21230_v15 }
 0x678   : > { %12130 = vmatpush3.msk.msra.mxu1 %vm16804_vm12, %v20494_v62  ;;  %12120 = vmatprep.mubr.msk.f32.mxu0 %vm21229_vm15, %v10961_v37  ;;  %vm21233_vm15 = vcmp.ge.s32.totalorder %v16121_v25, 1  ;;  %vm21237_vm12 = vcmp.lt.s32.totalorder %v16121_v25, 7  ;;  %v21463_v37 = vld [vmem:[#allocation137_spill] sm:$0xff] }
 0x679   : > { %12131 = vmatprep.subr.msk.mxu1 %vm16822_vm7, %v20494_v62  ;;  %12121 = vmatmul.mubr.msk.f32.vlgmr.msra.gmra.mxu0 %vm21232_vm9, %v10962_v44  ;;  %vm16857_vm6 = vmand %vm21234_vm8, %vm21233_vm15  ;;  %v10976_v44 = vld [vmem:[%s19736_s3 + $0x38] sm:$0xff] }
 0x67a   : > { %12132 = vmatpush3.msk.msra.mxu1 %vm16822_vm7, %v20494_v62  ;;  %12143 = vmatpush3.msra.mxu0 %v16638_v0  ;;  %vm16867_vm10 = vmand %vm4267_vm5, %vm21237_vm12  ;;  %vm21244_vm5 = vcmp.eq.s32.totalorder %v13032_v32, %v13576_v54 }
 0x67b   : > { %v21239_v20 = vsel %vm16867_vm10, 4294967295, %v21238_v20  ;;  %12133 = vmatprep.subr.msk.mxu1 %vm16840_vm0, %v20494_v62  ;;  %12144 = vmatprep.mubr.msk.f32.mxu0 %vm21232_vm9, %v10975_v16  ;;  %vm21240_vm15 = vmmov %vm21237_vm12  ;;  %vm21243_vm12 = vcmp.ge.s32.totalorder %v16121_v25, 1  ;;  %v21467_v16 = vld [vmem:[#allocation139_spill] sm:$0xff] }
 0x67c   : > { %vm16880_vm8 = vmand %vm4266_vm11, %vm21240_vm15  ;;  %12134 = vmatpush3.msk.msra.mxu1 %vm16840_vm0, %v20494_v62  ;;  %12147 = vmatprep.subr.msk.mxu0 %vm16857_vm6, %v20494_v62  ;;  %vm21247_vm11 = vcmask 64512  }
 0x67d   : > { %v21242_v14 = vsel %vm16880_vm8, 4294967295, %v21241_v14  ;;  %vm16895_vm9 = vmand %vm21244_vm5, %vm21243_vm12  ;;  %12135 = vmatprep.subr.msk.mxu1 %vm16867_vm10, %v20494_v62  ;;  %12145 = vmatmul.mubr.msk.f32.vlgmr.msra.gmra.mxu0 %vm21247_vm11, %v10976_v44  ;;  %v21254_v44 = vmov 0 }
 0x67e   : > { %12136 = vmatpush3.msk.msra.mxu1 %vm16867_vm10, %v20494_v62  ;;  %12148 = vmatpush3.msk.msra.mxu0 %vm16857_vm6, %v20494_v62  ;;  %vm21248_vm15 = vmmov %vm21243_vm12  ;;  %vm21249_vm12 = vcmp.eq.s32.totalorder %v13054_v34, %v13576_v54  ;;  %vm21257_vm10 = vcmp.eq.s32.totalorder %v13098_v38, %v13576_v54 }
 0x67f   : > { %vm16914_vm5 = vmand %vm21249_vm12, %vm21248_vm15  ;;  %12137 = vmatprep.subr.msk.mxu1 %vm16880_vm8, %v20494_v62  ;;  %12149 = vmatprep.subr.msk.mxu0 %vm16895_vm9, %v20494_v62 }
 0x680   : > { %v21251_v63 = vsel %vm16914_vm5, 4294967295, %v21250_v63  ;;  %12138 = vmatpush3.msk.msra.mxu1 %vm16880_vm8, %v20494_v62  ;;  %12150 = vmatpush3.msk.msra.mxu0 %vm16895_vm9, %v20494_v62  ;;  %vm21252_vm11 = vmmov %vm21248_vm15  ;;  %vm21253_vm15 = vcmp.eq.s32.totalorder %v13076_v36, %v13576_v54 }
 0x681   : > { %vm16935_vm12 = vmand %vm21253_vm15, %vm21252_vm11  ;;  %12151 = vmatprep.subr.msk.mxu0 %vm16914_vm5, %v20494_v62  ;;  %12166 = vmatprep.subr.mxu1 %v16638_v0  ;;  %vm21261_vm15 = vcmp.eq.s32.totalorder %v13120_v40, %v13576_v54 }
 0x682   : > { %v21255_v44 = vsel %vm16935_vm12, 4294967295, %v21254_v44  ;;  %12152 = vmatpush3.msk.msra.mxu0 %vm16914_vm5, %v20494_v62  ;;  %vm21256_vm8 = vmmov %vm21252_vm11 }
 0x683   : > { %vm16951_vm0 = vmand %vm21257_vm10, %vm21256_vm8  ;;  %12153 = vmatprep.subr.msk.mxu0 %vm16935_vm12, %v20494_v62 }
 0x684   : > { %v21259_v61 = vsel %vm16951_vm0, 4294967295, %v21258_v61  ;;  %12154 = vmatpush3.msk.msra.mxu0 %vm16935_vm12, %v20494_v62  ;;  %vm21260_vm11 = vmmov %vm21256_vm8 }
 0x685   : > { %vm16966_vm5 = vmand %vm21261_vm15, %vm21260_vm11  ;;  %12155 = vmatprep.subr.msk.mxu0 %vm16951_vm0, %v20494_v62  ;;  %vm21271_vm15 = vcmp.eq.s32.totalorder %v12829_v2, %v13576_v54 }
 0x686   : > { %v21263_v59 = vsel %vm16966_vm5, 4294967295, %v21262_v59  ;;  %12156 = vmatpush3.msk.msra.mxu0 %vm16951_vm0, %v20494_v62  ;;  %vm21265_vm10 = vmmov %vm21256_vm8  ;;  %vm21266_vm8 = vcmp.eq.s32.totalorder %v13142_v42, %v13576_v54 }
 0x687   : > { %21264 = vst [vmem:[#allocation236_spill] sm:$0xff] %v21263_v59  ;;  %vm16981_vm12 = vmand %vm21266_vm8, %vm21265_vm10  ;;  %12157 = vmatprep.subr.msk.mxu0 %vm16966_vm5, %v20494_v62 }
 0x688   : > { %v21268_v57 = vsel %vm16981_vm12, 4294967295, %v21267_v57  ;;  %12158 = vmatpush3.msk.msra.mxu0 %vm16966_vm5, %v20494_v62  ;;  %vm21270_vm11 = vmmov %vm21265_vm10  ;;  %vm21275_vm10 = vcmask 523264  }
 0x689   : > { %21269 = vst [vmem:[#allocation237_spill] sm:$0xff] %v21268_v57  ;;  %vm16996_vm0 = vmand %vm21271_vm15, %vm21270_vm11  ;;  %12159 = vmatprep.subr.msk.mxu0 %vm16981_vm12, %v20494_v62  ;;  %vm21277_vm11 = vcmask 64512  }
 0x68a   : > { %v21273_v55 = vsel %vm16996_vm0, 4294967295, %v21272_v55  ;;  %12160 = vmatpush3.msk.msra.mxu0 %vm16981_vm12, %v20494_v62  ;;  %vm21276_vm8 = vmmov %vm21275_vm10 }
 0x68b   : > { %21274 = vst [vmem:[#allocation238_spill] sm:$0xff] %v21273_v55  ;;  %12161 = vmatprep.subr.msk.mxu0 %vm16996_vm0, %v20494_v62  ;;  %vm21278_vm15 = vmmov %vm21276_vm8 }
 0x68c   : > { %12162 = vmatpush3.msk.msra.mxu0 %vm16996_vm0, %v20494_v62  ;;  %vm21282_vm0 = vcmp.eq.s32.totalorder %v13010_v30, %v14399_v7 }
 0x68d   : > { %12190 = vmatprep.subr.mxu0 %v16638_v0 }
 0x731   : > { %v12117_v53 = vpop.f32.mrf.mxu1 }
 0x733   : > { %v4256_v4 = vpop.f32.mrf.mxu1 }
 0x735   : > { %v12098_v51 = vpop.f32.mrf.mxu0 }
 0x736   : > { %v17013_v49 = vadd.f32 %v12117_v53, %v12098_v51  ;;  %v10990_v51 = vld [vmem:[%s19736_s3 + $0x48] sm:$0xff] }
 0x737   : > { %v17015_v47 = vpop.f32.mrf.mxu0 }
 0x738   : > { %v4257_v13 = vadd.f32 %v4256_v4, %v17015_v47  ;;  %v21325_v4 = vmov 0  ;;  %v21339_v47 = vmov 0 }
 0x739   : > { %v12122_v45 = vpop.f32.mrf.mxu0 }
 0x73b   : > { %v4368_v28 = vpop.f32.mrf.mxu0 }
 0x73c   : > { %12139 = vmatprep.mubr.msk.f32.mxu1 %vm21275_vm10, %v4368_v28  ;;  %v11003_v28 = vld [vmem:[%s19736_s3 + $0x50] sm:$0xff]  ;;  %vm21279_vm10 = vmmov %vm21276_vm8 }
 0x73d   : > { %12140 = vmatmul.mubr.msk.f32.vlgmr.msra.gmra.mxu1 %vm21276_vm8, %v12122_v45  ;;  %v12146_v24 = vpop.f32.mrf.mxu0  ;;  %vm21280_vm8 = vmmov %vm21277_vm11  ;;  %v21289_v45 = vmov 0 }
 0x73e   : > { %12167 = vmatpush3.msra.mxu1 %v16638_v0  ;;  %12168 = vmatprep.mubr.msk.f32.mxu1 %vm21277_vm11, %v10989_v26  ;;  %vm21281_vm11 = vcmp.lt.s32.totalorder %v16121_v25, 7  ;;  %v21283_v26 = vmov 0 }
 0x73f   : > { %v4551_v53 = vpop.f32.mrf.mxu0  ;;  %12171 = vmatprep.subr.msk.mxu1 %vm14554_vm14, %v20494_v62  ;;  %vm17041_vm12 = vmand %vm21282_vm0, %vm21281_vm11 }
 0x740   : > { %12163 = vmatprep.mubr.msk.f32.mxu0 %vm21278_vm15, %v4551_v53  ;;  %v21284_v26 = vsel %vm17041_vm12, 4294967295, %v21283_v26  ;;  %vm21286_vm15 = vmmov %vm21280_vm8  ;;  %v21300_v53 = vmov 0 }
 0x741   : > { %12164 = vmatmul.mubr.msk.f32.vlgmr.msra.gmra.mxu0 %vm21279_vm10, %v12146_v24  ;;  %12169 = vmatmul.mubr.msk.f32.vlgmr.msra.gmra.mxu1 %vm21280_vm8, %v10990_v51  ;;  %21285 = vst [vmem:[#allocation239_spill] sm:$0xff] %v21284_v26  ;;  %v11004_v24 = vld [vmem:[%s19736_s3 + $0x58] sm:$0xff]  ;;  %vm21287_vm0 = vmmov %vm21281_vm11  ;;  %vm21288_vm10 = vcmp.eq.s32.totalorder %v13032_v32, %v14399_v7  ;;  %v21295_v51 = vmov 0 }
 0x742   : > { %12172 = vmatpush3.msk.msra.mxu1 %vm14554_vm14, %v20494_v62  ;;  %12191 = vmatpush3.msra.mxu0 %v16638_v0  ;;  %vm17067_vm8 = vmand %vm21288_vm10, %vm21287_vm0 }
 0x743   : > { %12173 = vmatprep.subr.msk.mxu1 %vm14577_vm4, %v20494_v62  ;;  %12192 = vmatprep.mubr.msk.f32.mxu0 %vm21286_vm15, %v11003_v28  ;;  %v21290_v45 = vsel %vm17067_vm8, 4294967295, %v21289_v45  ;;  %vm21292_vm11 = vmmov %vm21286_vm15  ;;  %v21304_v28 = vmov 0 }
 0x744   : > { %12174 = vmatpush3.msk.msra.mxu1 %vm14577_vm4, %v20494_v62  ;;  %12195 = vmatprep.subr.msk.mxu0 %vm17041_vm12, %v20494_v62  ;;  %21291 = vst [vmem:[#allocation240_spill] sm:$0xff] %v21290_v45  ;;  %vm21293_vm15 = vmmov %vm21287_vm0  ;;  %vm21294_vm0 = vcmp.eq.s32.totalorder %v13054_v34, %v14399_v7  ;;  %vm4998_vm4 = vcmp.eq.s32.totalorder %v13076_v36, %v4993_v8 }
 0x745   : > { %12175 = vmatprep.subr.msk.mxu1 %vm14602_vm2, %v20494_v62  ;;  %12193 = vmatmul.mubr.msk.f32.vlgmr.msra.gmra.mxu0 %vm21292_vm11, %v11004_v24  ;;  %vm17086_vm10 = vmand %vm21294_vm0, %vm21293_vm15  ;;  %v21308_v24 = vmov 0 }
 0x746   : > { %12176 = vmatpush3.msk.msra.mxu1 %vm14602_vm2, %v20494_v62  ;;  %12196 = vmatpush3.msk.msra.mxu0 %vm17041_vm12, %v20494_v62  ;;  %v21296_v51 = vsel %vm17086_vm10, 4294967295, %v21295_v51  ;;  %vm21298_vm11 = vmmov %vm21293_vm15  ;;  %vm21299_vm15 = vcmp.eq.s32.totalorder %v13076_v36, %v14399_v7  ;;  %vm21330_vm2 = vcmask 64512   ;;  %vm21337_vm12 = vcmask 64512  }
 0x747   : > { %21297 = vst [vmem:[#allocation241_spill] sm:$0xff] %v21296_v51  ;;  %12177 = vmatprep.subr.msk.mxu1 %vm14627_vm13, %v20494_v62  ;;  %12197 = vmatprep.subr.msk.mxu0 %vm17067_vm8, %v20494_v62  ;;  %vm17107_vm0 = vmand %vm21299_vm15, %vm21298_vm11  ;;  %vm21303_vm15 = vcmp.eq.s32.totalorder %v13098_v38, %v14399_v7 }
 0x748   : > { %12178 = vmatpush3.msk.msra.mxu1 %vm14627_vm13, %v20494_v62  ;;  %12198 = vmatpush3.msk.msra.mxu0 %vm17067_vm8, %v20494_v62  ;;  %v21301_v53 = vsel %vm17107_vm0, 4294967295, %v21300_v53  ;;  %vm17128_vm13 = vmand %vm21303_vm15, %vm21298_vm11  ;;  %vm21307_vm15 = vcmp.eq.s32.totalorder %v13120_v40, %v14399_v7  ;;  %vm5000_vm8 = vcmp.eq.s32.totalorder %v13032_v32, %v4993_v8 }
 0x749   : > { %21302 = vst [vmem:[#allocation242_spill] sm:$0xff] %v21301_v53  ;;  %12179 = vmatprep.subr.msk.mxu1 %vm14652_vm1, %v20494_v62  ;;  %12199 = vmatprep.subr.msk.mxu0 %vm17086_vm10, %v20494_v62  ;;  %v21305_v28 = vsel %vm17128_vm13, 4294967295, %v21304_v28 }
 0x74a   : > { %12180 = vmatpush3.msk.msra.mxu1 %vm14652_vm1, %v20494_v62  ;;  %12200 = vmatpush3.msk.msra.mxu0 %vm17086_vm10, %v20494_v62  ;;  %21306 = vst [vmem:[#allocation243_spill] sm:$0xff] %v21305_v28  ;;  %vm17149_vm1 = vmand %vm21307_vm15, %vm21298_vm11  ;;  %vm21312_vm10 = vnez %v21311_v21  ;;  %vm21313_vm15 = vcmp.eq.s32.totalorder %v13142_v42, %v14399_v7 }
 0x74b   : > { %12181 = vmatprep.subr.msk.mxu1 %vm14677_vm3, %v20494_v62  ;;  %12201 = vmatprep.subr.msk.mxu0 %vm17107_vm0, %v20494_v62  ;;  %v21309_v24 = vsel %vm17149_vm1, 4294967295, %v21308_v24 }
 0x74c   : > { %12182 = vmatpush3.msk.msra.mxu1 %vm14677_vm3, %v20494_v62  ;;  %12202 = vmatpush3.msk.msra.mxu0 %vm17107_vm0, %v20494_v62  ;;  %21310 = vst [vmem:[#allocation244_spill] sm:$0xff] %v21309_v24  ;;  %vm17170_vm3 = vmand %vm21313_vm15, %vm21298_vm11  ;;  %vm21318_vm0 = vnez %v21317_v11  ;;  %vm21319_vm15 = vcmp.eq.s32.totalorder %v12829_v2, %v14399_v7 }
 0x74d   : > { %12183 = vmatprep.subr.msk.mxu1 %vm21312_vm10, %v20494_v62  ;;  %12203 = vmatprep.subr.msk.mxu0 %vm17128_vm13, %v20494_v62  ;;  %v21315_v18 = vsel %vm17170_vm3, 4294967295, %v21314_v18 }
 0x74e   : > { %12184 = vmatpush3.msk.msra.mxu1 %vm21312_vm10, %v20494_v62  ;;  %12204 = vmatpush3.msk.msra.mxu0 %vm17128_vm13, %v20494_v62  ;;  %21316 = vst [vmem:[#allocation245_spill] sm:$0xff] %v21315_v18  ;;  %vm17191_vm13 = vmand %vm21319_vm15, %vm21298_vm11  ;;  %vm5001_vm11 = vcmp.eq.s32.totalorder %v13010_v30, %v4993_v8  ;;  %vm21323_vm15 = vcmask 523264  }
 0x74f   : > { %12185 = vmatprep.subr.msk.mxu1 %vm21318_vm0, %v20494_v62  ;;  %12205 = vmatprep.subr.msk.mxu0 %vm17149_vm1, %v20494_v62  ;;  %v21321_v6 = vsel %vm17191_vm13, 4294967295, %v21320_v6 }
 0x750   : > { %12186 = vmatpush3.msk.msra.mxu1 %vm21318_vm0, %v20494_v62  ;;  %12206 = vmatpush3.msk.msra.mxu0 %vm17149_vm1, %v20494_v62  ;;  %21322 = vst [vmem:[#allocation246_spill] sm:$0xff] %v21321_v6  ;;  %vm21328_vm1 = vmmov %vm21323_vm15 }
 0x751   : > { %12207 = vmatprep.subr.msk.mxu0 %vm17170_vm3, %v20494_v62  ;;  %12214 = vmatprep.subr.mxu1 %v16638_v0 }
 0x752   : > { %12208 = vmatpush3.msk.msra.mxu0 %vm17170_vm3, %v20494_v62 }
 0x753   : > { %12209 = vmatprep.subr.msk.mxu0 %vm17191_vm13, %v20494_v62 }
 0x754   : > { %12210 = vmatpush3.msk.msra.mxu0 %vm17191_vm13, %v20494_v62  ;;  %vm21324_vm13 = vcmp.ge.s32.totalorder %v16121_v25, 1 }
 0x755   : > { %12238 = vmatprep.subr.mxu0 %v16638_v0  ;;  %vm17223_vm3 = vmand %vm5001_vm11, %vm21324_vm13  ;;  %vm21332_vm11 = vcmp.ge.s32.totalorder %v16121_v25, 1 }
 0x756   : > { %v21326_v4 = vsel %vm17223_vm3, 4294967295, %v21325_v4  ;;  %vm21331_vm13 = vmmov %vm21323_vm15 }
 0x757   : > { %21327 = vst [vmem:[#allocation247_spill] sm:$0xff] %v21326_v4 }
 0x7fd   : > { %v12141_v31 = vpop.f32.mrf.mxu1 }
 0x7fe   : > { %v4459_v9 = vadd.f32 %v12141_v31, %v17013_v49  ;;  %v11032_v49 = vld [vmem:[%s19736_s3 + $0x78] sm:$0xff]  ;;  %v21343_v31 = vmov 0 }
 0x7ff   : > { %v4449_v5 = vpop.f32.mrf.mxu1 }
 0x800   : > { %v4458_v18 = vadd.f32 %v4449_v5, %v4257_v13 }
 0x801   : > { %v12165_v24 = vpop.f32.mrf.mxu0  ;;  %v12170_v28 = vpop.f32.mrf.mxu1 }
 0x802   : > { %v17213_v39 = vadd.f32 %v12165_v24, %v4459_v9  ;;  %v17230_v9 = vadd.s32 8, %v12831_v3  ;;  %v21355_v24 = vmov 0 }
 0x803   : > { %v4632_v6 = vpop.f32.mrf.mxu0  ;;  %v4718_v53 = vpop.f32.mrf.mxu1 }
 0x804   : > { %v17218_v51 = vadd.f32 %v4632_v6, %v4458_v18  ;;  %12187 = vmatprep.mubr.msk.f32.mxu1 %vm21323_vm15, %v4718_v53  ;;  %21329 = vst [vmem:[#allocation248_spill] sm:$0xff] %v17230_v9  ;;  %v11018_v6 = vld [vmem:[%s19736_s3 + $0x68] sm:$0xff]  ;;  %vm17244_vm15 = vmand %vm5000_vm8, %vm21332_vm11  ;;  %v21333_v18 = vmov 0  ;;  %vm20305_vm14 = vcmp.eq.s32.totalorder %v13010_v30, %v17230_v9  ;;  %v21347_v53 = vmov 0 }
 0x805   : > { %12188 = vmatmul.mubr.msk.f32.vlgmr.msra.gmra.mxu1 %vm21328_vm1, %v12170_v28  ;;  %v12194_v5 = vpop.f32.mrf.mxu0  ;;  %vm4999_vm1 = vcmp.eq.s32.totalorder %v13054_v34, %v4993_v8  ;;  %v21334_v18 = vsel %vm17244_vm15, 4294967295, %v21333_v18  ;;  %vm21338_vm8 = vmmov %vm21332_vm11  ;;  %vm4997_vm11 = vcmp.eq.s32.totalorder %v13098_v38, %v4993_v8  ;;  %v21351_v28 = vmov 0 }
 0x806   : > { %12215 = vmatpush3.msra.mxu1 %v16638_v0  ;;  %12216 = vmatprep.mubr.msk.f32.mxu1 %vm21330_vm2, %v11017_v41  ;;  %21335 = vst [vmem:[#allocation249_spill] sm:$0xff] %v21334_v18  ;;  %v11031_v41 = vld [vmem:[%s19736_s3 + $0x70] sm:$0xff]  ;;  %vm21336_vm2 = vmmov %vm21331_vm13 }
 0x807   : > { %v4901_v13 = vpop.f32.mrf.mxu0  ;;  %12219 = vmatprep.subr.msk.mxu1 %vm17223_vm3, %v20494_v62 }
 0x808   : > { %12211 = vmatprep.mubr.msk.f32.mxu0 %vm21331_vm13, %v4901_v13  ;;  %vm17262_vm13 = vmand %vm4999_vm1, %vm21338_vm8 }
 0x809   : > { %12212 = vmatmul.mubr.msk.f32.vlgmr.msra.gmra.mxu0 %vm21336_vm2, %v12194_v5  ;;  %12217 = vmatmul.mubr.msk.f32.vlgmr.msra.gmra.mxu1 %vm21337_vm12, %v11018_v6  ;;  %v21340_v47 = vsel %vm17262_vm13, 4294967295, %v21339_v47  ;;  %vm21342_vm1 = vmmov %vm21338_vm8  ;;  %vm20306_vm8 = vcmp.eq.s32.totalorder %v13032_v32, %v17230_v9  ;;  %v5369_v6 = vadd.s32 9, %v12831_v3 }
 0x80a   : > { %12220 = vmatpush3.msk.msra.mxu1 %vm17223_vm3, %v20494_v62  ;;  %12239 = vmatpush3.msra.mxu0 %v16638_v0  ;;  %21341 = vst [vmem:[#allocation250_spill] sm:$0xff] %v21340_v47  ;;  %vm17279_vm2 = vmand %vm4998_vm4, %vm21342_vm1  ;;  %v11044_v47 = vld [vmem:[%s19736_s3 + $0x80] sm:$0xff] }
 0x80b   : > { %12221 = vmatprep.subr.msk.mxu1 %vm17244_vm15, %v20494_v62  ;;  %12240 = vmatprep.mubr.msk.f32.mxu0 %vm21337_vm12, %v11031_v41  ;;  %v21344_v31 = vsel %vm17279_vm2, 4294967295, %v21343_v31  ;;  %vm21346_vm4 = vmmov %vm21342_vm1 }
 0x80c   : > { %12222 = vmatpush3.msk.msra.mxu1 %vm17244_vm15, %v20494_v62  ;;  %21345 = vst [vmem:[#allocation251_spill] sm:$0xff] %v21344_v31  ;;  %12243 = vmatprep.subr.msk.mxu0 %vm20305_vm14, %v20494_v62  ;;  %vm4996_vm15 = vcmp.eq.s32.totalorder %v13120_v40, %v4993_v8  ;;  %vm17299_vm1 = vmand %vm4997_vm11, %vm21346_vm4 }
 0x80d   : > { %12223 = vmatprep.subr.msk.mxu1 %vm17262_vm13, %v20494_v62  ;;  %12241 = vmatmul.mubr.msk.f32.vlgmr.msra.gmra.mxu0 %vm21337_vm12, %v11032_v49  ;;  %v21348_v53 = vsel %vm17299_vm1, 4294967295, %v21347_v53  ;;  %vm4995_vm12 = vcmp.eq.s32.totalorder %v13142_v42, %v4993_v8  ;;  %vm21350_vm11 = vmmov %vm21346_vm4 }
 0x80e   : > { %12224 = vmatpush3.msk.msra.mxu1 %vm17262_vm13, %v20494_v62  ;;  %21349 = vst [vmem:[#allocation252_spill] sm:$0xff] %v21348_v53  ;;  %12244 = vmatpush3.msk.msra.mxu0 %vm20305_vm14, %v20494_v62  ;;  %vm17320_vm4 = vmand %vm4996_vm15, %vm21350_vm11  ;;  %vm4994_vm14 = vcmp.eq.s32.totalorder %v12829_v2, %v4993_v8  ;;  %v21359_v8 = vmov 0  ;;  %vm5374_vm13 = vcmp.eq.s32.totalorder %v13076_v36, %v5369_v6 }
 0x80f   : > { %12225 = vmatprep.subr.msk.mxu1 %vm17279_vm2, %v20494_v62  ;;  %12245 = vmatprep.subr.msk.mxu0 %vm20306_vm8, %v20494_v62  ;;  %v21352_v28 = vsel %vm17320_vm4, 4294967295, %v21351_v28  ;;  %vm21354_vm15 = vmmov %vm21350_vm11 }
 0x810   : > { %12226 = vmatpush3.msk.msra.mxu1 %vm17279_vm2, %v20494_v62  ;;  %21353 = vst [vmem:[#allocation253_spill] sm:$0xff] %v21352_v28  ;;  %12246 = vmatpush3.msk.msra.mxu0 %vm20306_vm8, %v20494_v62  ;;  %vm17337_vm11 = vmand %vm4995_vm12, %vm21354_vm15  ;;  %vm20319_vm12 = vcmp.eq.s32.totalorder %v13098_v38, %v17230_v9 }
 0x811   : > { %12227 = vmatprep.subr.msk.mxu1 %vm17299_vm1, %v20494_v62  ;;  %v21356_v24 = vsel %vm17337_vm11, 4294967295, %v21355_v24  ;;  %vm21358_vm8 = vmmov %vm21354_vm15  ;;  %vm20311_vm15 = vcmp.eq.s32.totalorder %v13120_v40, %v17230_v9 }
 0x812   : > { %12228 = vmatpush3.msk.msra.mxu1 %vm17299_vm1, %v20494_v62  ;;  %21357 = vst [vmem:[#allocation254_spill] sm:$0xff] %v21356_v24  ;;  %vm17349_vm2 = vmand %vm4994_vm14, %vm21358_vm8  ;;  %vm20320_vm14 = vcmp.eq.s32.totalorder %v13054_v34, %v17230_v9  ;;  %vm20308_vm8 = vcmp.eq.s32.totalorder %v13076_v36, %v17230_v9  ;;  %vm21375_vm1 = vcmask 64512  }
 0x813   : > { %12229 = vmatprep.subr.msk.mxu1 %vm17320_vm4, %v20494_v62  ;;  %v21360_v8 = vsel %vm17349_vm2, 4294967295, %v21359_v8  ;;  %12247 = vmatprep.subr.msk.mxu0 %vm20320_vm14, %v20494_v62 }
 0x814   : > { %12230 = vmatpush3.msk.msra.mxu1 %vm17320_vm4, %v20494_v62  ;;  %21361 = vst [vmem:[#allocation255_spill] sm:$0xff] %v21360_v8  ;;  %12248 = vmatpush3.msk.msra.mxu0 %vm20320_vm14, %v20494_v62  ;;  %vm21368_vm4 = vcmask 64512  }
 0x815   : > { %12231 = vmatprep.subr.msk.mxu1 %vm17337_vm11, %v20494_v62  ;;  %12249 = vmatprep.subr.msk.mxu0 %vm20308_vm8, %v20494_v62 }
 0x816   : > { %12232 = vmatpush3.msk.msra.mxu1 %vm17337_vm11, %v20494_v62  ;;  %12250 = vmatpush3.msk.msra.mxu0 %vm20308_vm8, %v20494_v62  ;;  %vm20318_vm8 = vcmp.eq.s32.totalorder %v13142_v42, %v17230_v9  ;;  %vm5376_vm11 = vcmp.eq.s32.totalorder %v13032_v32, %v5369_v6 }
 0x817   : > { %12233 = vmatprep.subr.msk.mxu1 %vm17349_vm2, %v20494_v62  ;;  %12251 = vmatprep.subr.msk.mxu0 %vm20319_vm12, %v20494_v62 }
 0x818   : > { %12234 = vmatpush3.msk.msra.mxu1 %vm17349_vm2, %v20494_v62  ;;  %12252 = vmatpush3.msk.msra.mxu0 %vm20319_vm12, %v20494_v62  ;;  %vm21363_vm12 = vcmp.lt.s32.totalorder %v16121_v25, 7 }
 0x819   : > { %12262 = vmatprep.subr.mxu1 %v16638_v0  ;;  %12253 = vmatprep.subr.msk.mxu0 %vm20311_vm15, %v20494_v62 }
 0x81a   : > { %12254 = vmatpush3.msk.msra.mxu0 %vm20311_vm15, %v20494_v62  ;;  %vm5377_vm15 = vcmp.eq.s32.totalorder %v13010_v30, %v5369_v6 }
 0x81b   : > { %12255 = vmatprep.subr.msk.mxu0 %vm20318_vm8, %v20494_v62  ;;  %vm17432_vm14 = vmand %vm5377_vm15, %vm21363_vm12 }
 0x81c   : > { %12256 = vmatpush3.msk.msra.mxu0 %vm20318_vm8, %v20494_v62  ;;  %vm21362_vm8 = vcmask 523264  }
 0x81d   : > { %12257 = vmatprep.subr.mxu0 %v20507_v48  ;;  %vm21367_vm2 = vmmov %vm21362_vm8 }
 0x81e   : > { %12258 = vmatpush3.msra.mxu0 %v20507_v48  ;;  %vm21369_vm12 = vmmov %vm21367_vm2 }
 0x8c5   : > { %v12189_v5 = vpop.f32.mrf.mxu1 }
 0x8c6   : > { %v4809_v13 = vadd.f32 %v12189_v5, %v17213_v39  ;;  %v21364_v39 = vmov 0  ;;  %v21389_v5 = vmov 0 }
 0x8c7   : > { %v4799_v41 = vpop.f32.mrf.mxu1  ;;  %v21365_v39 = vsel %vm17432_vm14, 4294967295, %v21364_v39 }
 0x8c8   : > { %v4808_v49 = vadd.f32 %v4799_v41, %v17218_v51  ;;  %21366 = vst [vmem:[#allocation256_spill] sm:$0xff] %v21365_v39  ;;  %v5575_v41 = vshra.s32 %v12831_v3, 2 }
 0x8c9   : > { %v12213_v8 = vpop.f32.mrf.mxu0  ;;  %v12218_v24 = vpop.f32.mrf.mxu1 }
 0x8ca   : > { %v17422_v28 = vadd.f32 %v12213_v8, %v4809_v13  ;;  %v21385_v8 = vmov 0  ;;  %v21393_v13 = vmov 0 }
 0x8cb   : > { %v4982_v53 = vpop.f32.mrf.mxu0  ;;  %v5093_v31 = vpop.f32.mrf.mxu1 }
 0x8cc   : > { %v17427_v9 = vadd.f32 %v4982_v53, %v4808_v49  ;;  %12235 = vmatprep.mubr.msk.f32.mxu1 %vm21362_vm8, %v5093_v31  ;;  %v11045_v53 = vld [vmem:[%s19736_s3 + $0x88] sm:$0xff]  ;;  %vm5375_vm8 = vcmp.eq.s32.totalorder %v13054_v34, %v5369_v6  ;;  %v17536_v49 = vand.u32 3, %v12831_v3 }
 0x8cd   : > { %12236 = vmatmul.mubr.msk.f32.vlgmr.msra.gmra.mxu1 %vm21367_vm2, %v12218_v24  ;;  %v12242_v51 = vpop.f32.mrf.mxu0  ;;  %vm21370_vm2 = vcmp.lt.s32.totalorder %v16121_v25, 7  ;;  %v21371_v24 = vmov 0 }
 0x8ce   : > { %12263 = vmatpush3.msra.mxu1 %v16638_v0  ;;  %12264 = vmatprep.mubr.msk.f32.mxu1 %vm21368_vm4, %v11044_v47  ;;  %vm17450_vm15 = vmand %vm5376_vm11, %vm21370_vm2  ;;  %v21377_v0 = vmov 0  ;;  %v21381_v47 = vmov 0 }
 0x8cf   : > { %v5277_v31 = vpop.f32.mrf.mxu0  ;;  %12267 = vmatprep.subr.msk.mxu1 %vm17432_vm14, %v20494_v62  ;;  %v21372_v24 = vsel %vm17450_vm15, 4294967295, %v21371_v24  ;;  %vm21374_vm4 = vmmov %vm21369_vm12 }
 0x8d0   : > { %12259 = vmatprep.mubr.msk.f32.mxu0 %vm21369_vm12, %v5277_v31  ;;  %21373 = vst [vmem:[#allocation257_spill] sm:$0xff] %v21372_v24  ;;  %vm21376_vm3 = vmmov %vm21370_vm2  ;;  %vm5372_vm12 = vcmp.eq.s32.totalorder %v13120_v40, %v5369_v6  ;;  %v5578_v31 = vmul.u32 2, %v17536_v49  ;;  %v5566_v24 = vpop.permute.xlu0 %5565 }
 0x8d1   : > { %12260 = vmatmul.mubr.msk.f32.vlgmr.msra.gmra.mxu0 %vm21374_vm4, %v12242_v51  ;;  %12265 = vmatmul.mubr.msk.f32.vlgmr.msra.gmra.mxu1 %vm21375_vm1, %v11045_v53  ;;  %vm17462_vm5 = vmand %vm5375_vm8, %vm21376_vm3  ;;  %vm5373_vm3 = vcmp.eq.s32.totalorder %v13098_v38, %v5369_v6  ;;  %v7510_v51 = vld [vmem:[%s19739_s6] sm:$0xff]  ;;  %v5577_v53 = vmul.u32 16, %v5575_v41 }
 0x8d2   : > { %12268 = vmatpush3.msk.msra.mxu1 %vm17432_vm14, %v20494_v62  ;;  %v21378_v0 = vsel %vm17462_vm5, 4294967295, %v21377_v0  ;;  %vm21380_vm1 = vmmov %vm21370_vm2 }
 0x8d3   : > { %21379 = vst [vmem:[#allocation258_spill] sm:$0xff] %v21378_v0  ;;  %12269 = vmatprep.subr.msk.mxu1 %vm17450_vm15, %v20494_v62  ;;  %vm17474_vm11 = vmand %vm5374_vm13, %vm21380_vm1 }
 0x8d4   : > { %12270 = vmatpush3.msk.msra.mxu1 %vm17450_vm15, %v20494_v62  ;;  %v21382_v47 = vsel %vm17474_vm11, 4294967295, %v21381_v47  ;;  %vm21384_vm13 = vmmov %vm21380_vm1 }
 0x8d5   : > { %21383 = vst [vmem:[#allocation259_spill] sm:$0xff] %v21382_v47  ;;  %12271 = vmatprep.subr.msk.mxu1 %vm17462_vm5, %v20494_v62  ;;  %vm17493_vm8 = vmand %vm5373_vm3, %vm21384_vm13 }
 0x8d6   : > { %12272 = vmatpush3.msk.msra.mxu1 %vm17462_vm5, %v20494_v62  ;;  %v21386_v8 = vsel %vm17493_vm8, 4294967295, %v21385_v8  ;;  %vm21388_vm2 = vmmov %vm21380_vm1  ;;  %vm5371_vm1 = vcmp.eq.s32.totalorder %v13142_v42, %v5369_v6  ;;  %v5562_v6 = vld [vmem:[%s19737_s4 + $0x8] sm:$0xff] }
 0x8d7   : > { %12273 = vmatprep.subr.msk.mxu1 %vm17474_vm11, %v20494_v62  ;;  %21387 = vst [vmem:[#allocation260_spill] sm:$0xff] %v21386_v8  ;;  %vm17506_vm4 = vmand %vm5372_vm12, %vm21388_vm2  ;;  %5570 = vperm.xlu1 %12742, %v5562_v6  }
 0x8d8   : > { %12274 = vmatpush3.msk.msra.mxu1 %vm17474_vm11, %v20494_v62  ;;  %v21390_v5 = vsel %vm17506_vm4, 4294967295, %v21389_v5  ;;  %vm21392_vm3 = vmmov %vm21388_vm2 }
 0x8d9   : > { %12275 = vmatprep.subr.msk.mxu1 %vm17493_vm8, %v20494_v62  ;;  %21391 = vst [vmem:[#allocation261_spill] sm:$0xff] %v21390_v5  ;;  %vm17519_vm13 = vmand %vm5371_vm1, %vm21392_vm3  ;;  %v8953_v5 = vld [vmem:[%s19741_s8] sm:$0xff] }
 0x8da   : > { %12276 = vmatpush3.msk.msra.mxu1 %vm17493_vm8, %v20494_v62  ;;  %v21394_v13 = vsel %vm17519_vm13, 4294967295, %v21393_v13 }
 0x8db   : > { %12277 = vmatprep.subr.msk.mxu1 %vm17506_vm4, %v20494_v62  ;;  %21395 = vst [vmem:[#allocation262_spill] sm:$0xff] %v21394_v13  ;;  %v5579_v13 = vadd.s32 %v5578_v31, %v5577_v53  ;;  %7514 = vperm.xlu1 %12742, %v7510_v51  }
 0x8dc   : > { %12278 = vmatpush3.msk.msra.mxu1 %vm17506_vm4, %v20494_v62 }
 0x8dd   : > { %12279 = vmatprep.subr.msk.mxu1 %vm17519_vm13, %v20494_v62  ;;  %vm5587_vm12 = vcmp.eq.s32.totalorder %v13010_v30, %v5579_v13  ;;  %v5677_v8 = vadd.s32 1, %v5579_v13  ;;  %vm5586_vm2 = vcmp.eq.s32.totalorder %v13032_v32, %v5579_v13  ;;  %vm5585_vm3 = vcmp.eq.s32.totalorder %v13054_v34, %v5579_v13 }
 0x8de   : > { %12280 = vmatpush3.msk.msra.mxu1 %vm17519_vm13, %v20494_v62  ;;  %12286 = vmatprep.subr.msk.mxu0 %vm5587_vm12, %v20494_v62  ;;  %vm5584_vm13 = vcmp.eq.s32.totalorder %v13076_v36, %v5579_v13  ;;  %vm5583_vm4 = vcmp.eq.s32.totalorder %v13098_v38, %v5579_v13 }
 0x8df   : > { %12281 = vmatprep.subr.mxu1 %v20507_v48  ;;  %vm5685_vm1 = vcmp.eq.s32.totalorder %v13010_v30, %v5677_v8  ;;  %12287 = vmatpush3.msk.msra.mxu0 %vm5587_vm12, %v20494_v62  ;;  %vm21396_vm12 = vcmask 523264  }
 0x8e0   : > { %12282 = vmatpush3.msra.mxu1 %v20507_v48  ;;  %8956 = vperm.xlu1 %12742, %v8953_v5  }
 0x8e1   : > { %12305 = vmatprep.subr.msk.mxu1 %vm5685_vm1, %v20494_v62  ;;  %12288 = vmatprep.subr.msk.mxu0 %vm5586_vm2, %v20494_v62 }
 0x8e2   : > { %12289 = vmatpush3.msk.msra.mxu0 %vm5586_vm2, %v20494_v62  ;;  %vm5684_vm2 = vcmp.eq.s32.totalorder %v13032_v32, %v5677_v8 }
 0x8e3   : > { %12290 = vmatprep.subr.msk.mxu0 %vm5585_vm3, %v20494_v62 }
 0x8e4   : > { %12291 = vmatpush3.msk.msra.mxu0 %vm5585_vm3, %v20494_v62  ;;  %vm21397_vm3 = vmmov %vm21396_vm12 }
 0x8e5   : > { %12292 = vmatprep.subr.msk.mxu0 %vm5584_vm13, %v20494_v62 }
 0x8e6   : > { %12293 = vmatpush3.msk.msra.mxu0 %vm5584_vm13, %v20494_v62  ;;  %vm5682_vm13 = vcmp.eq.s32.totalorder %v13076_v36, %v5677_v8 }
 0x8e7   : > { %12294 = vmatprep.subr.msk.mxu0 %vm5583_vm4, %v20494_v62 }
 0x8e8   : > { %12295 = vmatpush3.msk.msra.mxu0 %vm5583_vm4, %v20494_v62  ;;  %vm5683_vm4 = vcmp.eq.s32.totalorder %v13054_v34, %v5677_v8 }
 0x952   : > { %v5571_v39 = vpop.permute.xlu1 %5570 }
 0x98d   : > { %v12237_v5 = vpop.f32.mrf.mxu1 }
 0x98e   : > { %v5184_v6 = vadd.f32 %v12237_v5, %v17422_v28  ;;  %v17599_v28 = vadd.s32 9, %v5579_v13 }
 0x98f   : > { %v5174_v41 = vpop.f32.mrf.mxu1 }
 0x990   : > { %v5183_v51 = vadd.f32 %v5174_v41, %v17427_v9  ;;  %v17597_v9 = vadd.s32 8, %v5579_v13 }
 0x991   : > { %v12266_v53 = vpop.f32.mrf.mxu1 }
 0x992   : > { %vm21402_vm8 = vcmp.eq.s32.totalorder %v13010_v30, %v17597_v9 }
 0x993   : > { %v5469_v31 = vpop.f32.mrf.mxu1 }
 0x994   : > { %12283 = vmatprep.mubr.msk.f32.mxu1 %vm21396_vm12, %v5469_v31  ;;  %vm5681_vm12 = vcmp.eq.s32.totalorder %v13098_v38, %v5677_v8 }
 0x995   : > { %12284 = vmatmul.mubr.msk.f32.vlgmr.msra.gmra.mxu1 %vm21397_vm3, %v12266_v53  ;;  %vm5581_vm3 = vcmp.eq.s32.totalorder %v13142_v42, %v5579_v13 }
 0x996   : > { %12306 = vmatpush3.msk.msra.mxu1 %vm5685_vm1, %v20494_v62  ;;  %vm5582_vm1 = vcmp.eq.s32.totalorder %v13120_v40, %v5579_v13 }
 0x997   : > { %12307 = vmatprep.subr.msk.mxu1 %vm5684_vm2, %v20494_v62  ;;  %12296 = vmatprep.subr.msk.mxu0 %vm5582_vm1, %v20494_v62 }
 0x998   : > { %12308 = vmatpush3.msk.msra.mxu1 %vm5684_vm2, %v20494_v62  ;;  %vm5680_vm2 = vcmp.eq.s32.totalorder %v13120_v40, %v5677_v8  ;;  %12297 = vmatpush3.msk.msra.mxu0 %vm5582_vm1, %v20494_v62  ;;  %vm20340_vm1 = vcmp.eq.s32.totalorder %v13010_v30, %v17597_v9 }
 0x999   : > { %12309 = vmatprep.subr.msk.mxu1 %vm5683_vm4, %v20494_v62  ;;  %12298 = vmatprep.subr.msk.mxu0 %vm5581_vm3, %v20494_v62 }
 0x99a   : > { %12310 = vmatpush3.msk.msra.mxu1 %vm5683_vm4, %v20494_v62  ;;  %vm5679_vm4 = vcmp.eq.s32.totalorder %v13142_v42, %v5677_v8  ;;  %12299 = vmatpush3.msk.msra.mxu0 %vm5581_vm3, %v20494_v62  ;;  %vm21398_vm3 = vcmask 523264  }
 0x99b   : > { %12311 = vmatprep.subr.msk.mxu1 %vm5682_vm13, %v20494_v62 }
 0x99c   : > { %12312 = vmatpush3.msk.msra.mxu1 %vm5682_vm13, %v20494_v62  ;;  %vm5580_vm13 = vcmp.eq.s32.totalorder %v12829_v2, %v5579_v13 }
 0x99d   : > { %12313 = vmatprep.subr.msk.mxu1 %vm5681_vm12, %v20494_v62  ;;  %12300 = vmatprep.subr.msk.mxu0 %vm5580_vm13, %v20494_v62 }
 0x99e   : > { %12314 = vmatpush3.msk.msra.mxu1 %vm5681_vm12, %v20494_v62  ;;  %vm5678_vm12 = vcmp.eq.s32.totalorder %v12829_v2, %v5677_v8  ;;  %12301 = vmatpush3.msk.msra.mxu0 %vm5580_vm13, %v20494_v62  ;;  %v12261_v8 = vpop.f32.mrf.mxu0  ;;  %vm5778_vm13 = vcmp.eq.s32.totalorder %v13032_v32, %v17597_v9 }
 0x99f   : > { %12315 = vmatprep.subr.msk.mxu1 %vm5680_vm2, %v20494_v62  ;;  %12324 = vmatprep.subr.msk.mxu0 %vm20340_vm1, %v20494_v62  ;;  %v5368_v5 = vadd.f32 %v12261_v8, %v5184_v6  ;;  %vm5872_vm1 = vcmp.eq.s32.totalorder %v13032_v32, %v17599_v28 }
 0x9a0   : > { %12316 = vmatpush3.msk.msra.mxu1 %vm5680_vm2, %v20494_v62  ;;  %vm20339_vm2 = vcmp.eq.s32.totalorder %v13010_v30, %v17599_v28  ;;  %v5358_v13 = vpop.f32.mrf.mxu0 }
 0x9a1   : > { %12317 = vmatprep.subr.msk.mxu1 %vm5679_vm4, %v20494_v62  ;;  %v5367_v53 = vadd.f32 %v5358_v13, %v5183_v51 }
 0x9a2   : > { %12318 = vmatpush3.msk.msra.mxu1 %vm5679_vm4, %v20494_v62  ;;  %vm21399_vm4 = vmmov %vm21398_vm3 }
 0x9a3   : > { %12319 = vmatprep.subr.msk.mxu1 %vm5678_vm12, %v20494_v62 }
 0x9a4   : > { %12320 = vmatpush3.msk.msra.mxu1 %vm5678_vm12, %v20494_v62  ;;  %vm21400_vm12 = vmmov %vm21398_vm3 }
 0x9a5   : > { %12343 = vmatprep.subr.msk.mxu1 %vm20339_vm2, %v20494_v62  ;;  %vm21401_vm2 = vmmov %vm21398_vm3 }
 0xa55   : > { %v12285_v41 = vpop.f32.mrf.mxu1 }
 0xa56   : > { %v5560_v31 = vadd.f32 %v12285_v41, %v5368_v5 }
 0xa57   : > { %v5550_v47 = vpop.f32.mrf.mxu1 }
 0xa58   : > { %v5559_v0 = vadd.f32 %v5550_v47, %v5367_v53  ;;  %v17619_v4 = vadd.f32 %v5571_v39, %v5560_v31  ;;  %v5969_v39 = vld [vmem:[%s19738_s5] sm:$0xff] }
 0xa5a   : > { %v17617_v18 = vadd.f32 %v5566_v24, %v5559_v0  ;;  %v11111_v24 = vld [vmem:[%s19738_s5 + $0x20] sm:$0xff] }
 0xa5c   : > { %12302 = vmatprep.mubr.msk.f32.mxu0 %vm21398_vm3, %v17617_v18  ;;  %12321 = vmatprep.mubr.msk.f32.mxu1 %vm21399_vm4, %v17617_v18  ;;  %vm21403_vm3 = vcmp.eq.s32.totalorder %v13010_v30, %v17599_v28  ;;  %vm21404_vm4 = vmmov %vm21401_vm2 }
 0xa5d   : > { %12303 = vmatmul.mubr.msk.f32.vlgmr.msra.gmra.mxu0 %vm21400_vm12, %v17619_v4  ;;  %12322 = vmatmul.mubr.msk.f32.vlgmr.msra.gmra.mxu1 %vm21401_vm2, %v17619_v4  ;;  %vm5777_vm2 = vcmp.eq.s32.totalorder %v13054_v34, %v17597_v9  ;;  %vm5871_vm12 = vcmp.eq.s32.totalorder %v13054_v34, %v17599_v28 }
 0xa5e   : > { %12325 = vmatpush3.msk.msra.mxu0 %vm21402_vm8, %v20494_v62  ;;  %12344 = vmatpush3.msk.msra.mxu1 %vm21403_vm3, %v20494_v62  ;;  %vm21405_vm8 = vmmov %vm21404_vm4  ;;  %vm5776_vm3 = vcmp.eq.s32.totalorder %v13076_v36, %v17597_v9 }
 0xa5f   : > { %12326 = vmatprep.subr.msk.mxu0 %vm5778_vm13, %v20494_v62  ;;  %12340 = vmatprep.mubr.msk.f32.mxu0 %vm21404_vm4, %v17617_v18  ;;  %vm5870_vm4 = vcmp.eq.s32.totalorder %v13076_v36, %v17599_v28 }
 0xa60   : > { %12345 = vmatprep.subr.msk.mxu1 %vm5872_vm1, %v20494_v62  ;;  %12359 = vmatprep.mubr.msk.f32.mxu1 %vm21405_vm8, %v17617_v18  ;;  %vm5775_vm8 = vcmp.eq.s32.totalorder %v13098_v38, %v17597_v9 }
 0xa61   : > { %12327 = vmatpush3.msk.msra.mxu0 %vm5778_vm13, %v20494_v62  ;;  %12346 = vmatpush3.msk.msra.mxu1 %vm5872_vm1, %v20494_v62  ;;  %vm5869_vm1 = vcmp.eq.s32.totalorder %v13098_v38, %v17599_v28  ;;  %vm5774_vm13 = vcmp.eq.s32.totalorder %v13120_v40, %v17597_v9 }
 0xa62   : > { %12328 = vmatprep.subr.msk.mxu0 %vm5777_vm2, %v20494_v62  ;;  %12347 = vmatprep.subr.msk.mxu1 %vm5871_vm12, %v20494_v62 }
 0xa63   : > { %12329 = vmatpush3.msk.msra.mxu0 %vm5777_vm2, %v20494_v62  ;;  %12348 = vmatpush3.msk.msra.mxu1 %vm5871_vm12, %v20494_v62  ;;  %vm5868_vm2 = vcmp.eq.s32.totalorder %v13120_v40, %v17599_v28  ;;  %vm5773_vm12 = vcmp.eq.s32.totalorder %v13142_v42, %v17597_v9 }
 0xa64   : > { %12330 = vmatprep.subr.msk.mxu0 %vm5776_vm3, %v20494_v62  ;;  %12349 = vmatprep.subr.msk.mxu1 %vm5870_vm4, %v20494_v62 }
 0xa65   : > { %12331 = vmatpush3.msk.msra.mxu0 %vm5776_vm3, %v20494_v62  ;;  %12350 = vmatpush3.msk.msra.mxu1 %vm5870_vm4, %v20494_v62  ;;  %vm5867_vm3 = vcmp.eq.s32.totalorder %v13142_v42, %v17599_v28  ;;  %vm5772_vm4 = vcmp.eq.s32.totalorder %v12829_v2, %v17597_v9 }
 0xa66   : > { %12332 = vmatprep.subr.msk.mxu0 %vm5775_vm8, %v20494_v62  ;;  %12351 = vmatprep.subr.msk.mxu1 %vm5869_vm1, %v20494_v62 }
 0xa67   : > { %12333 = vmatpush3.msk.msra.mxu0 %vm5775_vm8, %v20494_v62  ;;  %12352 = vmatpush3.msk.msra.mxu1 %vm5869_vm1, %v20494_v62  ;;  %vm5866_vm8 = vcmp.eq.s32.totalorder %v12829_v2, %v17599_v28  ;;  %vm21406_vm1 = vcmask 523264  }
 0xa68   : > { %12334 = vmatprep.subr.msk.mxu0 %vm5774_vm13, %v20494_v62  ;;  %12353 = vmatprep.subr.msk.mxu1 %vm5868_vm2, %v20494_v62 }
 0xa69   : > { %12335 = vmatpush3.msk.msra.mxu0 %vm5774_vm13, %v20494_v62  ;;  %12354 = vmatpush3.msk.msra.mxu1 %vm5868_vm2, %v20494_v62  ;;  %vm21407_vm13 = vmmov %vm21406_vm1  ;;  %vm5971_vm2 = vcmask 130048  }
 0xa6a   : > { %12336 = vmatprep.subr.msk.mxu0 %vm5773_vm12, %v20494_v62  ;;  %12355 = vmatprep.subr.msk.mxu1 %vm5867_vm3, %v20494_v62 }
 0xa6b   : > { %12337 = vmatpush3.msk.msra.mxu0 %vm5773_vm12, %v20494_v62  ;;  %12356 = vmatpush3.msk.msra.mxu1 %vm5867_vm3, %v20494_v62 }
 0xa6c   : > { %12338 = vmatprep.subr.msk.mxu0 %vm5772_vm4, %v20494_v62  ;;  %12357 = vmatprep.subr.msk.mxu1 %vm5866_vm8, %v20494_v62 }
 0xa6d   : > { %12339 = vmatpush3.msk.msra.mxu0 %vm5772_vm4, %v20494_v62  ;;  %12358 = vmatpush3.msk.msra.mxu1 %vm5866_vm8, %v20494_v62  ;;  %vm20344_vm8 = vcmp.ge.s32.totalorder %v17536_v49, 1 }
 0xa6e   : > { %12341 = vmatmul.mubr.msk.f32.vlgmr.msra.gmra.mxu0 %vm21406_vm1, %v17619_v4  ;;  %12360 = vmatmul.mubr.msk.f32.vlgmr.msra.gmra.mxu1 %vm21407_vm13, %v17619_v4 }
 0xa6f   : > { %12366 = vmatprep.mubr.msk.f32.mxu0 %vm5971_vm2, %v5969_v39  ;;  %12394 = vmatprep.mubr.msk.f32.mxu1 %vm5971_vm2, %v11111_v24  ;;  %v5970_v24 = vld [vmem:[%s19738_s5 + $0x8] sm:$0xff] }
 0xb1d   : > { %v12304_v0 = vpop.f32.mrf.mxu0  ;;  %v12323_v47 = vpop.f32.mrf.mxu1 }
 0xb1e   : > { %v5770_v9 = vmax.f32 %v12304_v0, %v12323_v47  ;;  %v11112_v0 = vld [vmem:[%s19738_s5 + $0x28] sm:$0xff]  ;;  %v11099_v47 = vld [vmem:[%s19738_s5 + $0x10] sm:$0xff] }
 0xb1f   : > { %v5668_v6 = vpop.f32.mrf.mxu0  ;;  %v5760_v51 = vpop.f32.mrf.mxu1 }
 0xb20   : > { %v5769_v13 = vmax.f32 %v5668_v6, %v5760_v51  ;;  %v11100_v6 = vld [vmem:[%s19738_s5 + $0x18] sm:$0xff]  ;;  %v11119_v51 = vld [vmem:[%s19738_s5 + $0x30] sm:$0xff] }
 0xb2e   : > { %v12342_v28 = vpop.f32.mrf.mxu0  ;;  %v12361_v8 = vpop.f32.mrf.mxu1 }
 0xb2f   : > { %v5864_v5 = vmax.f32 %v5770_v9, %v12342_v28  ;;  %v11120_v9 = vld [vmem:[%s19738_s5 + $0x38] sm:$0xff]  ;;  %v11127_v28 = vld [vmem:[%s19738_s5 + $0x40] sm:$0xff] }
 0xb30   : > { %v5854_v41 = vpop.f32.mrf.mxu0  ;;  %v5948_v39 = vpop.f32.mrf.mxu1 }
 0xb31   : > { %v17709_v53 = vmax.f32 %v5864_v5, %v12361_v8  ;;  %v5863_v31 = vmax.f32 %v5769_v13, %v5854_v41  ;;  %v11128_v8 = vld [vmem:[%s19738_s5 + $0x48] sm:$0xff]  ;;  %v11135_v13 = vld [vmem:[%s19738_s5 + $0x50] sm:$0xff]  ;;  %v11136_v5 = vld [vmem:[%s19738_s5 + $0x58] sm:$0xff] }
 0xb32   : > { %v11143_v41 = vld [vmem:[%s19738_s5 + $0x60] sm:$0xff] }
 0xb33   : > { %v17711_v43 = vmax.f32 %v5863_v31, %v5948_v39  ;;  %12362 = vmatprep.subr.mxu0 %v17709_v53  ;;  %12390 = vmatprep.subr.mxu1 %v17709_v53  ;;  %v11144_v31 = vld [vmem:[%s19738_s5 + $0x68] sm:$0xff]  ;;  %v11151_v39 = vld [vmem:[%s19738_s5 + $0x70] sm:$0xff] }
 0xb34   : > { %12363 = vmatpush3.msra.mxu0 %v17709_v53  ;;  %12391 = vmatpush3.msra.mxu1 %v17709_v53 }
 0xb35   : > { %12364 = vmatprep.subr.mxu0 %v17711_v43  ;;  %12392 = vmatprep.subr.mxu1 %v17711_v43 }
 0xb36   : > { %12365 = vmatpush3.msra.mxu0 %v17711_v43  ;;  %12393 = vmatpush3.msra.mxu1 %v17711_v43 }
 0xb37   : > { %12367 = vmatmul.mubr.msk.f32.vlgmr.msra.gmra.mxu0 %vm5971_vm2, %v5970_v24  ;;  %12369 = vmatprep.subr.mxu0 %v17709_v53  ;;  %v11152_v24 = vld [vmem:[%s19738_s5 + $0x78] sm:$0xff] }
 0xb38   : > { %12404 = vmatprep.subr.mxu1 %v17709_v53  ;;  %12370 = vmatpush3.msra.mxu0 %v17709_v53 }
 0xb39   : > { %12395 = vmatmul.mubr.msk.f32.vlgmr.msra.gmra.mxu1 %vm5971_vm2, %v11112_v0  ;;  %12371 = vmatprep.subr.mxu0 %v17711_v43  ;;  %v11159_v0 = vld [vmem:[%s19738_s5 + $0x80] sm:$0xff] }
 0xb3a   : > { %12405 = vmatpush3.msra.mxu1 %v17709_v53  ;;  %12372 = vmatpush3.msra.mxu0 %v17711_v43 }
 0xb3b   : > { %12406 = vmatprep.subr.mxu1 %v17711_v43  ;;  %12373 = vmatprep.mubr.msk.f32.mxu0 %vm5971_vm2, %v11099_v47  ;;  %v11160_v47 = vld [vmem:[%s19738_s5 + $0x88] sm:$0xff] }
 0xb3c   : > { %12407 = vmatpush3.msra.mxu1 %v17711_v43  ;;  %12374 = vmatmul.mubr.msk.f32.vlgmr.msra.gmra.mxu0 %vm5971_vm2, %v11100_v6  ;;  %v6053_v6 = vadd.s32 4294967292, %v12831_v3 }
 0xb3d   : > { %12408 = vmatprep.mubr.msk.f32.mxu1 %vm5971_vm2, %v11119_v51  ;;  %12418 = vmatprep.subr.mxu1 %v17709_v53  ;;  %v6990_v51 = vadd.s32 3, %v12831_v3 }
 0xb3e   : > { %12409 = vmatmul.mubr.msk.f32.vlgmr.msra.gmra.mxu1 %vm5971_vm2, %v11120_v9  ;;  %vm6055_vm12 = vcmp.eq.s32.totalorder %v13142_v42, %v6053_v6  ;;  %vm6054_vm3 = vcmp.eq.s32.totalorder %v12829_v2, %v6053_v6 }
 0xb3f   : > { %12419 = vmatpush3.msra.mxu1 %v17709_v53  ;;  %12422 = vmatprep.mubr.msk.f32.mxu1 %vm5971_vm2, %v11127_v28 }
 0xb40   : > { %12420 = vmatprep.subr.mxu1 %v17711_v43  ;;  %12376 = vmatprep.subr.msk.mxu0 %vm6055_vm12, %v20494_v62 }
 0xb41   : > { %12421 = vmatpush3.msra.mxu1 %v17711_v43  ;;  %12377 = vmatpush3.msk.msra.mxu0 %vm6055_vm12, %v20494_v62 }
 0xb42   : > { %12432 = vmatprep.subr.mxu1 %v17709_v53  ;;  %12423 = vmatmul.mubr.msk.f32.vlgmr.msra.gmra.mxu1 %vm5971_vm2, %v11128_v8 }
 0xb43   : > { %12433 = vmatpush3.msra.mxu1 %v17709_v53  ;;  %12436 = vmatprep.mubr.msk.f32.mxu1 %vm5971_vm2, %v11135_v13  ;;  %v6304_v13 = vadd.s32 4294967293, %v12831_v3 }
 0xb44   : > { %12434 = vmatprep.subr.mxu1 %v17711_v43  ;;  %12378 = vmatprep.subr.msk.mxu0 %vm6054_vm3, %v20494_v62 }
 0xb45   : > { %12435 = vmatpush3.msra.mxu1 %v17711_v43  ;;  %12379 = vmatpush3.msk.msra.mxu0 %vm6054_vm3, %v20494_v62  ;;  %vm6306_vm3 = vcmp.eq.s32.totalorder %v13142_v42, %v6304_v13 }
 0xb46   : > { %12446 = vmatprep.subr.mxu1 %v17709_v53  ;;  %12437 = vmatmul.mubr.msk.f32.vlgmr.msra.gmra.mxu1 %vm5971_vm2, %v11136_v5 }
 0xb47   : > { %12447 = vmatpush3.msra.mxu1 %v17709_v53  ;;  %12450 = vmatprep.mubr.msk.f32.mxu1 %vm5971_vm2, %v11143_v41 }
 0xb48   : > { %12448 = vmatprep.subr.mxu1 %v17711_v43 }
 0xb49   : > { %12449 = vmatpush3.msra.mxu1 %v17711_v43 }
 0xb4a   : > { %12460 = vmatprep.subr.mxu1 %v17709_v53  ;;  %12451 = vmatmul.mubr.msk.f32.vlgmr.msra.gmra.mxu1 %vm5971_vm2, %v11144_v31 }
 0xb4b   : > { %12461 = vmatpush3.msra.mxu1 %v17709_v53  ;;  %12464 = vmatprep.mubr.msk.f32.mxu1 %vm5971_vm2, %v11151_v39 }
 0xb4c   : > { %12462 = vmatprep.subr.mxu1 %v17711_v43 }
 0xb4d   : > { %12463 = vmatpush3.msra.mxu1 %v17711_v43 }
 0xb4e   : > { %12474 = vmatprep.subr.mxu1 %v17709_v53  ;;  %12465 = vmatmul.mubr.msk.f32.vlgmr.msra.gmra.mxu1 %vm5971_vm2, %v11152_v24 }
 0xb4f   : > { %12475 = vmatpush3.msra.mxu1 %v17709_v53  ;;  %12478 = vmatprep.mubr.msk.f32.mxu1 %vm5971_vm2, %v11159_v0  ;;  %v5959_v53 = vadd.s32 4294967291, %v12831_v3 }
 0xb50   : > { %12476 = vmatprep.subr.mxu1 %v17711_v43 }
 0xb51   : > { %12477 = vmatpush3.msra.mxu1 %v17711_v43  ;;  %vm5961_vm4 = vcmp.eq.s32.totalorder %v13142_v42, %v5959_v53  ;;  %vm5960_vm13 = vcmp.eq.s32.totalorder %v12829_v2, %v5959_v53 }
 0xb52   : > { %12479 = vmatmul.mubr.msk.f32.vlgmr.msra.gmra.mxu1 %vm5971_vm2, %v11160_v47  ;;  %vm17825_vm1 = vmand %vm5961_vm4, %vm20344_vm8  ;;  %vm20347_vm4 = vcmp.lt.s32.totalorder %v17536_v49, 3 }
 0xb53   : > { %12383 = vmatprep.subr.msk.mxu0 %vm17825_vm1, %v20494_v62  ;;  %vm17835_vm12 = vmand %vm5960_vm13, %vm20344_vm8  ;;  %vm6305_vm13 = vcmp.eq.s32.totalorder %v12829_v2, %v6304_v13 }
 0xb54   : > { %vm6311_vm8 = vmand %vm6306_vm3, %vm20347_vm4  ;;  %vm21413_vm3 = vcmp.eq.s32.totalorder %v13142_v42, %v13576_v54 }
 0xb55   : > { %vm6310_vm11 = vmand %vm6305_vm13, %vm20347_vm4  ;;  %vm21415_vm13 = vcmp.eq.s32.totalorder %v12829_v2, %v13576_v54 }
 0xbf7   : > { %v12368_v9 = vpop.f32.mrf.mxu0 }
 0xbf9   : > { %v6044_v28 = vpop.f32.mrf.mxu0  ;;  %v12396_v8 = vpop.f32.mrf.mxu1 }
 0xbfb   : > { %v6389_v5 = vpop.f32.mrf.mxu1 }
 0xbfc   : > { %v12375_v41 = vpop.f32.mrf.mxu0 }
 0xbfe   : > { %v6133_v31 = vpop.f32.mrf.mxu0  ;;  %v12410_v39 = vpop.f32.mrf.mxu1 }
 0xbff   : > { %12380 = vmatprep.mubr.msk.f32.mxu0 %vm5971_vm2, %v6133_v31 }
 0xc00   : > { %12381 = vmatmul.mubr.msk.f32.vlgmr.msra.gmra.mxu0 %vm5971_vm2, %v12375_v41  ;;  %v6560_v24 = vpop.f32.mrf.mxu1  ;;  %v21424_v41 = vshra.s32 %v12831_v3, 3 }
 0xc01   : > { %12384 = vmatpush3.msk.msra.mxu0 %vm17825_vm1, %v20494_v62  ;;  %12387 = vmatprep.mubr.msk.f32.mxu0 %vm5971_vm2, %v6044_v28  ;;  %vm21412_vm1 = vcmp.ge.s32.totalorder %v17536_v49, 1  ;;  %v7164_v28 = vadd.s32 4, %v12831_v3 }
 0xc02   : > { %12385 = vmatprep.subr.msk.mxu0 %vm17835_vm12, %v20494_v62  ;;  %v12424_v0 = vpop.f32.mrf.mxu1  ;;  %vm6482_vm5 = vmand %vm21413_vm3, %vm21412_vm1  ;;  %vm21419_vm3 = vcmp.eq.s32.totalorder %v12829_v2, %v14399_v7 }
 0xc03   : > { %12386 = vmatpush3.msk.msra.mxu0 %vm17835_vm12, %v20494_v62  ;;  %vm21414_vm12 = vmmov %vm21412_vm1 }
 0xc04   : > { %12388 = vmatmul.mubr.msk.f32.vlgmr.msra.gmra.mxu0 %vm5971_vm2, %v12368_v9  ;;  %12397 = vmatprep.subr.msk.mxu0 %vm6311_vm8, %v20494_v62  ;;  %v6727_v47 = vpop.f32.mrf.mxu1  ;;  %vm6481_vm4 = vmand %vm21415_vm13, %vm21414_vm12  ;;  %vm6991_vm13 = vcmp.eq.s32.totalorder %v12829_v2, %v6990_v51 }
 0xc05   : > { %12398 = vmatpush3.msk.msra.mxu0 %vm6311_vm8, %v20494_v62  ;;  %12401 = vmatprep.mubr.msk.f32.mxu0 %vm5971_vm2, %v6389_v5 }
 0xc06   : > { %12399 = vmatprep.subr.msk.mxu0 %vm6310_vm11, %v20494_v62  ;;  %v12438_v6 = vpop.f32.mrf.mxu1 }
 0xc07   : > { %12400 = vmatpush3.msk.msra.mxu0 %vm6310_vm11, %v20494_v62  ;;  %vm21417_vm11 = vcmp.eq.s32.totalorder %v13142_v42, %v14399_v7  ;;  %v7336_v7 = vadd.s32 5, %v12831_v3 }
 0xc08   : > { %12402 = vmatmul.mubr.msk.f32.vlgmr.msra.gmra.mxu0 %vm5971_vm2, %v12396_v8  ;;  %12411 = vmatprep.subr.msk.mxu0 %vm6482_vm5, %v20494_v62  ;;  %v6898_v53 = vpop.f32.mrf.mxu1 }
 0xc09   : > { %12412 = vmatpush3.msk.msra.mxu0 %vm6482_vm5, %v20494_v62  ;;  %12415 = vmatprep.mubr.msk.f32.mxu0 %vm5971_vm2, %v6560_v24  ;;  %vm21416_vm5 = vcmp.lt.s32.totalorder %v17536_v49, 3 }
 0xc0a   : > { %12413 = vmatprep.subr.msk.mxu0 %vm6481_vm4, %v20494_v62  ;;  %v12452_v43 = vpop.f32.mrf.mxu1  ;;  %vm6820_vm8 = vmand %vm21417_vm11, %vm21416_vm5 }
 0xc0b   : > { %12414 = vmatpush3.msk.msra.mxu0 %vm6481_vm4, %v20494_v62  ;;  %vm6992_vm4 = vcmp.eq.s32.totalorder %v13142_v42, %v6990_v51  ;;  %vm21418_vm1 = vmmov %vm21416_vm5  ;;  %vm21420_vm5 = vcmp.ge.s32.totalorder %v17536_v49, 1 }
 0xc0c   : > { %12416 = vmatmul.mubr.msk.f32.vlgmr.msra.gmra.mxu0 %vm5971_vm2, %v12410_v39  ;;  %12425 = vmatprep.subr.msk.mxu0 %vm21312_vm10, %v20494_v62  ;;  %v7072_v54 = vpop.f32.mrf.mxu1  ;;  %vm6819_vm12 = vmand %vm21419_vm3, %vm21418_vm1  ;;  %v7526_v39 = vshra.s32 %v16121_v25, 1 }
 0xc0d   : > { %12426 = vmatpush3.msk.msra.mxu0 %vm21312_vm10, %v20494_v62  ;;  %12429 = vmatprep.mubr.msk.f32.mxu0 %vm5971_vm2, %v6727_v47  ;;  %vm6994_vm11 = vmand %vm6992_vm4, %vm21420_vm5  ;;  %vm7338_vm4 = vcmp.eq.s32.totalorder %v13142_v42, %v7336_v7 }
 0xc0e   : > { %12427 = vmatprep.subr.msk.mxu0 %vm21318_vm0, %v20494_v62  ;;  %v12466_v9 = vpop.f32.mrf.mxu1  ;;  %vm21421_vm1 = vmmov %vm21420_vm5  ;;  %vm21422_vm5 = vcmp.lt.s32.totalorder %v17536_v49, 3  ;;  %v7524_v49 = vshra.s32 %v21424_v41, 1 }
 0xc0f   : > { %12428 = vmatpush3.msk.msra.mxu0 %vm21318_vm0, %v20494_v62  ;;  %vm6993_vm3 = vmand %vm6991_vm13, %vm21421_vm1  ;;  %vm7337_vm13 = vcmp.eq.s32.totalorder %v12829_v2, %v7336_v7 }
 0xc10   : > { %12430 = vmatmul.mubr.msk.f32.vlgmr.msra.gmra.mxu0 %vm5971_vm2, %v12424_v0  ;;  %12439 = vmatprep.subr.msk.mxu0 %vm6820_vm8, %v20494_v62  ;;  %v7244_v8 = vpop.f32.mrf.mxu1  ;;  %vm21423_vm1 = vmmov %vm21422_vm5  ;;  %v7525_v31 = vmul.u32 4, %v7524_v49 }
 0xc11   : > { %12440 = vmatpush3.msk.msra.mxu0 %vm6820_vm8, %v20494_v62  ;;  %12443 = vmatprep.mubr.msk.f32.mxu0 %vm5971_vm2, %v6898_v53  ;;  %vm7166_vm8 = vcmp.eq.s32.totalorder %v13142_v42, %v7164_v28 }
 0xc12   : > { %12441 = vmatprep.subr.msk.mxu0 %vm6819_vm12, %v20494_v62  ;;  %v12480_v13 = vpop.f32.mrf.mxu1  ;;  %v7527_v24 = vadd.s32 %v7526_v39, %v7525_v31 }
 0xc13   : > { %12442 = vmatpush3.msk.msra.mxu0 %vm6819_vm12, %v20494_v62  ;;  %vm7165_vm12 = vcmp.eq.s32.totalorder %v12829_v2, %v7164_v28 }
 0xc14   : > { %12444 = vmatmul.mubr.msk.f32.vlgmr.msra.gmra.mxu0 %vm5971_vm2, %v12438_v6  ;;  %12453 = vmatprep.subr.msk.mxu0 %vm6994_vm11, %v20494_v62  ;;  %v7418_v5 = vpop.f32.mrf.mxu1 }
 0xc15   : > { %12454 = vmatpush3.msk.msra.mxu0 %vm6994_vm11, %v20494_v62  ;;  %12457 = vmatprep.mubr.msk.f32.mxu0 %vm5971_vm2, %v7072_v54  ;;  %vm7340_vm11 = vmand %vm7338_vm4, %vm21422_vm5  ;;  %vm7528_vm4 = vcmp.eq.s32.totalorder %v12829_v2, %v7527_v24  ;;  %vm21426_vm5 = vnez %v21204_v46 }
 0xc16   : > { %12455 = vmatprep.subr.msk.mxu0 %vm6993_vm3, %v20494_v62 }
 0xc17   : > { %12456 = vmatpush3.msk.msra.mxu0 %vm6993_vm3, %v20494_v62  ;;  %vm7339_vm3 = vmand %vm7337_vm13, %vm21423_vm1  ;;  %vm21425_vm13 = vcmp.eq.s32.totalorder %v13010_v30, %v16551_v60  ;;  %vm21428_vm1 = vnez %v21206_v29  ;;  %v11203_v29 = vld [vmem:[%s19740_s7 + $0x18] sm:$0xff] }
 0xc18   : > { %12458 = vmatmul.mubr.msk.f32.vlgmr.msra.gmra.mxu0 %vm5971_vm2, %v12452_v43  ;;  %12467 = vmatprep.subr.msk.mxu0 %vm7166_vm8, %v20494_v62 }
 0xc19   : > { %12468 = vmatpush3.msk.msra.mxu0 %vm7166_vm8, %v20494_v62  ;;  %12471 = vmatprep.mubr.msk.f32.mxu0 %vm5971_vm2, %v7244_v8  ;;  %vm7529_vm8 = vcmp.eq.s32.totalorder %v13142_v42, %v7527_v24 }
 0xc1a   : > { %12469 = vmatprep.subr.msk.mxu0 %vm7165_vm12, %v20494_v62  ;;  %12488 = vmatprep.subr.msk.mxu1 %vm7529_vm8, %v20494_v62 }
 0xc1b   : > { %12470 = vmatpush3.msk.msra.mxu0 %vm7165_vm12, %v20494_v62  ;;  %12489 = vmatpush3.msk.msra.mxu1 %vm7529_vm8, %v20494_v62  ;;  %vm12756_vm12 = vmmov 0   ;;  %vm21430_vm8 = vnez %v21208_v33 }
 0xc1c   : > { %12472 = vmatmul.mubr.msk.f32.vlgmr.msra.gmra.mxu0 %vm5971_vm2, %v12466_v9  ;;  %12481 = vmatprep.subr.msk.mxu0 %vm7340_vm11, %v20494_v62 }
 0xc1d   : > { %12482 = vmatpush3.msk.msra.mxu0 %vm7340_vm11, %v20494_v62  ;;  %12485 = vmatprep.mubr.msk.f32.mxu0 %vm5971_vm2, %v7418_v5  ;;  %vm21427_vm11 = vcmp.eq.s32.totalorder %v13032_v32, %v16551_v60 }
 0xc1e   : > { %12483 = vmatprep.subr.msk.mxu0 %vm7339_vm3, %v20494_v62  ;;  %12490 = vmatprep.subr.msk.mxu1 %vm7528_vm4, %v20494_v62 }
 0xc1f   : > { %12484 = vmatpush3.msk.msra.mxu0 %vm7339_vm3, %v20494_v62  ;;  %12491 = vmatpush3.msk.msra.mxu1 %vm7528_vm4, %v20494_v62  ;;  %vm21429_vm3 = vcmp.eq.s32.totalorder %v13054_v34, %v16551_v60  ;;  %vm21431_vm4 = vcmp.eq.s32.totalorder %v13076_v36, %v16551_v60 }
 0xc20   : > { %12486 = vmatmul.mubr.msk.f32.vlgmr.msra.gmra.mxu0 %vm5971_vm2, %v12480_v13  ;;  %12495 = vmatprep.subr.mxu0 %v20507_v48 }
 0xc21   : > { %12502 = vmatprep.subr.mxu1 %v20507_v48  ;;  %12499 = vmatprep.mubr.msk.f32.mxu0 %vm12756_vm12, %v20507_v48 }
 0xcc0   : > { %v12382_v0 = vpop.f32.mrf.mxu0 }
 0xcc2   : > { %v6214_v47 = vpop.f32.mrf.mxu0 }
 0xcc4   : > { %v12389_v6 = vpop.f32.mrf.mxu0 }
 0xcc5   : > { %v6301_v8 = vadd.f32 %v12389_v6, %v12382_v0 }
 0xcc6   : > { %v6295_v53 = vpop.f32.mrf.mxu0 }
 0xcc7   : > { %v6296_v13 = vadd.f32 %v6295_v53, %v6214_v47 }
 0xcc8   : > { %v12403_v25 = vpop.f32.mrf.mxu0 }
 0xcc9   : > { %v6480_v5 = vadd.f32 %v12403_v25, %v6301_v8  ;;  %v7515_v25 = vpop.permute.xlu1 %7514 }
 0xcca   : > { %v6470_v43 = vpop.f32.mrf.mxu0 }
 0xccb   : > { %v6479_v49 = vadd.f32 %v6470_v43, %v6296_v13  ;;  %v7520_v43 = vpop.permute.xlu0 %7519  ;;  %v21831_v13 = vld [vmem:[#allocation87_spill] sm:$0xff] }
 0xccc   : > { %v12417_v51 = vpop.f32.mrf.mxu0 }
 0xccd   : > { %v6651_v31 = vadd.f32 %v12417_v51, %v6480_v5  ;;  %v21487_v5 = vld [vmem:[#allocation245_spill] sm:$0xff] }
 0xcce   : > { %v6641_v54 = vpop.f32.mrf.mxu0 }
 0xccf   : > { %v6650_v24 = vadd.f32 %v6641_v54, %v6479_v49  ;;  %v21479_v54 = vld [vmem:[#allocation145_spill] sm:$0xff] }
 0xcd0   : > { %v12431_v9 = vpop.f32.mrf.mxu0 }
 0xcd1   : > { %v6818_v3 = vadd.f32 %v12431_v9, %v6651_v31  ;;  %v21481_v9 = vld [vmem:[#allocation243_spill] sm:$0xff] }
 0xcd2   : > { %v6808_v28 = vpop.f32.mrf.mxu0 }
 0xcd3   : > { %v6817_v21 = vadd.f32 %v6808_v28, %v6650_v24  ;;  %v21829_v28 = vld [vmem:[#allocation150_spill] sm:$0xff] }
 0xcd4   : > { %v12445_v7 = vpop.f32.mrf.mxu0 }
 0xcd5   : > { %v6989_v45 = vadd.f32 %v12445_v7, %v6818_v3  ;;  %v21484_v7 = vld [vmem:[#allocation244_spill] sm:$0xff] }
 0xcd6   : > { %v6979_v41 = vpop.f32.mrf.mxu0 }
 0xcd7   : > { %v6988_v26 = vadd.f32 %v6979_v41, %v6817_v21  ;;  %v21489_v41 = vld [vmem:[#allocation246_spill] sm:$0xff] }
 0xcd8   : > { %v12459_v39 = vpop.f32.mrf.mxu0 }
 0xcd9   : > { %v7163_v10 = vadd.f32 %v12459_v39, %v6989_v45  ;;  %v21473_v45 = vld [vmem:[#allocation241_spill] sm:$0xff] }
 0xcda   : > { %v7153_v11 = vpop.f32.mrf.mxu0 }
 0xcdb   : > { %v7162_v55 = vadd.f32 %v7153_v11, %v6988_v26  ;;  %v21471_v26 = vld [vmem:[#allocation141_spill] sm:$0xff] }
 0xcdc   : > { %v12473_v1 = vpop.f32.mrf.mxu0 }
 0xcdd   : > { %v7335_v57 = vadd.f32 %v12473_v1, %v7163_v10 }
 0xcde   : > { %v7325_v56 = vpop.f32.mrf.mxu0 }
 0xcdf   : > { %v7334_v0 = vadd.f32 %v7325_v56, %v7162_v55 }
 0xce0   : > { %v12487_v59 = vpop.f32.mrf.mxu0 }
 0xce1   : > { %v7509_v6 = vadd.f32 %v12487_v59, %v7335_v57  ;;  %v7615_v57 = vld [vmem:[%s19740_s7] sm:$0xff]  ;;  %v11172_v59 = vld [vmem:[%s19740_s7 + $0x8] sm:$0xff] }
 0xce2   : > { %v7499_v47 = vpop.f32.mrf.mxu0 }
 0xce3   : > { %v7508_v53 = vadd.f32 %v7499_v47, %v7334_v0  ;;  %v7523_v8 = vadd.f32 %v7520_v43, %v7509_v6 }
 0xce5   : > { %v7522_v51 = vadd.f32 %v7515_v25, %v7508_v53  ;;  %v11236_v25 = vld [vmem:[%s19740_s7 + $0x30] sm:$0xff] }
 0xce7   : > { %12492 = vmatprep.mubr.msk.f32.mxu1 %vm5971_vm2, %v7522_v51  ;;  %v11247_v51 = vld [vmem:[%s19740_s7 + $0x38] sm:$0xff] }
 0xce8   : > { %12493 = vmatmul.mubr.msk.f32.vlgmr.msra.gmra.mxu1 %vm5971_vm2, %v7523_v8 }
 0xce9   : > { %12506 = vmatprep.mubr.msk.f32.mxu1 %vm12756_vm12, %v20507_v48 }
 0xda8   : > { %v12494_v3 = vpop.f32.mrf.mxu1 }
 0xda9   : > { %v17965_v11 = vadd.f32 %v12494_v3, %v17619_v4  ;;  %v21475_v4 = vld [vmem:[#allocation143_spill] sm:$0xff] }
 0xdaa   : > { %v7604_v21 = vpop.f32.mrf.mxu1  ;;  %v21493_v3 = vld [vmem:[#allocation247_spill] sm:$0xff] }
 0xdab   : > { %v17968_v55 = vadd.f32 %v7604_v21, %v17617_v18  ;;  %12496 = vmatpush3.msra.mxu0 %v17965_v11  ;;  %12503 = vmatpush3.msra.mxu1 %v17965_v11  ;;  %v21477_v18 = vld [vmem:[#allocation242_spill] sm:$0xff]  ;;  %v21495_v21 = vld [vmem:[#allocation249_spill] sm:$0xff] }
 0xdac   : > { %12497 = vmatprep.subr.mxu0 %v20507_v48  ;;  %12504 = vmatprep.subr.mxu1 %v20507_v48 }
 0xdad   : > { %12498 = vmatpush3.msra.mxu0 %v17968_v55  ;;  %12505 = vmatpush3.msra.mxu1 %v17968_v55 }
 0xdae   : > { %12500 = vmatmul.mubr.msk.f32.vlgmr.msra.gmra.mxu0 %vm5971_vm2, %v7615_v57  ;;  %12507 = vmatmul.mubr.msk.f32.vlgmr.msra.gmra.mxu1 %vm5971_vm2, %v11172_v59  ;;  %v21497_v57 = vld [vmem:[#allocation248_spill] sm:$0xff]  ;;  %v21499_v59 = vld [vmem:[#allocation250_spill] sm:$0xff] }
 0xdaf   : > { %12509 = vmatprep.subr.mxu0 %v20507_v48  ;;  %12528 = vmatprep.subr.mxu1 %v20507_v48 }
 0xdb0   : > { %12510 = vmatpush3.msk.msra.mxu0 %vm21425_vm13, %v20494_v62  ;;  %12529 = vmatpush3.msk.msra.mxu1 %vm21426_vm5, %v20494_v62  ;;  %vm21432_vm13 = vnez %v21210_v58  ;;  %vm21433_vm5 = vcmp.eq.s32.totalorder %v13098_v38, %v16551_v60 }
 0xdb1   : > { %12511 = vmatprep.subr.mxu0 %v20507_v48  ;;  %12530 = vmatprep.subr.mxu1 %v20507_v48 }
 0xdb2   : > { %12512 = vmatpush3.msk.msra.mxu0 %vm21427_vm11, %v20494_v62  ;;  %12531 = vmatpush3.msk.msra.mxu1 %vm21428_vm1, %v20494_v62  ;;  %vm21434_vm11 = vnez %v21212_v35  ;;  %vm21435_vm1 = vcmp.eq.s32.totalorder %v13120_v40, %v16551_v60 }
 0xdb3   : > { %12513 = vmatprep.subr.mxu0 %v20507_v48  ;;  %12532 = vmatprep.subr.mxu1 %v20507_v48 }
 0xdb4   : > { %12514 = vmatpush3.msk.msra.mxu0 %vm21429_vm3, %v20494_v62  ;;  %12533 = vmatpush3.msk.msra.mxu1 %vm21430_vm8, %v20494_v62  ;;  %vm21436_vm3 = vnez %v21214_v50  ;;  %vm21437_vm8 = vcmp.eq.s32.totalorder %v13142_v42, %v16551_v60 }
 0xdb5   : > { %12515 = vmatprep.subr.mxu0 %v20507_v48  ;;  %12534 = vmatprep.subr.mxu1 %v20507_v48 }
 0xdb6   : > { %12516 = vmatpush3.msk.msra.mxu0 %vm21431_vm4, %v20494_v62  ;;  %12535 = vmatpush3.msk.msra.mxu1 %vm21432_vm13, %v20494_v62  ;;  %vm21438_vm4 = vnez %v21216_v17  ;;  %vm21439_vm13 = vcmp.eq.s32.totalorder %v12829_v2, %v16551_v60  ;;  %v11192_v60 = vld [vmem:[%s19740_s7 + $0x10] sm:$0xff] }
 0xdb7   : > { %12517 = vmatprep.subr.mxu0 %v20507_v48  ;;  %12536 = vmatprep.subr.mxu1 %v20507_v48 }
 0xdb8   : > { %12518 = vmatpush3.msk.msra.mxu0 %vm21433_vm5, %v20494_v62  ;;  %12537 = vmatpush3.msk.msra.mxu1 %vm21434_vm11, %v20494_v62  ;;  %vm21440_vm5 = vnez %v21218_v27  ;;  %vm21441_vm11 = vcmask 523264  }
 0xdb9   : > { %12519 = vmatprep.subr.mxu0 %v20507_v48  ;;  %12538 = vmatprep.subr.mxu1 %v20507_v48 }
 0xdba   : > { %12520 = vmatpush3.msk.msra.mxu0 %vm21435_vm1, %v20494_v62  ;;  %12539 = vmatpush3.msk.msra.mxu1 %vm21436_vm3, %v20494_v62  ;;  %vm21442_vm1 = vmmov %vm21441_vm11  ;;  %vm21443_vm3 = vnez %v21220_v23  ;;  %v11214_v23 = vld [vmem:[%s19740_s7 + $0x20] sm:$0xff] }
 0xdbb   : > { %12521 = vmatprep.subr.mxu0 %v20507_v48  ;;  %12540 = vmatprep.subr.mxu1 %v20507_v48 }
 0xdbc   : > { %12522 = vmatpush3.msk.msra.mxu0 %vm21437_vm8, %v20494_v62  ;;  %12541 = vmatpush3.msk.msra.mxu1 %vm21438_vm4, %v20494_v62  ;;  %vm21444_vm8 = vnez %v21222_v19  ;;  %vm21445_vm4 = vnez %v21224_v22  ;;  %v11225_v22 = vld [vmem:[%s19740_s7 + $0x28] sm:$0xff] }
 0xdbd   : > { %12523 = vmatprep.subr.mxu0 %v20507_v48  ;;  %12542 = vmatprep.subr.mxu1 %v20507_v48 }
 0xdbe   : > { %12524 = vmatpush3.msk.msra.mxu0 %vm21439_vm13, %v20494_v62  ;;  %12525 = vmatprep.mubr.msk.f32.mxu0 %vm12756_vm12, %v20507_v48  ;;  %vm21446_vm13 = vnez %v21226_v12 }
 0xdbf   : > { %12543 = vmatpush3.msk.msra.mxu1 %vm21440_vm5, %v20494_v62  ;;  %12544 = vmatprep.mubr.msk.f32.mxu1 %vm12756_vm12, %v20507_v48  ;;  %vm21448_vm5 = vnez %v21231_v15 }
 0xdc0   : > { %12547 = vmatprep.subr.mxu0 %v20507_v48  ;;  %12554 = vmatprep.subr.mxu1 %v20507_v48 }
 0xe6e   : > { %v7685_v1 = vpop.f32.mrf.mxu0  ;;  %v7760_v10 = vpop.f32.mrf.mxu1 }
 0xe6f   : > { %12526 = vmatmul.mubr.msk.f32.vlgmr.msra.gmra.mxu0 %vm21441_vm11, %v7760_v10  ;;  %12545 = vmatmul.mubr.msk.f32.vlgmr.msra.gmra.mxu1 %vm21442_vm1, %v7685_v1  ;;  %vm21451_vm11 = vnez %v21259_v61  ;;  %vm21452_vm1 = vnez %v21242_v14  ;;  %v21455_v61 = vld [vmem:[#allocation237_spill] sm:$0xff]  ;;  %v21457_v14 = vld [vmem:[#allocation238_spill] sm:$0xff]  ;;  %v21502_v1 = vld [vmem:[#allocation251_spill] sm:$0xff] }
 0xe70   : > { %12548 = vmatpush3.msra.mxu0 %v17965_v11  ;;  %v12508_v56 = vpop.f32.mrf.mxu1  ;;  %12551 = vmatprep.mubr.msk.f32.mxu0 %vm12756_vm12, %v20507_v48  ;;  %v12501_v46 = vpop.f32.mrf.mxu0  ;;  %v21505_v10 = vld [vmem:[#allocation252_spill] sm:$0xff] }
 0xe71   : > { %12549 = vmatprep.subr.mxu0 %v20507_v48  ;;  %12555 = vmatpush3.msk.msra.mxu1 %vm21443_vm3, %v20494_v62  ;;  %v21508_v56 = vld [vmem:[#allocation253_spill] sm:$0xff]  ;;  %v21513_v46 = vld [vmem:[#allocation255_spill] sm:$0xff] }
 0xe72   : > { %12550 = vmatpush3.msra.mxu0 %v17968_v55  ;;  %12556 = vmatprep.subr.mxu1 %v20507_v48 }
 0xe73   : > { %12573 = vmatprep.subr.mxu0 %v20507_v48  ;;  %12552 = vmatmul.mubr.msk.f32.vlgmr.msra.gmra.mxu0 %vm5971_vm2, %v11192_v60  ;;  %v21511_v60 = vld [vmem:[#allocation254_spill] sm:$0xff] }
 0xe74   : > { %12574 = vmatpush3.msra.mxu0 %v17965_v11  ;;  %12577 = vmatprep.mubr.msk.f32.mxu0 %vm12756_vm12, %v20507_v48 }
 0xe75   : > { %12575 = vmatprep.subr.mxu0 %v20507_v48  ;;  %12557 = vmatpush3.msk.msra.mxu1 %vm21444_vm8, %v20494_v62  ;;  %vm21456_vm8 = vnez %v21455_v61 }
 0xe76   : > { %12576 = vmatpush3.msra.mxu0 %v17968_v55  ;;  %12558 = vmatprep.subr.mxu1 %v20507_v48 }
 0xe77   : > { %12578 = vmatmul.mubr.msk.f32.vlgmr.msra.gmra.mxu0 %vm5971_vm2, %v11203_v29  ;;  %12580 = vmatprep.subr.mxu0 %v20507_v48 }
 0xe78   : > { %12559 = vmatpush3.msk.msra.mxu1 %vm21445_vm4, %v20494_v62  ;;  %12581 = vmatpush3.msk.msra.mxu0 %vm16857_vm6, %v20494_v62  ;;  %vm21447_vm6 = vnez %v21251_v63  ;;  %v21453_v63 = vld [vmem:[#allocation236_spill] sm:$0xff]  ;;  %vm21458_vm4 = vnez %v21457_v14 }
 0xe79   : > { %12560 = vmatprep.subr.mxu1 %v20507_v48  ;;  %12582 = vmatprep.subr.mxu0 %v20507_v48  ;;  %vm21454_vm3 = vnez %v21453_v63 }
 0xe7a   : > { %12561 = vmatpush3.msk.msra.mxu1 %vm21446_vm13, %v20494_v62  ;;  %12583 = vmatpush3.msk.msra.mxu0 %vm16895_vm9, %v20494_v62  ;;  %vm21449_vm9 = vnez %v21255_v44  ;;  %vm21459_vm13 = vcmask 523264   ;;  %v21469_v44 = vld [vmem:[#allocation240_spill] sm:$0xff] }
 0xe7b   : > { %12562 = vmatprep.subr.mxu1 %v20507_v48  ;;  %12584 = vmatprep.subr.mxu0 %v20507_v48 }
 0xe7c   : > { %12563 = vmatpush3.msk.msra.mxu1 %vm16822_vm7, %v20494_v62  ;;  %12585 = vmatpush3.msk.msra.mxu0 %vm21447_vm6, %v20494_v62  ;;  %vm21450_vm7 = vnez %v21239_v20  ;;  %vm21460_vm6 = vmmov %vm21459_vm13  ;;  %v21465_v20 = vld [vmem:[#allocation239_spill] sm:$0xff] }
 0xe7d   : > { %12564 = vmatprep.subr.mxu1 %v20507_v48  ;;  %12586 = vmatprep.subr.mxu0 %v20507_v48 }
 0xe7e   : > { %12565 = vmatpush3.msk.msra.mxu1 %vm21448_vm5, %v20494_v62  ;;  %12587 = vmatpush3.msk.msra.mxu0 %vm21449_vm9, %v20494_v62  ;;  %vm21462_vm5 = vnez %v21461_v52  ;;  %vm21464_vm9 = vnez %v21463_v37  ;;  %v21815_v52 = vld [vmem:[#allocation138_spill] sm:$0xff]  ;;  %v21817_v37 = vld [vmem:[#allocation140_spill] sm:$0xff] }
 0xe7f   : > { %12566 = vmatprep.subr.mxu1 %v20507_v48  ;;  %12588 = vmatprep.subr.mxu0 %v20507_v48 }
 0xe80   : > { %12567 = vmatpush3.msk.msra.mxu1 %vm21450_vm7, %v20494_v62  ;;  %12589 = vmatpush3.msk.msra.mxu0 %vm21451_vm11, %v20494_v62  ;;  %vm21466_vm7 = vnez %v21465_v20  ;;  %vm21468_vm11 = vnez %v21467_v16  ;;  %v21529_v20 = vld [vmem:[#allocation262_spill] sm:$0xff] }
 0xe81   : > { %12568 = vmatprep.subr.mxu1 %v20507_v48  ;;  %12590 = vmatprep.subr.mxu0 %v20507_v48  ;;  %v21819_v16 = vld [vmem:[#allocation142_spill] sm:$0xff] }
 0xe82   : > { %12569 = vmatpush3.msk.msra.mxu1 %vm21452_vm1, %v20494_v62  ;;  %12591 = vmatpush3.msk.msra.mxu0 %vm21454_vm3, %v20494_v62  ;;  %vm21470_vm1 = vnez %v21469_v44  ;;  %vm21472_vm3 = vnez %v21471_v26  ;;  %v21531_v44 = vld [vmem:[#allocation4_spill] sm:$0xff] }
 0xe83   : > { %12570 = vmatprep.mubr.msk.f32.mxu1 %vm12756_vm12, %v20507_v48  ;;  %12592 = vmatprep.subr.mxu0 %v20507_v48  ;;  %v21821_v26 = vld [vmem:[#allocation144_spill] sm:$0xff] }
 0xe84   : > { %12599 = vmatprep.subr.mxu1 %v20507_v48  ;;  %12593 = vmatpush3.msk.msra.mxu0 %vm21456_vm8, %v20494_v62  ;;  %vm21474_vm8 = vnez %v21473_v45  ;;  %v8961_v45 = vshra.s32 %v21531_v44, 4 }
 0xe85   : > { %12594 = vmatprep.subr.mxu0 %v20507_v48  ;;  %12596 = vmatprep.mubr.msk.f32.mxu0 %vm12756_vm12, %v20507_v48 }
 0xe86   : > { %12595 = vmatpush3.msk.msra.mxu0 %vm21458_vm4, %v20494_v62  ;;  %vm21476_vm4 = vnez %v21475_v4  ;;  %v21823_v4 = vld [vmem:[#allocation146_spill] sm:$0xff] }
 0xe87   : > { %12625 = vmatprep.subr.mxu0 %v20507_v48 }
 0xf2f   : > { %v7833_v15 = vpop.f32.mrf.mxu0  ;;  %v7906_v33 = vpop.f32.mrf.mxu1 }
 0xf30   : > { %v7907_v58 = vadd.f32 %v7906_v33, %v7833_v15 }
 0xf31   : > { %v12527_v35 = vpop.f32.mrf.mxu0  ;;  %v12546_v50 = vpop.f32.mrf.mxu1 }
 0xf32   : > { %v11257_v50 = vld [vmem:[%s19740_s7 + $0x40] sm:$0xff] }
 0xf33   : > { %v7981_v17 = vpop.f32.mrf.mxu0 }
 0xf34   : > { %12571 = vmatmul.mubr.msk.f32.vlgmr.msra.gmra.mxu1 %vm21459_vm13, %v7981_v17  ;;  %vm21478_vm13 = vnez %v21477_v18  ;;  %v21532_v18 = vld [vmem:[#allocation2_spill] sm:$0xff] }
 0xf35   : > { %12600 = vmatpush3.msra.mxu1 %v17965_v11  ;;  %v12553_v27 = vpop.f32.mrf.mxu0  ;;  %12603 = vmatprep.mubr.msk.f32.mxu1 %vm12756_vm12, %v20507_v48 }
 0xf36   : > { %12601 = vmatprep.subr.mxu1 %v20507_v48  ;;  %v21548_v27 = vld [vmem:[#allocation13_spill] sm:$0xff] }
 0xf37   : > { %12602 = vmatpush3.msra.mxu1 %v17968_v55  ;;  %v8130_v19 = vpop.f32.mrf.mxu0 }
 0xf38   : > { %12597 = vmatmul.mubr.msk.f32.vlgmr.msra.gmra.mxu0 %vm21460_vm6, %v8130_v19  ;;  %12604 = vmatmul.mubr.msk.f32.vlgmr.msra.gmra.mxu1 %vm5971_vm2, %v11214_v23  ;;  %vm21480_vm6 = vnez %v21479_v54  ;;  %v21521_v23 = vld [vmem:[#allocation258_spill] sm:$0xff]  ;;  %v21523_v19 = vld [vmem:[#allocation259_spill] sm:$0xff]  ;;  %v21825_v54 = vld [vmem:[#allocation148_spill] sm:$0xff] }
 0xf39   : > { %12626 = vmatpush3.msra.mxu0 %v17965_v11  ;;  %12629 = vmatprep.mubr.msk.f32.mxu0 %vm12756_vm12, %v20507_v48  ;;  %v12579_v12 = vpop.f32.mrf.mxu0 }
 0xf3a   : > { %12627 = vmatprep.subr.mxu0 %v20507_v48  ;;  %12606 = vmatprep.subr.mxu1 %v20507_v48  ;;  %v21527_v12 = vld [vmem:[#allocation261_spill] sm:$0xff] }
 0xf3b   : > { %12628 = vmatpush3.msra.mxu0 %v17968_v55  ;;  %12607 = vmatpush3.msk.msra.mxu1 %vm21462_vm5, %v20494_v62 }
 0xf3c   : > { %12630 = vmatmul.mubr.msk.f32.vlgmr.msra.gmra.mxu0 %vm5971_vm2, %v11225_v22  ;;  %12608 = vmatprep.subr.mxu1 %v20507_v48  ;;  %v21525_v22 = vld [vmem:[#allocation260_spill] sm:$0xff] }
 0xf3d   : > { %12609 = vmatpush3.msk.msra.mxu1 %vm21464_vm9, %v20494_v62  ;;  %12632 = vmatprep.subr.mxu0 %v20507_v48 }
 0xf3e   : > { %12610 = vmatprep.subr.mxu1 %v20507_v48  ;;  %12633 = vmatpush3.msk.msra.mxu0 %vm21466_vm7, %v20494_v62  ;;  %vm21482_vm7 = vnez %v21481_v9  ;;  %v8960_v9 = vshra.s32 %v21532_v18, 4 }
 0xf3f   : > { %12611 = vmatpush3.msk.msra.mxu1 %vm21468_vm11, %v20494_v62  ;;  %12634 = vmatprep.subr.mxu0 %v20507_v48 }
 0xf40   : > { %12612 = vmatprep.subr.mxu1 %v20507_v48  ;;  %12635 = vmatpush3.msk.msra.mxu0 %vm21470_vm1, %v20494_v62  ;;  %vm21485_vm1 = vnez %v21484_v7  ;;  %v8963_v7 = vshra.s32 %v8961_v45, 1  ;;  %v21561_v45 = vld [vmem:[#allocation14_spill] sm:$0xff] }
 0xf41   : > { %12613 = vmatpush3.msk.msra.mxu1 %vm21472_vm3, %v20494_v62  ;;  %12636 = vmatprep.subr.mxu0 %v20507_v48 }
 0xf42   : > { %12614 = vmatprep.subr.mxu1 %v20507_v48  ;;  %12637 = vmatpush3.msk.msra.mxu0 %vm21474_vm8, %v20494_v62  ;;  %vm21488_vm8 = vnez %v21487_v5  ;;  %v21533_v5 = vld [vmem:[#allocation7_spill] sm:$0xff] }
 0xf43   : > { %12615 = vmatpush3.msk.msra.mxu1 %vm21476_vm4, %v20494_v62  ;;  %12638 = vmatprep.subr.mxu0 %v20507_v48 }
 0xf44   : > { %12616 = vmatprep.subr.mxu1 %v20507_v48  ;;  %12639 = vmatpush3.msk.msra.mxu0 %vm21478_vm13, %v20494_v62  ;;  %vm21490_vm13 = vnez %v21489_v41  ;;  %v8967_v41 = vshra.s32 %v21533_v5, 1  ;;  %v21567_v5 = vld [vmem:[#allocation22_spill] sm:$0xff] }
 0xf45   : > { %12617 = vmatpush3.msk.msra.mxu1 %vm21480_vm6, %v20494_v62  ;;  %12640 = vmatprep.subr.mxu0 %v20507_v48 }
 0xf46   : > { %12618 = vmatprep.subr.mxu1 %v20507_v48  ;;  %12641 = vmatpush3.msk.msra.mxu0 %vm21482_vm7, %v20494_v62  ;;  %vm21491_vm7 = vcmask 523264  }
 0xf47   : > { %12619 = vmatpush3.msk.msra.mxu1 %vm21312_vm10, %v20494_v62  ;;  %12642 = vmatprep.subr.mxu0 %v20507_v48 }
 0xf48   : > { %12620 = vmatprep.subr.mxu1 %v20507_v48  ;;  %12643 = vmatpush3.msk.msra.mxu0 %vm21485_vm1, %v20494_v62  ;;  %vm21492_vm1 = vmmov %vm21491_vm7 }
 0xf49   : > { %12621 = vmatpush3.msk.msra.mxu1 %vm21318_vm0, %v20494_v62  ;;  %12622 = vmatprep.mubr.msk.f32.mxu1 %vm12756_vm12, %v20507_v48 }
 0xf4a   : > { %12644 = vmatprep.subr.mxu0 %v20507_v48  ;;  %12651 = vmatprep.subr.mxu1 %v20507_v48 }
 0xf4b   : > { %12645 = vmatpush3.msk.msra.mxu0 %vm21488_vm8, %v20494_v62  ;;  %12648 = vmatprep.mubr.msk.f32.mxu0 %vm12756_vm12, %v20507_v48  ;;  %vm21494_vm8 = vnez %v21493_v3 }
 0xf4c   : > { %12646 = vmatprep.subr.mxu0 %v20507_v48 }
 0xf4d   : > { %12647 = vmatpush3.msk.msra.mxu0 %vm21490_vm13, %v20494_v62  ;;  %vm21496_vm13 = vnez %v21495_v21 }
 0xf4e   : > { %12677 = vmatprep.subr.mxu0 %v20507_v48 }
 0xff4   : > { %v8054_v49 = vpop.f32.mrf.mxu1 }
 0xff5   : > { %v8058_v31 = vadd.f32 %v8054_v49, %v7907_v58  ;;  %v8962_v49 = vshra.s32 %v8960_v9, 1  ;;  %v21563_v9 = vld [vmem:[#allocation21_spill] sm:$0xff] }
 0xff6   : > { %v12572_v39 = vpop.f32.mrf.mxu1 }
 0xff8   : > { %v8203_v24 = vpop.f32.mrf.mxu0  ;;  %v8279_v0 = vpop.f32.mrf.mxu1 }
 0xff9   : > { %v8207_v6 = vadd.f32 %v8203_v24, %v8058_v31  ;;  %12623 = vmatmul.mubr.msk.f32.vlgmr.msra.gmra.mxu1 %vm21491_vm7, %v8279_v0  ;;  %vm21498_vm7 = vcmp.eq.s32.totalorder %v13010_v30, %v21497_v57  ;;  %v21534_v31 = vld [vmem:[#allocation9_spill] sm:$0xff]  ;;  %v8965_v24 = vmul.u32 8, %v8963_v7  ;;  %v8964_v0 = vmul.u32 8, %v8962_v49  ;;  %v21565_v7 = vld [vmem:[#allocation16_spill] sm:$0xff]  ;;  %v21571_v49 = vld [vmem:[#allocation23_spill] sm:$0xff] }
 0xffa   : > { %12652 = vmatpush3.msra.mxu1 %v17965_v11  ;;  %v12598_v47 = vpop.f32.mrf.mxu0  ;;  %v12605_v53 = vpop.f32.mrf.mxu1  ;;  %12655 = vmatprep.mubr.msk.f32.mxu1 %vm12756_vm12, %v20507_v48  ;;  %v8966_v39 = vshra.s32 %v21534_v31, 1  ;;  %v21573_v31 = vld [vmem:[#allocation20_spill] sm:$0xff] }
 0xffb   : > { %12653 = vmatprep.subr.mxu1 %v20507_v48 }
 0xffc   : > { %12654 = vmatpush3.msra.mxu1 %v17968_v55  ;;  %v8428_v43 = vpop.f32.mrf.mxu0  ;;  %v8968_v47 = vadd.s32 %v8966_v39, %v8964_v0  ;;  %v21575_v39 = vld [vmem:[#allocation24_spill] sm:$0xff]  ;;  %v21581_v0 = vld [vmem:[#allocation26_spill] sm:$0xff] }
 0xffd   : > { %12649 = vmatmul.mubr.msk.f32.vlgmr.msra.gmra.mxu0 %vm21492_vm1, %v8428_v43  ;;  %12656 = vmatmul.mubr.msk.f32.vlgmr.msra.gmra.mxu1 %vm5971_vm2, %v11236_v25  ;;  %vm21500_vm1 = vnez %v21499_v59 }
 0xffe   : > { %12678 = vmatpush3.msra.mxu0 %v17965_v11  ;;  %12681 = vmatprep.mubr.msk.f32.mxu0 %vm12756_vm12, %v20507_v48  ;;  %v12631_v8 = vpop.f32.mrf.mxu0 }
 0xfff   : > { %12679 = vmatprep.subr.mxu0 %v20507_v48  ;;  %12658 = vmatprep.subr.mxu1 %v20507_v48 }
0x1000   : > { %12680 = vmatpush3.msra.mxu0 %v17968_v55  ;;  %12659 = vmatpush3.msk.msra.mxu1 %vm21494_vm8, %v20494_v62  ;;  %vm21501_vm8 = vcmp.eq.s32.totalorder %v13032_v32, %v21497_v57 }
0x1001   : > { %12682 = vmatmul.mubr.msk.f32.vlgmr.msra.gmra.mxu0 %vm5971_vm2, %v11247_v51  ;;  %12660 = vmatprep.subr.mxu1 %v20507_v48 }
0x1002   : > { %12661 = vmatpush3.msk.msra.mxu1 %vm21496_vm13, %v20494_v62  ;;  %12684 = vmatprep.subr.mxu0 %v20507_v48  ;;  %vm21503_vm13 = vnez %v21502_v1 }
0x1003   : > { %12662 = vmatprep.subr.mxu1 %v20507_v48  ;;  %12685 = vmatpush3.msk.msra.mxu0 %vm21498_vm7, %v20494_v62  ;;  %vm21504_vm7 = vcmp.eq.s32.totalorder %v13054_v34, %v21497_v57 }
0x1004   : > { %12663 = vmatpush3.msk.msra.mxu1 %vm21500_vm1, %v20494_v62  ;;  %12686 = vmatprep.subr.mxu0 %v20507_v48  ;;  %vm21506_vm1 = vnez %v21505_v10  ;;  %v8957_v10 = vpop.permute.xlu1 %8956 }
0x1005   : > { %12664 = vmatprep.subr.mxu1 %v20507_v48  ;;  %12687 = vmatpush3.msk.msra.mxu0 %vm21501_vm8, %v20494_v62  ;;  %vm21507_vm8 = vcmp.eq.s32.totalorder %v13076_v36, %v21497_v57 }
0x1006   : > { %12665 = vmatpush3.msk.msra.mxu1 %vm21503_vm13, %v20494_v62  ;;  %12688 = vmatprep.subr.mxu0 %v20507_v48  ;;  %vm21509_vm13 = vnez %v21508_v56 }
0x1007   : > { %12666 = vmatprep.subr.mxu1 %v20507_v48  ;;  %12689 = vmatpush3.msk.msra.mxu0 %vm21504_vm7, %v20494_v62  ;;  %vm21510_vm7 = vcmp.eq.s32.totalorder %v13098_v38, %v21497_v57 }
0x1008   : > { %12667 = vmatpush3.msk.msra.mxu1 %vm21506_vm1, %v20494_v62  ;;  %12690 = vmatprep.subr.mxu0 %v20507_v48  ;;  %vm21512_vm1 = vnez %v21511_v60 }
0x1009   : > { %12668 = vmatprep.subr.mxu1 %v20507_v48  ;;  %12691 = vmatpush3.msk.msra.mxu0 %vm21507_vm8, %v20494_v62  ;;  %vm21514_vm8 = vnez %v21513_v46 }
0x100a   : > { %12669 = vmatpush3.msk.msra.mxu1 %vm21509_vm13, %v20494_v62  ;;  %12692 = vmatprep.subr.mxu0 %v20507_v48  ;;  %vm21515_vm13 = vcmp.eq.s32.totalorder %v13120_v40, %v21497_v57 }
0x100b   : > { %12670 = vmatprep.subr.mxu1 %v20507_v48  ;;  %12693 = vmatpush3.msk.msra.mxu0 %vm21510_vm7, %v20494_v62  ;;  %vm21516_vm7 = vcmp.eq.s32.totalorder %v13142_v42, %v21497_v57 }
0x100c   : > { %12671 = vmatpush3.msk.msra.mxu1 %vm21512_vm1, %v20494_v62  ;;  %12694 = vmatprep.subr.mxu0 %v20507_v48  ;;  %vm21517_vm1 = vcmask 523264  }
0x100d   : > { %12672 = vmatprep.subr.mxu1 %v20507_v48  ;;  %12674 = vmatprep.mubr.msk.f32.mxu1 %vm12756_vm12, %v20507_v48 }
0x100e   : > { %12673 = vmatpush3.msk.msra.mxu1 %vm21514_vm8, %v20494_v62  ;;  %12695 = vmatpush3.msk.msra.mxu0 %vm21515_vm13, %v20494_v62  ;;  %vm21518_vm8 = vmmov %vm21517_vm1  ;;  %vm21530_vm13 = vnez %v21529_v20  ;;  %v21559_v20 = vld [vmem:[#allocation19_spill] sm:$0xff] }
0x100f   : > { %12703 = vmatprep.subr.mxu1 %v20507_v48  ;;  %12696 = vmatprep.subr.mxu0 %v20507_v48 }
0x1010   : > { %12697 = vmatpush3.msk.msra.mxu0 %vm21516_vm7, %v20494_v62  ;;  %12700 = vmatprep.mubr.msk.f32.mxu0 %vm12756_vm12, %v20507_v48 }
0x1011   : > { %12698 = vmatprep.subr.mxu0 %v20507_v48 }
0x1012   : > { %12699 = vmatpush3.msra.mxu0 %v20507_v48 }
0x10b9   : > { %v8352_v29 = vpop.f32.mrf.mxu1 }
0x10ba   : > { %v8356_v63 = vadd.f32 %v8352_v29, %v8207_v6  ;;  %v8969_v6 = vadd.s32 %v8967_v41, %v8965_v24  ;;  %v21569_v41 = vld [vmem:[#allocation18_spill] sm:$0xff]  ;;  %v21578_v24 = vld [vmem:[#allocation25_spill] sm:$0xff] }
0x10bb   : > { %v12624_v61 = vpop.f32.mrf.mxu1 }
0x10bc   : > { %vm8985_vm7 = vcmp.eq.s32.totalorder %v13010_v30, %v8969_v6 }
0x10bd   : > { %v8501_v14 = vpop.f32.mrf.mxu0  ;;  %v8577_v15 = vpop.f32.mrf.mxu1  ;;  %11267 = vmatprep.subr.msk.mxu0 %vm8985_vm7, %v20494_v62  ;;  %vm8977_vm7 = vcmp.eq.s32.totalorder %v13098_v38, %v8969_v6 }
0x10be   : > { %v18336_v33 = vadd.f32 %v8501_v14, %v8356_v63  ;;  %12675 = vmatmul.mubr.msk.f32.vlgmr.msra.gmra.mxu1 %vm21517_vm1, %v8577_v15  ;;  %vm8984_vm1 = vcmp.eq.s32.totalorder %v13010_v30, %v8968_v47  ;;  %v21537_v63 = vld [vmem:[#allocation234_spill] sm:$0xff]  ;;  %v21538_v14 = vld [vmem:[#allocation235_spill] sm:$0xff] }
0x10bf   : > { %12704 = vmatpush3.msra.mxu1 %v17965_v11  ;;  %v12650_v58 = vpop.f32.mrf.mxu0  ;;  %v12657_v35 = vpop.f32.mrf.mxu1  ;;  %12707 = vmatprep.mubr.msk.f32.mxu1 %vm12756_vm12, %v20507_v48 }
0x10c0   : > { %12705 = vmatprep.subr.mxu1 %v20507_v48  ;;  %v11285_v58 = vld [vmem:[%s19742_s9 + $0x8] sm:$0xff] }
0x10c1   : > { %12706 = vmatpush3.msra.mxu1 %v17968_v55  ;;  %v8726_v17 = vpop.f32.mrf.mxu0  ;;  %v21541_v35 = vld [vmem:[#allocation3_spill] sm:$0xff] }
0x10c2   : > { %12701 = vmatmul.mubr.msk.f32.vlgmr.msra.gmra.mxu0 %vm21518_vm8, %v8726_v17  ;;  %12708 = vmatmul.mubr.msk.f32.vlgmr.msra.gmra.mxu1 %vm5971_vm2, %v11257_v50  ;;  %vm21522_vm2 = vnez %v21521_v23  ;;  %vm8983_vm8 = vcmp.eq.s32.totalorder %v13032_v32, %v8969_v6  ;;  %v21542_v50 = vld [vmem:[#allocation6_spill] sm:$0xff]  ;;  %v21550_v55 = vld [vmem:[#allocation15_spill] sm:$0xff]  ;;  %v21552_v23 = vld [vmem:[#allocation8_spill] sm:$0xff] }
0x10c3   : > { %12710 = vmatprep.subr.mxu1 %v20507_v48  ;;  %v12683_v11 = vpop.f32.mrf.mxu0  ;;  %12726 = vmatprep.mubr.msk.f32.mxu1 %vm12756_vm12, %v20507_v48  ;;  %vm21524_vm12 = vnez %v21523_v19  ;;  %v21544_v17 = vld [vmem:[#allocation10_spill] sm:$0xff]  ;;  %v21553_v19 = vld [vmem:[#allocation12_spill] sm:$0xff] }
0x10c4   : > { %12711 = vmatpush3.msk.msra.mxu1 %vm17432_vm14, %v20494_v62  ;;  %9069 = vmatprep.mubr.f32.mxu0 %v20507_v48  ;;  %vm21526_vm14 = vnez %v21525_v22  ;;  %v21546_v11 = vld [vmem:[#allocation5_spill] sm:$0xff] }
0x10c5   : > { %12712 = vmatprep.subr.mxu1 %v20507_v48  ;;  %11268 = vmatpush1.msk.msra.mxu0 %vm8984_vm1, %v20494_v62  ;;  %vm8976_vm1 = vcmp.eq.s32.totalorder %v13098_v38, %v8968_v47  ;;  %v21555_v22 = vld [vmem:[#allocation17_spill] sm:$0xff] }
0x10c6   : > { %12713 = vmatpush3.msk.msra.mxu1 %vm17450_vm15, %v20494_v62  ;;  %vm21528_vm15 = vnez %v21527_v12  ;;  %11269 = vmatprep.subr.msk.mxu0 %vm8983_vm8, %v20494_v62  ;;  %vm8975_vm8 = vcmp.eq.s32.totalorder %v13120_v40, %v8969_v6  ;;  %v21557_v12 = vld [vmem:[#allocation11_spill] sm:$0xff] }
0x10c7   : > { %12714 = vmatprep.subr.mxu1 %v20507_v48 }
0x10c8   : > { %12715 = vmatpush3.msk.msra.mxu1 %vm21522_vm2, %v20494_v62  ;;  %vm8982_vm2 = vcmp.eq.s32.totalorder %v13032_v32, %v8968_v47 }
0x10c9   : > { %12716 = vmatprep.subr.mxu1 %v20507_v48  ;;  %11270 = vmatpush1.msk.msra.mxu0 %vm8982_vm2, %v20494_v62  ;;  %vm21535_vm2 = vcmask 523264  }
0x10ca   : > { %12717 = vmatpush3.msk.msra.mxu1 %vm21524_vm12, %v20494_v62  ;;  %vm8981_vm12 = vcmp.eq.s32.totalorder %v13054_v34, %v8969_v6 }
0x10cb   : > { %12718 = vmatprep.subr.mxu1 %v20507_v48  ;;  %11271 = vmatprep.subr.msk.mxu0 %vm8981_vm12, %v20494_v62  ;;  %vm8974_vm12 = vcmp.eq.s32.totalorder %v13120_v40, %v8968_v47 }
0x10cc   : > { %12719 = vmatpush3.msk.msra.mxu1 %vm21526_vm14, %v20494_v62  ;;  %vm8980_vm14 = vcmp.eq.s32.totalorder %v13054_v34, %v8968_v47 }
0x10cd   : > { %12720 = vmatprep.subr.mxu1 %v20507_v48  ;;  %11272 = vmatpush1.msk.msra.mxu0 %vm8980_vm14, %v20494_v62  ;;  %vm8973_vm14 = vcmp.eq.s32.totalorder %v13142_v42, %v8969_v6 }
0x10ce   : > { %12721 = vmatpush3.msk.msra.mxu1 %vm21528_vm15, %v20494_v62  ;;  %vm8979_vm15 = vcmp.eq.s32.totalorder %v13076_v36, %v8969_v6 }
0x10cf   : > { %12722 = vmatprep.subr.mxu1 %v20507_v48  ;;  %11273 = vmatprep.subr.msk.mxu0 %vm8979_vm15, %v20494_v62  ;;  %vm8972_vm15 = vcmp.eq.s32.totalorder %v13142_v42, %v8968_v47 }
0x10d0   : > { %12723 = vmatpush3.msk.msra.mxu1 %vm21530_vm13, %v20494_v62  ;;  %vm8978_vm13 = vcmp.eq.s32.totalorder %v13076_v36, %v8968_v47 }
0x10d1   : > { %12724 = vmatprep.subr.mxu1 %v20507_v48  ;;  %11274 = vmatpush1.msk.msra.mxu0 %vm8978_vm13, %v20494_v62  ;;  %vm8971_vm13 = vcmp.eq.s32.totalorder %v12829_v2, %v8969_v6  ;;  %v21584_v6 = vld [vmem:[#allocation27_spill] sm:$0xff] }
0x10d2   : > { %12725 = vmatpush3.msra.mxu1 %v20507_v48  ;;  %11275 = vmatprep.subr.msk.mxu0 %vm8977_vm7, %v20494_v62  ;;  %vm8970_vm7 = vcmp.eq.s32.totalorder %v12829_v2, %v8968_v47  ;;  %v21587_v47 = vld [vmem:[#allocation28_spill] sm:$0xff] }
0x10d3   : > { %11276 = vmatpush1.msk.msra.mxu0 %vm8976_vm1, %v20494_v62  ;;  %vm21536_vm1 = vmmov %vm21535_vm2 }
0x10d4   : > { %11277 = vmatprep.subr.msk.mxu0 %vm8975_vm8, %v20494_v62  ;;  %vm21539_vm8 = vcmask 64512  }
0x10d5   : > { %11278 = vmatpush1.msk.msra.mxu0 %vm8974_vm12, %v20494_v62  ;;  %vm21543_vm12 = vcmp.eq.s32.totalorder %v21541_v35, %v21542_v50 }
0x10d6   : > { %11279 = vmatprep.subr.msk.mxu0 %vm8973_vm14, %v20494_v62  ;;  %vm21545_vm14 = vnez %v21544_v17  ;;  %v21635_v17 = vld [vmem:[#allocation53_spill] sm:$0xff] }
0x10d7   : > { %11280 = vmatpush1.msk.msra.mxu0 %vm8972_vm15, %v20494_v62  ;;  %vm21547_vm15 = vcmp.eq.s32.totalorder %v21546_v11, %v21542_v50 }
0x10d8   : > { %11281 = vmatprep.subr.msk.mxu0 %vm8971_vm13, %v20494_v62  ;;  %vm21549_vm13 = vnez %v21548_v27  ;;  %v21637_v27 = vld [vmem:[#allocation48_spill] sm:$0xff] }
0x10d9   : > { %11282 = vmatpush1.msk.msra.mxu0 %vm8970_vm7, %v20494_v62  ;;  %vm21551_vm7 = vnez %v21550_v55  ;;  %v21639_v55 = vld [vmem:[#allocation54_spill] sm:$0xff] }
0x117e   : > { %v8650_v53 = vpop.f32.mrf.mxu1 }
0x117f   : > { %v8654_v25 = vadd.f32 %v8650_v53, %v18336_v33  ;;  %v9078_v33 = vld [vmem:[%s19742_s9] sm:$0xff]  ;;  %v21590_v53 = vld [vmem:[#allocation29_spill] sm:$0xff] }
0x1180   : > { %v12676_v43 = vpop.f32.mrf.mxu1 }
0x1181   : > { %v21596_v43 = vld [vmem:[#allocation33_spill] sm:$0xff] }
0x1182   : > { %v8799_v51 = vpop.f32.mrf.mxu0  ;;  %v8875_v8 = vpop.f32.mrf.mxu1 }
0x1183   : > { %v8803_v3 = vadd.f32 %v8799_v51, %v8654_v25  ;;  %12727 = vmatmul.mubr.msk.f32.vlgmr.msra.gmra.mxu1 %vm21535_vm2, %v8875_v8  ;;  %vm21540_vm2 = vmmov %vm21539_vm8  ;;  %v21593_v25 = vld [vmem:[#allocation31_spill] sm:$0xff]  ;;  %v21603_v8 = vld [vmem:[#allocation37_spill] sm:$0xff] }
0x1184   : > { %v12709_v21 = vpop.f32.mrf.mxu1  ;;  %v12702_v57 = vpop.f32.mrf.mxu0  ;;  %9146 = vmatprep.mubr.f32.mxu1 %v20507_v48  ;;  %v21599_v51 = vld [vmem:[#allocation35_spill] sm:$0xff] }
0x1185   : > { %v21609_v21 = vld [vmem:[#allocation34_spill] sm:$0xff]  ;;  %v21611_v57 = vld [vmem:[#allocation41_spill] sm:$0xff] }
0x1243   : > { %v8948_v59 = vpop.f32.mrf.mxu1 }
0x1244   : > { %v8952_v1 = vadd.f32 %v8948_v59, %v8803_v3  ;;  %v21607_v3 = vld [vmem:[#allocation39_spill] sm:$0xff]  ;;  %v21613_v59 = vld [vmem:[#allocation36_spill] sm:$0xff] }
0x1245   : > { %v12728_v56 = vpop.f32.mrf.mxu1 }
0x1246   : > { %v8959_v60 = vadd.f32 %v8957_v10, %v8952_v1  ;;  %v21615_v1 = vld [vmem:[#allocation43_spill] sm:$0xff]  ;;  %v21617_v10 = vld [vmem:[#allocation38_spill] sm:$0xff]  ;;  %v21619_v56 = vld [vmem:[#allocation45_spill] sm:$0xff] }
0x1248   : > { %11283 = vmatmul.mubr.msk.f32.vlgmr.msra.gmra.mxu0 %vm21536_vm1, %v8959_v60  ;;  %vm21554_vm1 = vcmp.eq.s32.totalorder %v21552_v23, %v21553_v19  ;;  %v21621_v60 = vld [vmem:[#allocation40_spill] sm:$0xff] }
0x1249   : > { %9222 = vmatprep.mubr.f32.mxu0 %v20507_v48 }
0x1308   : > { %v9071_v46 = vpop.f32.mrf.mxu0 }
0x1309   : > { %v18427_v15 = vadd.f32 %v9071_v46, %v21538_v14  ;;  %v21623_v46 = vld [vmem:[#allocation47_spill] sm:$0xff]  ;;  %v21629_v14 = vld [vmem:[#allocation44_spill] sm:$0xff] }
0x130a   : > { %v9073_v29 = vpop.f32.mrf.mxu0 }
0x130b   : > { %v18424_v61 = vadd.f32 %v9073_v29, %v21537_v63  ;;  %v21625_v29 = vld [vmem:[#allocation42_spill] sm:$0xff]  ;;  %v21627_v63 = vld [vmem:[#allocation49_spill] sm:$0xff] }
0x130d   : > { %9112 = vmatprep.subr.mxu1 %v18424_v61  ;;  %9188 = vmatprep.subr.mxu0 %v18424_v61 }
0x130e   : > { %9113 = vmatpush1.msra.mxu1 %v18427_v15  ;;  %9189 = vmatpush1.msra.mxu0 %v18427_v15 }
0x130f   : > { %11284 = vmatmul.mubr.msk.f32.vlgmr.msra.gmra.mxu1 %vm21539_vm8, %v9078_v33  ;;  %11286 = vmatmul.mubr.msk.f32.vlgmr.msra.gmra.mxu0 %vm21540_vm2, %v11285_v58  ;;  %vm21556_vm8 = vnez %v21555_v22  ;;  %vm21558_vm2 = vcmp.eq.s32.totalorder %v21557_v12, %v21553_v19  ;;  %v21631_v33 = vld [vmem:[#allocation51_spill] sm:$0xff]  ;;  %v21633_v58 = vld [vmem:[#allocation46_spill] sm:$0xff] }
0x1310   : > { %11287 = vmatprep.subr.msk.mxu1 %vm21543_vm12, %v20494_v62  ;;  %11317 = vmatprep.subr.msk.mxu0 %vm21545_vm14, %v20494_v62  ;;  %vm21560_vm12 = vnez %v21559_v20  ;;  %vm21562_vm14 = vcmp.eq.s32.totalorder %v21561_v45, %v21553_v19  ;;  %v21643_v22 = vld [vmem:[#allocation55_spill] sm:$0xff]  ;;  %v21645_v20 = vld [vmem:[#allocation52_spill] sm:$0xff] }
0x1311   : > { %9230 = vmatpush1.msra.mxu1 %v20507_v48  ;;  %9301 = vmatpush1.msra.mxu0 %v20507_v48 }
0x1312   : > { %11288 = vmatprep.subr.msk.mxu1 %vm21547_vm15, %v20494_v62  ;;  %11318 = vmatprep.subr.msk.mxu0 %vm21549_vm13, %v20494_v62  ;;  %vm21564_vm15 = vnez %v21563_v9  ;;  %vm21566_vm13 = vcmp.eq.s32.totalorder %v21565_v7, %v21553_v19  ;;  %v21647_v9 = vld [vmem:[#allocation56_spill] sm:$0xff] }
0x1313   : > { %9232 = vmatpush1.msra.mxu1 %v20507_v48  ;;  %9303 = vmatpush1.msra.mxu0 %v20507_v48 }
0x1314   : > { %9233 = vmatprep.subr.mxu1 %v20507_v48  ;;  %11319 = vmatprep.subr.msk.mxu0 %vm21551_vm7, %v20494_v62  ;;  %vm21568_vm7 = vnez %v21567_v5  ;;  %v21649_v5 = vld [vmem:[#allocation57_spill] sm:$0xff] }
0x1315   : > { %11289 = vmatpush1.msk.msra.mxu1 %vm21554_vm1, %v20494_v62  ;;  %11320 = vmatpush1.msk.msra.mxu0 %vm21556_vm8, %v20494_v62  ;;  %vm21570_vm1 = vcmp.eq.s32.totalorder %v21569_v41, %v21553_v19  ;;  %vm21572_vm8 = vnez %v21571_v49  ;;  %v21651_v49 = vld [vmem:[#allocation59_spill] sm:$0xff] }
0x1316   : > { %9235 = vmatprep.subr.mxu1 %v20507_v48  ;;  %9306 = vmatprep.subr.mxu0 %v20507_v48 }
0x1317   : > { %11290 = vmatpush1.msk.msra.mxu1 %vm21558_vm2, %v20494_v62  ;;  %11321 = vmatpush1.msk.msra.mxu0 %vm21560_vm12, %v20494_v62  ;;  %vm21574_vm2 = vcmp.eq.s32.totalorder %v21573_v31, %v21553_v19  ;;  %vm21576_vm12 = vnez %v21575_v39  ;;  %v21653_v39 = vld [vmem:[#allocation58_spill] sm:$0xff] }
0x1318   : > { %9237 = vmatprep.subr.mxu1 %v20507_v48  ;;  %9308 = vmatprep.subr.mxu0 %v20507_v48 }
0x1319   : > { %11291 = vmatpush1.msk.msra.mxu1 %vm21562_vm14, %v20494_v62  ;;  %11322 = vmatpush1.msk.msra.mxu0 %vm21564_vm15, %v20494_v62  ;;  %vm21577_vm14 = vcmp.eq.s32.totalorder %v13010_v30, %v21553_v19  ;;  %vm21579_vm15 = vnez %v21578_v24  ;;  %v21655_v24 = vld [vmem:[#allocation60_spill] sm:$0xff] }
0x131a   : > { %9239 = vmatprep.subr.mxu1 %v20507_v48  ;;  %9310 = vmatprep.subr.mxu0 %v20507_v48 }
0x131b   : > { %11292 = vmatpush1.msk.msra.mxu1 %vm21566_vm13, %v20494_v62  ;;  %11323 = vmatpush1.msk.msra.mxu0 %vm21568_vm7, %v20494_v62  ;;  %vm21580_vm13 = vcmp.eq.s32.totalorder %v13032_v32, %v21553_v19  ;;  %vm21582_vm7 = vnez %v21581_v0  ;;  %v21657_v0 = vld [vmem:[#allocation61_spill] sm:$0xff] }
0x131c   : > { %9241 = vmatprep.subr.mxu1 %v20507_v48  ;;  %9312 = vmatprep.subr.mxu0 %v20507_v48 }
0x131d   : > { %11293 = vmatpush1.msk.msra.mxu1 %vm21570_vm1, %v20494_v62  ;;  %11324 = vmatpush1.msk.msra.mxu0 %vm21572_vm8, %v20494_v62  ;;  %vm21583_vm1 = vcmp.eq.s32.totalorder %v13054_v34, %v21553_v19  ;;  %vm21585_vm8 = vnez %v21584_v6 }
0x131e   : > { %9243 = vmatprep.subr.mxu1 %v20507_v48  ;;  %9314 = vmatprep.subr.mxu0 %v20507_v48 }
0x131f   : > { %11294 = vmatpush1.msk.msra.mxu1 %vm21574_vm2, %v20494_v62  ;;  %11325 = vmatpush1.msk.msra.mxu0 %vm21576_vm12, %v20494_v62  ;;  %vm21586_vm2 = vcmp.eq.s32.totalorder %v13076_v36, %v21553_v19  ;;  %vm21588_vm12 = vnez %v21587_v47 }
0x1320   : > { %9245 = vmatprep.subr.mxu1 %v20507_v48  ;;  %9316 = vmatprep.subr.mxu0 %v20507_v48 }
0x1321   : > { %11295 = vmatpush1.msk.msra.mxu1 %vm21577_vm14, %v20494_v62  ;;  %11326 = vmatpush1.msk.msra.mxu0 %vm21579_vm15, %v20494_v62  ;;  %vm21589_vm14 = vcmp.eq.s32.totalorder %v13098_v38, %v21553_v19  ;;  %vm21591_vm15 = vnez %v21590_v53 }
0x1322   : > { %9247 = vmatprep.subr.mxu1 %v20507_v48  ;;  %9318 = vmatprep.subr.mxu0 %v20507_v48 }
0x1323   : > { %11296 = vmatpush1.msk.msra.mxu1 %vm21580_vm13, %v20494_v62  ;;  %11327 = vmatpush1.msk.msra.mxu0 %vm21582_vm7, %v20494_v62  ;;  %vm21592_vm13 = vcmp.eq.s32.totalorder %v13120_v40, %v21553_v19  ;;  %vm21594_vm7 = vnez %v21593_v25 }
0x1324   : > { %9249 = vmatprep.subr.mxu1 %v20507_v48  ;;  %9320 = vmatprep.subr.mxu0 %v20507_v48 }
0x1325   : > { %11297 = vmatpush1.msk.msra.mxu1 %vm21583_vm1, %v20494_v62  ;;  %11328 = vmatpush1.msk.msra.mxu0 %vm21585_vm8, %v20494_v62  ;;  %vm21595_vm1 = vcmp.eq.s32.totalorder %v13142_v42, %v21553_v19  ;;  %vm21597_vm8 = vnez %v21596_v43  ;;  %v21601_v42 = vld [vmem:[#allocation30_spill] sm:$0xff] }
0x1326   : > { %9251 = vmatprep.subr.mxu1 %v20507_v48  ;;  %9322 = vmatprep.subr.mxu0 %v20507_v48  ;;  %v21659_v43 = vld [vmem:[#allocation62_spill] sm:$0xff] }
0x1327   : > { %11298 = vmatpush1.msk.msra.mxu1 %vm21586_vm2, %v20494_v62  ;;  %11329 = vmatpush1.msk.msra.mxu0 %vm21588_vm12, %v20494_v62  ;;  %vm21598_vm2 = vcmp.eq.s32.totalorder %v12829_v2, %v21553_v19  ;;  %vm21600_vm12 = vnez %v21599_v51  ;;  %v21605_v2 = vld [vmem:[#allocation32_spill] sm:$0xff]  ;;  %v21641_v19 = vld [vmem:[#allocation50_spill] sm:$0xff]  ;;  %v21661_v51 = vld [vmem:[#allocation63_spill] sm:$0xff] }
0x1328   : > { %9253 = vmatprep.subr.mxu1 %v20507_v48  ;;  %9324 = vmatprep.subr.mxu0 %v20507_v48 }
0x1329   : > { %11299 = vmatpush1.msk.msra.mxu1 %vm21589_vm14, %v20494_v62  ;;  %11330 = vmatpush1.msk.msra.mxu0 %vm21591_vm15, %v20494_v62  ;;  %vm21602_vm14 = vcmp.eq.s32.totalorder %v21601_v42, %v21542_v50  ;;  %vm21604_vm15 = vnez %v21603_v8  ;;  %v21664_v8 = vld [vmem:[#allocation66_spill] sm:$0xff] }
0x132a   : > { %9255 = vmatprep.subr.mxu1 %v20507_v48  ;;  %9326 = vmatprep.subr.mxu0 %v20507_v48 }
0x132b   : > { %11300 = vmatpush1.msk.msra.mxu1 %vm21592_vm13, %v20494_v62  ;;  %11331 = vmatpush1.msk.msra.mxu0 %vm21594_vm7, %v20494_v62  ;;  %vm21606_vm13 = vcmp.eq.s32.totalorder %v21605_v2, %v21542_v50  ;;  %vm21608_vm7 = vnez %v21607_v3  ;;  %v11382_v3 = vld [vmem:[%s19742_s9 + $0x18] sm:$0xff] }
0x132c   : > { %9257 = vmatprep.subr.mxu1 %v20507_v48  ;;  %9328 = vmatprep.subr.mxu0 %v20507_v48 }
0x132d   : > { %11301 = vmatpush1.msk.msra.mxu1 %vm21595_vm1, %v20494_v62  ;;  %11332 = vmatpush1.msk.msra.mxu0 %vm21597_vm8, %v20494_v62  ;;  %vm21610_vm1 = vcmp.eq.s32.totalorder %v21609_v21, %v21542_v50  ;;  %vm21612_vm8 = vnez %v21611_v57  ;;  %v21666_v57 = vld [vmem:[#allocation68_spill] sm:$0xff] }
0x132e   : > { %9259 = vmatprep.subr.mxu1 %v20507_v48  ;;  %9330 = vmatprep.subr.mxu0 %v20507_v48 }
0x132f   : > { %11302 = vmatpush1.msk.msra.mxu1 %vm21598_vm2, %v20494_v62  ;;  %11333 = vmatpush1.msk.msra.mxu0 %vm21600_vm12, %v20494_v62  ;;  %vm21614_vm2 = vcmp.eq.s32.totalorder %v21613_v59, %v21542_v50  ;;  %vm21616_vm12 = vnez %v21615_v1  ;;  %v21668_v1 = vld [vmem:[#allocation64_spill] sm:$0xff] }
0x1330   : > { %11303 = vmatprep.subr.msk.mxu1 %vm21602_vm14, %v20494_v62  ;;  %11334 = vmatprep.subr.msk.mxu0 %vm21604_vm15, %v20494_v62  ;;  %vm21618_vm14 = vcmp.eq.s32.totalorder %v21617_v10, %v21542_v50  ;;  %vm21620_vm15 = vnez %v21619_v56  ;;  %v21671_v56 = vld [vmem:[#allocation70_spill] sm:$0xff] }
0x1331   : > { %9266 = vmatpush2.msra.mxu1 %v20507_v48  ;;  %9337 = vmatpush2.msra.mxu0 %v20507_v48 }
0x1332   : > { %11304 = vmatprep.subr.msk.mxu1 %vm21606_vm13, %v20494_v62  ;;  %11335 = vmatprep.subr.msk.mxu0 %vm21608_vm7, %v20494_v62  ;;  %vm21622_vm13 = vcmp.eq.s32.totalorder %v21621_v60, %v21542_v50  ;;  %vm21624_vm7 = vnez %v21623_v46  ;;  %v21673_v46 = vld [vmem:[#allocation65_spill] sm:$0xff] }
0x1333   : > { %9268 = vmatpush2.msra.mxu1 %v20507_v48  ;;  %9339 = vmatpush2.msra.mxu0 %v20507_v48 }
0x1334   : > { %11305 = vmatprep.subr.msk.mxu1 %vm21610_vm1, %v20494_v62  ;;  %11336 = vmatprep.subr.msk.mxu0 %vm21612_vm8, %v20494_v62  ;;  %vm21626_vm1 = vcmp.eq.s32.totalorder %v21625_v29, %v21542_v50  ;;  %vm21628_vm8 = vnez %v21627_v63  ;;  %v21675_v63 = vld [vmem:[#allocation72_spill] sm:$0xff] }
0x1335   : > { %9270 = vmatpush2.msra.mxu1 %v20507_v48  ;;  %9341 = vmatpush2.msra.mxu0 %v20507_v48 }
0x1336   : > { %11306 = vmatprep.subr.msk.mxu1 %vm21614_vm2, %v20494_v62  ;;  %11337 = vmatprep.subr.msk.mxu0 %vm21616_vm12, %v20494_v62  ;;  %vm21630_vm2 = vcmp.eq.s32.totalorder %v21629_v14, %v21542_v50  ;;  %vm21632_vm12 = vnez %v21631_v33  ;;  %v21677_v33 = vld [vmem:[#allocation67_spill] sm:$0xff] }
0x1337   : > { %9272 = vmatpush2.msra.mxu1 %v20507_v48  ;;  %9343 = vmatpush2.msra.mxu0 %v20507_v48 }
0x1338   : > { %11307 = vmatprep.subr.msk.mxu1 %vm21618_vm14, %v20494_v62  ;;  %11338 = vmatprep.subr.msk.mxu0 %vm21620_vm15, %v20494_v62  ;;  %vm21634_vm14 = vcmp.eq.s32.totalorder %v21633_v58, %v21542_v50  ;;  %vm21636_vm15 = vnez %v21635_v17  ;;  %v21679_v17 = vld [vmem:[#allocation74_spill] sm:$0xff] }
0x1339   : > { %9274 = vmatpush2.msra.mxu1 %v20507_v48  ;;  %9345 = vmatpush2.msra.mxu0 %v20507_v48 }
0x133a   : > { %11308 = vmatprep.subr.msk.mxu1 %vm21622_vm13, %v20494_v62  ;;  %11339 = vmatprep.subr.msk.mxu0 %vm21624_vm7, %v20494_v62  ;;  %vm21638_vm13 = vcmp.eq.s32.totalorder %v21637_v27, %v21542_v50  ;;  %vm21640_vm7 = vnez %v21639_v55  ;;  %v21681_v55 = vld [vmem:[#allocation69_spill] sm:$0xff] }
0x133b   : > { %9276 = vmatpush2.msra.mxu1 %v20507_v48  ;;  %9347 = vmatpush2.msra.mxu0 %v20507_v48 }
0x133c   : > { %11309 = vmatprep.subr.msk.mxu1 %vm21626_vm1, %v20494_v62  ;;  %11340 = vmatprep.subr.msk.mxu0 %vm21628_vm8, %v20494_v62  ;;  %vm21642_vm1 = vcmp.eq.s32.totalorder %v21641_v19, %v21542_v50  ;;  %vm21644_vm8 = vnez %v21643_v22  ;;  %v21683_v22 = vld [vmem:[#allocation76_spill] sm:$0xff] }
0x133d   : > { %9278 = vmatpush2.msra.mxu1 %v20507_v48  ;;  %9349 = vmatpush2.msra.mxu0 %v20507_v48 }
0x133e   : > { %11310 = vmatprep.subr.msk.mxu1 %vm21630_vm2, %v20494_v62  ;;  %11341 = vmatprep.subr.msk.mxu0 %vm21632_vm12, %v20494_v62  ;;  %vm21646_vm2 = vcmp.eq.s32.totalorder %v21645_v20, %v21542_v50  ;;  %vm21648_vm12 = vnez %v21647_v9  ;;  %v21685_v9 = vld [vmem:[#allocation71_spill] sm:$0xff] }
0x133f   : > { %9280 = vmatpush2.msra.mxu1 %v20507_v48  ;;  %9351 = vmatpush2.msra.mxu0 %v20507_v48 }
0x1340   : > { %11311 = vmatprep.subr.msk.mxu1 %vm21634_vm14, %v20494_v62  ;;  %11342 = vmatprep.subr.msk.mxu0 %vm21636_vm15, %v20494_v62  ;;  %vm21650_vm14 = vcmp.eq.s32.totalorder %v21649_v5, %v21542_v50  ;;  %vm21652_vm15 = vnez %v21651_v49  ;;  %v21687_v49 = vld [vmem:[#allocation78_spill] sm:$0xff] }
0x1341   : > { %9282 = vmatpush2.msra.mxu1 %v20507_v48  ;;  %9353 = vmatpush2.msra.mxu0 %v20507_v48 }
0x1342   : > { %11312 = vmatprep.subr.msk.mxu1 %vm21638_vm13, %v20494_v62  ;;  %11343 = vmatprep.subr.msk.mxu0 %vm21640_vm7, %v20494_v62  ;;  %vm21654_vm13 = vcmp.eq.s32.totalorder %v21653_v39, %v21542_v50  ;;  %vm21656_vm7 = vnez %v21655_v24  ;;  %v11348_v50 = vld [vmem:[%s19742_s9 + $0x10] sm:$0xff]  ;;  %v21689_v24 = vld [vmem:[#allocation73_spill] sm:$0xff] }
0x1343   : > { %9284 = vmatpush2.msra.mxu1 %v20507_v48  ;;  %9355 = vmatpush2.msra.mxu0 %v20507_v48 }
0x1344   : > { %11313 = vmatprep.subr.msk.mxu1 %vm21642_vm1, %v20494_v62  ;;  %11344 = vmatprep.subr.msk.mxu0 %vm21644_vm8, %v20494_v62  ;;  %vm21658_vm1 = vnez %v21657_v0  ;;  %vm21660_vm8 = vnez %v21659_v43  ;;  %v21691_v0 = vld [vmem:[#allocation80_spill] sm:$0xff]  ;;  %v21703_v43 = vld [vmem:[#allocation86_spill] sm:$0xff] }
0x1345   : > { %9286 = vmatpush2.msra.mxu1 %v20507_v48  ;;  %9357 = vmatpush2.msra.mxu0 %v20507_v48 }
0x1346   : > { %11314 = vmatprep.subr.msk.mxu1 %vm21646_vm2, %v20494_v62  ;;  %11345 = vmatprep.subr.msk.mxu0 %vm21648_vm12, %v20494_v62  ;;  %vm21662_vm2 = vnez %v21661_v51  ;;  %vm21663_vm12 = vcmask 64512   ;;  %v21705_v51 = vld [vmem:[#allocation81_spill] sm:$0xff] }
0x1347   : > { %9288 = vmatpush2.msra.mxu1 %v20507_v48  ;;  %9359 = vmatpush2.msra.mxu0 %v20507_v48 }
0x1348   : > { %11315 = vmatprep.subr.msk.mxu1 %vm21650_vm14, %v20494_v62  ;;  %11346 = vmatprep.subr.msk.mxu0 %vm21652_vm15, %v20494_v62  ;;  %vm21665_vm14 = vnez %v21664_v8  ;;  %vm21667_vm15 = vnez %v21666_v57  ;;  %v21707_v8 = vld [vmem:[#allocation89_spill] sm:$0xff]  ;;  %v21711_v57 = vld [vmem:[#allocation91_spill] sm:$0xff] }
0x1349   : > { %9290 = vmatpush2.msra.mxu1 %v20507_v48  ;;  %9361 = vmatpush2.msra.mxu0 %v20507_v48 }
0x134a   : > { %11316 = vmatprep.subr.msk.mxu1 %vm21654_vm13, %v20494_v62  ;;  %11347 = vmatprep.subr.msk.mxu0 %vm21656_vm7, %v20494_v62  ;;  %vm21669_vm13 = vnez %v21668_v1  ;;  %vm21670_vm7 = vmmov %vm21663_vm12  ;;  %v21713_v1 = vld [vmem:[#allocation85_spill] sm:$0xff] }
0x134b   : > { %9292 = vmatpush2.msra.mxu1 %v20507_v48  ;;  %9363 = vmatpush2.msra.mxu0 %v20507_v48 }
0x134c   : > { %9406 = vmatprep.subr.mxu1 %v18424_v61  ;;  %11350 = vmatprep.subr.msk.mxu0 %vm21658_vm1, %v20494_v62  ;;  %vm21672_vm1 = vnez %v21671_v56  ;;  %v21715_v56 = vld [vmem:[#allocation94_spill] sm:$0xff] }
0x13cf   : > { %v9148_v6 = vpop.f32.mrf.mxu1  ;;  %v9224_v47 = vpop.f32.mrf.mxu0 }
0x13d1   : > { %v9150_v53 = vpop.f32.mrf.mxu1  ;;  %v9226_v25 = vpop.f32.mrf.mxu0 }
0x13d2   : > { %9293 = vmatprep.mubr.f32.mxu1 %v9226_v25  ;;  %9364 = vmatprep.mubr.f32.mxu0 %v9150_v53  ;;  %v21697_v53 = vld [vmem:[#allocation77_spill] sm:$0xff]  ;;  %v21699_v25 = vld [vmem:[#allocation84_spill] sm:$0xff] }
0x13d3   : > { %9294 = vmatmul.mubr.f32.vlgmr.msra.gmra.mxu1 %v9224_v47  ;;  %9365 = vmatmul.mubr.f32.vlgmr.msra.gmra.mxu0 %v9148_v6  ;;  %v21693_v6 = vld [vmem:[#allocation75_spill] sm:$0xff]  ;;  %v21695_v47 = vld [vmem:[#allocation82_spill] sm:$0xff] }
0x13d4   : > { %9407 = vmatpush1.msra.mxu1 %v18427_v15  ;;  %9448 = vmatpush1.msra.mxu0 %v20507_v48 }
0x13d5   : > { %11351 = vmatprep.subr.msk.mxu0 %vm21660_vm8, %v20494_v62  ;;  %9555 = vmatprep.subr.mxu1 %v18424_v61  ;;  %vm21674_vm8 = vnez %v21673_v46  ;;  %v21717_v46 = vld [vmem:[#allocation88_spill] sm:$0xff] }
0x13d6   : > { %11352 = vmatpush1.msk.msra.mxu0 %vm21662_vm2, %v20494_v62  ;;  %9440 = vmatprep.mubr.f32.mxu1 %v20507_v48  ;;  %vm21676_vm2 = vnez %v21675_v63  ;;  %v21719_v63 = vld [vmem:[#allocation95_spill] sm:$0xff] }
0x13d7   : > { %9451 = vmatprep.subr.mxu0 %v20507_v48  ;;  %11349 = vmatmul.mubr.msk.f32.vlgmr.msra.gmra.mxu1 %vm21663_vm12, %v11348_v50  ;;  %vm21678_vm12 = vnez %v21677_v33  ;;  %v21701_v50 = vld [vmem:[#allocation79_spill] sm:$0xff]  ;;  %v21721_v33 = vld [vmem:[#allocation90_spill] sm:$0xff] }
0x13d8   : > { %11353 = vmatpush1.msk.msra.mxu0 %vm21665_vm14, %v20494_v62  ;;  %9556 = vmatpush1.msra.mxu1 %v18427_v15  ;;  %vm21680_vm14 = vnez %v21679_v17  ;;  %v21723_v17 = vld [vmem:[#allocation97_spill] sm:$0xff] }
0x13d9   : > { %9453 = vmatprep.subr.mxu0 %v20507_v48  ;;  %9589 = vmatprep.mubr.f32.mxu1 %v20507_v48 }
0x13da   : > { %11354 = vmatpush1.msk.msra.mxu0 %vm21667_vm15, %v20494_v62  ;;  %11384 = vmatprep.subr.msk.mxu1 %vm21669_vm13, %v20494_v62  ;;  %vm21682_vm15 = vnez %v21681_v55  ;;  %vm21684_vm13 = vnez %v21683_v22  ;;  %v21725_v55 = vld [vmem:[#allocation92_spill] sm:$0xff]  ;;  %v21727_v22 = vld [vmem:[#allocation99_spill] sm:$0xff] }
0x13db   : > { %9455 = vmatprep.subr.mxu0 %v20507_v48  ;;  %11383 = vmatmul.mubr.msk.f32.vlgmr.msra.gmra.mxu1 %vm21670_vm7, %v11382_v3  ;;  %vm21686_vm7 = vnez %v21685_v9  ;;  %v21709_v3 = vld [vmem:[#allocation83_spill] sm:$0xff]  ;;  %v21729_v9 = vld [vmem:[#allocation96_spill] sm:$0xff] }
0x13dc   : > { %11355 = vmatpush1.msk.msra.mxu0 %vm21672_vm1, %v20494_v62  ;;  %11385 = vmatpush1.msk.msra.mxu1 %vm21674_vm8, %v20494_v62  ;;  %vm21688_vm1 = vnez %v21687_v49  ;;  %vm21690_vm8 = vnez %v21689_v24  ;;  %v21731_v49 = vld [vmem:[#allocation101_spill] sm:$0xff]  ;;  %v21733_v24 = vld [vmem:[#allocation98_spill] sm:$0xff] }
0x13dd   : > { %9457 = vmatprep.subr.mxu0 %v20507_v48  ;;  %9598 = vmatprep.subr.mxu1 %v20507_v48 }
0x13de   : > { %11356 = vmatpush1.msk.msra.mxu0 %vm21676_vm2, %v20494_v62  ;;  %11386 = vmatpush1.msk.msra.mxu1 %vm21678_vm12, %v20494_v62  ;;  %vm21692_vm2 = vnez %v21691_v0  ;;  %vm21694_vm12 = vnez %v21693_v6  ;;  %v21735_v0 = vld [vmem:[#allocation103_spill] sm:$0xff]  ;;  %v21737_v6 = vld [vmem:[#allocation100_spill] sm:$0xff] }
0x13df   : > { %9459 = vmatprep.subr.mxu0 %v20507_v48  ;;  %9600 = vmatprep.subr.mxu1 %v20507_v48 }
0x13e0   : > { %11357 = vmatpush1.msk.msra.mxu0 %vm21680_vm14, %v20494_v62  ;;  %11387 = vmatpush1.msk.msra.mxu1 %vm21682_vm15, %v20494_v62  ;;  %vm21696_vm14 = vnez %v21695_v47  ;;  %vm21698_vm15 = vnez %v21697_v53  ;;  %v21739_v47 = vld [vmem:[#allocation105_spill] sm:$0xff]  ;;  %v21741_v53 = vld [vmem:[#allocation102_spill] sm:$0xff] }
0x13e1   : > { %9461 = vmatprep.subr.mxu0 %v20507_v48  ;;  %9602 = vmatprep.subr.mxu1 %v20507_v48 }
0x13e2   : > { %11358 = vmatpush1.msk.msra.mxu0 %vm21684_vm13, %v20494_v62  ;;  %11388 = vmatpush1.msk.msra.mxu1 %vm21686_vm7, %v20494_v62  ;;  %vm21700_vm13 = vnez %v21699_v25  ;;  %vm21702_vm7 = vnez %v21701_v50  ;;  %v21743_v25 = vld [vmem:[#allocation107_spill] sm:$0xff]  ;;  %v21745_v50 = vld [vmem:[#allocation104_spill] sm:$0xff] }
0x13e3   : > { %9463 = vmatprep.subr.mxu0 %v20507_v48  ;;  %9604 = vmatprep.subr.mxu1 %v20507_v48 }
0x13e4   : > { %11359 = vmatpush1.msk.msra.mxu0 %vm21688_vm1, %v20494_v62  ;;  %11389 = vmatpush1.msk.msra.mxu1 %vm21690_vm8, %v20494_v62  ;;  %vm21704_vm1 = vnez %v21703_v43  ;;  %vm21706_vm8 = vnez %v21705_v51  ;;  %v21747_v43 = vld [vmem:[#allocation109_spill] sm:$0xff]  ;;  %v21749_v51 = vld [vmem:[#allocation106_spill] sm:$0xff] }
0x13e5   : > { %9465 = vmatprep.subr.mxu0 %v20507_v48  ;;  %9606 = vmatprep.subr.mxu1 %v20507_v48 }
0x13e6   : > { %11360 = vmatpush1.msk.msra.mxu0 %vm21692_vm2, %v20494_v62  ;;  %11390 = vmatpush1.msk.msra.mxu1 %vm21694_vm12, %v20494_v62  ;;  %vm21708_vm2 = vnez %v21707_v8  ;;  %vm21710_vm12 = vnez %v21709_v3  ;;  %v21751_v8 = vld [vmem:[#allocation111_spill] sm:$0xff]  ;;  %v21753_v3 = vld [vmem:[#allocation108_spill] sm:$0xff] }
0x13e7   : > { %9467 = vmatprep.subr.mxu0 %v20507_v48  ;;  %9608 = vmatprep.subr.mxu1 %v20507_v48 }
0x13e8   : > { %11361 = vmatpush1.msk.msra.mxu0 %vm21696_vm14, %v20494_v62  ;;  %11391 = vmatpush1.msk.msra.mxu1 %vm21698_vm15, %v20494_v62  ;;  %vm21712_vm14 = vnez %v21711_v57  ;;  %vm21714_vm15 = vnez %v21713_v1  ;;  %v21755_v57 = vld [vmem:[#allocation113_spill] sm:$0xff]  ;;  %v21757_v1 = vld [vmem:[#allocation110_spill] sm:$0xff] }
0x13e9   : > { %9469 = vmatprep.subr.mxu0 %v20507_v48  ;;  %9610 = vmatprep.subr.mxu1 %v20507_v48 }
0x13ea   : > { %11362 = vmatpush1.msk.msra.mxu0 %vm21700_vm13, %v20494_v62  ;;  %11392 = vmatpush1.msk.msra.mxu1 %vm21702_vm7, %v20494_v62  ;;  %vm21716_vm13 = vnez %v21715_v56  ;;  %vm21718_vm7 = vnez %v21717_v46  ;;  %v21759_v56 = vld [vmem:[#allocation115_spill] sm:$0xff]  ;;  %v21761_v46 = vld [vmem:[#allocation112_spill] sm:$0xff] }
0x13eb   : > { %9471 = vmatprep.subr.mxu0 %v20507_v48  ;;  %9612 = vmatprep.subr.mxu1 %v20507_v48 }
0x13ec   : > { %11363 = vmatpush1.msk.msra.mxu0 %vm21704_vm1, %v20494_v62  ;;  %11393 = vmatpush1.msk.msra.mxu1 %vm21706_vm8, %v20494_v62  ;;  %vm21720_vm1 = vnez %v21719_v63  ;;  %vm21722_vm8 = vnez %v21721_v33  ;;  %v21763_v63 = vld [vmem:[#allocation118_spill] sm:$0xff] }
0x13ed   : > { %9473 = vmatprep.subr.mxu0 %v20507_v48  ;;  %9614 = vmatprep.subr.mxu1 %v20507_v48  ;;  %v21765_v33 = vld [vmem:[#allocation114_spill] sm:$0xff] }
0x13ee   : > { %11364 = vmatpush1.msk.msra.mxu0 %vm21708_vm2, %v20494_v62  ;;  %11394 = vmatpush1.msk.msra.mxu1 %vm21710_vm12, %v20494_v62  ;;  %vm21724_vm2 = vnez %v21723_v17  ;;  %vm21726_vm12 = vnez %v21725_v55  ;;  %v21767_v17 = vld [vmem:[#allocation120_spill] sm:$0xff] }
0x13ef   : > { %9475 = vmatprep.subr.mxu0 %v20507_v48  ;;  %9616 = vmatprep.subr.mxu1 %v20507_v48  ;;  %v21769_v55 = vld [vmem:[#allocation116_spill] sm:$0xff] }
0x13f0   : > { %11365 = vmatpush1.msk.msra.mxu0 %vm21712_vm14, %v20494_v62  ;;  %11395 = vmatpush1.msk.msra.mxu1 %vm21714_vm15, %v20494_v62  ;;  %vm21728_vm14 = vnez %v21727_v22  ;;  %vm21730_vm15 = vnez %v21729_v9  ;;  %v21771_v22 = vld [vmem:[#allocation122_spill] sm:$0xff]  ;;  %v21773_v9 = vld [vmem:[#allocation117_spill] sm:$0xff] }
0x13f1   : > { %9477 = vmatprep.subr.mxu0 %v20507_v48  ;;  %9618 = vmatprep.subr.mxu1 %v20507_v48 }
0x13f2   : > { %11366 = vmatpush1.msk.msra.mxu0 %vm21716_vm13, %v20494_v62  ;;  %11396 = vmatpush1.msk.msra.mxu1 %vm21718_vm7, %v20494_v62  ;;  %vm21732_vm13 = vnez %v21731_v49  ;;  %vm21734_vm7 = vnez %v21733_v24  ;;  %v21775_v49 = vld [vmem:[#allocation124_spill] sm:$0xff]  ;;  %v21777_v24 = vld [vmem:[#allocation119_spill] sm:$0xff] }
0x13f3   : > { %11367 = vmatprep.subr.msk.mxu0 %vm21720_vm1, %v20494_v62  ;;  %9620 = vmatprep.subr.mxu1 %v20507_v48  ;;  %vm21736_vm1 = vnez %v21735_v0  ;;  %v21779_v0 = vld [vmem:[#allocation121_spill] sm:$0xff] }
0x13f4   : > { %9482 = vmatpush2.msra.mxu0 %v20507_v48  ;;  %11397 = vmatpush1.msk.msra.mxu1 %vm21722_vm8, %v20494_v62  ;;  %vm21738_vm8 = vnez %v21737_v6  ;;  %v21781_v6 = vld [vmem:[#allocation123_spill] sm:$0xff] }
0x13f5   : > { %11368 = vmatprep.subr.msk.mxu0 %vm21724_vm2, %v20494_v62  ;;  %9622 = vmatprep.subr.mxu1 %v20507_v48  ;;  %vm21740_vm2 = vnez %v21739_v47  ;;  %v21783_v47 = vld [vmem:[#allocation125_spill] sm:$0xff] }
0x13f6   : > { %9484 = vmatpush2.msra.mxu0 %v20507_v48  ;;  %11398 = vmatpush1.msk.msra.mxu1 %vm21726_vm12, %v20494_v62  ;;  %vm21742_vm12 = vnez %v21741_v53  ;;  %v21785_v53 = vld [vmem:[#allocation126_spill] sm:$0xff] }
0x13f7   : > { %11369 = vmatprep.subr.msk.mxu0 %vm21728_vm14, %v20494_v62  ;;  %9624 = vmatprep.subr.mxu1 %v20507_v48  ;;  %vm21744_vm14 = vnez %v21743_v25  ;;  %v21787_v25 = vld [vmem:[#allocation127_spill] sm:$0xff] }
0x13f8   : > { %9486 = vmatpush2.msra.mxu0 %v20507_v48  ;;  %11399 = vmatpush1.msk.msra.mxu1 %vm21730_vm15, %v20494_v62  ;;  %vm21746_vm15 = vnez %v21745_v50 }
0x13f9   : > { %11370 = vmatprep.subr.msk.mxu0 %vm21732_vm13, %v20494_v62  ;;  %9626 = vmatprep.subr.mxu1 %v20507_v48  ;;  %vm21748_vm13 = vnez %v21747_v43 }
0x13fa   : > { %9488 = vmatpush2.msra.mxu0 %v20507_v48  ;;  %11400 = vmatpush1.msk.msra.mxu1 %vm21734_vm7, %v20494_v62  ;;  %vm21750_vm7 = vnez %v21749_v51 }
0x13fb   : > { %11371 = vmatprep.subr.msk.mxu0 %vm21736_vm1, %v20494_v62  ;;  %11401 = vmatprep.subr.msk.mxu1 %vm21738_vm8, %v20494_v62  ;;  %vm21752_vm1 = vnez %v21751_v8  ;;  %vm21754_vm8 = vnez %v21753_v3 }
0x13fc   : > { %9490 = vmatpush2.msra.mxu0 %v20507_v48  ;;  %9629 = vmatpush2.msra.mxu1 %v20507_v48 }
0x13fd   : > { %11372 = vmatprep.subr.msk.mxu0 %vm21740_vm2, %v20494_v62  ;;  %11402 = vmatprep.subr.msk.mxu1 %vm21742_vm12, %v20494_v62  ;;  %vm21756_vm2 = vnez %v21755_v57  ;;  %vm21758_vm12 = vnez %v21757_v1 }
0x13fe   : > { %9492 = vmatpush2.msra.mxu0 %v20507_v48  ;;  %9631 = vmatpush2.msra.mxu1 %v20507_v48 }
0x13ff   : > { %11373 = vmatprep.subr.msk.mxu0 %vm21744_vm14, %v20494_v62  ;;  %11403 = vmatprep.subr.msk.mxu1 %vm21746_vm15, %v20494_v62  ;;  %vm21760_vm14 = vnez %v21759_v56  ;;  %vm21762_vm15 = vnez %v21761_v46  ;;  %v11417_v56 = vld [vmem:[%s19742_s9 + $0x20] sm:$0xff] }
0x1400   : > { %9494 = vmatpush2.msra.mxu0 %v20507_v48  ;;  %9633 = vmatpush2.msra.mxu1 %v20507_v48 }
0x1401   : > { %11374 = vmatprep.subr.msk.mxu0 %vm21748_vm13, %v20494_v62  ;;  %11404 = vmatprep.subr.msk.mxu1 %vm21750_vm7, %v20494_v62  ;;  %vm21764_vm13 = vnez %v21763_v63  ;;  %vm21766_vm7 = vnez %v21765_v33  ;;  %v11451_v63 = vld [vmem:[%s19742_s9 + $0x28] sm:$0xff]  ;;  %v21794_v33 = vld [vmem:[#allocation128_spill] sm:$0xff] }
0x1402   : > { %9496 = vmatpush2.msra.mxu0 %v20507_v48  ;;  %9635 = vmatpush2.msra.mxu1 %v20507_v48 }
0x1403   : > { %11375 = vmatprep.subr.msk.mxu0 %vm21752_vm1, %v20494_v62  ;;  %11405 = vmatprep.subr.msk.mxu1 %vm21754_vm8, %v20494_v62  ;;  %vm21768_vm1 = vnez %v21767_v17  ;;  %vm21770_vm8 = vnez %v21769_v55  ;;  %v21797_v17 = vld [vmem:[#allocation129_spill] sm:$0xff]  ;;  %v21800_v55 = vld [vmem:[#allocation130_spill] sm:$0xff] }
0x1404   : > { %9498 = vmatpush2.msra.mxu0 %v20507_v48  ;;  %9637 = vmatpush2.msra.mxu1 %v20507_v48 }
0x1405   : > { %11376 = vmatprep.subr.msk.mxu0 %vm21756_vm2, %v20494_v62  ;;  %11406 = vmatprep.subr.msk.mxu1 %vm21758_vm12, %v20494_v62  ;;  %vm21772_vm2 = vnez %v21771_v22  ;;  %vm21774_vm12 = vnez %v21773_v9  ;;  %v21803_v22 = vld [vmem:[#allocation131_spill] sm:$0xff]  ;;  %v21806_v9 = vld [vmem:[#allocation132_spill] sm:$0xff] }
0x1406   : > { %9500 = vmatpush2.msra.mxu0 %v20507_v48  ;;  %9639 = vmatpush2.msra.mxu1 %v20507_v48 }
0x1407   : > { %11377 = vmatprep.subr.msk.mxu0 %vm21760_vm14, %v20494_v62  ;;  %11407 = vmatprep.subr.msk.mxu1 %vm21762_vm15, %v20494_v62  ;;  %vm21776_vm14 = vnez %v21775_v49  ;;  %vm21778_vm15 = vnez %v21777_v24  ;;  %v21809_v49 = vld [vmem:[#allocation133_spill] sm:$0xff]  ;;  %v21811_v24 = vld [vmem:[#allocation134_spill] sm:$0xff] }
0x1408   : > { %9502 = vmatpush2.msra.mxu0 %v20507_v48  ;;  %9641 = vmatpush2.msra.mxu1 %v20507_v48 }
0x1409   : > { %11378 = vmatprep.subr.msk.mxu0 %vm21764_vm13, %v20494_v62  ;;  %11408 = vmatprep.subr.msk.mxu1 %vm21766_vm7, %v20494_v62  ;;  %vm21780_vm13 = vnez %v21779_v0  ;;  %vm21782_vm7 = vnez %v21781_v6  ;;  %v21827_v0 = vld [vmem:[#allocation93_spill] sm:$0xff]  ;;  %v21833_v6 = vld [vmem:[#allocation151_spill] sm:$0xff] }
0x140a   : > { %9504 = vmatpush2.msra.mxu0 %v20507_v48  ;;  %9643 = vmatpush2.msra.mxu1 %v20507_v48 }
0x140b   : > { %11379 = vmatprep.subr.msk.mxu0 %vm21768_vm1, %v20494_v62  ;;  %11409 = vmatprep.subr.msk.mxu1 %vm21770_vm8, %v20494_v62  ;;  %vm21784_vm1 = vnez %v21783_v47  ;;  %vm21786_vm8 = vnez %v21785_v53  ;;  %v21836_v47 = vld [vmem:[#allocation152_spill] sm:$0xff]  ;;  %v21839_v53 = vld [vmem:[#allocation153_spill] sm:$0xff] }
0x140c   : > { %9506 = vmatpush2.msra.mxu0 %v20507_v48  ;;  %9645 = vmatpush2.msra.mxu1 %v20507_v48 }
0x140d   : > { %11380 = vmatprep.subr.msk.mxu0 %vm21772_vm2, %v20494_v62  ;;  %11410 = vmatprep.subr.msk.mxu1 %vm21774_vm12, %v20494_v62  ;;  %vm21788_vm2 = vnez %v21787_v25  ;;  %vm21789_vm12 = vcmask 64512   ;;  %v21842_v25 = vld [vmem:[#allocation154_spill] sm:$0xff] }
0x140e   : > { %9508 = vmatpush2.msra.mxu0 %v20507_v48  ;;  %9647 = vmatpush2.msra.mxu1 %v20507_v48 }
0x140f   : > { %11381 = vmatprep.subr.msk.mxu0 %vm21776_vm14, %v20494_v62  ;;  %11411 = vmatprep.subr.msk.mxu1 %vm21778_vm15, %v20494_v62  ;;  %vm21790_vm14 = vcmp.eq.s32.totalorder %v21541_v35, %v21532_v18  ;;  %vm21791_vm15 = vcmp.eq.s32.totalorder %v21546_v11, %v21532_v18 }
0x1410   : > { %9510 = vmatpush2.msra.mxu0 %v20507_v48  ;;  %9649 = vmatpush2.msra.mxu1 %v20507_v48 }
0x1411   : > { %11412 = vmatprep.subr.msk.mxu1 %vm21780_vm13, %v20494_v62  ;;  %9704 = vmatprep.subr.mxu0 %v18424_v61  ;;  %vm21792_vm13 = vmmov %vm21789_vm12 }
0x1412   : > { %9651 = vmatpush2.msra.mxu1 %v20507_v48 }
0x1413   : > { %11413 = vmatprep.subr.msk.mxu1 %vm21782_vm7, %v20494_v62  ;;  %vm21793_vm7 = vcmp.eq.s32.totalorder %v21552_v23, %v21532_v18 }
0x1414   : > { %9653 = vmatpush2.msra.mxu1 %v20507_v48 }
0x1415   : > { %11414 = vmatprep.subr.msk.mxu1 %vm21784_vm1, %v20494_v62  ;;  %vm21795_vm1 = vnez %v21794_v33  ;;  %v21869_v33 = vld [vmem:[#allocation163_spill] sm:$0xff] }
0x1416   : > { %9655 = vmatpush2.msra.mxu1 %v20507_v48 }
0x1417   : > { %11415 = vmatprep.subr.msk.mxu1 %vm21786_vm8, %v20494_v62  ;;  %vm21796_vm8 = vcmp.eq.s32.totalorder %v21557_v12, %v21532_v18 }
0x1418   : > { %9657 = vmatpush2.msra.mxu1 %v20507_v48 }
0x1419   : > { %11416 = vmatprep.subr.msk.mxu1 %vm21788_vm2, %v20494_v62  ;;  %vm21798_vm2 = vnez %v21797_v17  ;;  %v21872_v17 = vld [vmem:[#allocation164_spill] sm:$0xff] }
0x141a   : > { %9659 = vmatpush2.msra.mxu1 %v20507_v48 }
0x141b   : > { %9853 = vmatprep.subr.mxu1 %v18424_v61 }
0x1493   : > { %v9295_v50 = vpop.f32.mrf.mxu1  ;;  %v9366_v43 = vpop.f32.mrf.mxu0 }
0x1494   : > { %v18985_v51 = vadd.f32 %v9366_v43, %v9295_v50  ;;  %v21845_v50 = vld [vmem:[#allocation155_spill] sm:$0xff]  ;;  %v21848_v43 = vld [vmem:[#allocation156_spill] sm:$0xff] }
0x1495   : > { %v18987_v8 = vpop.f32.mrf.mxu1 }
0x1497   : > { %v9442_v3 = vpop.f32.mrf.mxu1 }
0x1499   : > { %v9444_v57 = vpop.f32.mrf.mxu1 }
0x149a   : > { %9511 = vmatprep.mubr.f32.mxu0 %v9444_v57  ;;  %v21854_v57 = vld [vmem:[#allocation158_spill] sm:$0xff] }
0x149b   : > { %9512 = vmatmul.mubr.f32.vlgmr.msra.gmra.mxu0 %v9442_v3  ;;  %v9591_v1 = vpop.f32.mrf.mxu1  ;;  %v21851_v3 = vld [vmem:[#allocation157_spill] sm:$0xff] }
0x149c   : > { %9705 = vmatpush1.msra.mxu0 %v18427_v15  ;;  %9738 = vmatprep.mubr.f32.mxu0 %v20507_v48 }
0x149d   : > { %v9593_v46 = vpop.f32.mrf.mxu1  ;;  %9745 = vmatprep.subr.mxu0 %v20507_v48 }
0x149e   : > { %9660 = vmatprep.mubr.f32.mxu1 %v9593_v46  ;;  %v21863_v46 = vld [vmem:[#allocation161_spill] sm:$0xff] }
0x149f   : > { %9661 = vmatmul.mubr.f32.vlgmr.msra.gmra.mxu1 %v9591_v1  ;;  %11418 = vmatmul.mubr.msk.f32.vlgmr.msra.gmra.mxu0 %vm21789_vm12, %v11417_v56  ;;  %vm21799_vm12 = vcmp.eq.s32.totalorder %v21561_v45, %v21532_v18  ;;  %v21857_v1 = vld [vmem:[#allocation159_spill] sm:$0xff]  ;;  %v21860_v56 = vld [vmem:[#allocation160_spill] sm:$0xff] }
0x14a0   : > { %11419 = vmatpush1.msk.msra.mxu0 %vm21790_vm14, %v20494_v62  ;;  %9854 = vmatpush1.msra.mxu1 %v18427_v15  ;;  %vm21801_vm14 = vnez %v21800_v55  ;;  %v21875_v55 = vld [vmem:[#allocation165_spill] sm:$0xff] }
0x14a1   : > { %9747 = vmatprep.subr.mxu0 %v20507_v48  ;;  %9887 = vmatprep.mubr.f32.mxu1 %v20507_v48 }
0x14a2   : > { %11420 = vmatpush1.msk.msra.mxu0 %vm21791_vm15, %v20494_v62  ;;  %9894 = vmatprep.subr.mxu1 %v20507_v48  ;;  %vm21802_vm15 = vcmp.eq.s32.totalorder %v21565_v7, %v21532_v18 }
0x14a3   : > { %9749 = vmatprep.subr.mxu0 %v20507_v48  ;;  %11452 = vmatmul.mubr.msk.f32.vlgmr.msra.gmra.mxu1 %vm21792_vm13, %v11451_v63  ;;  %vm21804_vm13 = vnez %v21803_v22  ;;  %v21866_v63 = vld [vmem:[#allocation162_spill] sm:$0xff] }
0x14a4   : > { %11421 = vmatpush1.msk.msra.mxu0 %vm21793_vm7, %v20494_v62  ;;  %11453 = vmatpush1.msk.msra.mxu1 %vm21795_vm1, %v20494_v62  ;;  %vm21805_vm7 = vcmp.eq.s32.totalorder %v21569_v41, %v21532_v18  ;;  %vm21807_vm1 = vnez %v21806_v9  ;;  %v21877_v22 = vld [vmem:[#allocation166_spill] sm:$0xff]  ;;  %v21879_v9 = vld [vmem:[#allocation167_spill] sm:$0xff] }
0x14a5   : > { %9751 = vmatprep.subr.mxu0 %v20507_v48  ;;  %9896 = vmatprep.subr.mxu1 %v20507_v48 }
0x14a6   : > { %11422 = vmatpush1.msk.msra.mxu0 %vm21796_vm8, %v20494_v62  ;;  %11454 = vmatpush1.msk.msra.mxu1 %vm21798_vm2, %v20494_v62  ;;  %vm21808_vm8 = vcmp.eq.s32.totalorder %v21573_v31, %v21532_v18  ;;  %vm21810_vm2 = vnez %v21809_v49  ;;  %v21813_v18 = vld [vmem:[#allocation136_spill] sm:$0xff]  ;;  %v9368_v49 = vpop.f32.mrf.mxu0 }
0x14a7   : > { %9753 = vmatprep.subr.mxu0 %v20507_v48  ;;  %9898 = vmatprep.subr.mxu1 %v20507_v48 }
0x14a8   : > { %11423 = vmatpush1.msk.msra.mxu0 %vm21799_vm12, %v20494_v62  ;;  %11455 = vmatpush1.msk.msra.mxu1 %vm21801_vm14, %v20494_v62  ;;  %vm21812_vm12 = vnez %v21811_v24  ;;  %vm21814_vm14 = vnez %v21813_v18  ;;  %v9369_v18 = vadd.f32 %v9368_v49, %v18987_v8 }
0x14a9   : > { %9755 = vmatprep.subr.mxu0 %v20507_v48  ;;  %9900 = vmatprep.subr.mxu1 %v20507_v48 }
0x14aa   : > { %11424 = vmatpush1.msk.msra.mxu0 %vm21802_vm15, %v20494_v62  ;;  %11456 = vmatpush1.msk.msra.mxu1 %vm21804_vm13, %v20494_v62  ;;  %vm21830_vm15 = vnez %v21829_v28  ;;  %vm21834_vm13 = vnez %v21833_v6 }
0x14ab   : > { %9757 = vmatprep.subr.mxu0 %v20507_v48  ;;  %9902 = vmatprep.subr.mxu1 %v20507_v48 }
0x14ac   : > { %11425 = vmatpush1.msk.msra.mxu0 %vm21805_vm7, %v20494_v62  ;;  %11457 = vmatpush1.msk.msra.mxu1 %vm21807_vm1, %v20494_v62  ;;  %vm21835_vm7 = vcmp.eq.s32.totalorder %v21601_v42, %v21531_v44  ;;  %vm21837_vm1 = vnez %v21836_v47 }
0x14ad   : > { %9759 = vmatprep.subr.mxu0 %v20507_v48  ;;  %9904 = vmatprep.subr.mxu1 %v20507_v48 }
0x14ae   : > { %11426 = vmatpush1.msk.msra.mxu0 %vm21808_vm8, %v20494_v62  ;;  %11458 = vmatpush1.msk.msra.mxu1 %vm21810_vm2, %v20494_v62  ;;  %vm21838_vm8 = vcmp.eq.s32.totalorder %v21605_v2, %v21531_v44  ;;  %vm21840_vm2 = vnez %v21839_v53 }
0x14af   : > { %9761 = vmatprep.subr.mxu0 %v20507_v48  ;;  %9906 = vmatprep.subr.mxu1 %v20507_v48 }
0x14b0   : > { %11427 = vmatpush1.msk.msra.mxu0 %vm21462_vm5, %v20494_v62  ;;  %11459 = vmatpush1.msk.msra.mxu1 %vm21812_vm12, %v20494_v62  ;;  %vm21816_vm5 = vnez %v21815_v52  ;;  %vm21841_vm12 = vcmp.eq.s32.totalorder %v21609_v21, %v21531_v44 }
0x14b1   : > { %9763 = vmatprep.subr.mxu0 %v20507_v48  ;;  %9908 = vmatprep.subr.mxu1 %v20507_v48 }
0x14b2   : > { %11428 = vmatpush1.msk.msra.mxu0 %vm21464_vm9, %v20494_v62  ;;  %11460 = vmatpush1.msk.msra.mxu1 %vm21814_vm14, %v20494_v62  ;;  %vm21818_vm9 = vnez %v21817_v37  ;;  %vm21843_vm14 = vnez %v21842_v25  ;;  %v21884_v25 = vld [vmem:[#allocation170_spill] sm:$0xff] }
0x14b3   : > { %9765 = vmatprep.subr.mxu0 %v20507_v48  ;;  %9910 = vmatprep.subr.mxu1 %v20507_v48 }
0x14b4   : > { %11429 = vmatpush1.msk.msra.mxu0 %vm21468_vm11, %v20494_v62  ;;  %11461 = vmatpush1.msk.msra.mxu1 %vm21816_vm5, %v20494_v62  ;;  %vm21820_vm11 = vnez %v21819_v16  ;;  %vm21844_vm5 = vcmp.eq.s32.totalorder %v21613_v59, %v21531_v44 }
0x14b5   : > { %9767 = vmatprep.subr.mxu0 %v20507_v48  ;;  %9912 = vmatprep.subr.mxu1 %v20507_v48 }
0x14b6   : > { %11430 = vmatpush1.msk.msra.mxu0 %vm21472_vm3, %v20494_v62  ;;  %11462 = vmatpush1.msk.msra.mxu1 %vm21818_vm9, %v20494_v62  ;;  %vm21822_vm3 = vnez %v21821_v26  ;;  %vm21846_vm9 = vnez %v21845_v50  ;;  %v11520_v50 = vld [vmem:[%s19742_s9 + $0x38] sm:$0xff] }
0x14b7   : > { %9769 = vmatprep.subr.mxu0 %v20507_v48  ;;  %9914 = vmatprep.subr.mxu1 %v20507_v48 }
0x14b8   : > { %11431 = vmatpush1.msk.msra.mxu0 %vm21476_vm4, %v20494_v62  ;;  %11463 = vmatpush1.msk.msra.mxu1 %vm21820_vm11, %v20494_v62  ;;  %vm21824_vm4 = vnez %v21823_v4  ;;  %vm21847_vm11 = vcmp.eq.s32.totalorder %v21617_v10, %v21531_v44 }
0x14b9   : > { %9771 = vmatprep.subr.mxu0 %v20507_v48  ;;  %9916 = vmatprep.subr.mxu1 %v20507_v48 }
0x14ba   : > { %11432 = vmatpush1.msk.msra.mxu0 %vm21480_vm6, %v20494_v62  ;;  %11464 = vmatpush1.msk.msra.mxu1 %vm21822_vm3, %v20494_v62  ;;  %vm21826_vm6 = vnez %v21825_v54  ;;  %vm21849_vm3 = vnez %v21848_v43  ;;  %v21886_v43 = vld [vmem:[#allocation171_spill] sm:$0xff] }
0x14bb   : > { %9773 = vmatprep.subr.mxu0 %v20507_v48  ;;  %9918 = vmatprep.subr.mxu1 %v20507_v48 }
0x14bc   : > { %11433 = vmatpush1.msk.msra.mxu0 %vm21312_vm10, %v20494_v62  ;;  %11465 = vmatpush1.msk.msra.mxu1 %vm21824_vm4, %v20494_v62  ;;  %vm21828_vm10 = vcmp.eq.s32.totalorder %v21827_v0, %v21531_v44  ;;  %vm21850_vm4 = vcmp.eq.s32.totalorder %v21621_v60, %v21531_v44 }
0x14bd   : > { %9775 = vmatprep.subr.mxu0 %v20507_v48  ;;  %9920 = vmatprep.subr.mxu1 %v20507_v48 }
0x14be   : > { %11434 = vmatpush1.msk.msra.mxu0 %vm21318_vm0, %v20494_v62  ;;  %11466 = vmatpush1.msk.msra.mxu1 %vm21826_vm6, %v20494_v62  ;;  %vm21832_vm0 = vcmp.eq.s32.totalorder %v21831_v13, %v21531_v44  ;;  %vm21852_vm6 = vnez %v21851_v3  ;;  %v21889_v3 = vld [vmem:[#allocation172_spill] sm:$0xff] }
0x14bf   : > { %11435 = vmatprep.subr.msk.mxu0 %vm21828_vm10, %v20494_v62  ;;  %9922 = vmatprep.subr.mxu1 %v20507_v48  ;;  %vm21853_vm10 = vcmp.eq.s32.totalorder %v21625_v29, %v21531_v44 }
0x14c0   : > { %9778 = vmatpush2.msra.mxu0 %v20507_v48  ;;  %11467 = vmatpush1.msk.msra.mxu1 %vm21830_vm15, %v20494_v62  ;;  %vm21855_vm15 = vnez %v21854_v57  ;;  %v21891_v57 = vld [vmem:[#allocation169_spill] sm:$0xff] }
0x14c1   : > { %11436 = vmatprep.subr.msk.mxu0 %vm21832_vm0, %v20494_v62  ;;  %9924 = vmatprep.subr.mxu1 %v20507_v48  ;;  %vm21856_vm0 = vcmp.eq.s32.totalorder %v21629_v14, %v21531_v44 }
0x14c2   : > { %9780 = vmatpush2.msra.mxu0 %v20507_v48  ;;  %11468 = vmatpush1.msk.msra.mxu1 %vm21834_vm13, %v20494_v62  ;;  %vm21858_vm13 = vnez %v21857_v1  ;;  %v21893_v1 = vld [vmem:[#allocation173_spill] sm:$0xff] }
0x14c3   : > { %11437 = vmatprep.subr.msk.mxu0 %vm21835_vm7, %v20494_v62  ;;  %11469 = vmatprep.subr.msk.mxu1 %vm21837_vm1, %v20494_v62  ;;  %vm21859_vm7 = vcmp.eq.s32.totalorder %v21633_v58, %v21531_v44  ;;  %vm21861_vm1 = vnez %v21860_v56  ;;  %v21936_v56 = vld [vmem:[#allocation185_spill] sm:$0xff] }
0x14c4   : > { %9782 = vmatpush2.msra.mxu0 %v20507_v48  ;;  %9927 = vmatpush2.msra.mxu1 %v20507_v48 }
0x14c5   : > { %11438 = vmatprep.subr.msk.mxu0 %vm21838_vm8, %v20494_v62  ;;  %11470 = vmatprep.subr.msk.mxu1 %vm21840_vm2, %v20494_v62  ;;  %vm21862_vm8 = vcmp.eq.s32.totalorder %v21637_v27, %v21531_v44  ;;  %vm21864_vm2 = vnez %v21863_v46  ;;  %v21938_v46 = vld [vmem:[#allocation189_spill] sm:$0xff] }
0x14c6   : > { %9784 = vmatpush2.msra.mxu0 %v20507_v48  ;;  %9929 = vmatpush2.msra.mxu1 %v20507_v48 }
0x14c7   : > { %11439 = vmatprep.subr.msk.mxu0 %vm21841_vm12, %v20494_v62  ;;  %11471 = vmatprep.subr.msk.mxu1 %vm21843_vm14, %v20494_v62  ;;  %vm21865_vm12 = vcmp.eq.s32.totalorder %v21641_v19, %v21531_v44  ;;  %vm21867_vm14 = vnez %v21866_v63  ;;  %v21974_v63 = vld [vmem:[#allocation201_spill] sm:$0xff] }
0x14c8   : > { %9786 = vmatpush2.msra.mxu0 %v20507_v48  ;;  %9931 = vmatpush2.msra.mxu1 %v20507_v48 }
0x14c9   : > { %11440 = vmatprep.subr.msk.mxu0 %vm21844_vm5, %v20494_v62  ;;  %11472 = vmatprep.subr.msk.mxu1 %vm21846_vm9, %v20494_v62  ;;  %vm21868_vm5 = vcmp.eq.s32.totalorder %v21645_v20, %v21531_v44  ;;  %vm21870_vm9 = vnez %v21869_v33 }
0x14ca   : > { %9788 = vmatpush2.msra.mxu0 %v20507_v48  ;;  %9933 = vmatpush2.msra.mxu1 %v20507_v48 }
0x14cb   : > { %11441 = vmatprep.subr.msk.mxu0 %vm21847_vm11, %v20494_v62  ;;  %11473 = vmatprep.subr.msk.mxu1 %vm21849_vm3, %v20494_v62  ;;  %vm21871_vm11 = vcmp.eq.s32.totalorder %v21649_v5, %v21531_v44  ;;  %vm21873_vm3 = vnez %v21872_v17 }
0x14cc   : > { %9790 = vmatpush2.msra.mxu0 %v20507_v48  ;;  %9935 = vmatpush2.msra.mxu1 %v20507_v48 }
0x14cd   : > { %11442 = vmatprep.subr.msk.mxu0 %vm21850_vm4, %v20494_v62  ;;  %11474 = vmatprep.subr.msk.mxu1 %vm21852_vm6, %v20494_v62  ;;  %vm21874_vm4 = vcmp.eq.s32.totalorder %v21653_v39, %v21531_v44  ;;  %vm21876_vm6 = vnez %v21875_v55  ;;  %v21881_v44 = vld [vmem:[#allocation168_spill] sm:$0xff] }
0x14ce   : > { %9792 = vmatpush2.msra.mxu0 %v20507_v48  ;;  %9937 = vmatpush2.msra.mxu1 %v20507_v48 }
0x14cf   : > { %11443 = vmatprep.subr.msk.mxu0 %vm21853_vm10, %v20494_v62  ;;  %11475 = vmatprep.subr.msk.mxu1 %vm21855_vm15, %v20494_v62  ;;  %vm21878_vm10 = vnez %v21877_v22  ;;  %vm21880_vm15 = vnez %v21879_v9 }
0x14d0   : > { %9794 = vmatpush2.msra.mxu0 %v20507_v48  ;;  %9939 = vmatpush2.msra.mxu1 %v20507_v48 }
0x14d1   : > { %11444 = vmatprep.subr.msk.mxu0 %vm21856_vm0, %v20494_v62  ;;  %11476 = vmatprep.subr.msk.mxu1 %vm21858_vm13, %v20494_v62  ;;  %vm21882_vm0 = vnez %v21881_v44  ;;  %vm21883_vm13 = vcmask 64512  }
0x14d2   : > { %9796 = vmatpush2.msra.mxu0 %v20507_v48  ;;  %9941 = vmatpush2.msra.mxu1 %v20507_v48 }
0x14d3   : > { %11445 = vmatprep.subr.msk.mxu0 %vm21859_vm7, %v20494_v62  ;;  %11477 = vmatprep.subr.msk.mxu1 %vm21861_vm1, %v20494_v62  ;;  %vm21885_vm7 = vnez %v21884_v25  ;;  %vm21887_vm1 = vnez %v21886_v43  ;;  %v22010_v25 = vld [vmem:[#allocation217_spill] sm:$0xff]  ;;  %v22014_v43 = vld [vmem:[#allocation219_spill] sm:$0xff] }
0x14d4   : > { %9798 = vmatpush2.msra.mxu0 %v20507_v48  ;;  %9943 = vmatpush2.msra.mxu1 %v20507_v48 }
0x14d5   : > { %11446 = vmatprep.subr.msk.mxu0 %vm21862_vm8, %v20494_v62  ;;  %11478 = vmatprep.subr.msk.mxu1 %vm21864_vm2, %v20494_v62  ;;  %vm21888_vm8 = vmmov %vm21883_vm13  ;;  %vm21890_vm2 = vnez %v21889_v3  ;;  %v22016_v3 = vld [vmem:[#allocation220_spill] sm:$0xff] }
0x14d6   : > { %9800 = vmatpush2.msra.mxu0 %v20507_v48  ;;  %9945 = vmatpush2.msra.mxu1 %v20507_v48 }
0x14d7   : > { %11447 = vmatprep.subr.msk.mxu0 %vm21865_vm12, %v20494_v62  ;;  %11479 = vmatprep.subr.msk.mxu1 %vm21867_vm14, %v20494_v62  ;;  %vm21892_vm12 = vcmp.eq.s32.totalorder %v21541_v35, %v21891_v57  ;;  %vm21894_vm14 = vnez %v21893_v1  ;;  %v21896_v35 = vld [vmem:[#allocation174_spill] sm:$0xff] }
0x14d8   : > { %9802 = vmatpush2.msra.mxu0 %v20507_v48  ;;  %9947 = vmatpush2.msra.mxu1 %v20507_v48  ;;  %v22020_v1 = vld [vmem:[#allocation222_spill] sm:$0xff] }
0x14d9   : > { %11448 = vmatprep.subr.msk.mxu0 %vm21868_vm5, %v20494_v62  ;;  %11480 = vmatprep.subr.msk.mxu1 %vm21870_vm9, %v20494_v62  ;;  %vm21895_vm5 = vcmp.eq.s32.totalorder %v21546_v11, %v21891_v57  ;;  %vm21897_vm9 = vnez %v21896_v35  ;;  %v21899_v11 = vld [vmem:[#allocation175_spill] sm:$0xff] }
0x14da   : > { %9804 = vmatpush2.msra.mxu0 %v20507_v48  ;;  %9949 = vmatpush2.msra.mxu1 %v20507_v48  ;;  %v22022_v35 = vld [vmem:[#allocation223_spill] sm:$0xff] }
0x14db   : > { %11449 = vmatprep.subr.msk.mxu0 %vm21871_vm11, %v20494_v62  ;;  %11481 = vmatprep.subr.msk.mxu1 %vm21873_vm3, %v20494_v62  ;;  %vm21898_vm11 = vcmp.eq.s32.totalorder %v21552_v23, %v21891_v57  ;;  %vm21900_vm3 = vnez %v21899_v11  ;;  %v21902_v23 = vld [vmem:[#allocation176_spill] sm:$0xff] }
0x14dc   : > { %9806 = vmatpush2.msra.mxu0 %v20507_v48  ;;  %9951 = vmatpush2.msra.mxu1 %v20507_v48  ;;  %v22024_v11 = vld [vmem:[#allocation224_spill] sm:$0xff] }
0x14dd   : > { %11450 = vmatprep.subr.msk.mxu0 %vm21874_vm4, %v20494_v62  ;;  %11482 = vmatprep.subr.msk.mxu1 %vm21876_vm6, %v20494_v62  ;;  %vm21901_vm4 = vcmp.eq.s32.totalorder %v21557_v12, %v21891_v57  ;;  %vm21903_vm6 = vnez %v21902_v23  ;;  %v21905_v12 = vld [vmem:[#allocation177_spill] sm:$0xff] }
0x14de   : > { %9808 = vmatpush2.msra.mxu0 %v20507_v48  ;;  %9953 = vmatpush2.msra.mxu1 %v20507_v48  ;;  %v22026_v23 = vld [vmem:[#allocation225_spill] sm:$0xff] }
0x14df   : > { %11483 = vmatprep.subr.msk.mxu1 %vm21878_vm10, %v20494_v62  ;;  %10002 = vmatprep.subr.mxu0 %v18424_v61  ;;  %vm21904_vm10 = vcmp.eq.s32.totalorder %v21561_v45, %v21891_v57  ;;  %v21908_v45 = vld [vmem:[#allocation178_spill] sm:$0xff] }
0x14e0   : > { %9955 = vmatpush2.msra.mxu1 %v20507_v48 }
0x14e1   : > { %11484 = vmatprep.subr.msk.mxu1 %vm21880_vm15, %v20494_v62  ;;  %vm21906_vm15 = vnez %v21905_v12  ;;  %v22028_v12 = vld [vmem:[#allocation226_spill] sm:$0xff] }
0x14e2   : > { %11485 = vmatpush2.msk.msra.mxu1 %vm21882_vm0, %v20494_v62  ;;  %vm21907_vm0 = vcmp.eq.s32.totalorder %v21565_v7, %v21891_v57  ;;  %v21911_v7 = vld [vmem:[#allocation179_spill] sm:$0xff] }
0x14e3   : > { %10151 = vmatprep.subr.mxu1 %v18424_v61 }
0x155b   : > { %v9513_v24 = vpop.f32.mrf.mxu0 }
0x155c   : > { %v9518_v52 = vadd.f32 %v9513_v24, %v18985_v51  ;;  %v11486_v51 = vld [vmem:[%s19742_s9 + $0x30] sm:$0xff] }
0x155d   : > { %v9515_v37 = vpop.f32.mrf.mxu0 }
0x155e   : > { %v9519_v16 = vadd.f32 %v9515_v37, %v9369_v18  ;;  %v21982_v18 = vld [vmem:[#allocation203_spill] sm:$0xff]  ;;  %v21988_v37 = vld [vmem:[#allocation206_spill] sm:$0xff] }
0x155f   : > { %v9662_v26 = vpop.f32.mrf.mxu1  ;;  %v9740_v4 = vpop.f32.mrf.mxu0 }
0x1560   : > { %v19287_v54 = vadd.f32 %v9662_v26, %v9518_v52  ;;  %v21986_v52 = vld [vmem:[#allocation205_spill] sm:$0xff]  ;;  %v21992_v26 = vld [vmem:[#allocation208_spill] sm:$0xff] }
0x1561   : > { %v9664_v28 = vpop.f32.mrf.mxu1  ;;  %v9742_v6 = vpop.f32.mrf.mxu0 }
0x1562   : > { %v19289_v47 = vadd.f32 %v9664_v28, %v9519_v16  ;;  %9809 = vmatprep.mubr.f32.mxu0 %v9742_v6  ;;  %v21990_v16 = vld [vmem:[#allocation207_spill] sm:$0xff]  ;;  %v22000_v6 = vld [vmem:[#allocation212_spill] sm:$0xff] }
0x1563   : > { %9810 = vmatmul.mubr.f32.vlgmr.msra.gmra.mxu0 %v9740_v4  ;;  %v9889_v53 = vpop.f32.mrf.mxu1  ;;  %v21994_v4 = vld [vmem:[#allocation209_spill] sm:$0xff]  ;;  %v21998_v28 = vld [vmem:[#allocation211_spill] sm:$0xff] }
0x1564   : > { %10003 = vmatpush1.msra.mxu0 %v18427_v15  ;;  %10036 = vmatprep.mubr.f32.mxu0 %v20507_v48 }
0x1565   : > { %v9891_v8 = vpop.f32.mrf.mxu1  ;;  %10043 = vmatprep.subr.mxu0 %v20507_v48 }
0x1566   : > { %9958 = vmatprep.mubr.f32.mxu1 %v9891_v8  ;;  %v22008_v8 = vld [vmem:[#allocation216_spill] sm:$0xff] }
0x1567   : > { %9959 = vmatmul.mubr.f32.vlgmr.msra.gmra.mxu1 %v9889_v53  ;;  %11487 = vmatmul.mubr.msk.f32.vlgmr.msra.gmra.mxu0 %vm21883_vm13, %v11486_v51  ;;  %vm21909_vm13 = vnez %v21908_v45  ;;  %v22004_v53 = vld [vmem:[#allocation214_spill] sm:$0xff]  ;;  %v22006_v51 = vld [vmem:[#allocation215_spill] sm:$0xff] }
0x1568   : > { %11488 = vmatpush1.msk.msra.mxu0 %vm21885_vm7, %v20494_v62  ;;  %10152 = vmatpush1.msra.mxu1 %v18427_v15  ;;  %vm21910_vm7 = vcmp.eq.s32.totalorder %v21569_v41, %v21891_v57  ;;  %v21914_v41 = vld [vmem:[#allocation180_spill] sm:$0xff]  ;;  %v22030_v45 = vld [vmem:[#allocation227_spill] sm:$0xff] }
0x1569   : > { %10045 = vmatprep.subr.mxu0 %v20507_v48  ;;  %10185 = vmatprep.mubr.f32.mxu1 %v20507_v48 }
0x156a   : > { %11489 = vmatpush1.msk.msra.mxu0 %vm21887_vm1, %v20494_v62  ;;  %10192 = vmatprep.subr.mxu1 %v20507_v48  ;;  %vm21912_vm1 = vnez %v21911_v7  ;;  %v22032_v7 = vld [vmem:[#allocation228_spill] sm:$0xff] }
0x156b   : > { %10047 = vmatprep.subr.mxu0 %v20507_v48  ;;  %11521 = vmatmul.mubr.msk.f32.vlgmr.msra.gmra.mxu1 %vm21888_vm8, %v11520_v50  ;;  %vm21913_vm8 = vcmp.eq.s32.totalorder %v21573_v31, %v21891_v57  ;;  %v21917_v31 = vld [vmem:[#allocation181_spill] sm:$0xff]  ;;  %v22012_v50 = vld [vmem:[#allocation218_spill] sm:$0xff] }
0x156c   : > { %11490 = vmatpush1.msk.msra.mxu0 %vm21890_vm2, %v20494_v62  ;;  %11522 = vmatpush1.msk.msra.mxu1 %vm21892_vm12, %v20494_v62  ;;  %vm21915_vm2 = vnez %v21914_v41  ;;  %vm21916_vm12 = vcmp.eq.s32.totalorder %v13010_v30, %v21891_v57  ;;  %v21920_v30 = vld [vmem:[#allocation182_spill] sm:$0xff]  ;;  %v22034_v41 = vld [vmem:[#allocation229_spill] sm:$0xff] }
0x156d   : > { %10049 = vmatprep.subr.mxu0 %v20507_v48  ;;  %10194 = vmatprep.subr.mxu1 %v20507_v48 }
0x156e   : > { %11491 = vmatpush1.msk.msra.mxu0 %vm21894_vm14, %v20494_v62  ;;  %11523 = vmatpush1.msk.msra.mxu1 %vm21895_vm5, %v20494_v62  ;;  %vm21918_vm14 = vnez %v21917_v31  ;;  %vm21919_vm5 = vcmp.eq.s32.totalorder %v13032_v32, %v21891_v57  ;;  %v21923_v32 = vld [vmem:[#allocation183_spill] sm:$0xff]  ;;  %v22036_v31 = vld [vmem:[#allocation230_spill] sm:$0xff] }
0x156f   : > { %10051 = vmatprep.subr.mxu0 %v20507_v48  ;;  %10196 = vmatprep.subr.mxu1 %v20507_v48 }
0x1570   : > { %11492 = vmatpush1.msk.msra.mxu0 %vm21897_vm9, %v20494_v62  ;;  %11524 = vmatpush1.msk.msra.mxu1 %vm21898_vm11, %v20494_v62  ;;  %vm21921_vm9 = vnez %v21920_v30  ;;  %vm21922_vm11 = vcmp.eq.s32.totalorder %v13054_v34, %v21891_v57  ;;  %v21926_v34 = vld [vmem:[#allocation184_spill] sm:$0xff]  ;;  %v22038_v30 = vld [vmem:[#allocation231_spill] sm:$0xff] }
0x1571   : > { %10053 = vmatprep.subr.mxu0 %v20507_v48  ;;  %10198 = vmatprep.subr.mxu1 %v20507_v48 }
0x1572   : > { %11493 = vmatpush1.msk.msra.mxu0 %vm21900_vm3, %v20494_v62  ;;  %11525 = vmatpush1.msk.msra.mxu1 %vm21901_vm4, %v20494_v62  ;;  %vm21924_vm3 = vnez %v21923_v32  ;;  %vm21925_vm4 = vcmp.eq.s32.totalorder %v13076_v36, %v21891_v57  ;;  %v21930_v36 = vld [vmem:[#allocation186_spill] sm:$0xff]  ;;  %v22040_v32 = vld [vmem:[#allocation232_spill] sm:$0xff] }
0x1573   : > { %10055 = vmatprep.subr.mxu0 %v20507_v48  ;;  %10200 = vmatprep.subr.mxu1 %v20507_v48 }
0x1574   : > { %11494 = vmatpush1.msk.msra.mxu0 %vm21903_vm6, %v20494_v62  ;;  %11526 = vmatpush1.msk.msra.mxu1 %vm21904_vm10, %v20494_v62  ;;  %vm21927_vm6 = vnez %v21926_v34  ;;  %vm21928_vm10 = vcmp.eq.s32.totalorder %v13098_v38, %v21891_v57  ;;  %v21932_v38 = vld [vmem:[#allocation187_spill] sm:$0xff]  ;;  %v22042_v34 = vld [vmem:[#allocation233_spill] sm:$0xff] }
0x1575   : > { %10057 = vmatprep.subr.mxu0 %v20507_v48  ;;  %10202 = vmatprep.subr.mxu1 %v20507_v48 }
0x1576   : > { %11495 = vmatpush1.msk.msra.mxu0 %vm21906_vm15, %v20494_v62  ;;  %11527 = vmatpush1.msk.msra.mxu1 %vm21907_vm0, %v20494_v62  ;;  %vm21929_vm15 = vcmp.eq.s32.totalorder %v13120_v40, %v21891_v57  ;;  %vm21931_vm0 = vnez %v21930_v36  ;;  %v21934_v40 = vld [vmem:[#allocation188_spill] sm:$0xff] }
0x1577   : > { %10059 = vmatprep.subr.mxu0 %v20507_v48  ;;  %10204 = vmatprep.subr.mxu1 %v20507_v48 }
0x1578   : > { %11496 = vmatpush1.msk.msra.mxu0 %vm21909_vm13, %v20494_v62  ;;  %11528 = vmatpush1.msk.msra.mxu1 %vm21910_vm7, %v20494_v62  ;;  %vm21933_vm13 = vnez %v21932_v38  ;;  %vm21935_vm7 = vnez %v21934_v40 }
0x1579   : > { %10061 = vmatprep.subr.mxu0 %v20507_v48  ;;  %10206 = vmatprep.subr.mxu1 %v20507_v48 }
0x157a   : > { %11497 = vmatpush1.msk.msra.mxu0 %vm21912_vm1, %v20494_v62  ;;  %11529 = vmatpush1.msk.msra.mxu1 %vm21913_vm8, %v20494_v62  ;;  %vm21937_vm1 = vcmp.eq.s32.totalorder %v21827_v0, %v21936_v56  ;;  %vm21939_vm8 = vnez %v21938_v46  ;;  %v21941_v0 = vld [vmem:[#allocation190_spill] sm:$0xff] }
0x157b   : > { %10063 = vmatprep.subr.mxu0 %v20507_v48  ;;  %10208 = vmatprep.subr.mxu1 %v20507_v48 }
0x157c   : > { %11498 = vmatpush1.msk.msra.mxu0 %vm21915_vm2, %v20494_v62  ;;  %11530 = vmatpush1.msk.msra.mxu1 %vm21916_vm12, %v20494_v62  ;;  %vm21940_vm2 = vcmp.eq.s32.totalorder %v21831_v13, %v21936_v56  ;;  %vm21942_vm12 = vnez %v21941_v0  ;;  %v21944_v13 = vld [vmem:[#allocation191_spill] sm:$0xff] }
0x157d   : > { %10065 = vmatprep.subr.mxu0 %v20507_v48  ;;  %10210 = vmatprep.subr.mxu1 %v20507_v48 }
0x157e   : > { %11499 = vmatpush1.msk.msra.mxu0 %vm21918_vm14, %v20494_v62  ;;  %11531 = vmatpush1.msk.msra.mxu1 %vm21919_vm5, %v20494_v62  ;;  %vm21943_vm14 = vcmp.eq.s32.totalorder %v21601_v42, %v21936_v56  ;;  %vm21945_vm5 = vnez %v21944_v13  ;;  %v21947_v42 = vld [vmem:[#allocation192_spill] sm:$0xff] }
0x157f   : > { %10067 = vmatprep.subr.mxu0 %v20507_v48  ;;  %10212 = vmatprep.subr.mxu1 %v20507_v48 }
0x1580   : > { %11500 = vmatpush1.msk.msra.mxu0 %vm21921_vm9, %v20494_v62  ;;  %11532 = vmatpush1.msk.msra.mxu1 %vm21922_vm11, %v20494_v62  ;;  %vm21946_vm9 = vcmp.eq.s32.totalorder %v21605_v2, %v21936_v56  ;;  %vm21948_vm11 = vnez %v21947_v42  ;;  %v21950_v2 = vld [vmem:[#allocation193_spill] sm:$0xff] }
0x1581   : > { %10069 = vmatprep.subr.mxu0 %v20507_v48  ;;  %10214 = vmatprep.subr.mxu1 %v20507_v48 }
0x1582   : > { %11501 = vmatpush1.msk.msra.mxu0 %vm21924_vm3, %v20494_v62  ;;  %11533 = vmatpush1.msk.msra.mxu1 %vm21925_vm4, %v20494_v62  ;;  %vm21949_vm3 = vcmp.eq.s32.totalorder %v21609_v21, %v21936_v56  ;;  %vm21951_vm4 = vnez %v21950_v2  ;;  %v21953_v21 = vld [vmem:[#allocation194_spill] sm:$0xff] }
0x1583   : > { %10071 = vmatprep.subr.mxu0 %v20507_v48  ;;  %10216 = vmatprep.subr.mxu1 %v20507_v48 }
0x1584   : > { %11502 = vmatpush1.msk.msra.mxu0 %vm21927_vm6, %v20494_v62  ;;  %11534 = vmatpush1.msk.msra.mxu1 %vm21928_vm10, %v20494_v62  ;;  %vm21952_vm6 = vcmp.eq.s32.totalorder %v21613_v59, %v21936_v56  ;;  %vm21954_vm10 = vnez %v21953_v21  ;;  %v21956_v59 = vld [vmem:[#allocation195_spill] sm:$0xff] }
0x1585   : > { %10073 = vmatprep.subr.mxu0 %v20507_v48  ;;  %10218 = vmatprep.subr.mxu1 %v20507_v48 }
0x1586   : > { %10074 = vmatpush1.msra.mxu0 %v20507_v48  ;;  %11535 = vmatpush1.msk.msra.mxu1 %vm21929_vm15, %v20494_v62  ;;  %vm21955_vm15 = vcmp.eq.s32.totalorder %v21617_v10, %v21936_v56  ;;  %v21959_v10 = vld [vmem:[#allocation196_spill] sm:$0xff] }
0x1587   : > { %11503 = vmatprep.subr.msk.mxu0 %vm21931_vm0, %v20494_v62  ;;  %10220 = vmatprep.subr.mxu1 %v20507_v48  ;;  %vm21957_vm0 = vnez %v21956_v59 }
0x1588   : > { %10076 = vmatpush2.msra.mxu0 %v20507_v48  ;;  %10221 = vmatpush1.msra.mxu1 %v20507_v48 }
0x1589   : > { %11504 = vmatprep.subr.msk.mxu0 %vm21933_vm13, %v20494_v62  ;;  %10222 = vmatprep.subr.mxu1 %v20507_v48  ;;  %vm21958_vm13 = vcmp.eq.s32.totalorder %v21621_v60, %v21936_v56  ;;  %v21962_v60 = vld [vmem:[#allocation197_spill] sm:$0xff] }
0x158a   : > { %10078 = vmatpush2.msra.mxu0 %v20507_v48  ;;  %10223 = vmatpush1.msra.mxu1 %v20507_v48 }
0x158b   : > { %11505 = vmatprep.subr.msk.mxu0 %vm21935_vm7, %v20494_v62  ;;  %11536 = vmatprep.subr.msk.mxu1 %vm21937_vm1, %v20494_v62  ;;  %vm21960_vm7 = vnez %v21959_v10  ;;  %vm21961_vm1 = vcmp.eq.s32.totalorder %v21625_v29, %v21936_v56  ;;  %v21965_v29 = vld [vmem:[#allocation198_spill] sm:$0xff]  ;;  %v10418_v10 = vpop.permute.xlu0 %10417 }
0x158c   : > { %10080 = vmatpush2.msra.mxu0 %v20507_v48  ;;  %10225 = vmatpush2.msra.mxu1 %v20507_v48 }
0x158d   : > { %11506 = vmatprep.subr.msk.mxu0 %vm21939_vm8, %v20494_v62  ;;  %11537 = vmatprep.subr.msk.mxu1 %vm21940_vm2, %v20494_v62  ;;  %vm21963_vm8 = vnez %v21962_v60  ;;  %vm21964_vm2 = vcmp.eq.s32.totalorder %v21629_v14, %v21936_v56  ;;  %v21968_v14 = vld [vmem:[#allocation199_spill] sm:$0xff] }
0x158e   : > { %10082 = vmatpush2.msra.mxu0 %v20507_v48  ;;  %10227 = vmatpush2.msra.mxu1 %v20507_v48 }
0x158f   : > { %11507 = vmatprep.subr.msk.mxu0 %vm21942_vm12, %v20494_v62  ;;  %11538 = vmatprep.subr.msk.mxu1 %vm21943_vm14, %v20494_v62  ;;  %vm21966_vm12 = vnez %v21965_v29  ;;  %vm21967_vm14 = vcmp.eq.s32.totalorder %v21633_v58, %v21936_v56  ;;  %v21971_v58 = vld [vmem:[#allocation200_spill] sm:$0xff] }
0x1590   : > { %10084 = vmatpush2.msra.mxu0 %v20507_v48  ;;  %10229 = vmatpush2.msra.mxu1 %v20507_v48 }
0x1591   : > { %11508 = vmatprep.subr.msk.mxu0 %vm21945_vm5, %v20494_v62  ;;  %11539 = vmatprep.subr.msk.mxu1 %vm21946_vm9, %v20494_v62  ;;  %vm21969_vm5 = vnez %v21968_v14  ;;  %vm21970_vm9 = vcmp.eq.s32.totalorder %v21637_v27, %v21936_v56  ;;  %v21977_v27 = vld [vmem:[#allocation202_spill] sm:$0xff] }
0x1592   : > { %10086 = vmatpush2.msra.mxu0 %v20507_v48  ;;  %10231 = vmatpush2.msra.mxu1 %v20507_v48 }
0x1593   : > { %11509 = vmatprep.subr.msk.mxu0 %vm21948_vm11, %v20494_v62  ;;  %11540 = vmatprep.subr.msk.mxu1 %vm21949_vm3, %v20494_v62  ;;  %vm21972_vm11 = vnez %v21971_v58  ;;  %vm21973_vm3 = vcmp.eq.s32.totalorder %v21641_v19, %v21936_v56 }
0x1594   : > { %10088 = vmatpush2.msra.mxu0 %v20507_v48  ;;  %10233 = vmatpush2.msra.mxu1 %v20507_v48 }
0x1595   : > { %11510 = vmatprep.subr.msk.mxu0 %vm21951_vm4, %v20494_v62  ;;  %11541 = vmatprep.subr.msk.mxu1 %vm21952_vm6, %v20494_v62  ;;  %vm21975_vm4 = vnez %v21974_v63  ;;  %vm21976_vm6 = vcmp.eq.s32.totalorder %v21645_v20, %v21936_v56 }
0x1596   : > { %10090 = vmatpush2.msra.mxu0 %v20507_v48  ;;  %10235 = vmatpush2.msra.mxu1 %v20507_v48 }
0x1597   : > { %11511 = vmatprep.subr.msk.mxu0 %vm21954_vm10, %v20494_v62  ;;  %11542 = vmatprep.subr.msk.mxu1 %vm21955_vm15, %v20494_v62  ;;  %vm21978_vm10 = vnez %v21977_v27  ;;  %vm21979_vm15 = vcmp.eq.s32.totalorder %v21649_v5, %v21891_v57 }
0x1598   : > { %10092 = vmatpush2.msra.mxu0 %v20507_v48  ;;  %10237 = vmatpush2.msra.mxu1 %v20507_v48 }
0x1599   : > { %11512 = vmatprep.subr.msk.mxu0 %vm21957_vm0, %v20494_v62  ;;  %11543 = vmatprep.subr.msk.mxu1 %vm21958_vm13, %v20494_v62  ;;  %vm21980_vm0 = vcmp.eq.s32.totalorder %v21653_v39, %v21891_v57  ;;  %v11552_v39 = vld [vmem:[%s19742_s9 + $0x40] sm:$0xff]  ;;  %vm21981_vm13 = vcmask 64512   ;;  %v22018_v57 = vld [vmem:[#allocation221_spill] sm:$0xff] }
0x159a   : > { %10094 = vmatpush2.msra.mxu0 %v20507_v48  ;;  %10239 = vmatpush2.msra.mxu1 %v20507_v48 }
0x159b   : > { %11513 = vmatprep.subr.msk.mxu0 %vm21960_vm7, %v20494_v62  ;;  %11544 = vmatprep.subr.msk.mxu1 %vm21961_vm1, %v20494_v62  ;;  %vm21983_vm7 = vnez %v21982_v18 }
0x159c   : > { %10096 = vmatpush2.msra.mxu0 %v20507_v48  ;;  %10241 = vmatpush2.msra.mxu1 %v20507_v48 }
0x159d   : > { %11514 = vmatprep.subr.msk.mxu0 %vm21963_vm8, %v20494_v62  ;;  %11545 = vmatprep.subr.msk.mxu1 %vm21964_vm2, %v20494_v62  ;;  %vm21987_vm8 = vnez %v21986_v52  ;;  %vm21989_vm2 = vnez %v21988_v37 }
0x159e   : > { %10098 = vmatpush2.msra.mxu0 %v20507_v48  ;;  %10243 = vmatpush2.msra.mxu1 %v20507_v48 }
0x159f   : > { %11515 = vmatprep.subr.msk.mxu0 %vm21966_vm12, %v20494_v62  ;;  %11546 = vmatprep.subr.msk.mxu1 %vm21967_vm14, %v20494_v62  ;;  %vm21991_vm12 = vnez %v21990_v16  ;;  %vm21993_vm14 = vnez %v21992_v26 }
0x15a0   : > { %10100 = vmatpush2.msra.mxu0 %v20507_v48  ;;  %10245 = vmatpush2.msra.mxu1 %v20507_v48 }
0x15a1   : > { %11516 = vmatprep.subr.msk.mxu0 %vm21969_vm5, %v20494_v62  ;;  %11547 = vmatprep.subr.msk.mxu1 %vm21970_vm9, %v20494_v62  ;;  %vm21995_vm5 = vnez %v21994_v4 }
0x15a2   : > { %10102 = vmatpush2.msra.mxu0 %v20507_v48  ;;  %10247 = vmatpush2.msra.mxu1 %v20507_v48 }
0x15a3   : > { %11517 = vmatprep.subr.msk.mxu0 %vm21972_vm11, %v20494_v62  ;;  %11548 = vmatprep.subr.msk.mxu1 %vm21973_vm3, %v20494_v62  ;;  %vm21999_vm11 = vnez %v21998_v28  ;;  %vm22001_vm3 = vnez %v22000_v6 }
0x15a4   : > { %11518 = vmatpush2.msk.msra.mxu0 %vm21975_vm4, %v20494_v62  ;;  %10249 = vmatpush2.msra.mxu1 %v20507_v48 }
0x15a5   : > { %10105 = vmatprep.subr.mxu0 %v20507_v48  ;;  %11549 = vmatprep.subr.msk.mxu1 %vm21976_vm6, %v20494_v62  ;;  %vm22005_vm6 = vnez %v22004_v53 }
0x15a6   : > { %11519 = vmatpush2.msk.msra.mxu0 %vm21978_vm10, %v20494_v62  ;;  %10251 = vmatpush2.msra.mxu1 %v20507_v48  ;;  %vm22007_vm10 = vnez %v22006_v51 }
0x15a7   : > { %10300 = vmatprep.subr.mxu0 %v18424_v61  ;;  %10252 = vmatprep.subr.mxu1 %v20507_v48 }
0x15a8   : > { %11550 = vmatpush2.msk.msra.mxu1 %vm21979_vm15, %v20494_v62  ;;  %vm22009_vm15 = vnez %v22008_v8 }
0x15a9   : > { %10254 = vmatprep.subr.mxu1 %v20507_v48 }
0x15aa   : > { %11551 = vmatpush2.msk.msra.mxu1 %vm21980_vm0, %v20494_v62  ;;  %vm22011_vm0 = vnez %v22010_v25 }
0x1623   : > { %v9811_v19 = vpop.f32.mrf.mxu0 }
0x1624   : > { %v9816_v20 = vadd.f32 %v9811_v19, %v19287_v54  ;;  %v21996_v54 = vld [vmem:[#allocation210_spill] sm:$0xff] }
0x1625   : > { %v9813_v33 = vpop.f32.mrf.mxu0  ;;  %vm21997_vm9 = vnez %v21996_v54 }
0x1626   : > { %v9817_v61 = vadd.f32 %v9813_v33, %v19289_v47  ;;  %v22002_v47 = vld [vmem:[#allocation213_spill] sm:$0xff] }
0x1627   : > { %v9960_v17 = vpop.f32.mrf.mxu1  ;;  %v10038_v55 = vpop.f32.mrf.mxu0  ;;  %vm22003_vm4 = vnez %v22002_v47 }
0x1628   : > { %v19588_v22 = vadd.f32 %v9960_v17, %v9816_v20 }
0x1629   : > { %v9962_v9 = vpop.f32.mrf.mxu1  ;;  %v10040_v5 = vpop.f32.mrf.mxu0 }
0x162a   : > { %v19590_v44 = vadd.f32 %v9962_v9, %v9817_v61  ;;  %10107 = vmatprep.mubr.f32.mxu0 %v10040_v5 }
0x162b   : > { %10108 = vmatmul.mubr.f32.vlgmr.msra.gmra.mxu0 %v10038_v55  ;;  %v10187_v49 = vpop.f32.mrf.mxu1 }
0x162c   : > { %10301 = vmatpush1.msra.mxu0 %v18427_v15  ;;  %10334 = vmatprep.mubr.f32.mxu0 %v20507_v48  ;;  %v21984_v15 = vld [vmem:[#allocation204_spill] sm:$0xff] }
0x162d   : > { %v10189_v24 = vpop.f32.mrf.mxu1  ;;  %10341 = vmatprep.subr.mxu0 %v20507_v48  ;;  %vm21985_vm1 = vnez %v21984_v15 }
0x162e   : > { %10256 = vmatprep.mubr.f32.mxu1 %v10189_v24 }
0x162f   : > { %10257 = vmatmul.mubr.f32.vlgmr.msra.gmra.mxu1 %v10187_v49  ;;  %11553 = vmatmul.mubr.msk.f32.vlgmr.msra.gmra.mxu0 %vm21981_vm13, %v11552_v39  ;;  %vm22013_vm13 = vnez %v22012_v50 }
0x1630   : > { %11554 = vmatpush1.msk.msra.mxu0 %vm21983_vm7, %v20494_v62  ;;  %vm22015_vm7 = vnez %v22014_v43 }
0x1631   : > { %10343 = vmatprep.subr.mxu0 %v20507_v48 }
0x1632   : > { %11555 = vmatpush1.msk.msra.mxu0 %vm21985_vm1, %v20494_v62  ;;  %vm22017_vm1 = vnez %v22016_v3 }
0x1633   : > { %10345 = vmatprep.subr.mxu0 %v20507_v48 }
0x1634   : > { %11556 = vmatpush1.msk.msra.mxu0 %vm21987_vm8, %v20494_v62  ;;  %vm22019_vm8 = vnez %v22018_v57 }
0x1635   : > { %10347 = vmatprep.subr.mxu0 %v20507_v48 }
0x1636   : > { %11557 = vmatpush1.msk.msra.mxu0 %vm21989_vm2, %v20494_v62  ;;  %vm22021_vm2 = vnez %v22020_v1 }
0x1637   : > { %10349 = vmatprep.subr.mxu0 %v20507_v48 }
0x1638   : > { %11558 = vmatpush1.msk.msra.mxu0 %vm21991_vm12, %v20494_v62  ;;  %vm22023_vm12 = vnez %v22022_v35 }
0x1639   : > { %10351 = vmatprep.subr.mxu0 %v20507_v48 }
0x163a   : > { %11559 = vmatpush1.msk.msra.mxu0 %vm21993_vm14, %v20494_v62  ;;  %vm22025_vm14 = vnez %v22024_v11 }
0x163b   : > { %10353 = vmatprep.subr.mxu0 %v20507_v48 }
0x163c   : > { %11560 = vmatpush1.msk.msra.mxu0 %vm21995_vm5, %v20494_v62  ;;  %vm22027_vm5 = vnez %v22026_v23 }
0x163d   : > { %10355 = vmatprep.subr.mxu0 %v20507_v48 }
0x163e   : > { %11561 = vmatpush1.msk.msra.mxu0 %vm21997_vm9, %v20494_v62  ;;  %vm22029_vm9 = vnez %v22028_v12 }
0x163f   : > { %10357 = vmatprep.subr.mxu0 %v20507_v48 }
0x1640   : > { %11562 = vmatpush1.msk.msra.mxu0 %vm21999_vm11, %v20494_v62  ;;  %vm22031_vm11 = vnez %v22030_v45 }
0x1641   : > { %10359 = vmatprep.subr.mxu0 %v20507_v48 }
0x1642   : > { %11563 = vmatpush1.msk.msra.mxu0 %vm22001_vm3, %v20494_v62  ;;  %vm22033_vm3 = vnez %v22032_v7 }
0x1643   : > { %10361 = vmatprep.subr.mxu0 %v20507_v48 }
0x1644   : > { %11564 = vmatpush1.msk.msra.mxu0 %vm22003_vm4, %v20494_v62  ;;  %vm22035_vm4 = vnez %v22034_v41 }
0x1645   : > { %10363 = vmatprep.subr.mxu0 %v20507_v48 }
0x1646   : > { %11565 = vmatpush1.msk.msra.mxu0 %vm22005_vm6, %v20494_v62  ;;  %vm22037_vm6 = vnez %v22036_v31 }
0x1647   : > { %10365 = vmatprep.subr.mxu0 %v20507_v48 }
0x1648   : > { %11566 = vmatpush1.msk.msra.mxu0 %vm22007_vm10, %v20494_v62  ;;  %vm22039_vm10 = vnez %v22038_v30 }
0x1649   : > { %10367 = vmatprep.subr.mxu0 %v20507_v48 }
0x164a   : > { %11567 = vmatpush1.msk.msra.mxu0 %vm22009_vm15, %v20494_v62  ;;  %vm22041_vm15 = vnez %v22040_v32 }
0x164b   : > { %10369 = vmatprep.subr.mxu0 %v20507_v48 }
0x164c   : > { %10370 = vmatpush1.msra.mxu0 %v20507_v48 }
0x164d   : > { %10371 = vmatprep.subr.mxu0 %v20507_v48 }
0x164e   : > { %10372 = vmatpush1.msra.mxu0 %v20507_v48 }
0x164f   : > { %11568 = vmatprep.subr.msk.mxu0 %vm22011_vm0, %v20494_v62  ;;  %vm22043_vm0 = vnez %v22042_v34 }
0x1650   : > { %10374 = vmatpush2.msra.mxu0 %v20507_v48 }
0x1651   : > { %11569 = vmatprep.subr.msk.mxu0 %vm22013_vm13, %v20494_v62 }
0x1652   : > { %10376 = vmatpush2.msra.mxu0 %v20507_v48 }
0x1653   : > { %11570 = vmatprep.subr.msk.mxu0 %vm22015_vm7, %v20494_v62 }
0x1654   : > { %10378 = vmatpush2.msra.mxu0 %v20507_v48 }
0x1655   : > { %11571 = vmatprep.subr.msk.mxu0 %vm22017_vm1, %v20494_v62 }
0x1656   : > { %10380 = vmatpush2.msra.mxu0 %v20507_v48 }
0x1657   : > { %11572 = vmatprep.subr.msk.mxu0 %vm22019_vm8, %v20494_v62 }
0x1658   : > { %10382 = vmatpush2.msra.mxu0 %v20507_v48 }
0x1659   : > { %11573 = vmatprep.subr.msk.mxu0 %vm22021_vm2, %v20494_v62 }
0x165a   : > { %10384 = vmatpush2.msra.mxu0 %v20507_v48 }
0x165b   : > { %11574 = vmatprep.subr.msk.mxu0 %vm22023_vm12, %v20494_v62 }
0x165c   : > { %10386 = vmatpush2.msra.mxu0 %v20507_v48 }
0x165d   : > { %11575 = vmatprep.subr.msk.mxu0 %vm22025_vm14, %v20494_v62 }
0x165e   : > { %10388 = vmatpush2.msra.mxu0 %v20507_v48 }
0x165f   : > { %11576 = vmatprep.subr.msk.mxu0 %vm22027_vm5, %v20494_v62 }
0x1660   : > { %10390 = vmatpush2.msra.mxu0 %v20507_v48 }
0x1661   : > { %11577 = vmatprep.subr.msk.mxu0 %vm22029_vm9, %v20494_v62 }
0x1662   : > { %10392 = vmatpush2.msra.mxu0 %v20507_v48 }
0x1663   : > { %11578 = vmatprep.subr.msk.mxu0 %vm22031_vm11, %v20494_v62 }
0x1664   : > { %10394 = vmatpush2.msra.mxu0 %v20507_v48 }
0x1665   : > { %11579 = vmatprep.subr.msk.mxu0 %vm22033_vm3, %v20494_v62 }
0x1666   : > { %10396 = vmatpush2.msra.mxu0 %v20507_v48 }
0x1667   : > { %11580 = vmatprep.subr.msk.mxu0 %vm22035_vm4, %v20494_v62 }
0x1668   : > { %10398 = vmatpush2.msra.mxu0 %v20507_v48 }
0x1669   : > { %11581 = vmatprep.subr.msk.mxu0 %vm22037_vm6, %v20494_v62 }
0x166a   : > { %11582 = vmatpush2.msk.msra.mxu0 %vm22039_vm10, %v20494_v62 }
0x166b   : > { %10401 = vmatprep.subr.mxu0 %v20507_v48 }
0x166c   : > { %11583 = vmatpush2.msk.msra.mxu0 %vm22041_vm15, %v20494_v62 }
0x166d   : > { %10403 = vmatprep.subr.mxu0 %v20507_v48 }
0x166e   : > { %11584 = vmatpush2.msk.msra.mxu0 %vm22043_vm0, %v20494_v62 }
0x16eb   : > { %v10109_v36 = vpop.f32.mrf.mxu0 }
0x16ec   : > { %v10114_v38 = vadd.f32 %v10109_v36, %v19588_v22 }
0x16ed   : > { %v10111_v40 = vpop.f32.mrf.mxu0 }
0x16ee   : > { %v10115_v56 = vadd.f32 %v10111_v40, %v19590_v44 }
0x16ef   : > { %v10336_v46 = vpop.f32.mrf.mxu0  ;;  %v10258_v13 = vpop.f32.mrf.mxu1 }
0x16f0   : > { %v10263_v2 = vadd.f32 %v10258_v13, %v10114_v38 }
0x16f1   : > { %v10338_v0 = vpop.f32.mrf.mxu0  ;;  %v10260_v42 = vpop.f32.mrf.mxu1 }
0x16f2   : > { %10405 = vmatprep.mubr.f32.mxu0 %v10338_v0  ;;  %v10264_v48 = vadd.f32 %v10260_v42, %v10115_v56 }
0x16f3   : > { %10406 = vmatmul.mubr.f32.vlgmr.msra.gmra.mxu0 %v10336_v46 }
0x17b3   : > { %v10407_v21 = vpop.f32.mrf.mxu0 }
0x17b4   : > { %v10412_v59 = vadd.f32 %v10407_v21, %v10263_v2 }
0x17b5   : > { %v10409_v62 = vpop.f32.mrf.mxu0 }
0x17b6   : > { %v10420_v60 = vadd.f32 %v10418_v10, %v10412_v59  ;;  %v10413_v29 = vadd.f32 %v10409_v62, %v10264_v48 }
0x17b8   : > { %10422 = vst [vmem:[%s386_s30] sm:$0xff] %v10420_v60  ;;  %v10421_v14 = vadd.f32 %v10418_v10, %v10413_v29 }
0x17ba   : > { %10423 = vst [vmem:[%s386_s30 + $0x8] sm:$0xff] %v10421_v14 }
0x17bb PF: > { %s21_s17 = sadd.s32 1, %s12751_s17  }
0x17bc   : > { %p18_p4 = scmp.ge.s32.totalorder %s21_s17, 4  }
0x17be   :  { %20 = sbr.rel (!%p18_p4) target bundleno = 1 (0x1), region = 134 }

</bundles_post_ra>
